<compile_context>
chip_gen: v7x
topology: tpu7x:2x2x1
jax: 0.10.0
libtpu: 0.0.40
codegen_flags: <defaults>
</compile_context>

<pallas_src>
import functools

import jax
import jax.numpy as jnp
from jax.experimental import pallas as pl
from jax.experimental.pallas import tpu as pltpu


def _mixconv_kernel(x_ref, w3_ref, b3_ref, w5_ref, b5_ref, o_ref, *,
                    c_in1, c_in2, c_out1, c_out2, K3, K5, Wp, Lp, off3, off5):
    """Fused MixConv2d forward for one batch element.

    x_ref : VMEM (1, Lf, Cin)  bf16  zero-padded, channels-last, flattened plane
    w3_ref: VMEM (K3, Cout1, K3*Cin1) bf16  per-kh weight tiles (kw folded in)
    b3_ref: VMEM (Cout1, 1) f32
    w5_ref: VMEM (K5, Cout2, K5*Cin2) bf16
    b5_ref: VMEM (Cout2, 1) f32
    o_ref : VMEM (1, Cout, Lp) f32  lane-dense flattened output (Lp % 128 == 0)
    """

    def branch(w_ref, b_ref, ch0, cin, cout, K, off):
        # Accumulator initialized with the broadcast bias (f32, lane-dense).
        acc = jnp.broadcast_to(b_ref[...], (cout, Lp))
        for kh in range(K):
            base = (kh + off) * Wp + off
            # K row(sublane)-offset views of the plane; with channels on lanes
            # these are cheap offset loads, not lane rotations.  Stacking them
            # along the lane dim folds the kw taps into the contraction dim.
            taps = [x_ref[0, base + kw: base + kw + Lp, ch0:ch0 + cin]
                    for kw in range(K)]
            slab = jnp.concatenate(taps, axis=-1)          # (Lp, K*cin) bf16
            # (cout, K*cin) x (Lp, K*cin)^T -> (cout, Lp), f32 accumulate on
            # the MXU (transposed-rhs matmul, same pattern as q @ k^T).
            acc = acc + jax.lax.dot_general(
                w_ref[kh], slab,
                dimension_numbers=(((1,), (1,)), ((), ())),
                preferred_element_type=jnp.float32)
        return acc

    y3 = branch(w3_ref, b3_ref, 0, c_in1, c_out1, K3, off3)
    y5 = branch(w5_ref, b5_ref, c_in1, c_in2, c_out2, K5, off5)
    # Single full-block, lane-dense store (Cout, Lp).
    o_ref[0] = jnp.concatenate([y3, y5], axis=0).astype(o_ref.dtype)


def mixconv2d(x, params, padding=1, stride=1):
    """Forward pass of MixConv2d (3x3 on first channel half, 5x5 on second)."""
    # TODO(synk): stride > 1 on the 5x5 branch is not implemented; the only
    # shape-consistent configuration of the module (channel concat) uses
    # stride=1, which is also the module default.
    assert stride == 1
    N, Cin, H, W = x.shape
    w3, b3, w5, b5 = params["w3"], params["b3"], params["w5"], params["b5"]
    c_in1 = Cin // 2
    c_in2 = Cin - c_in1
    c_out1, c_out2 = w3.shape[0], w5.shape[0]
    Cout = c_out1 + c_out2
    K3, K5 = w3.shape[2], w5.shape[2]
    assert w3.shape[1] == c_in1 and w5.shape[1] == c_in2 and K5 == K3 + 2

    pad = padding + 1                        # one halo ring covers both windows
    Hp, Wp = H + 2 * pad, W + 2 * pad
    Ho = H + 2 * padding - K3 + 1            # output size of the 3x3 branch
    Wo = W + 2 * padding - K3 + 1
    assert Ho == H + 2 * (padding + 1) - K5 + 1   # both branches agree
    off3 = pad - padding                     # 3x3 halo offset inside the plane
    off5 = pad - (padding + 1)               # 5x5 halo offset (= 0)
    L = Ho * Wp                              # flattened output (valid + junk cols)
    Lp = -(-L // 128) * 128                  # lane-dense accumulator/store width

    # Furthest tap start; every slab read [d, d + Lp) must stay inside the plane.
    max_d = max((K3 - 1 + off3) * Wp + (K3 - 1 + off3),
                (K5 - 1 + off5) * Wp + (K5 - 1 + off5))
    extra_rows = max(0, -(-(max_d + Lp - Hp * Wp) // Wp))
    Lf = (Hp + extra_rows) * Wp
    assert max_d + Lp <= Lf

    # ONE fused XLA prep op: NCHW -> channels-last, bf16 cast, zero halo,
    # flatten (the reshape is free).  Channels-last makes every tap shift a
    # row offset instead of a lane rotation; bf16 halves DMA/VMEM bytes.
    x_cl = jnp.transpose(x, (0, 2, 3, 1)).astype(jnp.bfloat16)
    x_cl = jnp.pad(x_cl, ((0, 0), (pad, pad + extra_rows), (pad, pad), (0, 0)))
    x_flat = x_cl.reshape(N, Lf, Cin)

    # Weights OIHW -> (K, Cout_b, K*Cin_b): one MXU operand per kh with the kw
    # taps folded into the contraction dim (index kw*cin + c, matching the
    # kernel's lane-concat order).
    w3m = jnp.transpose(w3, (2, 0, 3, 1)).reshape(K3, c_out1, K3 * c_in1)
    w5m = jnp.transpose(w5, (2, 0, 3, 1)).reshape(K5, c_out2, K5 * c_in2)
    w3m = w3m.astype(jnp.bfloat16)
    w5m = w5m.astype(jnp.bfloat16)
    b3m = b3.reshape(c_out1, 1).astype(jnp.float32)
    b5m = b5.reshape(c_out2, 1).astype(jnp.float32)

    kernel = functools.partial(
        _mixconv_kernel, c_in1=c_in1, c_in2=c_in2, c_out1=c_out1,
        c_out2=c_out2, K3=K3, K5=K5, Wp=Wp, Lp=Lp, off3=off3, off5=off5)

    out_flat = pl.pallas_call(
        kernel,
        out_shape=jax.ShapeDtypeStruct((N, Cout, Lp), x.dtype),
        grid=(N,),
        in_specs=[
            pl.BlockSpec((1, Lf, Cin), lambda n: (n, 0, 0)),              # plane
            pl.BlockSpec((K3, c_out1, K3 * c_in1), lambda n: (0, 0, 0)),  # w3
            pl.BlockSpec((c_out1, 1), lambda n: (0, 0)),                  # b3
            pl.BlockSpec((K5, c_out2, K5 * c_in2), lambda n: (0, 0, 0)),  # w5
            pl.BlockSpec((c_out2, 1), lambda n: (0, 0)),                  # b5
        ],
        out_specs=pl.BlockSpec((1, Cout, Lp), lambda n: (n, 0, 0)),
        compiler_params=pltpu.CompilerParams(
            dimension_semantics=("parallel",),       # N=2 keeps both v7x TCs busy
            vmem_limit_bytes=32 * 1024 * 1024),      # > v5e 16 MiB default scope
    )(x_flat, w3m, b3m, w5m, b5m)

    # ONE fused slice+reshape copy drops the junk columns (j >= Wo) and the
    # lane padding (p >= L).  TODO(synk): a consumer that accepts the
    # (Cout, Ho, Wp)-strided layout could skip this copy entirely.
    return out_flat[:, :, :L].reshape(N, Cout, Ho, Wp)[:, :, :, :Wo]


def init_mixconv_params(key, in_channels, out_channels, kernel_size=3,
                        groups=2, dtype=jnp.float32):
    # Mirrors MixConv2d.__init__ parameter shapes.  groups=2 -> each branch
    # is a regular (groups=1) convolution, which is what the kernel supports.
    assert groups == 2
    c_in1 = in_channels // 2
    c_in2 = in_channels - c_in1
    c_out1 = out_channels // 2
    c_out2 = out_channels - c_out1
    k3, k5 = kernel_size, kernel_size + 2

    keys = jax.random.split(key, 4)

    def u(k, shape, fan_in):
        bound = float(fan_in) ** -0.5
        return jax.random.uniform(k, shape, dtype, -bound, bound)

    return dict(
        w3=u(keys[0], (c_out1, c_in1, k3, k3), c_in1 * k3 * k3),
        b3=u(keys[1], (c_out1,), c_in1 * k3 * k3),
        w5=u(keys[2], (c_out2, c_in2, k5, k5), c_in2 * k5 * k5),
        b5=u(keys[3], (c_out2,), c_in2 * k5 * k5),
    )


def _ref_conv2d(x, w, b, padding):
    y = jax.lax.conv_general_dilated(
        x, w, window_strides=(1, 1),
        padding=[(padding, padding), (padding, padding)],
        dimension_numbers=("NCHW", "OIHW", "NCHW"),
        precision=jax.lax.Precision.HIGHEST)
    return y + b[None, :, None, None]


if __name__ == "__main__":
    key = jax.random.PRNGKey(0)
    kp, kx = jax.random.split(key)

    in_channels = out_channels = 4
    padding = 1  # conv_3 uses padding, conv_5 uses padding + 1
    params = init_mixconv_params(kp, in_channels, out_channels,
                                 kernel_size=3, groups=2)

    x = jax.random.normal(kx, (2, in_channels, 16, 16), dtype=jnp.float32)

    out = jax.block_until_ready(mixconv2d(x, params, padding=padding, stride=1))

    # Reference: XLA convolution on bf16-rounded operands (the kernel's bf16
    # MXU products are exact in f32, so only accumulation order differs).
    c1 = in_channels // 2
    xb = x.astype(jnp.bfloat16).astype(jnp.float32)
    w3b = params["w3"].astype(jnp.bfloat16).astype(jnp.float32)
    w5b = params["w5"].astype(jnp.bfloat16).astype(jnp.float32)
    ref = jnp.concatenate([
        _ref_conv2d(xb[:, :c1], w3b, params["b3"], padding),
        _ref_conv2d(xb[:, c1:], w5b, params["b5"], padding + 1),
    ], axis=1)

    assert out.shape == (2, out_channels, 16, 16), out.shape
    max_err = float(jnp.max(jnp.abs(out - ref)))
    assert jnp.allclose(out, ref, atol=2e-3, rtol=2e-3), max_err

    print("KERNEL_OK")
</pallas_src>

<mosaic_0001>
module attributes {stable_mosaic.version = 11 : i64} {
  func.func @_mixconv_kernel(%arg0: i32, %arg1: memref<1x480x4xbf16, #tpu.memory_space<vmem>>, %arg2: memref<3x2x6xbf16, #tpu.memory_space<vmem>>, %arg3: memref<2x1xf32, #tpu.memory_space<vmem>>, %arg4: memref<5x2x10xbf16, #tpu.memory_space<vmem>>, %arg5: memref<2x1xf32, #tpu.memory_space<vmem>>, %arg6: memref<1x4x384xf32, #tpu.memory_space<vmem>>) attributes {dimension_semantics = [#tpu.dimension_semantics<parallel>], iteration_bounds = array<i64: 2>, scalar_prefetch = 0 : i64, scratch_operands = 0 : i64, tpu.core_type = #tpu.core_type<tc>, window_params = [{transform_indices = @transform_0, window_bounds = array<i64: 1, 480, 4>}, {pipeline_mode = #tpu.pipeline_mode<synchronous>, transform_indices = @transform_1, window_bounds = array<i64: 3, 2, 6>}, {pipeline_mode = #tpu.pipeline_mode<synchronous>, transform_indices = @transform_2, window_bounds = array<i64: 2, 1>}, {pipeline_mode = #tpu.pipeline_mode<synchronous>, transform_indices = @transform_3, window_bounds = array<i64: 5, 2, 10>}, {pipeline_mode = #tpu.pipeline_mode<synchronous>, transform_indices = @transform_4, window_bounds = array<i64: 2, 1>}, {transform_indices = @transform_5, window_bounds = array<i64: 1, 4, 384>}]} {
    %c0 = arith.constant 0 : index
    %c0_0 = arith.constant 0 : index
    %0 = vector.load %arg3[%c0, %c0_0] : memref<2x1xf32, #tpu.memory_space<vmem>>, vector<2x1xf32>
    %1 = vector.shape_cast %0 : vector<2x1xf32> to vector<2x1xf32>
    %2 = vector.broadcast %1 : vector<2x1xf32> to vector<2x384xf32>
    %c0_1 = arith.constant 0 : index
    %c21 = arith.constant 21 : index
    %c0_2 = arith.constant 0 : index
    %3 = vector.load %arg1[%c0_1, %c21, %c0_2] : memref<1x480x4xbf16, #tpu.memory_space<vmem>>, vector<1x384x2xbf16>
    %4 = vector.shape_cast %3 : vector<1x384x2xbf16> to vector<384x2xbf16>
    %c0_3 = arith.constant 0 : index
    %c22 = arith.constant 22 : index
    %c0_4 = arith.constant 0 : index
    %5 = vector.load %arg1[%c0_3, %c22, %c0_4] : memref<1x480x4xbf16, #tpu.memory_space<vmem>>, vector<1x384x2xbf16>
    %6 = vector.shape_cast %5 : vector<1x384x2xbf16> to vector<384x2xbf16>
    %c0_5 = arith.constant 0 : index
    %c23 = arith.constant 23 : index
    %c0_6 = arith.constant 0 : index
    %7 = vector.load %arg1[%c0_5, %c23, %c0_6] : memref<1x480x4xbf16, #tpu.memory_space<vmem>>, vector<1x384x2xbf16>
    %8 = vector.shape_cast %7 : vector<1x384x2xbf16> to vector<384x2xbf16>
    %9 = tpu.concatenate %4, %6, %8 in 1 : vector<384x2xbf16>, vector<384x2xbf16>, vector<384x2xbf16> -> vector<384x6xbf16>
    %c0_7 = arith.constant 0 : index
    %c0_8 = arith.constant 0 : index
    %c0_9 = arith.constant 0 : index
    %10 = vector.load %arg2[%c0_7, %c0_8, %c0_9] : memref<3x2x6xbf16, #tpu.memory_space<vmem>>, vector<1x2x6xbf16>
    %11 = vector.shape_cast %10 : vector<1x2x6xbf16> to vector<2x6xbf16>
    %cst = arith.constant dense<0.000000e+00> : vector<2x384xf32>
    %12 = tpu.matmul %11, %9, %cst {dimension_numbers = #tpu.dot_dimension_numbers<[1], [1], [0], [0], [0, 0, 1, 0], [], []>} : vector<2x6xbf16>, vector<384x6xbf16>, vector<2x384xf32> -> vector<2x384xf32>
    %13 = arith.addf %2, %12 : vector<2x384xf32>
    %c0_10 = arith.constant 0 : index
    %c41 = arith.constant 41 : index
    %c0_11 = arith.constant 0 : index
    %14 = vector.load %arg1[%c0_10, %c41, %c0_11] : memref<1x480x4xbf16, #tpu.memory_space<vmem>>, vector<1x384x2xbf16>
    %15 = vector.shape_cast %14 : vector<1x384x2xbf16> to vector<384x2xbf16>
    %c0_12 = arith.constant 0 : index
    %c42 = arith.constant 42 : index
    %c0_13 = arith.constant 0 : index
    %16 = vector.load %arg1[%c0_12, %c42, %c0_13] : memref<1x480x4xbf16, #tpu.memory_space<vmem>>, vector<1x384x2xbf16>
    %17 = vector.shape_cast %16 : vector<1x384x2xbf16> to vector<384x2xbf16>
    %c0_14 = arith.constant 0 : index
    %c43 = arith.constant 43 : index
    %c0_15 = arith.constant 0 : index
    %18 = vector.load %arg1[%c0_14, %c43, %c0_15] : memref<1x480x4xbf16, #tpu.memory_space<vmem>>, vector<1x384x2xbf16>
    %19 = vector.shape_cast %18 : vector<1x384x2xbf16> to vector<384x2xbf16>
    %20 = tpu.concatenate %15, %17, %19 in 1 : vector<384x2xbf16>, vector<384x2xbf16>, vector<384x2xbf16> -> vector<384x6xbf16>
    %c1 = arith.constant 1 : index
    %c0_16 = arith.constant 0 : index
    %c0_17 = arith.constant 0 : index
    %21 = vector.load %arg2[%c1, %c0_16, %c0_17] : memref<3x2x6xbf16, #tpu.memory_space<vmem>>, vector<1x2x6xbf16>
    %22 = vector.shape_cast %21 : vector<1x2x6xbf16> to vector<2x6xbf16>
    %cst_18 = arith.constant dense<0.000000e+00> : vector<2x384xf32>
    %23 = tpu.matmul %22, %20, %cst_18 {dimension_numbers = #tpu.dot_dimension_numbers<[1], [1], [0], [0], [0, 0, 1, 0], [], []>} : vector<2x6xbf16>, vector<384x6xbf16>, vector<2x384xf32> -> vector<2x384xf32>
    %24 = arith.addf %13, %23 : vector<2x384xf32>
    %c0_19 = arith.constant 0 : index
    %c61 = arith.constant 61 : index
    %c0_20 = arith.constant 0 : index
    %25 = vector.load %arg1[%c0_19, %c61, %c0_20] : memref<1x480x4xbf16, #tpu.memory_space<vmem>>, vector<1x384x2xbf16>
    %26 = vector.shape_cast %25 : vector<1x384x2xbf16> to vector<384x2xbf16>
    %c0_21 = arith.constant 0 : index
    %c62 = arith.constant 62 : index
    %c0_22 = arith.constant 0 : index
    %27 = vector.load %arg1[%c0_21, %c62, %c0_22] : memref<1x480x4xbf16, #tpu.memory_space<vmem>>, vector<1x384x2xbf16>
    %28 = vector.shape_cast %27 : vector<1x384x2xbf16> to vector<384x2xbf16>
    %c0_23 = arith.constant 0 : index
    %c63 = arith.constant 63 : index
    %c0_24 = arith.constant 0 : index
    %29 = vector.load %arg1[%c0_23, %c63, %c0_24] : memref<1x480x4xbf16, #tpu.memory_space<vmem>>, vector<1x384x2xbf16>
    %30 = vector.shape_cast %29 : vector<1x384x2xbf16> to vector<384x2xbf16>
    %31 = tpu.concatenate %26, %28, %30 in 1 : vector<384x2xbf16>, vector<384x2xbf16>, vector<384x2xbf16> -> vector<384x6xbf16>
    %c2 = arith.constant 2 : index
    %c0_25 = arith.constant 0 : index
    %c0_26 = arith.constant 0 : index
    %32 = vector.load %arg2[%c2, %c0_25, %c0_26] : memref<3x2x6xbf16, #tpu.memory_space<vmem>>, vector<1x2x6xbf16>
    %33 = vector.shape_cast %32 : vector<1x2x6xbf16> to vector<2x6xbf16>
    %cst_27 = arith.constant dense<0.000000e+00> : vector<2x384xf32>
    %34 = tpu.matmul %33, %31, %cst_27 {dimension_numbers = #tpu.dot_dimension_numbers<[1], [1], [0], [0], [0, 0, 1, 0], [], []>} : vector<2x6xbf16>, vector<384x6xbf16>, vector<2x384xf32> -> vector<2x384xf32>
    %35 = arith.addf %24, %34 : vector<2x384xf32>
    %c0_28 = arith.constant 0 : index
    %c0_29 = arith.constant 0 : index
    %36 = vector.load %arg5[%c0_28, %c0_29] : memref<2x1xf32, #tpu.memory_space<vmem>>, vector<2x1xf32>
    %37 = vector.shape_cast %36 : vector<2x1xf32> to vector<2x1xf32>
    %38 = vector.broadcast %37 : vector<2x1xf32> to vector<2x384xf32>
    %c0_30 = arith.constant 0 : index
    %c0_31 = arith.constant 0 : index
    %c2_32 = arith.constant 2 : index
    %39 = vector.load %arg1[%c0_30, %c0_31, %c2_32] : memref<1x480x4xbf16, #tpu.memory_space<vmem>>, vector<1x384x2xbf16>
    %40 = vector.shape_cast %39 : vector<1x384x2xbf16> to vector<384x2xbf16>
    %c0_33 = arith.constant 0 : index
    %c1_34 = arith.constant 1 : index
    %c2_35 = arith.constant 2 : index
    %41 = vector.load %arg1[%c0_33, %c1_34, %c2_35] : memref<1x480x4xbf16, #tpu.memory_space<vmem>>, vector<1x384x2xbf16>
    %42 = vector.shape_cast %41 : vector<1x384x2xbf16> to vector<384x2xbf16>
    %c0_36 = arith.constant 0 : index
    %c2_37 = arith.constant 2 : index
    %c2_38 = arith.constant 2 : index
    %43 = vector.load %arg1[%c0_36, %c2_37, %c2_38] : memref<1x480x4xbf16, #tpu.memory_space<vmem>>, vector<1x384x2xbf16>
    %44 = vector.shape_cast %43 : vector<1x384x2xbf16> to vector<384x2xbf16>
    %c0_39 = arith.constant 0 : index
    %c3 = arith.constant 3 : index
    %c2_40 = arith.constant 2 : index
    %45 = vector.load %arg1[%c0_39, %c3, %c2_40] : memref<1x480x4xbf16, #tpu.memory_space<vmem>>, vector<1x384x2xbf16>
    %46 = vector.shape_cast %45 : vector<1x384x2xbf16> to vector<384x2xbf16>
    %c0_41 = arith.constant 0 : index
    %c4 = arith.constant 4 : index
    %c2_42 = arith.constant 2 : index
    %47 = vector.load %arg1[%c0_41, %c4, %c2_42] : memref<1x480x4xbf16, #tpu.memory_space<vmem>>, vector<1x384x2xbf16>
    %48 = vector.shape_cast %47 : vector<1x384x2xbf16> to vector<384x2xbf16>
    %49 = tpu.concatenate %40, %42, %44, %46, %48 in 1 : vector<384x2xbf16>, vector<384x2xbf16>, vector<384x2xbf16>, vector<384x2xbf16>, vector<384x2xbf16> -> vector<384x10xbf16>
    %c0_43 = arith.constant 0 : index
    %c0_44 = arith.constant 0 : index
    %c0_45 = arith.constant 0 : index
    %50 = vector.load %arg4[%c0_43, %c0_44, %c0_45] : memref<5x2x10xbf16, #tpu.memory_space<vmem>>, vector<1x2x10xbf16>
    %51 = vector.shape_cast %50 : vector<1x2x10xbf16> to vector<2x10xbf16>
    %cst_46 = arith.constant dense<0.000000e+00> : vector<2x384xf32>
    %52 = tpu.matmul %51, %49, %cst_46 {dimension_numbers = #tpu.dot_dimension_numbers<[1], [1], [0], [0], [0, 0, 1, 0], [], []>} : vector<2x10xbf16>, vector<384x10xbf16>, vector<2x384xf32> -> vector<2x384xf32>
    %53 = arith.addf %38, %52 : vector<2x384xf32>
    %c0_47 = arith.constant 0 : index
    %c20 = arith.constant 20 : index
    %c2_48 = arith.constant 2 : index
    %54 = vector.load %arg1[%c0_47, %c20, %c2_48] : memref<1x480x4xbf16, #tpu.memory_space<vmem>>, vector<1x384x2xbf16>
    %55 = vector.shape_cast %54 : vector<1x384x2xbf16> to vector<384x2xbf16>
    %c0_49 = arith.constant 0 : index
    %c21_50 = arith.constant 21 : index
    %c2_51 = arith.constant 2 : index
    %56 = vector.load %arg1[%c0_49, %c21_50, %c2_51] : memref<1x480x4xbf16, #tpu.memory_space<vmem>>, vector<1x384x2xbf16>
    %57 = vector.shape_cast %56 : vector<1x384x2xbf16> to vector<384x2xbf16>
    %c0_52 = arith.constant 0 : index
    %c22_53 = arith.constant 22 : index
    %c2_54 = arith.constant 2 : index
    %58 = vector.load %arg1[%c0_52, %c22_53, %c2_54] : memref<1x480x4xbf16, #tpu.memory_space<vmem>>, vector<1x384x2xbf16>
    %59 = vector.shape_cast %58 : vector<1x384x2xbf16> to vector<384x2xbf16>
    %c0_55 = arith.constant 0 : index
    %c23_56 = arith.constant 23 : index
    %c2_57 = arith.constant 2 : index
    %60 = vector.load %arg1[%c0_55, %c23_56, %c2_57] : memref<1x480x4xbf16, #tpu.memory_space<vmem>>, vector<1x384x2xbf16>
    %61 = vector.shape_cast %60 : vector<1x384x2xbf16> to vector<384x2xbf16>
    %c0_58 = arith.constant 0 : index
    %c24 = arith.constant 24 : index
    %c2_59 = arith.constant 2 : index
    %62 = vector.load %arg1[%c0_58, %c24, %c2_59] : memref<1x480x4xbf16, #tpu.memory_space<vmem>>, vector<1x384x2xbf16>
    %63 = vector.shape_cast %62 : vector<1x384x2xbf16> to vector<384x2xbf16>
    %64 = tpu.concatenate %55, %57, %59, %61, %63 in 1 : vector<384x2xbf16>, vector<384x2xbf16>, vector<384x2xbf16>, vector<384x2xbf16>, vector<384x2xbf16> -> vector<384x10xbf16>
    %c1_60 = arith.constant 1 : index
    %c0_61 = arith.constant 0 : index
    %c0_62 = arith.constant 0 : index
    %65 = vector.load %arg4[%c1_60, %c0_61, %c0_62] : memref<5x2x10xbf16, #tpu.memory_space<vmem>>, vector<1x2x10xbf16>
    %66 = vector.shape_cast %65 : vector<1x2x10xbf16> to vector<2x10xbf16>
    %cst_63 = arith.constant dense<0.000000e+00> : vector<2x384xf32>
    %67 = tpu.matmul %66, %64, %cst_63 {dimension_numbers = #tpu.dot_dimension_numbers<[1], [1], [0], [0], [0, 0, 1, 0], [], []>} : vector<2x10xbf16>, vector<384x10xbf16>, vector<2x384xf32> -> vector<2x384xf32>
    %68 = arith.addf %53, %67 : vector<2x384xf32>
    %c0_64 = arith.constant 0 : index
    %c40 = arith.constant 40 : index
    %c2_65 = arith.constant 2 : index
    %69 = vector.load %arg1[%c0_64, %c40, %c2_65] : memref<1x480x4xbf16, #tpu.memory_space<vmem>>, vector<1x384x2xbf16>
    %70 = vector.shape_cast %69 : vector<1x384x2xbf16> to vector<384x2xbf16>
    %c0_66 = arith.constant 0 : index
    %c41_67 = arith.constant 41 : index
    %c2_68 = arith.constant 2 : index
    %71 = vector.load %arg1[%c0_66, %c41_67, %c2_68] : memref<1x480x4xbf16, #tpu.memory_space<vmem>>, vector<1x384x2xbf16>
    %72 = vector.shape_cast %71 : vector<1x384x2xbf16> to vector<384x2xbf16>
    %c0_69 = arith.constant 0 : index
    %c42_70 = arith.constant 42 : index
    %c2_71 = arith.constant 2 : index
    %73 = vector.load %arg1[%c0_69, %c42_70, %c2_71] : memref<1x480x4xbf16, #tpu.memory_space<vmem>>, vector<1x384x2xbf16>
    %74 = vector.shape_cast %73 : vector<1x384x2xbf16> to vector<384x2xbf16>
    %c0_72 = arith.constant 0 : index
    %c43_73 = arith.constant 43 : index
    %c2_74 = arith.constant 2 : index
    %75 = vector.load %arg1[%c0_72, %c43_73, %c2_74] : memref<1x480x4xbf16, #tpu.memory_space<vmem>>, vector<1x384x2xbf16>
    %76 = vector.shape_cast %75 : vector<1x384x2xbf16> to vector<384x2xbf16>
    %c0_75 = arith.constant 0 : index
    %c44 = arith.constant 44 : index
    %c2_76 = arith.constant 2 : index
    %77 = vector.load %arg1[%c0_75, %c44, %c2_76] : memref<1x480x4xbf16, #tpu.memory_space<vmem>>, vector<1x384x2xbf16>
    %78 = vector.shape_cast %77 : vector<1x384x2xbf16> to vector<384x2xbf16>
    %79 = tpu.concatenate %70, %72, %74, %76, %78 in 1 : vector<384x2xbf16>, vector<384x2xbf16>, vector<384x2xbf16>, vector<384x2xbf16>, vector<384x2xbf16> -> vector<384x10xbf16>
    %c2_77 = arith.constant 2 : index
    %c0_78 = arith.constant 0 : index
    %c0_79 = arith.constant 0 : index
    %80 = vector.load %arg4[%c2_77, %c0_78, %c0_79] : memref<5x2x10xbf16, #tpu.memory_space<vmem>>, vector<1x2x10xbf16>
    %81 = vector.shape_cast %80 : vector<1x2x10xbf16> to vector<2x10xbf16>
    %cst_80 = arith.constant dense<0.000000e+00> : vector<2x384xf32>
    %82 = tpu.matmul %81, %79, %cst_80 {dimension_numbers = #tpu.dot_dimension_numbers<[1], [1], [0], [0], [0, 0, 1, 0], [], []>} : vector<2x10xbf16>, vector<384x10xbf16>, vector<2x384xf32> -> vector<2x384xf32>
    %83 = arith.addf %68, %82 : vector<2x384xf32>
    %c0_81 = arith.constant 0 : index
    %c60 = arith.constant 60 : index
    %c2_82 = arith.constant 2 : index
    %84 = vector.load %arg1[%c0_81, %c60, %c2_82] : memref<1x480x4xbf16, #tpu.memory_space<vmem>>, vector<1x384x2xbf16>
    %85 = vector.shape_cast %84 : vector<1x384x2xbf16> to vector<384x2xbf16>
    %c0_83 = arith.constant 0 : index
    %c61_84 = arith.constant 61 : index
    %c2_85 = arith.constant 2 : index
    %86 = vector.load %arg1[%c0_83, %c61_84, %c2_85] : memref<1x480x4xbf16, #tpu.memory_space<vmem>>, vector<1x384x2xbf16>
    %87 = vector.shape_cast %86 : vector<1x384x2xbf16> to vector<384x2xbf16>
    %c0_86 = arith.constant 0 : index
    %c62_87 = arith.constant 62 : index
    %c2_88 = arith.constant 2 : index
    %88 = vector.load %arg1[%c0_86, %c62_87, %c2_88] : memref<1x480x4xbf16, #tpu.memory_space<vmem>>, vector<1x384x2xbf16>
    %89 = vector.shape_cast %88 : vector<1x384x2xbf16> to vector<384x2xbf16>
    %c0_89 = arith.constant 0 : index
    %c63_90 = arith.constant 63 : index
    %c2_91 = arith.constant 2 : index
    %90 = vector.load %arg1[%c0_89, %c63_90, %c2_91] : memref<1x480x4xbf16, #tpu.memory_space<vmem>>, vector<1x384x2xbf16>
    %91 = vector.shape_cast %90 : vector<1x384x2xbf16> to vector<384x2xbf16>
    %c0_92 = arith.constant 0 : index
    %c64 = arith.constant 64 : index
    %c2_93 = arith.constant 2 : index
    %92 = vector.load %arg1[%c0_92, %c64, %c2_93] : memref<1x480x4xbf16, #tpu.memory_space<vmem>>, vector<1x384x2xbf16>
    %93 = vector.shape_cast %92 : vector<1x384x2xbf16> to vector<384x2xbf16>
    %94 = tpu.concatenate %85, %87, %89, %91, %93 in 1 : vector<384x2xbf16>, vector<384x2xbf16>, vector<384x2xbf16>, vector<384x2xbf16>, vector<384x2xbf16> -> vector<384x10xbf16>
    %c3_94 = arith.constant 3 : index
    %c0_95 = arith.constant 0 : index
    %c0_96 = arith.constant 0 : index
    %95 = vector.load %arg4[%c3_94, %c0_95, %c0_96] : memref<5x2x10xbf16, #tpu.memory_space<vmem>>, vector<1x2x10xbf16>
    %96 = vector.shape_cast %95 : vector<1x2x10xbf16> to vector<2x10xbf16>
    %cst_97 = arith.constant dense<0.000000e+00> : vector<2x384xf32>
    %97 = tpu.matmul %96, %94, %cst_97 {dimension_numbers = #tpu.dot_dimension_numbers<[1], [1], [0], [0], [0, 0, 1, 0], [], []>} : vector<2x10xbf16>, vector<384x10xbf16>, vector<2x384xf32> -> vector<2x384xf32>
    %98 = arith.addf %83, %97 : vector<2x384xf32>
    %c0_98 = arith.constant 0 : index
    %c80 = arith.constant 80 : index
    %c2_99 = arith.constant 2 : index
    %99 = vector.load %arg1[%c0_98, %c80, %c2_99] : memref<1x480x4xbf16, #tpu.memory_space<vmem>>, vector<1x384x2xbf16>
    %100 = vector.shape_cast %99 : vector<1x384x2xbf16> to vector<384x2xbf16>
    %c0_100 = arith.constant 0 : index
    %c81 = arith.constant 81 : index
    %c2_101 = arith.constant 2 : index
    %101 = vector.load %arg1[%c0_100, %c81, %c2_101] : memref<1x480x4xbf16, #tpu.memory_space<vmem>>, vector<1x384x2xbf16>
    %102 = vector.shape_cast %101 : vector<1x384x2xbf16> to vector<384x2xbf16>
    %c0_102 = arith.constant 0 : index
    %c82 = arith.constant 82 : index
    %c2_103 = arith.constant 2 : index
    %103 = vector.load %arg1[%c0_102, %c82, %c2_103] : memref<1x480x4xbf16, #tpu.memory_space<vmem>>, vector<1x384x2xbf16>
    %104 = vector.shape_cast %103 : vector<1x384x2xbf16> to vector<384x2xbf16>
    %c0_104 = arith.constant 0 : index
    %c83 = arith.constant 83 : index
    %c2_105 = arith.constant 2 : index
    %105 = vector.load %arg1[%c0_104, %c83, %c2_105] : memref<1x480x4xbf16, #tpu.memory_space<vmem>>, vector<1x384x2xbf16>
    %106 = vector.shape_cast %105 : vector<1x384x2xbf16> to vector<384x2xbf16>
    %c0_106 = arith.constant 0 : index
    %c84 = arith.constant 84 : index
    %c2_107 = arith.constant 2 : index
    %107 = vector.load %arg1[%c0_106, %c84, %c2_107] : memref<1x480x4xbf16, #tpu.memory_space<vmem>>, vector<1x384x2xbf16>
    %108 = vector.shape_cast %107 : vector<1x384x2xbf16> to vector<384x2xbf16>
    %109 = tpu.concatenate %100, %102, %104, %106, %108 in 1 : vector<384x2xbf16>, vector<384x2xbf16>, vector<384x2xbf16>, vector<384x2xbf16>, vector<384x2xbf16> -> vector<384x10xbf16>
    %c4_108 = arith.constant 4 : index
    %c0_109 = arith.constant 0 : index
    %c0_110 = arith.constant 0 : index
    %110 = vector.load %arg4[%c4_108, %c0_109, %c0_110] : memref<5x2x10xbf16, #tpu.memory_space<vmem>>, vector<1x2x10xbf16>
    %111 = vector.shape_cast %110 : vector<1x2x10xbf16> to vector<2x10xbf16>
    %cst_111 = arith.constant dense<0.000000e+00> : vector<2x384xf32>
    %112 = tpu.matmul %111, %109, %cst_111 {dimension_numbers = #tpu.dot_dimension_numbers<[1], [1], [0], [0], [0, 0, 1, 0], [], []>} : vector<2x10xbf16>, vector<384x10xbf16>, vector<2x384xf32> -> vector<2x384xf32>
    %113 = arith.addf %98, %112 : vector<2x384xf32>
    %114 = tpu.concatenate %35, %113 in 0 : vector<2x384xf32>, vector<2x384xf32> -> vector<4x384xf32>
    %c0_112 = arith.constant 0 : index
    %c0_113 = arith.constant 0 : index
    %c0_114 = arith.constant 0 : index
    %115 = vector.load %arg6[%c0_112, %c0_113, %c0_114] : memref<1x4x384xf32, #tpu.memory_space<vmem>>, vector<1x4x384xf32>
    %116 = vector.shape_cast %115 : vector<1x4x384xf32> to vector<4x384xf32>
    %117 = vector.shape_cast %114 : vector<4x384xf32> to vector<1x4x384xf32>
    tpu.vector_store %arg6[%c0_112, %c0_113, %c0_114], %117 {strides = array<i32>} : memref<1x4x384xf32, #tpu.memory_space<vmem>>, vector<1x4x384xf32>,
    return
  }
  func.func @transform_0(%arg0: i32) -> (i32, i32, i32) {
    %c0_i32 = arith.constant 0 : i32
    %c0_i32_0 = arith.constant 0 : i32
    %c0_i32_1 = arith.constant 0 : i32
    return %arg0, %c0_i32, %c0_i32_0 : i32, i32, i32
  }
  func.func @transform_1(%arg0: i32) -> (i32, i32, i32) {
    %c0_i32 = arith.constant 0 : i32
    %c0_i32_0 = arith.constant 0 : i32
    %c0_i32_1 = arith.constant 0 : i32
    %c0_i32_2 = arith.constant 0 : i32
    return %c0_i32, %c0_i32_0, %c0_i32_1 : i32, i32, i32
  }
  func.func @transform_2(%arg0: i32) -> (i32, i32) {
    %c0_i32 = arith.constant 0 : i32
    %c0_i32_0 = arith.constant 0 : i32
    %c0_i32_1 = arith.constant 0 : i32
    return %c0_i32, %c0_i32_0 : i32, i32
  }
  func.func @transform_3(%arg0: i32) -> (i32, i32, i32) {
    %c0_i32 = arith.constant 0 : i32
    %c0_i32_0 = arith.constant 0 : i32
    %c0_i32_1 = arith.constant 0 : i32
    %c0_i32_2 = arith.constant 0 : i32
    return %c0_i32, %c0_i32_0, %c0_i32_1 : i32, i32, i32
  }
  func.func @transform_4(%arg0: i32) -> (i32, i32) {
    %c0_i32 = arith.constant 0 : i32
    %c0_i32_0 = arith.constant 0 : i32
    %c0_i32_1 = arith.constant 0 : i32
    return %c0_i32, %c0_i32_0 : i32, i32
  }
  func.func @transform_5(%arg0: i32) -> (i32, i32, i32) {
    %c0_i32 = arith.constant 0 : i32
    %c0_i32_0 = arith.constant 0 : i32
    %c0_i32_1 = arith.constant 0 : i32
    return %arg0, %c0_i32, %c0_i32_0 : i32, i32, i32
  }
}

</mosaic_0001>

<bundles_post_ra>
// kernel: tpu_custom_call.1
= control target key start
LH: loop header
LB: loop body
LE: loop exit
PB: predicated region body
PF: predicated region fallthrough
CT: control target
= control target key end

     0   :  { %10 = vsyncpa [#allocation3], 0  ;;  %s17296_s0 = inlined_call_operand.vmem [shape: bf16[2,480,4], index: 0, kind: input, shape index: {}]   ;;  %s17297_s1 = inlined_call_operand.vmem [shape: bf16[3,2,6], index: 1, kind: input, shape index: {}]   ;;  %s17298_s2 = inlined_call_operand.vmem [shape: f32[2,1], index: 2, kind: input, shape index: {}]   ;;  %s17299_s3 = inlined_call_operand.vmem [shape: bf16[5,2,10], index: 3, kind: input, shape index: {}]   ;;  %s17300_s4 = inlined_call_operand.vmem [shape: f32[2,1], index: 4, kind: input, shape index: {}]   ;;  %s17301_s5 = inlined_call_operand.hbm [shape: f32[2,4,384], index: 5, kind: output, shape index: {}]  }
   0x1   :  { %12 = vsyncpa [#allocation3 + $0x1], 0  ;;  %s9397_s18 = smov 0   ;;  %s9399_s19 = smov 0  }
   0x2   :  { %s9401_s20 = smov 0   ;;  %s9403_s21 = smov 0  }
   0x3 LB: > { %s9418_s22 = sadd.s32 4294967295, %s9357_s21   ;;  %s8115_s23 = sadd.s32 4294967294, %s9357_s21   ;;  %s9357_s21 = sphi %s9403_s21, %s19071_s21   ;;  %s9353_s20 = sphi %s9401_s20, %s19070_s20   ;;  %s9349_s19 = sphi %s9399_s19, %s19069_s19   ;;  %s9345_s18 = sphi %s9397_s18, %s19068_s18  }
   0x4   : > { %s9422_s24 = sadd.s32 1, %s9357_s21   ;;  %s135_s25 = sadd.s32 1, %s9353_s20 }
   0x5   : > { %s132_s26 = ssub.s32 %s9357_s21, %s9422_s24  ;;  %p145_p0 = scmp.ne.s32.totalorder %s9353_s20, %s9349_s19 }
   0x6   : > { %p133_p1 = scmp.eq.s32.totalorder %s132_s26, 0  ;;  %p146_p2 = scmp.eq.s32.totalorder %s9418_s22, 1 }
   0x7   : > { %p151_p3 = scmp.ne.s32.totalorder %s9349_s19, %s9345_s18  ;;  %p152_p4 = scmp.eq.s32.totalorder %s8115_s23, 1 }
   0x8   : > { %s9433_s27 = scalar_select %p133_p1, %s9353_s20, %s135_s25  }
   0x9   : > { %p9435_p5 = por %p146_p2, %p145_p0  ;;  %p9439_p6 = por %p152_p4, %p151_p3 }
   0xa   : > { %p8118_p7 = scmp.ge.s32.totalorder %s9357_s21, 1  ;;  %p190_p8 = scmp.lt.s32.totalorder %s9357_s21, 3 }
   0xc   : > { %p191_p9 = pnand %p8118_p7, %p190_p8 }
   0xe   : > { %194 = sbr.rel (%p191_p9) target bundleno = 1701 (0x6a5), region = 40 }
  0x15   : > { %v224_v0 = vld [vmem:[%s17298_s2] sm:$0x3]  ;;  %p218_p10 = scmp.lt.s32.totalorder %s9418_s22, 1  ;;  %v9359_v1 = vmov 0   ;;  %vm407_vm0 = vsmask.f32 7424 }
  0x16   : > { %8900 = vset.pattern.permute.xlu0 %v9359_v1  ;;  %8901 = vset.pattern.permute.xlu1 %v9359_v1  ;;  %s9360_s12 = smov 2   ;;  %vm660_vm1 = vcmask 1046528   ;;  %s9361_s13 = smov 4   ;;  %vm1064_vm2 = vcmask 48128   ;;  %vm760_vm3 = vcmask 15360   ;;  %vm812_vm4 = vcmask 31744  }
  0x17   : > { %227 = vperm.xlu0 %8900, %v224_v0   ;;  %s219_s7 = scalar_select %p218_p10, %s9418_s22, 1  ;;  %vm864_vm5 = vsmask.f32 5376  ;;  %vm9363_vm6 = vmmov 0   ;;  %vm3701_vm7 = vsmask.f32 6400 }
  0x18   : > { %s9364_s6 = smov 126   ;;  %vm3862_vm8 = vcmask 1045504   ;;  %s9365_s14 = smov 6   ;;  %vm4128_vm9 = vcmask 64512   ;;  %vm4178_vm10 = vcmask 80896   ;;  %vm4605_vm11 = vcmask 1041408  }
  0x19   : > { %s8852_s8 = smul.u32 240, %s219_s7  ;;  %s9366_s26 = smov [#allocation2]  }
  0x1a   : > { %s8853_s10 = smul.u32 192, %s9418_s22  ;;  %s9299_s30 = sshll.u32 %s9366_s26, 4  ;;  %s9300_s30 = int_to_ptr.vmem [resolvable:$false] %s9299_s30 }
  0x1b   : > { %s9453_s11 = scalar_lea.vmem %s17296_s0, %s8852_s8  ;;  %s9301_s7 = scalar_lea.vmem %s9300_s30, 384 }
  0x1c   : > { %v232_v2 = vld [vmem:[%s9453_s11 + $0x10] sm:$0xf]  ;;  %v233_v3 = vld [vmem:[%s9453_s11 + $0x14] sm:$0xf]  ;;  %v234_v4 = vld [vmem:[%s9453_s11 + $0x18] sm:$0xf]  ;;  %s17251_s23 = scalar_lea.hbm %s17301_s5, %s8853_s10 }
  0x1d   : > { %v235_v5 = vld [vmem:[%s9453_s11 + $0x1c] sm:$0xf]  ;;  %v9459_v6 = vcombine.low %v232_v2, %v233_v3  ;;  %v231_v7 = vld [vmem:[%s9453_s11 + $0xc] sm:$0xf]  ;;  %v279_v8 = vld [vmem:[%s9453_s11 + $0x8] sm:$0x8] }
  0x1e   : > { %v9463_v9 = vcombine.low %v234_v4, %v235_v5  ;;  %v9465_v10 = vcombine.low %v279_v8, %v231_v7  ;;  %v236_v11 = vld [vmem:[%s9453_s11 + $0x20] sm:$0xf]  ;;  %v237_v12 = vld [vmem:[%s9453_s11 + $0x24] sm:$0xf]  ;;  %v238_v13 = vld [vmem:[%s9453_s11 + $0x28] sm:$0xf] }
  0x1f   : > { %17749 = vst [vmem:[#allocation5_spill] sm:$0xff] %v9459_v6  ;;  %v17347_v14 = vshll.u32 %v9459_v6, 16  ;;  %v17349_v15 = vshrl.u32 %v9459_v6, 16  ;;  %v9472_v16 = vcombine.low %v236_v11, %v237_v12  ;;  %v239_v17 = vld [vmem:[%s9453_s11 + $0x2c] sm:$0xf] }
  0x20   : > { %17750 = vst [vmem:[#allocation6_spill] sm:$0xff] %v9463_v9  ;;  %17751 = vst [vmem:[#allocation7_spill] sm:$0xff] %v9465_v10  ;;  %v240_v18 = vld [vmem:[%s9453_s11 + $0x30] sm:$0xf]  ;;  %v17348_v19 = vshll.u32 %v9463_v9, 16  ;;  %v17345_v20 = vshrl.u32 %v9465_v10, 16  ;;  %v9486_v26 = vcombine.low %v238_v13, %v239_v17 }
  0x21   : > { %17752 = vst [vmem:[#allocation8_spill] sm:$0xff] %v9472_v16  ;;  %v17338_v21 = vshll.u32 %v9465_v10, 16  ;;  %v17346_v22 = vshrl.u32 %v9463_v9, 16  ;;  %v241_v23 = vld [vmem:[%s9453_s11 + $0x34] sm:$0xf]  ;;  %v9483_v24 = vrot.slane %v17347_v14, 1 }
  0x22   : > { %v17326_v25 = vshll.u32 %v9472_v16, 16  ;;  %17754 = vst [vmem:[#allocation10_spill] sm:$0xff] %v9486_v26  ;;  %v242_v27 = vld [vmem:[%s9453_s11 + $0x38] sm:$0xf]  ;;  %v426_v28 = vrot.slane %v17348_v19, 1  ;;  %v17327_v30 = vshrl.u32 %v9472_v16, 16  ;;  %v9501_v35 = vcombine.low %v240_v18, %v241_v23 }
  0x23   : > { %17753 = vst [vmem:[#allocation9_spill] sm:$0xff] %v9483_v24  ;;  %v413_v29 = vrot.slane %v17338_v21, 1  ;;  %v243_v31 = vld [vmem:[%s9453_s11 + $0x3c] sm:$0xf]  ;;  %v422_v32 = vor.u32 %v17349_v15, %v9483_v24  ;;  %v17322_v34 = vshll.u32 %v9486_v26, 16  ;;  %v17325_v40 = vshrl.u32 %v9486_v26, 16 }
  0x24   : > { %v434_v33 = vrot.slane %v17326_v25, 1  ;;  %17755 = vst [vmem:[#allocation11_spill] sm:$0xff] %v9501_v35  ;;  %v244_v36 = vld [vmem:[%s9453_s11 + $0x40] sm:$0xf]  ;;  %v245_v37 = vld [vmem:[%s9453_s11 + $0x44] sm:$0xf]  ;;  %v430_v39 = vor.u32 %v17346_v22, %v426_v28  ;;  %v9510_v41 = vcombine.low %v242_v27, %v243_v31 }
  0x25   : > { %v414_v38 = vor.u32 %v413_v29, %v17345_v20  ;;  %v246_v42 = vld [vmem:[%s9453_s11 + $0x48] sm:$0xf]  ;;  %v247_v43 = vld [vmem:[%s9453_s11 + $0x4c] sm:$0xf]  ;;  %v9515_v44 = vsel %vm407_vm0, %v422_v32, %v426_v28  ;;  %v442_v46 = vrot.slane %v17322_v34, 1  ;;  %v17318_v47 = vshll.u32 %v9501_v35, 16 }
  0x26   : > { %17756 = vst [vmem:[#allocation12_spill] sm:$0xff] %v9510_v41  ;;  %17757 = vst [vmem:[#allocation13_spill] sm:$0xff] %v9515_v44  ;;  %v438_v45 = vor.u32 %v17327_v30, %v434_v33  ;;  %v248_v48 = vld [vmem:[%s9453_s11 + $0x50] sm:$0xf]  ;;  %v249_v49 = vld [vmem:[%s9453_s11 + $0x54] sm:$0xf]  ;;  %609 = vrot.lane.b32.xlu1 %v9515_v44, %s9360_s12  ;;  %v9529_v51 = vsel %vm407_vm0, %v430_v39, %v434_v33  ;;  %v9541_v57 = vcombine.low %v244_v36, %v245_v37 }
  0x27   : > { %v419_v50 = vsel %vm407_vm0, %v414_v38, %v9483_v24  ;;  %17758 = vst [vmem:[#allocation14_spill] sm:$0xff] %v9529_v51  ;;  %v17319_v52 = vshrl.u32 %v9501_v35, 16  ;;  %v17315_v53 = vshll.u32 %v9510_v41, 16  ;;  %v446_v55 = vor.u32 %v17325_v40, %v442_v46  ;;  %v250_v58 = vld [vmem:[%s9453_s11 + $0x58] sm:$0xf] }
  0x28   : > { %607 = vrot.lane.b32.xlu0 %v419_v50, %s9360_s12  ;;  %v9535_v54 = vsel %vm407_vm0, %v438_v45, %v442_v46  ;;  %v450_v56 = vrot.slane %v17318_v47, 1  ;;  %17760 = vst [vmem:[#allocation16_spill] sm:$0xff] %v9541_v57  ;;  %v251_v59 = vld [vmem:[%s9453_s11 + $0x5c] sm:$0xf]  ;;  %v17316_v61 = vshrl.u32 %v9510_v41, 16  ;;  %v9548_v62 = vcombine.low %v246_v42, %v247_v43 }
  0x29   : > { %17759 = vst [vmem:[#allocation15_spill] sm:$0xff] %v9535_v54  ;;  %v458_v60 = vrot.slane %v17315_v53, 1  ;;  %v9550_v63 = vcombine.low %v248_v48, %v249_v49  ;;  %v252_v0 = vld [vmem:[%s9453_s11 + $0x60] sm:$0xf]  ;;  %v253_v1 = vld [vmem:[%s9453_s11 + $0x64] sm:$0xf]  ;;  %v9577_v27 = vcombine.low %v250_v58, %v251_v59 }
  0x2a   : > { %17761 = vst [vmem:[#allocation17_spill] sm:$0xff] %v9548_v62  ;;  %v9555_v2 = vsel %vm407_vm0, %v446_v55, %v450_v56  ;;  %v454_v3 = vor.u32 %v17319_v52, %v450_v56  ;;  %v17313_v4 = vshll.u32 %v9541_v57, 16  ;;  %v17314_v5 = vshrl.u32 %v9541_v57, 16  ;;  %v254_v7 = vld [vmem:[%s9453_s11 + $0x68] sm:$0xf]  ;;  %611 = vrot.lane.b32.xlu1 %v9529_v51, %s9360_s12 }
  0x2b   : > { %17762 = vst [vmem:[#allocation18_spill] sm:$0xff] %v9550_v63  ;;  %17763 = vst [vmem:[#allocation19_spill] sm:$0xff] %v9555_v2  ;;  %v255_v8 = vld [vmem:[%s9453_s11 + $0x6c] sm:$0xf]  ;;  %v462_v11 = vor.u32 %v17316_v61, %v458_v60  ;;  %v17308_v12 = vshll.u32 %v9548_v62, 16  ;;  %v17311_v13 = vshrl.u32 %v9548_v62, 16  ;;  %v9584_v32 = vcombine.low %v252_v0, %v253_v1 }
  0x2c   : > { %v17305_v17 = vshll.u32 %v9550_v63, 16  ;;  %613 = vrot.lane.b32.xlu0 %v9535_v54, %s9360_s12  ;;  %v9573_v18 = vsel %vm407_vm0, %v454_v3, %v458_v60  ;;  %v466_v23 = vrot.slane %v17313_v4, 1  ;;  %17765 = vst [vmem:[#allocation21_spill] sm:$0xff] %v9577_v27  ;;  %v17306_v28 = vshrl.u32 %v9550_v63, 16  ;;  %v256_v36 = vld [vmem:[%s9453_s11 + $0x70] sm:$0xf] }
  0x2d   : > { %17764 = vst [vmem:[#allocation20_spill] sm:$0xff] %v9573_v18  ;;  %v474_v29 = vrot.slane %v17308_v12, 1  ;;  %17766 = vst [vmem:[#allocation22_spill] sm:$0xff] %v9584_v32  ;;  %v9586_v33 = vcombine.low %v254_v7, %v255_v8  ;;  %v257_v37 = vld [vmem:[%s9453_s11 + $0x74] sm:$0xf]  ;;  %v17303_v42 = vshll.u32 %v9577_v27, 16 }
  0x2e   : > { %v482_v31 = vrot.slane %v17305_v17, 1  ;;  %v9591_v38 = vsel %vm407_vm0, %v462_v11, %v466_v23  ;;  %v470_v39 = vor.u32 %v17314_v5, %v466_v23  ;;  %v258_v43 = vld [vmem:[%s9453_s11 + $0x78] sm:$0xf]  ;;  %v259_v45 = vld [vmem:[%s9453_s11 + $0x7c] sm:$0xf]  ;;  %615 = vrot.lane.b32.xlu1 %v9555_v2, %s9360_s12  ;;  %v17304_v49 = vshrl.u32 %v9577_v27, 16 }
  0x2f   : > { %17767 = vst [vmem:[#allocation23_spill] sm:$0xff] %v9586_v33  ;;  %17768 = vst [vmem:[#allocation24_spill] sm:$0xff] %v9591_v38  ;;  %v478_v46 = vor.u32 %v17311_v13, %v474_v29  ;;  %v17302_v50 = vshll.u32 %v9584_v32, 16  ;;  %v260_v55 = vld [vmem:[%s9453_s11 + $0x80] sm:$0xf]  ;;  %v490_v56 = vrot.slane %v17303_v42, 1  ;;  %v9613_v60 = vcombine.low %v256_v36, %v257_v37 }
  0x30   : > { %v486_v48 = vor.u32 %v17306_v28, %v482_v31  ;;  %617 = vrot.lane.b32.xlu0 %v9573_v18, %s9360_s12  ;;  %v17307_v58 = vshrl.u32 %v9584_v32, 16  ;;  %v17309_v59 = vshll.u32 %v9586_v33, 16  ;;  %v261_v0 = vld [vmem:[%s9453_s11 + $0x84] sm:$0xf]  ;;  %v9617_v1 = vsel %vm407_vm0, %v470_v39, %v474_v29  ;;  %v262_v11 = vld [vmem:[%s9453_s11 + $0x88] sm:$0xf] }
  0x31   : > { %17769 = vst [vmem:[#allocation25_spill] sm:$0xff] %v9613_v60  ;;  %17770 = vst [vmem:[#allocation26_spill] sm:$0xff] %v9617_v1  ;;  %v498_v3 = vrot.slane %v17302_v50, 1  ;;  %v9621_v7 = vcombine.low %v258_v43, %v259_v45  ;;  %v17310_v8 = vshll.u32 %v9613_v60, 16  ;;  %v263_v23 = vld [vmem:[%s9453_s11 + $0x8c] sm:$0xf]  ;;  %v9629_v36 = vsel %vm407_vm0, %v478_v46, %v482_v31 }
  0x32   : > { %619 = vrot.lane.b32.xlu1 %v9591_v38, %s9360_s12  ;;  %17772 = vst [vmem:[#allocation28_spill] sm:$0xff] %v9629_v36  ;;  %v494_v29 = vor.u32 %v17304_v49, %v490_v56  ;;  %v9634_v39 = vcombine.low %v260_v55, %v261_v0  ;;  %v264_v43 = vld [vmem:[%s9453_s11 + $0x90] sm:$0xf]  ;;  %v265_v45 = vld [vmem:[%s9453_s11 + $0x94] sm:$0xf]  ;;  %v9641_v50 = vsel %vm407_vm0, %v486_v48, %v490_v56  ;;  %v506_v46 = vrot.slane %v17309_v59, 1 }
  0x33   : > { %17771 = vst [vmem:[#allocation27_spill] sm:$0xff] %v9621_v7  ;;  %v17312_v37 = vshll.u32 %v9621_v7, 16  ;;  %17774 = vst [vmem:[#allocation30_spill] sm:$0xff] %v9641_v50  ;;  %v502_v31 = vor.u32 %v17307_v58, %v498_v3  ;;  %v17317_v42 = vshrl.u32 %v9586_v33, 16  ;;  %v266_v55 = vld [vmem:[%s9453_s11 + $0x98] sm:$0xf]  ;;  %v9654_v56 = vcombine.low %v262_v11, %v263_v23 }
  0x34   : > { %17773 = vst [vmem:[#allocation29_spill] sm:$0xff] %v9634_v39  ;;  %621 = vrot.lane.b32.xlu0 %v9617_v1, %s9360_s12  ;;  %v267_v0 = vld [vmem:[%s9453_s11 + $0x9c] sm:$0xf]  ;;  %v514_v49 = vrot.slane %v17310_v8, 1  ;;  %v17321_v17 = vshrl.u32 %v9613_v60, 16  ;;  %v17320_v48 = vshll.u32 %v9634_v39, 16  ;;  %v9656_v28 = vcombine.low %v264_v43, %v265_v45 }
  0x35   : > { %17775 = vst [vmem:[#allocation31_spill] sm:$0xff] %v9654_v56  ;;  %v268_v58 = vld [vmem:[%s9453_s11 + $0xa0] sm:$0xf]  ;;  %v269_v12 = vld [vmem:[%s9453_s11 + $0xa4] sm:$0xf]  ;;  %v9663_v59 = vsel %vm407_vm0, %v494_v29, %v498_v3  ;;  %v522_v8 = vrot.slane %v17312_v37, 1  ;;  %v510_v45 = vor.u32 %v17317_v42, %v506_v46  ;;  %v9678_v37 = vcombine.low %v266_v55, %v267_v0 }
  0x36   : > { %17776 = vst [vmem:[#allocation32_spill] sm:$0xff] %v9656_v28  ;;  %623 = vrot.lane.b32.xlu1 %v9629_v36, %s9360_s12  ;;  %17777 = vst [vmem:[#allocation33_spill] sm:$0xff] %v9663_v59  ;;  %v17323_v13 = vshrl.u32 %v9621_v7, 16  ;;  %v17324_v11 = vshll.u32 %v9654_v56, 16  ;;  %v270_v23 = vld [vmem:[%s9453_s11 + $0xa8] sm:$0xf]  ;;  %v9681_v4 = vsel %vm407_vm0, %v502_v31, %v506_v46  ;;  %v518_v5 = vor.u32 %v17321_v17, %v514_v49 }
  0x37   : > { %v271_v43 = vld [vmem:[%s9453_s11 + $0xac] sm:$0xf]  ;;  %v530_v3 = vrot.slane %v17320_v48, 1  ;;  %v17337_v29 = vshrl.u32 %v9634_v39, 16  ;;  %17778 = vst [vmem:[#allocation34_spill] sm:$0xff] %v9678_v37  ;;  %17779 = vst [vmem:[#allocation35_spill] sm:$0xff] %v9681_v4  ;;  %v9686_v61 = vcombine.low %v268_v58, %v269_v12  ;;  %v9703_v12 = vsel %vm407_vm0, %v510_v45, %v514_v49 }
  0x38   : > { %625 = vrot.lane.b32.xlu0 %v9641_v50, %s9360_s12  ;;  %v17329_v53 = vshll.u32 %v9656_v28, 16  ;;  %v272_v42 = vld [vmem:[%s9453_s11 + $0xb0] sm:$0xf]  ;;  %v17330_v47 = vshrl.u32 %v9654_v56, 16  ;;  %v273_v52 = vld [vmem:[%s9453_s11 + $0xb4] sm:$0xf]  ;;  %v526_v31 = vor.u32 %v17323_v13, %v522_v8  ;;  %v9708_v34 = vcombine.low %v270_v23, %v271_v43 }
  0x39   : > { %17780 = vst [vmem:[#allocation36_spill] sm:$0xff] %v9686_v61  ;;  %v538_v46 = vrot.slane %v17324_v11, 1  ;;  %v17328_v55 = vshll.u32 %v9678_v37, 16  ;;  %v274_v0 = vld [vmem:[%s9453_s11 + $0xb8] sm:$0xf]  ;;  %17781 = vst [vmem:[#allocation37_spill] sm:$0xff] %v9703_v12  ;;  %v534_v58 = vor.u32 %v17337_v29, %v530_v3  ;;  %v9712_v11 = vsel %vm407_vm0, %v518_v5, %v522_v8 }
  0x3a   : > { %627 = vrot.lane.b32.xlu1 %v9663_v59, %s9360_s12  ;;  %v275_v48 = vld [vmem:[%s9453_s11 + $0xbc] sm:$0xf]  ;;  %v17332_v17 = vshrl.u32 %v9656_v28, 16  ;;  %17782 = vst [vmem:[#allocation38_spill] sm:$0xff] %v9708_v34  ;;  %v276_v13 = vld [vmem:[%s9453_s11 + $0xc0] sm:$0xf]  ;;  %v9717_v30 = vcombine.low %v272_v42, %v273_v52  ;;  %v9723_v45 = vsel %vm407_vm0, %v526_v31, %v530_v3 }
  0x3b   : > { %17783 = vst [vmem:[#allocation39_spill] sm:$0xff] %v9712_v11  ;;  %v546_v40 = vrot.slane %v17329_v53, 1  ;;  %v17331_v25 = vshll.u32 %v9686_v61, 16  ;;  %v277_v49 = vld [vmem:[%s9453_s11 + $0xc4] sm:$0xf]  ;;  %17785 = vst [vmem:[#allocation41_spill] sm:$0xff] %v9723_v45  ;;  %v542_v23 = vor.u32 %v17330_v47, %v538_v46  ;;  %v9733_v52 = vsel %vm407_vm0, %v534_v58, %v538_v46 }
  0x3c   : > { %629 = vrot.lane.b32.xlu0 %v9681_v4, %s9360_s12  ;;  %17784 = vst [vmem:[#allocation40_spill] sm:$0xff] %v9717_v30  ;;  %v554_v5 = vrot.slane %v17328_v55, 1  ;;  %v17333_v8 = vshrl.u32 %v9678_v37, 16  ;;  %17786 = vst [vmem:[#allocation42_spill] sm:$0xff] %v9733_v52  ;;  %v17335_v42 = vshrl.u32 %v9686_v61, 16  ;;  %v17334_v43 = vshll.u32 %v9708_v34, 16 }
  0x3d   : > { %v9737_v3 = vcombine.low %v274_v0, %v275_v48  ;;  %v550_v31 = vor.u32 %v17332_v17, %v546_v40  ;;  %v562_v55 = vrot.slane %v17331_v25, 1  ;;  %v17336_v53 = vshll.u32 %v9717_v30, 16  ;;  %v8926_v0 = vld [vmem:[%s9453_s11 + $0xc8] ss:$0 sps:$4 sm:$0x77]   ;;  %v9964_v54 = vld [vmem:[%s9453_s11 + $0x2c] sm:$0xff]  }
  0x3e   : > { %631 = vrot.lane.b32.xlu1 %v9703_v12, %s9360_s12  ;;  %v9744_v47 = vcombine.low %v276_v13, %v277_v49  ;;  %v9749_v46 = vsel %vm407_vm0, %v542_v23, %v546_v40  ;;  %v558_v48 = vor.u32 %v17333_v8, %v554_v5  ;;  %v570_v58 = vrot.slane %v17334_v43, 1  ;;  %v280_v4 = vld [vmem:[%s9453_s11 + $0xc8] sm:$0xf]  ;;  %17824 = vst [vmem:[#allocation80_spill] sm:$0xff] %v9964_v54  ;;  %v9986_v38 = vld [vmem:[%s9453_s11 + $0x3c] sm:$0xff]  }
  0x3f   : > { %17787 = vst [vmem:[#allocation43_spill] sm:$0xff] %v9737_v3  ;;  %17789 = vst [vmem:[#allocation45_spill] sm:$0xff] %v9749_v46  ;;  %v17342_v25 = vshrl.u32 %v9708_v34, 16  ;;  %v17340_v13 = vshrl.u32 %v9717_v30, 16  ;;  %v17339_v49 = vshll.u32 %v9737_v3, 16  ;;  %v9762_v17 = vsel %vm407_vm0, %v550_v31, %v554_v5  ;;  %v9946_v50 = vld [vmem:[%s9453_s11 + $0x24] sm:$0xff]  }
  0x40   : > { %633 = vrot.lane.b32.xlu0 %v9712_v11, %s9360_s12  ;;  %17788 = vst [vmem:[#allocation44_spill] sm:$0xff] %v9744_v47  ;;  %17790 = vst [vmem:[#allocation46_spill] sm:$0xff] %v9762_v17  ;;  %v566_v40 = vor.u32 %v17335_v42, %v562_v55  ;;  %v578_v23 = vrot.slane %v17336_v53, 1  ;;  %v17341_v8 = vshll.u32 %v9744_v47, 16  ;;  %v9772_v43 = vsel %vm407_vm0, %v558_v48, %v562_v55 }
  0x41   : > { %17791 = vst [vmem:[#allocation47_spill] sm:$0xff] %v9772_v43  ;;  %v574_v5 = vor.u32 %v17342_v25, %v570_v58  ;;  %v586_v31 = vrot.slane %v17339_v49, 1  ;;  %v17344_v42 = vshrl.u32 %v9737_v3, 16  ;;  %v17343_v53 = vshrl.u32 %v9744_v47, 16  ;;  %17819 = vst [vmem:[#allocation75_spill] sm:$0xff] %v9946_v50 }
  0x42   : > { %635 = vrot.lane.b32.xlu1 %v9723_v45, %s9360_s12  ;;  %v9783_v29 = vsel %vm407_vm0, %v566_v40, %v570_v58  ;;  %v582_v55 = vor.u32 %v17340_v13, %v578_v23  ;;  %v594_v48 = vrot.slane %v17341_v8, 1  ;;  %v600_v21 = vshll.u32 %v8926_v0, 16  ;;  %v1273_v45 = vld [vmem:[%s9453_s11 + $0x14] sm:$0xe]  ;;  %17829 = vst [vmem:[#allocation84_spill] sm:$0xff] %v9986_v38 }
  0x43   : > { %17792 = vst [vmem:[#allocation48_spill] sm:$0xff] %v9783_v29  ;;  %v9794_v49 = vsel %vm407_vm0, %v574_v5, %v578_v23  ;;  %v590_v58 = vor.u32 %v17344_v42, %v586_v31  ;;  %v604_v25 = vshrl.u32 %v8926_v0, 16  ;;  %v664_v0 = vrot.slane %v9463_v9, 1 }
  0x44   : > { %637 = vrot.lane.b32.xlu0 %v9733_v52, %s9360_s12  ;;  %17793 = vst [vmem:[#allocation49_spill] sm:$0xff] %v9794_v49  ;;  %v9799_v40 = vsel %vm407_vm0, %v582_v55, %v586_v31  ;;  %v598_v13 = vor.u32 %v17343_v53, %v594_v48  ;;  %v602_v8 = vrot.slane %v600_v21, 1  ;;  %v661_v31 = vrot.slane %v9465_v10, 1 }
  0x45   : > { %17794 = vst [vmem:[#allocation50_spill] sm:$0xff] %v9799_v40  ;;  %v9808_v23 = vsel %vm407_vm0, %v590_v58, %v594_v48  ;;  %v662_v55 = vrot.slane %v9459_v6, 1  ;;  %v672_v42 = vrot.slane %v9510_v41, 1  ;;  %v674_v20 = vrot.slane %v9541_v57, 1 }
  0x46   : > { %639 = vrot.lane.b32.xlu1 %v9749_v46, %s9360_s12  ;;  %17795 = vst [vmem:[#allocation51_spill] sm:$0xff] %v9808_v23  ;;  %v9811_v5 = vsel %vm407_vm0, %v598_v13, %v602_v8  ;;  %v9817_v21 = vor.u32 %v604_v25, %v602_v8  ;;  %v666_v13 = vrot.slane %v9472_v16, 1  ;;  %v668_v8 = vrot.slane %v9486_v26, 1  ;;  %v9940_v46 = vld [vmem:[%s9453_s11 + $0x1c] sm:$0xff]   ;;  %v2205_v26 = vld [vmem:[%s9453_s11 + $0x70] sm:$0xf] }
  0x47   : > { %17796 = vst [vmem:[#allocation52_spill] sm:$0xff] %v9811_v5  ;;  %v9823_v48 = vsel %vm660_vm1, %v661_v31, %v662_v55  ;;  %v9831_v25 = vsel %vm660_vm1, %v662_v55, %v664_v0  ;;  %v670_v31 = vrot.slane %v9501_v35, 1  ;;  %v676_v22 = vrot.slane %v9548_v62, 1  ;;  %17818 = vst [vmem:[#allocation74_spill] sm:$0xff] %v9940_v46 }
  0x48   : > { %641 = vrot.lane.b32.xlu0 %v9762_v17, %s9360_s12  ;;  %17797 = vst [vmem:[#allocation53_spill] sm:$0xff] %v9817_v21  ;;  %17798 = vst [vmem:[#allocation54_spill] sm:$0xff] %v9823_v48  ;;  %v9835_v58 = vsel %vm660_vm1, %v664_v0, %v666_v13  ;;  %v9843_v53 = vsel %vm660_vm1, %v666_v13, %v668_v8  ;;  %v9859_v13 = vsel %vm660_vm1, %v672_v42, %v674_v20 }
  0x49   : > { %17799 = vst [vmem:[#allocation55_spill] sm:$0xff] %v9831_v25  ;;  %17800 = vst [vmem:[#allocation56_spill] sm:$0xff] %v9835_v58  ;;  %v9847_v55 = vsel %vm660_vm1, %v668_v8, %v670_v31  ;;  %v9855_v0 = vsel %vm660_vm1, %v670_v31, %v672_v42  ;;  %v678_v14 = vrot.slane %v9550_v63, 1  ;;  %v9867_v8 = vsel %vm660_vm1, %v674_v20, %v676_v22 }
  0x4a   : > { %643 = vrot.lane.b32.xlu1 %v9772_v43, %s9360_s12  ;;  %17801 = vst [vmem:[#allocation57_spill] sm:$0xff] %v9843_v53  ;;  %17802 = vst [vmem:[#allocation58_spill] sm:$0xff] %v9847_v55  ;;  %v680_v19 = vrot.slane %v9577_v27, 1  ;;  %v682_v15 = vrot.slane %v9584_v32, 1  ;;  %v694_v52 = vrot.slane %v9656_v28, 1  ;;  %v702_v43 = vrot.slane %v9717_v30, 1 }
  0x4b   : > { %17803 = vst [vmem:[#allocation59_spill] sm:$0xff] %v9855_v0  ;;  %17804 = vst [vmem:[#allocation60_spill] sm:$0xff] %v9859_v13  ;;  %v9871_v31 = vsel %vm660_vm1, %v676_v22, %v678_v14  ;;  %v17830_v36 = vshll.u32 %v9940_v46, 16  ;;  %v17832_v12 = vshll.u32 %v9946_v50, 16 }
  0x4c   : > { %645 = vrot.lane.b32.xlu0 %v9783_v29, %s9360_s12  ;;  %17805 = vst [vmem:[#allocation61_spill] sm:$0xff] %v9867_v8  ;;  %17806 = vst [vmem:[#allocation62_spill] sm:$0xff] %v9871_v31  ;;  %v9879_v42 = vsel %vm660_vm1, %v678_v14, %v680_v19  ;;  %v9883_v20 = vsel %vm660_vm1, %v680_v19, %v682_v15  ;;  %v688_v14 = vrot.slane %v9621_v7, 1  ;;  %v690_v19 = vrot.slane %v9634_v39, 1  ;;  %v1225_v29 = vld [vmem:[%s9453_s11 + $0x18] sm:$0xf] }
  0x4d   : > { %17807 = vst [vmem:[#allocation63_spill] sm:$0xff] %v9879_v42  ;;  %17808 = vst [vmem:[#allocation64_spill] sm:$0xff] %v9883_v20  ;;  %v9932_v11 = vcombine.low %v1273_v45, %v1225_v29  ;;  %v9954_v45 = vrot.slane %v9744_v47, 1  ;;  %v9990_v2 = vrot.slane %v17830_v36, 1 }
  0x4e   : > { %647 = vrot.lane.b32.xlu1 %v9794_v49, %s9360_s12  ;;  %v9907_v1 = vsel %vm660_vm1, %v688_v14, %v690_v19  ;;  %v10230_v30 = vld [vmem:[%s9453_s11 + $0xd4] ss:$0 sps:$4 sm:$0x11]  }
  0x4f   : > { %17812 = vst [vmem:[#allocation68_spill] sm:$0xff] %v9907_v1  ;;  %17816 = vst [vmem:[#allocation72_spill] sm:$0xff] %v9932_v11  ;;  %v17828_v44 = vshll.u32 %v9932_v11, 16  ;;  %v17834_v24 = vshrl.u32 %v9932_v11, 16 }
  0x50   : > { %649 = vrot.lane.b32.xlu0 %v9799_v40, %s9360_s12  ;;  %17821 = vst [vmem:[#allocation77_spill] sm:$0xff] %v9954_v45  ;;  %17831 = vst [vmem:[#allocation85_spill] sm:$0xff] %v9990_v2 }
  0x52   : > { %651 = vrot.lane.b32.xlu1 %v9808_v23, %s9360_s12 }
  0x54   : > { %653 = vrot.lane.b32.xlu0 %v9811_v5, %s9360_s12  ;;  %v686_v5 = vrot.slane %v9613_v60, 1  ;;  %v2187_v60 = vld [vmem:[%s9453_s11 + $0x28] sm:$0xf] }
  0x56   : > { %655 = vrot.lane.b32.xlu1 %v9817_v21, %s9360_s12  ;;  %v684_v21 = vrot.slane %v9586_v33, 1  ;;  %v9903_v40 = vsel %vm660_vm1, %v686_v5, %v688_v14  ;;  %v698_v14 = vrot.slane %v9686_v61, 1 }
  0x57   : > { %17811 = vst [vmem:[#allocation67_spill] sm:$0xff] %v9903_v40 }
  0x58   : > { %710 = vrot.lane.b32.xlu0 %v9823_v48, %s9361_s13  ;;  %v9891_v22 = vsel %vm660_vm1, %v682_v15, %v684_v21  ;;  %v9895_v23 = vsel %vm660_vm1, %v684_v21, %v686_v5  ;;  %v692_v15 = vrot.slane %v9654_v56, 1  ;;  %v696_v5 = vrot.slane %v9678_v37, 1 }
  0x59   : > { %17809 = vst [vmem:[#allocation65_spill] sm:$0xff] %v9891_v22  ;;  %17810 = vst [vmem:[#allocation66_spill] sm:$0xff] %v9895_v23 }
  0x5a   : > { %712 = vrot.lane.b32.xlu1 %v9831_v25, %s9361_s13  ;;  %v9915_v21 = vsel %vm660_vm1, %v690_v19, %v692_v15  ;;  %v9919_v49 = vsel %vm660_vm1, %v692_v15, %v694_v52  ;;  %v9929_v17 = vsel %vm660_vm1, %v694_v52, %v696_v5  ;;  %v700_v19 = vrot.slane %v9708_v34, 1  ;;  %v10188_v25 = vld [vmem:[%s9453_s11 + $0xcc] sm:$0xff]  }
  0x5b   : > { %17813 = vst [vmem:[#allocation69_spill] sm:$0xff] %v9915_v21  ;;  %17814 = vst [vmem:[#allocation70_spill] sm:$0xff] %v9919_v49  ;;  %v9935_v15 = vsel %vm660_vm1, %v696_v5, %v698_v14  ;;  %v704_v52 = vrot.slane %v9737_v3, 1  ;;  %v9956_v5 = vcombine.low %v280_v4, %v280_v4  ;;  %v9973_v4 = vld [vmem:[%s9453_s11 + $0x34] sm:$0xff]  }
  0x5c   : > { %714 = vrot.lane.b32.xlu0 %v9835_v58, %s9361_s13  ;;  %17815 = vst [vmem:[#allocation71_spill] sm:$0xff] %v9929_v17  ;;  %17817 = vst [vmem:[#allocation73_spill] sm:$0xff] %v9935_v15  ;;  %v9951_v29 = vsel %vm660_vm1, %v698_v14, %v700_v19  ;;  %v9960_v18 = vsel %vm660_vm1, %v700_v19, %v702_v43 }
  0x5d   : > { %17820 = vst [vmem:[#allocation76_spill] sm:$0xff] %v9951_v29  ;;  %17822 = vst [vmem:[#allocation78_spill] sm:$0xff] %v9956_v5  ;;  %v9969_v14 = vsel %vm660_vm1, %v702_v43, %v704_v52  ;;  %v9979_v19 = vsel %vm660_vm1, %v704_v52, %v9954_v45  ;;  %v708_v59 = vrot.slane %v9956_v5, 1  ;;  %v1406_v43 = vrot.slane %v17828_v44, 1 }
  0x5e   : > { %716 = vrot.lane.b32.xlu1 %v9843_v53, %s9361_s13  ;;  %17823 = vst [vmem:[#allocation79_spill] sm:$0xff] %v9960_v18  ;;  %17825 = vst [vmem:[#allocation81_spill] sm:$0xff] %v9969_v14  ;;  %v17378_v52 = vmov 0.0   ;;  %v1419_v44 = vrot.slane %v17832_v12, 1  ;;  %v17835_v12 = vshrl.u32 %v9940_v46, 16  ;;  %v17836_v5 = vshll.u32 %v9964_v54, 16 }
  0x5f   : > { %17826 = vst [vmem:[#allocation82_spill] sm:$0xff] %v9973_v4  ;;  %17827 = vst [vmem:[#allocation83_spill] sm:$0xff] %v9979_v19  ;;  %8573 = vmatprep.subr.bf16.mxu1 %v17378_v52  ;;  %v709_v36 = vsel %vm660_vm1, %v9954_v45, %v708_v59  ;;  %v1407_v52 = vor.u32 %v1406_v43, %v17834_v24  ;;  %v17838_v24 = vshll.u32 %v9973_v4, 16  ;;  %v10026_v45 = vld [vmem:[%s9453_s11 + $0x54] sm:$0xff]  }
  0x60   : > { %718 = vrot.lane.b32.xlu0 %v9847_v55, %s9361_s13  ;;  %v1427_v10 = vrot.slane %v17836_v5, 1  ;;  %17839 = vst [vmem:[#allocation88_spill] sm:$0xff] %v10026_v45  ;;  %17883 = vst [vmem:[#allocation113_spill] sm:$0xff] %v10188_v25 }
  0x61   : > { %v1435_v43 = vrot.slane %v17838_v24, 1  ;;  %v1412_v5 = vsel %vm407_vm0, %v1407_v52, %v9990_v2  ;;  %v17393_v24 = vshrl.u32 %v9986_v38, 16 }
  0x62   : > { %720 = vrot.lane.b32.xlu1 %v9855_v0, %s9361_s13  ;;  %v10176_v0 = vld [vmem:[%s9453_s11 + $0xc4] sm:$0xff]  }
  0x63   : > { %17880 = vst [vmem:[#allocation112_spill] sm:$0xff] %v10176_v0  ;;  %v17901_v7 = vshll.u32 %v10176_v0, 16 }
  0x64   : > { %722 = vrot.lane.b32.xlu0 %v9859_v13, %s9361_s13 }
  0x65   : > { %v1579_v61 = vrot.slane %v17901_v7, 1 }
  0x66   : > { %724 = vrot.lane.b32.xlu1 %v9867_v8, %s9361_s13 }
  0x68   : > { %726 = vrot.lane.b32.xlu0 %v9871_v31, %s9361_s13 }
  0x6a   : > { %728 = vrot.lane.b32.xlu1 %v9879_v42, %s9361_s13  ;;  %v10157_v42 = vld [vmem:[%s9453_s11 + $0xac] sm:$0xff]  }
  0x6b   : > { %17874 = vst [vmem:[#allocation108_spill] sm:$0xff] %v10157_v42 }
  0x6c   : > { %730 = vrot.lane.b32.xlu0 %v9883_v20, %s9361_s13 }
  0x6e   : > { %732 = vrot.lane.b32.xlu1 %v9891_v22, %s9361_s13  ;;  %v10154_v22 = vld [vmem:[%s9453_s11 + $0xa4] sm:$0xff]  }
  0x6f   : > { %17873 = vst [vmem:[#allocation107_spill] sm:$0xff] %v10154_v22 }
  0x70   : > { %734 = vrot.lane.b32.xlu0 %v9895_v23, %s9361_s13 }
  0x72   : > { %736 = vrot.lane.b32.xlu1 %v9903_v40, %s9361_s13 }
  0x74   : > { %738 = vrot.lane.b32.xlu0 %v9907_v1, %s9361_s13  ;;  %v10043_v1 = vld [vmem:[%s9453_s11 + $0x5c] sm:$0xff]  }
  0x75   : > { %17844 = vst [vmem:[#allocation90_spill] sm:$0xff] %v10043_v1  ;;  %v17859_v40 = vshll.u32 %v10043_v1, 16 }
  0x76   : > { %740 = vrot.lane.b32.xlu1 %v9915_v21, %s9361_s13 }
  0x77   : > { %v1475_v20 = vrot.slane %v17859_v40, 1  ;;  %v17863_v40 = vshrl.u32 %v10026_v45, 16 }
  0x78   : > { %742 = vrot.lane.b32.xlu0 %v9919_v49, %s9361_s13 }
  0x7a   : > { %744 = vrot.lane.b32.xlu1 %v9929_v17, %s9361_s13 }
  0x7c   : > { %746 = vrot.lane.b32.xlu0 %v9935_v15, %s9361_s13  ;;  %v1415_v15 = vor.u32 %v17835_v12, %v9990_v2  ;;  %v17840_v12 = vshrl.u32 %v9946_v50, 16  ;;  %v10060_v2 = vld [vmem:[%s9453_s11 + $0x64] sm:$0xff]  }
  0x7d   : > { %17848 = vst [vmem:[#allocation92_spill] sm:$0xff] %v10060_v2 }
  0x7e   : > { %748 = vrot.lane.b32.xlu1 %v9951_v29, %s9361_s13  ;;  %v10018_v29 = vld [vmem:[%s9453_s11 + $0x4c] sm:$0xff]   ;;  %v10037_v51 = vsel %vm407_vm0, %v1415_v15, %v1419_v44 }
  0x7f   : > { %17837 = vst [vmem:[#allocation87_spill] sm:$0xff] %v10018_v29  ;;  %17842 = vst [vmem:[#allocation89_spill] sm:$0xff] %v10037_v51 }
  0x80   : > { %750 = vrot.lane.b32.xlu0 %v9960_v18, %s9361_s13  ;;  %v10001_v18 = vld [vmem:[%s9453_s11 + $0x44] sm:$0xff]  }
  0x81   : > { %17833 = vst [vmem:[#allocation86_spill] sm:$0xff] %v10001_v18  ;;  %v17845_v52 = vshll.u32 %v10001_v18, 16 }
  0x82   : > { %752 = vrot.lane.b32.xlu1 %v9969_v14, %s9361_s13  ;;  %v17843_v14 = vshrl.u32 %v9964_v54, 16 }
  0x84   : > { %754 = vrot.lane.b32.xlu0 %v9979_v19, %s9361_s13  ;;  %v1423_v19 = vor.u32 %v17840_v12, %v1419_v44  ;;  %v1431_v17 = vor.u32 %v17843_v14, %v1427_v10  ;;  %v1451_v12 = vrot.slane %v17845_v52, 1  ;;  %v17847_v14 = vshrl.u32 %v9973_v4, 16 }
  0x86   : > { %756 = vrot.lane.b32.xlu1 %v709_v36, %s9361_s13  ;;  %v17841_v36 = vshll.u32 %v9986_v38, 16  ;;  %v10052_v15 = vsel %vm407_vm0, %v1423_v19, %v1427_v10  ;;  %v1439_v44 = vor.u32 %v17847_v14, %v1435_v43  ;;  %v10063_v52 = vsel %vm407_vm0, %v1431_v17, %v1435_v43  ;;  %v10070_v19 = vld [vmem:[%s9453_s11 + $0x6c] sm:$0xff]   ;;  %v10078_v17 = vld [vmem:[%s9453_s11 + $0x74] sm:$0xff]   ;;  %v10081_v43 = vld [vmem:[%s9453_s11 + $0x7c] sm:$0xff]  }
  0x87   : > { %17846 = vst [vmem:[#allocation91_spill] sm:$0xff] %v10052_v15  ;;  %17849 = vst [vmem:[#allocation93_spill] sm:$0xff] %v10063_v52  ;;  %v17852_v14 = vshrl.u32 %v10001_v18, 16  ;;  %v17885_v55 = vshrl.u32 %v10081_v43, 16 }
  0x88   : > { %758 = vrot.lane.b32.xlu0 %v708_v59, %s9361_s13  ;;  %v1443_v49 = vrot.slane %v17841_v36, 1  ;;  %v17850_v36 = vshll.u32 %v10018_v29, 16  ;;  %17851 = vst [vmem:[#allocation94_spill] sm:$0xff] %v10070_v19  ;;  %17853 = vst [vmem:[#allocation95_spill] sm:$0xff] %v10078_v17 }
  0x89   : > { %17854 = vst [vmem:[#allocation96_spill] sm:$0xff] %v10081_v43 }
  0x8a   : > { %1599 = vrot.lane.b32.xlu1 %v1412_v5, %s9360_s12  ;;  %v1447_v59 = vor.u32 %v17393_v24, %v1443_v49  ;;  %v1459_v21 = vrot.slane %v17850_v36, 1  ;;  %v1455_v24 = vor.u32 %v17852_v14, %v1451_v12  ;;  %v10086_v36 = vsel %vm407_vm0, %v1439_v44, %v1443_v49  ;;  %v10101_v49 = vld [vmem:[%s9453_s11 + $0x84] sm:$0xff]  }
  0x8b   : > { %17855 = vst [vmem:[#allocation97_spill] sm:$0xff] %v10086_v36  ;;  %v17402_v14 = vshll.u32 %v10060_v2, 16  ;;  %v17858_v5 = vshrl.u32 %v10018_v29, 16  ;;  %17860 = vst [vmem:[#allocation99_spill] sm:$0xff] %v10101_v49 }
  0x8c   : > { %1601 = vrot.lane.b32.xlu0 %v10037_v51, %s9360_s12  ;;  %v10089_v10 = vsel %vm407_vm0, %v1447_v59, %v1451_v12  ;;  %v17857_v51 = vshll.u32 %v10026_v45, 16  ;;  %v10106_v59 = vsel %vm407_vm0, %v1455_v24, %v1459_v21  ;;  %v10110_v12 = vld [vmem:[%s9453_s11 + $0x8c] sm:$0xff]   ;;  %v17865_v24 = vshrl.u32 %v10043_v1, 16 }
  0x8d   : > { %17856 = vst [vmem:[#allocation98_spill] sm:$0xff] %v10089_v10  ;;  %v1463_v23 = vor.u32 %v17858_v5, %v1459_v21  ;;  %17861 = vst [vmem:[#allocation100_spill] sm:$0xff] %v10106_v59  ;;  %v1483_v5 = vrot.slane %v17402_v14, 1 }
  0x8e   : > { %1603 = vrot.lane.b32.xlu1 %v10052_v15, %s9360_s12  ;;  %v1467_v15 = vrot.slane %v17857_v51, 1  ;;  %17862 = vst [vmem:[#allocation101_spill] sm:$0xff] %v10110_v12  ;;  %v1479_v51 = vor.u32 %v17865_v24, %v1475_v20  ;;  %v10151_v24 = vld [vmem:[%s9453_s11 + $0x9c] sm:$0xff]  }
  0x8f   : > { %17872 = vst [vmem:[#allocation106_spill] sm:$0xff] %v10151_v24  ;;  %v17893_v48 = vshll.u32 %v10151_v24, 16 }
  0x90   : > { %1605 = vrot.lane.b32.xlu0 %v10063_v52, %s9360_s12  ;;  %v1471_v44 = vor.u32 %v17863_v40, %v1467_v15  ;;  %v17408_v52 = vshrl.u32 %v10060_v2, 16  ;;  %v10121_v21 = vsel %vm407_vm0, %v1463_v23, %v1467_v15  ;;  %v17868_v23 = vshll.u32 %v10078_v17, 16 }
  0x91   : > { %17864 = vst [vmem:[#allocation102_spill] sm:$0xff] %v10121_v21  ;;  %v1539_v47 = vrot.slane %v17893_v48, 1 }
  0x92   : > { %1607 = vrot.lane.b32.xlu1 %v10086_v36, %s9360_s12  ;;  %v17866_v36 = vshll.u32 %v10070_v19, 16  ;;  %v1499_v15 = vrot.slane %v17868_v23, 1  ;;  %v10143_v14 = vsel %vm407_vm0, %v1471_v44, %v1475_v20  ;;  %v1487_v40 = vor.u32 %v17408_v52, %v1483_v5 }
  0x93   : > { %17870 = vst [vmem:[#allocation105_spill] sm:$0xff] %v10143_v14  ;;  %v10162_v20 = vsel %vm407_vm0, %v1479_v51, %v1483_v5  ;;  %v17876_v44 = vshrl.u32 %v10070_v19, 16  ;;  %v17881_v51 = vshrl.u32 %v10078_v17, 16 }
  0x94   : > { %1609 = vrot.lane.b32.xlu0 %v10089_v10, %s9360_s12  ;;  %v1491_v10 = vrot.slane %v17866_v36, 1  ;;  %v10138_v36 = vld [vmem:[%s9453_s11 + $0x94] sm:$0xff]   ;;  %17875 = vst [vmem:[#allocation109_spill] sm:$0xff] %v10162_v20 }
  0x95   : > { %17869 = vst [vmem:[#allocation104_spill] sm:$0xff] %v10138_v36  ;;  %v1503_v5 = vor.u32 %v17881_v51, %v1499_v15 }
  0x96   : > { %v10129_v31 = vpop.permute.xlu0 %227  ;;  %1611 = vrot.lane.b32.xlu1 %v10106_v59, %s9360_s12  ;;  %v1495_v52 = vor.u32 %v17876_v44, %v1491_v10  ;;  %v17879_v59 = vshll.u32 %v10101_v49, 16  ;;  %v17882_v44 = vshll.u32 %v10110_v12, 16 }
  0x97   : > { %17867 = vst [vmem:[#allocation103_spill] sm:$0xff] %v10129_v31  ;;  %v17871_v31 = vshll.u32 %v10081_v43, 16 }
  0x98   : > { %1613 = vrot.lane.b32.xlu0 %v10121_v21, %s9360_s12  ;;  %v10159_v13 = vpop.permute.xlu1 %609  ;;  %v10167_v21 = vld [vmem:[%s9453_s11 + $0xb4] sm:$0xff]   ;;  %v1515_v8 = vrot.slane %v17879_v59, 1  ;;  %v1523_v53 = vrot.slane %v17882_v44, 1  ;;  %v10193_v59 = vsel %vm407_vm0, %v1487_v40, %v1491_v10  ;;  %v10202_v44 = vsel %vm407_vm0, %v1495_v52, %v1499_v15 }
  0x99   : > { %v1507_v23 = vrot.slane %v17871_v31, 1  ;;  %17877 = vst [vmem:[#allocation110_spill] sm:$0xff] %v10167_v21  ;;  %v10170_v31 = vld [vmem:[%s9453_s11 + $0xbc] sm:$0xff]   ;;  %17884 = vst [vmem:[#allocation114_spill] sm:$0xff] %v10193_v59  ;;  %v17888_v52 = vshrl.u32 %v10101_v49, 16  ;;  %v17890_v40 = vshrl.u32 %v10110_v12, 16 }
  0x9a   : > { %17878 = vst [vmem:[#allocation111_spill] sm:$0xff] %v10170_v31  ;;  %1615 = vrot.lane.b32.xlu1 %v10143_v14, %s9360_s12  ;;  %v10180_v58 = vpop.permute.xlu0 %607  ;;  %17886 = vst [vmem:[#allocation115_spill] sm:$0xff] %v10202_v44  ;;  %v17897_v34 = vshll.u32 %v10167_v21, 16 }
  0x9b   : > { %v1511_v14 = vor.u32 %v17885_v55, %v1507_v23  ;;  %v10213_v51 = vsel %vm407_vm0, %v1503_v5, %v1507_v23  ;;  %v1519_v15 = vor.u32 %v17888_v52, %v1515_v8 }
  0x9c   : > { %1617 = vrot.lane.b32.xlu0 %v10162_v20, %s9360_s12  ;;  %v10199_v3 = vpop.permute.xlu1 %611  ;;  %17887 = vst [vmem:[#allocation116_spill] sm:$0xff] %v10213_v51  ;;  %v1527_v20 = vor.u32 %v17890_v40, %v1523_v53  ;;  %v17895_v40 = vshll.u32 %v10157_v42, 16  ;;  %v1563_v48 = vrot.slane %v17897_v34, 1 }
  0x9d   : > { %v10222_v10 = vsel %vm407_vm0, %v1511_v14, %v1515_v8  ;;  %v17904_v14 = vshrl.u32 %v10151_v24, 16 }
  0x9e   : > { %1619 = vrot.lane.b32.xlu1 %v10193_v59, %s9360_s12  ;;  %v10210_v55 = vpop.permute.xlu0 %613  ;;  %17889 = vst [vmem:[#allocation117_spill] sm:$0xff] %v10222_v10  ;;  %v17891_v59 = vshll.u32 %v10138_v36, 16  ;;  %v1555_v39 = vrot.slane %v17895_v40, 1  ;;  %v10256_v40 = vsel %vm407_vm0, %v1519_v15, %v1523_v53  ;;  %v1653_v15 = vrot.slane %v9940_v46, 1 }
  0x9f   : > { %17899 = vst [vmem:[#allocation120_spill] sm:$0xff] %v10256_v40  ;;  %v1543_v37 = vor.u32 %v17904_v14, %v1539_v47  ;;  %v1652_v14 = vrot.slane %v9932_v11, 1  ;;  %v2186_v11 = vld [vmem:[%s9453_s11 + $0x24] sm:$0xf] }
  0xa0   : > { %1621 = vrot.lane.b32.xlu0 %v10202_v44, %s9360_s12  ;;  %v1531_v23 = vrot.slane %v17891_v59, 1  ;;  %v10232_v52 = vpop.permute.xlu1 %615  ;;  %v17894_v44 = vshll.u32 %v10154_v22, 16  ;;  %v17900_v59 = vshrl.u32 %v10138_v36, 16 }
  0xa1   : > { %17892 = vst [vmem:[#allocation118_spill] sm:$0xff] %v10232_v52 }
  0xa2   : > { %v1547_v57 = vrot.slane %v17894_v44, 1  ;;  %1623 = vrot.lane.b32.xlu1 %v10213_v51, %s9360_s12  ;;  %v10245_v5 = vpop.permute.xlu0 %617  ;;  %v17898_v44 = vshll.u32 %v10170_v31, 16  ;;  %v1535_v51 = vor.u32 %v17900_v59, %v1531_v23  ;;  %v1593_v59 = vshll.u32 %v10230_v30, 16 }
  0xa3   : > { %17896 = vst [vmem:[#allocation119_spill] sm:$0xff] %v10245_v5 }
  0xa4   : > { %v1571_v8 = vrot.slane %v17898_v44, 1  ;;  %1625 = vrot.lane.b32.xlu0 %v10222_v10, %s9360_s12  ;;  %v10263_v41 = vpop.permute.xlu1 %619  ;;  %v10266_v44 = vsel %vm407_vm0, %v1527_v20, %v1531_v23  ;;  %v17905_v10 = vshll.u32 %v10188_v25, 16  ;;  %v10282_v20 = vsel %vm407_vm0, %v1535_v51, %v1539_v47 }
  0xa5   : > { %17902 = vst [vmem:[#allocation121_spill] sm:$0xff] %v10263_v41  ;;  %17903 = vst [vmem:[#allocation122_spill] sm:$0xff] %v10266_v44  ;;  %v17908_v23 = vshrl.u32 %v10154_v22, 16  ;;  %v10291_v28 = vsel %vm407_vm0, %v1543_v37, %v1547_v57  ;;  %v1595_v41 = vrot.slane %v1593_v59, 1 }
  0xa6   : > { %v1587_v53 = vrot.slane %v17905_v10, 1  ;;  %1627 = vrot.lane.b32.xlu1 %v10256_v40, %s9360_s12  ;;  %v10277_v7 = vpop.permute.xlu0 %621  ;;  %17907 = vst [vmem:[#allocation124_spill] sm:$0xff] %v10282_v20  ;;  %17909 = vst [vmem:[#allocation125_spill] sm:$0xff] %v10291_v28  ;;  %v17910_v40 = vshrl.u32 %v10157_v42, 16 }
  0xa7   : > { %17906 = vst [vmem:[#allocation123_spill] sm:$0xff] %v10277_v7  ;;  %v1551_v10 = vor.u32 %v17908_v23, %v1547_v57  ;;  %v17912_v57 = vshrl.u32 %v10167_v21, 16  ;;  %v1657_v23 = vrot.slane %v9964_v54, 1  ;;  %v1677_v54 = vrot.slane %v10081_v43, 1 }
  0xa8   : > { %1629 = vrot.lane.b32.xlu0 %v10266_v44, %s9360_s12  ;;  %v10288_v34 = vpop.permute.xlu1 %623  ;;  %v1559_v7 = vor.u32 %v17910_v40, %v1555_v39  ;;  %v1655_v44 = vrot.slane %v9946_v50, 1  ;;  %v1659_v40 = vrot.slane %v9973_v4, 1  ;;  %v17914_v50 = vshrl.u32 %v10170_v31, 16 }
  0xa9   : > { %v10303_v51 = vsel %vm407_vm0, %v1551_v10, %v1555_v39  ;;  %v1567_v37 = vor.u32 %v17912_v57, %v1563_v48  ;;  %v1663_v39 = vrot.slane %v10001_v18, 1  ;;  %v17919_v4 = vshrl.u32 %v10188_v25, 16 }
  0xaa   : > { %1631 = vrot.lane.b32.xlu1 %v10282_v20, %s9360_s12  ;;  %v10298_v47 = vpop.permute.xlu0 %625  ;;  %17911 = vst [vmem:[#allocation126_spill] sm:$0xff] %v10303_v51  ;;  %v10312_v20 = vsel %vm407_vm0, %v1559_v7, %v1563_v48  ;;  %v1575_v46 = vor.u32 %v17914_v50, %v1571_v8  ;;  %v17916_v48 = vshrl.u32 %v10176_v0, 16  ;;  %v1665_v50 = vrot.slane %v10018_v29, 1  ;;  %v2233_v29 = vld [vmem:[%s9453_s11 + $0x1c] sm:$0x8] }
  0xab   : > { %17913 = vst [vmem:[#allocation127_spill] sm:$0xff] %v10312_v20  ;;  %v10325_v57 = vsel %vm407_vm0, %v1567_v37, %v1571_v8  ;;  %v230_v8 = vld [vmem:[%s9453_s11 + $0x8] sm:$0xc]  ;;  %v1669_v37 = vrot.slane %v10043_v1, 1  ;;  %v10378_v43 = vsel %vm660_vm1, %v1653_v15, %v1655_v44 }
  0xac   : > { %1633 = vrot.lane.b32.xlu0 %v10291_v28, %s9360_s12  ;;  %v10309_v59 = vpop.permute.xlu1 %627  ;;  %v1661_v28 = vrot.slane %v9986_v38, 1  ;;  %17915 = vst [vmem:[#allocation128_spill] sm:$0xff] %v10325_v57  ;;  %v1583_v7 = vor.u32 %v17916_v48, %v1579_v61  ;;  %v1667_v38 = vrot.slane %v10026_v45, 1  ;;  %v1671_v48 = vrot.slane %v10060_v2, 1  ;;  %17927 = vst [vmem:[#allocation138_spill] sm:$0xff] %v10378_v43 }
  0xae   : > { %1635 = vrot.lane.b32.xlu1 %v10303_v51, %s9360_s12  ;;  %v10320_v10 = vpop.permute.xlu0 %629  ;;  %v10334_v51 = vsel %vm407_vm0, %v1575_v46, %v1579_v61  ;;  %v10348_v61 = vsel %vm407_vm0, %v1583_v7, %v1587_v53  ;;  %v1673_v46 = vrot.slane %v10070_v19, 1  ;;  %v10385_v19 = vsel %vm660_vm1, %v1655_v44, %v1657_v23 }
  0xaf   : > { %17918 = vst [vmem:[#allocation130_spill] sm:$0xff] %v10334_v51  ;;  %17921 = vst [vmem:[#allocation132_spill] sm:$0xff] %v10348_v61  ;;  %v1687_v44 = vrot.slane %v10154_v22, 1  ;;  %v10419_v22 = vsel %vm660_vm1, %v1669_v37, %v1671_v48 }
  0xb0   : > { %1637 = vrot.lane.b32.xlu0 %v10312_v20, %s9360_s12  ;;  %v10331_v18 = vpop.permute.xlu1 %631  ;;  %v1591_v20 = vor.u32 %v17919_v4, %v1587_v53  ;;  %v1675_v4 = vrot.slane %v10078_v17, 1  ;;  %v9114_v53 = vld [vmem:[%s9453_s11 + $0xc] sm:$0xf]  ;;  %17929 = vst [vmem:[#allocation140_spill] sm:$0xff] %v10385_v19  ;;  %17939 = vst [vmem:[#allocation149_spill] sm:$0xff] %v10419_v22 }
  0xb1   : > { %17917 = vst [vmem:[#allocation129_spill] sm:$0xff] %v10331_v18  ;;  %v10364_v7 = vcombine.low %v230_v8, %v9114_v53  ;;  %v1681_v8 = vrot.slane %v10110_v12, 1  ;;  %v1683_v53 = vrot.slane %v10138_v36, 1  ;;  %v2191_v12 = vld [vmem:[%s9453_s11 + $0x38] sm:$0xf]  ;;  %v10399_v36 = vsel %vm660_vm1, %v1663_v39, %v1665_v50 }
  0xb2   : > { %1639 = vrot.lane.b32.xlu1 %v10325_v57, %s9360_s12  ;;  %v10343_v45 = vpop.permute.xlu0 %633  ;;  %v10355_v2 = vsel %vm407_vm0, %v1591_v20, %v1595_v41  ;;  %v2185_v57 = vld [vmem:[%s9453_s11 + $0x20] sm:$0xf]  ;;  %v2188_v41 = vld [vmem:[%s9453_s11 + $0x2c] sm:$0xf]  ;;  %v2189_v20 = vld [vmem:[%s9453_s11 + $0x30] sm:$0xf] }
  0xb3   : > { %17920 = vst [vmem:[#allocation131_spill] sm:$0xff] %v10343_v45  ;;  %17923 = vst [vmem:[#allocation134_spill] sm:$0xff] %v10355_v2  ;;  %v10403_v45 = vcombine.low %v2233_v29, %v2185_v57  ;;  %v10421_v29 = vcombine.low %v2186_v11, %v2187_v60  ;;  %v2194_v57 = vld [vmem:[%s9453_s11 + $0x44] sm:$0xf]  ;;  %v10439_v60 = vsel %vm660_vm1, %v1673_v46, %v1675_v4 }
  0xb4   : > { %1641 = vrot.lane.b32.xlu0 %v10334_v51, %s9360_s12  ;;  %v10352_v1 = vpop.permute.xlu1 %635  ;;  %v1679_v51 = vrot.slane %v10101_v49, 1  ;;  %17924 = vst [vmem:[#allocation135_spill] sm:$0xff] %v10364_v7  ;;  %v10375_v49 = vsel %vm660_vm1, %v1652_v14, %v1653_v15  ;;  %v10394_v14 = vsel %vm660_vm1, %v1661_v28, %v1663_v39  ;;  %v2190_v15 = vld [vmem:[%s9453_s11 + $0x34] sm:$0xf]  ;;  %17933 = vst [vmem:[#allocation144_spill] sm:$0xff] %v10399_v36 }
  0xb5   : > { %17922 = vst [vmem:[#allocation133_spill] sm:$0xff] %v10352_v1  ;;  %17926 = vst [vmem:[#allocation137_spill] sm:$0xff] %v10375_v49  ;;  %v1685_v1 = vrot.slane %v10151_v24, 1  ;;  %v10416_v39 = vsel %vm660_vm1, %v1667_v38, %v1669_v37  ;;  %v2195_v24 = vld [vmem:[%s9453_s11 + $0x48] sm:$0xf]  ;;  %v10442_v11 = vsel %vm660_vm1, %v1675_v4, %v1677_v54 }
  0xb6   : > { %1643 = vrot.lane.b32.xlu1 %v10348_v61, %s9360_s12  ;;  %v10368_v17 = vpop.permute.xlu0 %637  ;;  %17932 = vst [vmem:[#allocation143_spill] sm:$0xff] %v10394_v14  ;;  %17934 = vst [vmem:[#allocation145_spill] sm:$0xff] %v10403_v45  ;;  %v2197_v37 = vld [vmem:[%s9453_s11 + $0x50] sm:$0xf] }
  0xb7   : > { %17925 = vst [vmem:[#allocation136_spill] sm:$0xff] %v10368_v17  ;;  %v10388_v17 = vsel %vm660_vm1, %v1657_v23, %v1659_v40  ;;  %v2192_v23 = vld [vmem:[%s9453_s11 + $0x3c] sm:$0xf]  ;;  %17938 = vst [vmem:[#allocation148_spill] sm:$0xff] %v10416_v39  ;;  %v10468_v4 = vsel %vm660_vm1, %v1685_v1, %v1687_v44 }
  0xb8   : > { %1645 = vrot.lane.b32.xlu0 %v10355_v2, %s9360_s12  ;;  %v10382_v61 = vpop.permute.xlu1 %639  ;;  %17930 = vst [vmem:[#allocation141_spill] sm:$0xff] %v10388_v17  ;;  %v10391_v2 = vsel %vm660_vm1, %v1659_v40, %v1661_v28  ;;  %v2193_v40 = vld [vmem:[%s9453_s11 + $0x40] sm:$0xf]  ;;  %v17935_v28 = vshrl.u32 %v10230_v30, 16  ;;  %17940 = vst [vmem:[#allocation150_spill] sm:$0xff] %v10421_v29  ;;  %v10428_v30 = vsel %vm660_vm1, %v1671_v48, %v1673_v46 }
  0xb9   : > { %17928 = vst [vmem:[#allocation139_spill] sm:$0xff] %v10382_v61  ;;  %17931 = vst [vmem:[#allocation142_spill] sm:$0xff] %v10391_v2  ;;  %v10413_v61 = vsel %vm660_vm1, %v1665_v50, %v1667_v38  ;;  %v1689_v50 = vrot.slane %v10157_v42, 1  ;;  %v10432_v38 = vcombine.low %v2188_v41, %v2189_v20  ;;  %v10448_v48 = vsel %vm660_vm1, %v1679_v51, %v1681_v8  ;;  %v10451_v42 = vld [vmem:[%s9453_s11 + $0xd4] ss:$0 sps:$4 sm:$0x33]  }
  0xba   : > { %1647 = vrot.lane.b32.xlu1 %v17935_v28, %s9360_s12  ;;  %v10410_v56 = vpop.permute.xlu0 %641  ;;  %17937 = vst [vmem:[#allocation147_spill] sm:$0xff] %v10413_v61  ;;  %17941 = vst [vmem:[#allocation151_spill] sm:$0xff] %v10428_v30  ;;  %v1691_v28 = vrot.slane %v10167_v21, 1  ;;  %v10454_v41 = vsel %vm660_vm1, %v1681_v8, %v1683_v53  ;;  %v1693_v20 = vrot.slane %v10170_v31, 1  ;;  %v10458_v21 = vcombine.low %v2190_v15, %v2191_v12  ;;  %v2200_v8 = vld [vmem:[%s9453_s11 + $0x5c] sm:$0xf] }
  0xbb   : > { %17936 = vst [vmem:[#allocation146_spill] sm:$0xff] %v10410_v56  ;;  %17942 = vst [vmem:[#allocation152_spill] sm:$0xff] %v10432_v38  ;;  %v2196_v56 = vld [vmem:[%s9453_s11 + $0x4c] sm:$0xf]  ;;  %v10471_v31 = vcombine.low %v2192_v23, %v2193_v40  ;;  %v10476_v12 = vsel %vm660_vm1, %v1687_v44, %v1689_v50  ;;  %v1695_v15 = vrot.slane %v10176_v0, 1  ;;  %v10480_v46 = vcombine.low %v2194_v57, %v2195_v24 }
  0xbc   : > { %1701 = vrot.lane.b32.xlu0 %v10375_v49, %s9361_s13  ;;  %v10436_v35 = vpop.permute.xlu1 %643  ;;  %17944 = vst [vmem:[#allocation154_spill] sm:$0xff] %v10439_v60  ;;  %17945 = vst [vmem:[#allocation155_spill] sm:$0xff] %v10442_v11  ;;  %v10445_v49 = vsel %vm660_vm1, %v1677_v54, %v1679_v51  ;;  %v10465_v51 = vsel %vm660_vm1, %v1683_v53, %v1685_v1  ;;  %v2198_v1 = vld [vmem:[%s9453_s11 + $0x54] sm:$0xf]  ;;  %v10487_v23 = vsel %vm660_vm1, %v1689_v50, %v1691_v28  ;;  %v2201_v0 = vld [vmem:[%s9453_s11 + $0x60] sm:$0xf] }
  0xbd   : > { %17943 = vst [vmem:[#allocation153_spill] sm:$0xff] %v10436_v35  ;;  %17946 = vst [vmem:[#allocation156_spill] sm:$0xff] %v10445_v49  ;;  %v10490_v40 = vrot.slane %v10188_v25, 1  ;;  %v10492_v44 = vcombine.low %v2196_v56, %v2197_v37  ;;  %v10497_v53 = vsel %vm660_vm1, %v1691_v28, %v1693_v20  ;;  %v17961_v57 = vshll.u32 %v10403_v45, 16  ;;  %v2203_v35 = vld [vmem:[%s9453_s11 + $0x68] sm:$0xf] }
  0xbe   : > { %17947 = vst [vmem:[#allocation157_spill] sm:$0xff] %v10448_v48  ;;  %17948 = vst [vmem:[#allocation158_spill] sm:$0xff] %v10454_v41  ;;  %1703 = vrot.lane.b32.xlu1 %v10378_v43, %s9361_s13  ;;  %v10462_v54 = vpop.permute.xlu0 %645  ;;  %v2199_v43 = vld [vmem:[%s9453_s11 + $0x58] sm:$0xf]  ;;  %v17963_v28 = vshll.u32 %v10421_v29, 16  ;;  %v17971_v33 = vshll.u32 %v10458_v21, 16 }
  0xbf   : > { %17949 = vst [vmem:[#allocation159_spill] sm:$0xff] %v10458_v21  ;;  %17950 = vst [vmem:[#allocation160_spill] sm:$0xff] %v10462_v54  ;;  %v2204_v50 = vld [vmem:[%s9453_s11 + $0x6c] sm:$0xf]  ;;  %v10531_v24 = vsel %vm660_vm1, %v1695_v15, %v10490_v40  ;;  %v10535_v52 = vcombine.low %v2198_v1, %v2199_v43  ;;  %v17974_v1 = vshrl.u32 %v10421_v29, 16  ;;  %v17978_v18 = vshrl.u32 %v10432_v38, 16 }
  0xc0   : > { %17951 = vst [vmem:[#allocation161_spill] sm:$0xff] %v10465_v51  ;;  %17952 = vst [vmem:[#allocation162_spill] sm:$0xff] %v10468_v4  ;;  %1705 = vrot.lane.b32.xlu0 %v10385_v19, %s9361_s13  ;;  %v10484_v54 = vpop.permute.xlu1 %647  ;;  %v2366_v19 = vrot.slane %v17961_v57, 1  ;;  %v10512_v25 = vrot.slane %v17963_v28, 1  ;;  %v17970_v28 = vshrl.u32 %v10403_v45, 16 }
  0xc1   : > { %17953 = vst [vmem:[#allocation163_spill] sm:$0xff] %v10471_v31  ;;  %17954 = vst [vmem:[#allocation164_spill] sm:$0xff] %v10476_v12 }
  0xc2   : > { %17955 = vst [vmem:[#allocation165_spill] sm:$0xff] %v10480_v46  ;;  %17956 = vst [vmem:[#allocation166_spill] sm:$0xff] %v10484_v54  ;;  %v2202_v54 = vld [vmem:[%s9453_s11 + $0x64] sm:$0xf]  ;;  %1707 = vrot.lane.b32.xlu1 %v10388_v17, %s9361_s13  ;;  %v10507_v56 = vpop.permute.xlu0 %649  ;;  %v10520_v17 = vsel %vm660_vm1, %v1693_v20, %v1695_v15  ;;  %v2367_v5 = vor.u32 %v2366_v19, %v17970_v28  ;;  %v10544_v15 = vcombine.low %v2200_v8, %v2201_v0  ;;  %v2211_v8 = vld [vmem:[%s9453_s11 + $0x88] sm:$0xf] }
  0xc3   : > { %17957 = vst [vmem:[#allocation167_spill] sm:$0xff] %v10487_v23  ;;  %17958 = vst [vmem:[#allocation168_spill] sm:$0xff] %v10490_v40  ;;  %v2375_v20 = vor.u32 %v17974_v1, %v10512_v25  ;;  %v17975_v19 = vshll.u32 %v10471_v31, 16  ;;  %v10557_v45 = vcombine.low %v2202_v54, %v2203_v35  ;;  %v2210_v0 = vld [vmem:[%s9453_s11 + $0x84] sm:$0xf] }
  0xc4   : > { %17959 = vst [vmem:[#allocation169_spill] sm:$0xff] %v10492_v44  ;;  %17960 = vst [vmem:[#allocation170_spill] sm:$0xff] %v10497_v53  ;;  %1709 = vrot.lane.b32.xlu0 %v10391_v2, %s9361_s13  ;;  %v10527_v57 = vpop.permute.xlu1 %651  ;;  %v2209_v2 = vld [vmem:[%s9453_s11 + $0x80] sm:$0xf] }
  0xc5   : > { %17962 = vst [vmem:[#allocation171_spill] sm:$0xff] %v10507_v56  ;;  %17964 = vst [vmem:[#allocation172_spill] sm:$0xff] %v10512_v25  ;;  %v17966_v56 = vshll.u32 %v10432_v38, 16  ;;  %v2395_v28 = vrot.slane %v17975_v19, 1 }
  0xc6   : > { %17965 = vst [vmem:[#allocation173_spill] sm:$0xff] %v10520_v17  ;;  %17967 = vst [vmem:[#allocation174_spill] sm:$0xff] %v10527_v57  ;;  %v2207_v17 = vld [vmem:[%s9453_s11 + $0x78] sm:$0xf]  ;;  %v2387_v57 = vrot.slane %v17971_v33, 1  ;;  %1711 = vrot.lane.b32.xlu1 %v10394_v14, %s9361_s13  ;;  %v10550_v43 = vpop.permute.xlu0 %653  ;;  %v10559_v33 = vcombine.low %v2204_v50, %v2205_v26  ;;  %v17982_v26 = vshll.u32 %v10492_v44, 16  ;;  %v10594_v50 = vcombine.low %v2210_v0, %v2211_v8 }
  0xc7   : > { %v2379_v37 = vrot.slane %v17966_v56, 1  ;;  %17968 = vst [vmem:[#allocation175_spill] sm:$0xff] %v10531_v24  ;;  %17969 = vst [vmem:[#allocation176_spill] sm:$0xff] %v10535_v52  ;;  %v2206_v56 = vld [vmem:[%s9453_s11 + $0x74] sm:$0xf] }
  0xc8   : > { %17972 = vst [vmem:[#allocation177_spill] sm:$0xff] %v10544_v15  ;;  %v2208_v24 = vld [vmem:[%s9453_s11 + $0x7c] sm:$0xf]  ;;  %17973 = vst [vmem:[#allocation178_spill] sm:$0xff] %v10550_v43  ;;  %1713 = vrot.lane.b32.xlu0 %v10399_v36, %s9361_s13  ;;  %v17979_v43 = vshll.u32 %v10480_v46, 16  ;;  %v10570_v53 = vcombine.low %v2206_v56, %v2207_v17  ;;  %v10572_v35 = vpop.permute.xlu1 %655  ;;  %v2411_v54 = vrot.slane %v17982_v26, 1 }
  0xc9   : > { %17976 = vst [vmem:[#allocation179_spill] sm:$0xff] %v10557_v45  ;;  %17977 = vst [vmem:[#allocation180_spill] sm:$0xff] %v10559_v33  ;;  %v2383_v14 = vor.u32 %v17978_v18, %v2379_v37  ;;  %v10578_v36 = vcombine.low %v2208_v24, %v2209_v2  ;;  %v10583_v18 = vld [vmem:[%s17297_s1] sm:$0x1]  ;;  %v17985_v17 = vrot.slane %v10451_v42, 1  ;;  %v10602_v24 = vsel %vm407_vm0, %v2367_v5, %v10512_v25 }
  0xca   : > { %v2403_v29 = vrot.slane %v17979_v43, 1  ;;  %17980 = vst [vmem:[#allocation181_spill] sm:$0xff] %v10570_v53  ;;  %17981 = vst [vmem:[#allocation182_spill] sm:$0xff] %v10572_v35  ;;  %v17986_v43 = vshrl.u32 %v10458_v21, 16  ;;  %8373 = vmatprep.mubr.msk.bf16.mxu0 %vm1064_vm2, %v10583_v18  ;;  %1715 = vrot.lane.b32.xlu1 %v10413_v61, %s9361_s13  ;;  %v711_v2 = vpop.permute.xlu0 %710  ;;  %v2212_v0 = vld [vmem:[%s9453_s11 + $0x8c] sm:$0xf] }
  0xcb   : > { %17983 = vst [vmem:[#allocation183_spill] sm:$0xff] %v10578_v36  ;;  %17984 = vst [vmem:[#allocation184_spill] sm:$0xff] %v10583_v18  ;;  %v10589_v56 = vsel %vm660_vm1, %v10490_v40, %v17985_v17  ;;  %v10605_v17 = vsel %vm407_vm0, %v2375_v20, %v2379_v37  ;;  %v2213_v8 = vld [vmem:[%s9453_s11 + $0x90] sm:$0xf]  ;;  %v10614_v1 = vsel %vm407_vm0, %v2383_v14, %v2387_v57  ;;  %v17990_v40 = vshrl.u32 %v10471_v31, 16 }
  0xcc   : > { %v2391_v26 = vor.u32 %v17986_v43, %v2387_v57  ;;  %17987 = vst [vmem:[#allocation185_spill] sm:$0xff] %v10594_v50  ;;  %17988 = vst [vmem:[#allocation186_spill] sm:$0xff] %v10605_v17  ;;  %1717 = vrot.lane.b32.xlu0 %v10416_v39, %s9361_s13  ;;  %v17991_v5 = vshrl.u32 %v10480_v46, 16  ;;  %v713_v20 = vpop.permute.xlu1 %712  ;;  %v17992_v43 = vshrl.u32 %v10492_v44, 16  ;;  %v17993_v18 = vshll.u32 %v10535_v52, 16 }
  0xcd   : > { %17989 = vst [vmem:[#allocation187_spill] sm:$0xff] %v10614_v1  ;;  %v2399_v61 = vor.u32 %v17990_v40, %v2395_v28  ;;  %v17994_v57 = vshll.u32 %v10544_v15, 16  ;;  %v10631_v37 = vcombine.low %v2212_v0, %v2213_v8  ;;  %v18002_v46 = vshrl.u32 %v10535_v52, 16  ;;  %v2216_v21 = vld [vmem:[%s9453_s11 + $0x9c] sm:$0xf] }
  0xce   : > { %v2407_v25 = vor.u32 %v17991_v5, %v2403_v29  ;;  %v2415_v19 = vor.u32 %v17992_v43, %v2411_v54  ;;  %v2419_v35 = vrot.slane %v17993_v18, 1  ;;  %1719 = vrot.lane.b32.xlu1 %v10419_v22, %s9361_s13  ;;  %v10635_v43 = vpop.permute.xlu0 %714  ;;  %v17996_v18 = vshll.u32 %v10557_v45, 16  ;;  %v2214_v22 = vld [vmem:[%s9453_s11 + $0x94] sm:$0xf] }
  0xcf   : > { %v2427_v40 = vrot.slane %v17994_v57, 1  ;;  %17995 = vst [vmem:[#allocation188_spill] sm:$0xff] %v10631_v37  ;;  %v17997_v57 = vshll.u32 %v10559_v33, 16  ;;  %v10646_v0 = vsel %vm407_vm0, %v2391_v26, %v2395_v28  ;;  %v10649_v8 = vsel %vm407_vm0, %v2399_v61, %v2403_v29  ;;  %v2215_v29 = vld [vmem:[%s9453_s11 + $0x98] sm:$0xf] }
  0xd0   : > { %v2435_v39 = vrot.slane %v17996_v18, 1  ;;  %1721 = vrot.lane.b32.xlu0 %v10428_v30, %s9361_s13  ;;  %17998 = vst [vmem:[#allocation189_spill] sm:$0xff] %v10646_v0  ;;  %17999 = vst [vmem:[#allocation190_spill] sm:$0xff] %v10649_v8  ;;  %v18000_v18 = vshll.u32 %v10570_v53, 16  ;;  %v10655_v31 = vpop.permute.xlu1 %716  ;;  %v2423_v30 = vor.u32 %v18002_v46, %v2419_v35  ;;  %v18003_v28 = vshll.u32 %v10578_v36, 16 }
  0xd1   : > { %v2443_v44 = vrot.slane %v17997_v57, 1  ;;  %v10658_v57 = vsel %vm407_vm0, %v2407_v25, %v2411_v54  ;;  %v18005_v14 = vshll.u32 %v10594_v50, 16  ;;  %v2217_v54 = vld [vmem:[%s9453_s11 + $0xa0] sm:$0xf]  ;;  %v765_v46 = vsel %vm760_vm3, %v9459_v6, %v10159_v13 }
  0xd2   : > { %v2451_v5 = vrot.slane %v18000_v18, 1  ;;  %18001 = vst [vmem:[#allocation191_spill] sm:$0xff] %v10658_v57  ;;  %v2459_v26 = vrot.slane %v18003_v28, 1  ;;  %v18004_v18 = vshrl.u32 %v10544_v15, 16  ;;  %1723 = vrot.lane.b32.xlu1 %v10439_v60, %s9361_s13  ;;  %v10679_v28 = vpop.permute.xlu0 %718  ;;  %v10682_v61 = vsel %vm407_vm0, %v2415_v19, %v2419_v35 }
  0xd3   : > { %v2467_v8 = vrot.slane %v18005_v14, 1  ;;  %18006 = vst [vmem:[#allocation192_spill] sm:$0xff] %v10682_v61  ;;  %v18008_v0 = vshrl.u32 %v10559_v33, 16  ;;  %v763_v13 = vsel %vm760_vm3, %v10364_v7, %v10180_v58  ;;  %v816_v6 = vsel %vm812_vm4, %v765_v46, %v713_v20 }
  0xd4   : > { %v2431_v38 = vor.u32 %v18004_v18, %v2427_v40  ;;  %v18007_v18 = vshrl.u32 %v10557_v45, 16  ;;  %1725 = vrot.lane.b32.xlu0 %v10442_v11, %s9361_s13  ;;  %v18009_v35 = vshrl.u32 %v10570_v53, 16  ;;  %v10696_v60 = vcombine.low %v2214_v22, %v2215_v29  ;;  %v10699_v33 = vpop.permute.xlu1 %720  ;;  %v2219_v11 = vld [vmem:[%s9453_s11 + $0xa8] sm:$0xf] }
  0xd5   : > { %v2447_v25 = vor.u32 %v18008_v0, %v2443_v44  ;;  %v10702_v0 = vsel %vm407_vm0, %v2423_v30, %v2427_v40  ;;  %v18012_v45 = vshrl.u32 %v10578_v36, 16  ;;  %v10706_v7 = vcombine.low %v2216_v21, %v2217_v54 }
  0xd6   : > { %v2439_v14 = vor.u32 %v18007_v18, %v2435_v39  ;;  %v2455_v19 = vor.u32 %v18009_v35, %v2451_v5  ;;  %18010 = vst [vmem:[#allocation193_spill] sm:$0xff] %v10696_v60  ;;  %v814_v18 = vsel %vm812_vm4, %v763_v13, %v711_v2  ;;  %18011 = vst [vmem:[#allocation194_spill] sm:$0xff] %v10702_v0  ;;  %v18015_v46 = vshrl.u32 %v10594_v50, 16  ;;  %v2218_v13 = vld [vmem:[%s9453_s11 + $0xa4] sm:$0xf] }
  0xd7   : > { %v2463_v58 = vor.u32 %v18012_v45, %v2459_v26  ;;  %18013 = vst [vmem:[#allocation195_spill] sm:$0xff] %v10706_v7  ;;  %v10709_v20 = vsel %vm407_vm0, %v2431_v38, %v2435_v39  ;;  %v18016_v22 = vshll.u32 %v10631_v37, 16  ;;  %v872_v30 = vshrl.u32 %v816_v6, 16  ;;  %1727 = vrot.lane.b32.xlu1 %v10445_v49, %s9361_s13  ;;  %v10720_v45 = vpop.permute.xlu0 %722 }
  0xd8   : > { %18014 = vst [vmem:[#allocation196_spill] sm:$0xff] %v10709_v20  ;;  %v2471_v35 = vor.u32 %v18015_v46, %v2467_v8  ;;  %v875_v40 = vshll.u32 %v816_v6, 16  ;;  %v10723_v21 = vsel %vm407_vm0, %v2439_v14, %v2443_v44  ;;  %v10726_v39 = vsel %vm407_vm0, %v2447_v25, %v2451_v5  ;;  %1729 = vrot.lane.b32.xlu0 %v10448_v48, %s9361_s13 }
  0xd9   : > { %v2475_v29 = vrot.slane %v18016_v22, 1  ;;  %18017 = vst [vmem:[#allocation197_spill] sm:$0xff] %v10723_v21  ;;  %18018 = vst [vmem:[#allocation198_spill] sm:$0xff] %v10726_v39  ;;  %v865_v38 = vshrl.u32 %v814_v18, 16  ;;  %v868_v54 = vshll.u32 %v814_v18, 16  ;;  %v10731_v46 = vsel %vm407_vm0, %v2455_v19, %v2459_v26  ;;  %v10734_v22 = vpop.permute.xlu1 %724 }
  0xda   : > { %18019 = vst [vmem:[#allocation199_spill] sm:$0xff] %v10731_v46  ;;  %v17556_v6 = vshll.u32 %v10696_v60, 16  ;;  %v10737_v2 = vsel %vm407_vm0, %v2463_v58, %v2467_v8  ;;  %v10741_v25 = vcombine.low %v2218_v13, %v2219_v11  ;;  %v767_v14 = vsel %vm760_vm3, %v9463_v9, %v10199_v3 }
  0xdb   : > { %18020 = vst [vmem:[#allocation200_spill] sm:$0xff] %v10737_v2  ;;  %v10747_v26 = vsel %vm407_vm0, %v2471_v35, %v2475_v29  ;;  %v18023_v19 = vshrl.u32 %v10631_v37, 16  ;;  %v779_v58 = vsel %vm760_vm3, %v9548_v62, %v10288_v34  ;;  %v874_v44 = vrot.slane %v872_v30, 2  ;;  %1731 = vrot.lane.b32.xlu1 %v10454_v41, %s9361_s13  ;;  %v727_v3 = vpop.permute.xlu0 %726 }
  0xdc   : > { %18021 = vst [vmem:[#allocation201_spill] sm:$0xff] %v10741_v25  ;;  %18022 = vst [vmem:[#allocation202_spill] sm:$0xff] %v10747_v26  ;;  %v877_v11 = vrot.slane %v875_v40, 3  ;;  %v818_v13 = vsel %vm812_vm4, %v767_v14, %v10635_v43  ;;  %v867_v35 = vrot.slane %v865_v38, 2  ;;  %v870_v5 = vrot.slane %v868_v54, 3  ;;  %1733 = vrot.lane.b32.xlu0 %v10465_v51, %s9361_s13 }
  0xdd   : > { %v10751_v18 = vor.u32 %v18023_v19, %v2475_v29  ;;  %v830_v29 = vsel %vm812_vm4, %v779_v58, %v727_v3  ;;  %v10766_v34 = vrot.slane %v17556_v6, 1  ;;  %v769_v43 = vsel %vm760_vm3, %v9472_v16, %v10210_v55  ;;  %v729_v54 = vpop.permute.xlu1 %728  ;;  %v2220_v55 = vld [vmem:[%s9453_s11 + $0xac] sm:$0xf]  ;;  %v2221_v51 = vld [vmem:[%s9453_s11 + $0xb0] sm:$0xf] }
  0xde   : > { %v781_v30 = vsel %vm760_vm3, %v9550_v63, %v10298_v47  ;;  %v783_v40 = vsel %vm760_vm3, %v9577_v27, %v10309_v59  ;;  %v928_v38 = vshrl.u32 %v830_v29, 16  ;;  %v785_v14 = vsel %vm760_vm3, %v9584_v32, %v10320_v10  ;;  %v18047_v27 = vld [vmem:[#allocation34_spill] sm:$0xff] }
  0xdf   : > { %v880_v19 = vshrl.u32 %v818_v13, 16  ;;  %v931_v58 = vshll.u32 %v830_v29, 16  ;;  %v832_v3 = vsel %vm812_vm4, %v781_v30, %v729_v54  ;;  %v10782_v6 = vor.u32 %v877_v11, %v874_v44  ;;  %1735 = vrot.lane.b32.xlu1 %v10468_v4, %s9361_s13  ;;  %v731_v59 = vpop.permute.xlu0 %730 }
  0xe0   : > { %v883_v8 = vshll.u32 %v818_v13, 16  ;;  %v936_v41 = vshrl.u32 %v832_v3, 16  ;;  %v939_v47 = vshll.u32 %v832_v3, 16  ;;  %v871_v49 = vor.u32 %v870_v5, %v867_v35  ;;  %1737 = vrot.lane.b32.xlu0 %v10476_v12, %s9361_s13  ;;  %v2222_v35 = vld [vmem:[%s9453_s11 + $0xb4] sm:$0xf]  ;;  %v18039_v12 = vld [vmem:[#allocation31_spill] sm:$0xff] }
  0xe1   : > { %v930_v48 = vrot.slane %v928_v38, 2  ;;  %v933_v63 = vrot.slane %v931_v58, 3  ;;  %v834_v10 = vsel %vm812_vm4, %v783_v40, %v731_v59  ;;  %v733_v30 = vpop.permute.xlu1 %732  ;;  %v882_v54 = vrot.slane %v880_v19, 2  ;;  %v2223_v59 = vld [vmem:[%s9453_s11 + $0xb8] sm:$0xf] }
  0xe2   : > { %v938_v29 = vrot.slane %v936_v41, 2  ;;  %v941_v44 = vrot.slane %v939_v47, 3  ;;  %v944_v11 = vshrl.u32 %v834_v10, 16  ;;  %v947_v13 = vshll.u32 %v834_v10, 16 }
  0xe3   : > { %v820_v3 = vsel %vm812_vm4, %v769_v43, %v10655_v31  ;;  %v836_v4 = vsel %vm812_vm4, %v785_v14, %v733_v30  ;;  %v10793_v5 = vcombine.low %v2220_v55, %v2221_v51  ;;  %v885_v38 = vrot.slane %v883_v8, 3  ;;  %1739 = vrot.lane.b32.xlu1 %v10487_v23, %s9361_s13  ;;  %v735_v41 = vpop.permute.xlu0 %734  ;;  %v18025_v31 = vld [vmem:[#allocation170_spill] sm:$0xff] }
  0xe4   : > { %v946_v40 = vrot.slane %v944_v11, 2  ;;  %v949_v58 = vrot.slane %v947_v13, 3  ;;  %v879_v47 = vsel %vm864_vm5, %v871_v49, %v10782_v6  ;;  %v952_v19 = vshrl.u32 %v836_v4, 16  ;;  %1741 = vrot.lane.b32.xlu0 %v18025_v31, %s9361_s13  ;;  %v18034_v13 = vld [vmem:[#allocation10_spill] sm:$0xff]  ;;  %v18036_v31 = vld [vmem:[#allocation11_spill] sm:$0xff] }
  0xe5   : > { %18024 = vst [vmem:[#allocation203_spill] sm:$0xff] %v10793_v5  ;;  %v955_v10 = vshll.u32 %v836_v4, 16  ;;  %v10803_v43 = vor.u32 %v933_v63, %v930_v48  ;;  %v942_v51 = vor.u32 %v941_v44, %v938_v29  ;;  %v10807_v8 = vpop.permute.xlu1 %736  ;;  %v18026_v55 = vshll.u32 %v10706_v7, 16  ;;  %v18028_v48 = vld [vmem:[#allocation129_spill] sm:$0xff]  ;;  %v18029_v29 = vld [vmem:[#allocation23_spill] sm:$0xff] }
  0xe6   : > { %v10805_v14 = vor.u32 %v949_v58, %v946_v40  ;;  %v888_v30 = vshrl.u32 %v820_v3, 16  ;;  %v891_v4 = vshll.u32 %v820_v3, 16  ;;  %v10817_v63 = vcombine.low %v2222_v35, %v2223_v59  ;;  %v18030_v58 = vld [vmem:[#allocation173_spill] sm:$0xff] }
  0xe7   : > { %v10811_v11 = vrot.slane %v18026_v55, 1  ;;  %v943_v23 = vsel %vm864_vm5, %v10803_v43, %v942_v51  ;;  %v787_v44 = vsel %vm760_vm3, %v18029_v29, %v18028_v48  ;;  %v10822_v40 = vor.u32 %v885_v38, %v882_v54  ;;  %1743 = vrot.lane.b32.xlu1 %v18030_v58, %s9361_s13  ;;  %v10827_v55 = vpop.permute.xlu0 %738  ;;  %v18032_v54 = vld [vmem:[#allocation175_spill] sm:$0xff]  ;;  %v18033_v38 = vld [vmem:[#allocation118_spill] sm:$0xff] }
  0xe8   : > { %18027 = vst [vmem:[#allocation204_spill] sm:$0xff] %v10817_v63  ;;  %8787 = vmatprep.subr.msk.bf16.mxu0 %vm1064_vm2, %v943_v23  ;;  %v1069_v3 = vsel %vm1064_vm2, %v879_v47, 0  ;;  %v10833_v35 = vsel %vm407_vm0, %v10751_v18, %v10766_v34  ;;  %v954_v59 = vrot.slane %v952_v19, 2  ;;  %v957_v49 = vrot.slane %v955_v10, 3  ;;  %1745 = vrot.lane.b32.xlu0 %v18032_v54, %s9361_s13  ;;  %v18035_v58 = vld [vmem:[#allocation119_spill] sm:$0xff] }
  0xe9   : > { %18031 = vst [vmem:[#allocation129_spill] sm:$0xff] %v10833_v35  ;;  %v838_v48 = vsel %vm812_vm4, %v787_v44, %v735_v41  ;;  %8358 = vmatpush3.bf16.xpose.msra.mxu0 %v1069_v3  ;;  %v951_v23 = vsel %vm864_vm5, %v942_v51, %v10805_v14  ;;  %v771_v47 = vsel %vm760_vm3, %v18034_v13, %v18033_v38  ;;  %v10847_v19 = vpop.permute.xlu1 %740  ;;  %v18037_v41 = vshrl.u32 %v10696_v60, 16  ;;  %v18038_v54 = vld [vmem:[#allocation139_spill] sm:$0xff] }
  0xea   : > { %v773_v18 = vsel %vm760_vm3, %v18036_v31, %v18035_v58  ;;  %8788 = vmatprep.subr.msk.bf16.mxu0 %vm1064_vm2, %v951_v23  ;;  %v890_v44 = vrot.slane %v888_v30, 2  ;;  %v893_v3 = vrot.slane %v891_v4, 3  ;;  %v822_v38 = vsel %vm812_vm4, %v771_v47, %v10679_v28  ;;  %v18041_v4 = vld [vmem:[#allocation131_spill] sm:$0xff]  ;;  %v18042_v28 = vld [vmem:[#allocation25_spill] sm:$0xff] }
  0xeb   : > { %v10852_v10 = vor.u32 %v18037_v41, %v10766_v34  ;;  %v795_v58 = vsel %vm760_vm3, %v18039_v12, %v18038_v54  ;;  %v960_v32 = vshrl.u32 %v838_v48, 16  ;;  %v963_v23 = vshll.u32 %v838_v48, 16  ;;  %1747 = vrot.lane.b32.xlu1 %v10589_v56, %s9361_s13  ;;  %v743_v29 = vpop.permute.xlu0 %742  ;;  %v18043_v41 = vld [vmem:[#allocation146_spill] sm:$0xff]  ;;  %v18044_v54 = vld [vmem:[#allocation32_spill] sm:$0xff] }
  0xec   : > { %v887_v34 = vsel %vm864_vm5, %v10782_v6, %v10822_v40  ;;  %v18040_v30 = vmov 0.0   ;;  %v789_v47 = vsel %vm760_vm3, %v18042_v28, %v18041_v4  ;;  %v797_v48 = vsel %vm760_vm3, %v18044_v54, %v18043_v41  ;;  %v18046_v6 = vld [vmem:[#allocation153_spill] sm:$0xff] }
  0xed   : > { %8589 = vmatprep.mubr.msk.bf16.mxu1 %vm9363_vm6, %v18040_v30  ;;  %v10873_v51 = vor.u32 %v957_v49, %v954_v59  ;;  %v846_v56 = vsel %vm812_vm4, %v795_v58, %v743_v29  ;;  %v18045_v12 = vrot.slane %v10451_v42, 1  ;;  %v799_v62 = vsel %vm760_vm3, %v18047_v27, %v18046_v6  ;;  %v745_v4 = vpop.permute.xlu1 %744 }
  0xee   : > { %v896_v31 = vshrl.u32 %v822_v38, 16  ;;  %v992_v16 = vshrl.u32 %v846_v56, 16  ;;  %v995_v13 = vshll.u32 %v846_v56, 16  ;;  %v10882_v28 = vor.u32 %v893_v3, %v890_v44 }
  0xef   : > { %1749 = vrot.lane.b32.xlu0 %v18045_v12, %s9361_s13  ;;  %v899_v9 = vshll.u32 %v822_v38, 16  ;;  %v848_v49 = vsel %vm812_vm4, %v797_v48, %v745_v4  ;;  %v1072_v59 = vsel %vm1064_vm2, %v887_v34, 0  ;;  %v962_v29 = vrot.slane %v960_v32, 2  ;;  %2560 = vrot.lane.b32.xlu1 %v10602_v24, %s9360_s12  ;;  %v747_v12 = vpop.permute.xlu0 %746 }
  0xf0   : > { %v965_v58 = vrot.slane %v963_v23, 3  ;;  %v1000_v41 = vshrl.u32 %v848_v49, 16  ;;  %v1003_v42 = vshll.u32 %v848_v49, 16  ;;  %v994_v6 = vrot.slane %v992_v16, 2 }
  0xf1   : > { %v997_v54 = vrot.slane %v995_v13, 3  ;;  %v850_v56 = vsel %vm812_vm4, %v799_v62, %v747_v12  ;;  %8360 = vmatpush3.bf16.xpose.msra.mxu0 %v1072_v59  ;;  %v959_v44 = vsel %vm864_vm5, %v10805_v14, %v10873_v51  ;;  %v840_v32 = vsel %vm812_vm4, %v789_v47, %v10807_v8  ;;  %v749_v16 = vpop.permute.xlu1 %748 }
  0xf2   : > { %v1002_v3 = vrot.slane %v1000_v41, 2  ;;  %v1005_v38 = vrot.slane %v1003_v42, 3  ;;  %v1008_v23 = vshrl.u32 %v850_v56, 16  ;;  %8789 = vmatprep.subr.msk.bf16.mxu0 %vm1064_vm2, %v959_v44  ;;  %v824_v62 = vsel %vm812_vm4, %v773_v18, %v10699_v33  ;;  %v18049_v42 = vld [vmem:[#allocation189_spill] sm:$0xff] }
  0xf3   : > { %2562 = vrot.lane.b32.xlu0 %v10605_v17, %s9360_s12  ;;  %v1011_v24 = vshll.u32 %v850_v56, 16  ;;  %v18048_v13 = vshrl.u32 %v10706_v7, 16  ;;  %v898_v48 = vrot.slane %v896_v31, 2  ;;  %v901_v4 = vrot.slane %v899_v9, 3  ;;  %2564 = vrot.lane.b32.xlu1 %v10614_v1, %s9360_s12  ;;  %v751_v47 = vpop.permute.xlu0 %750  ;;  %v18050_v9 = vld [vmem:[#allocation160_spill] sm:$0xff] }
  0xf4   : > { %v1006_v8 = vor.u32 %v1005_v38, %v1002_v3  ;;  %v895_v33 = vsel %vm864_vm5, %v10822_v40, %v10882_v28  ;;  %v10910_v18 = vor.u32 %v965_v58, %v962_v29  ;;  %v968_v49 = vshrl.u32 %v840_v32, 16  ;;  %v18051_v31 = vld [vmem:[#allocation36_spill] sm:$0xff]  ;;  %v18053_v58 = vld [vmem:[#allocation133_spill] sm:$0xff]  ;;  %v18054_v38 = vld [vmem:[#allocation27_spill] sm:$0xff] }
  0xf5   : > { %v10902_v14 = vor.u32 %v18048_v13, %v10811_v11  ;;  %v971_v59 = vshll.u32 %v840_v32, 16  ;;  %v10912_v41 = vor.u32 %v997_v54, %v994_v6  ;;  %v801_v12 = vsel %vm760_vm3, %v18051_v31, %v18050_v9  ;;  %v10919_v3 = vpop.permute.xlu1 %752  ;;  %v2224_v9 = vld [vmem:[%s9453_s11 + $0xbc] sm:$0xf] }
  0xf6   : > { %v1010_v56 = vrot.slane %v1008_v23, 2  ;;  %v1013_v44 = vrot.slane %v1011_v24, 3  ;;  %v18052_v40 = vshll.u32 %v10741_v25, 16  ;;  %v791_v54 = vsel %vm760_vm3, %v18054_v38, %v18053_v58  ;;  %v2225_v58 = vld [vmem:[%s9453_s11 + $0xc0] sm:$0xf] }
  0xf7   : > { %2566 = vrot.lane.b32.xlu0 %v18049_v42, %s9360_s12  ;;  %v852_v6 = vsel %vm812_vm4, %v801_v12, %v749_v16  ;;  %v1007_v32 = vsel %vm864_vm5, %v10912_v41, %v1006_v8  ;;  %v10931_v34 = vor.u32 %v901_v4, %v898_v48  ;;  %v904_v23 = vshrl.u32 %v824_v62, 16  ;;  %v18055_v42 = vld [vmem:[#allocation190_spill] sm:$0xff] }
  0xf8   : > { %v2499_v29 = vrot.slane %v18052_v40, 1  ;;  %v907_v24 = vshll.u32 %v824_v62, 16  ;;  %2568 = vrot.lane.b32.xlu1 %v18055_v42, %s9360_s12  ;;  %v10935_v40 = vpop.permute.xlu0 %754  ;;  %v1075_v1 = vsel %vm1064_vm2, %v895_v33, 0  ;;  %v970_v17 = vrot.slane %v968_v49, 2 }
  0xf9   : > { %v973_v16 = vrot.slane %v971_v59, 3  ;;  %v1117_v12 = vsel %vm1064_vm2, %v1007_v32, 0  ;;  %8362 = vmatpush3.bf16.xpose.msra.mxu0 %v1075_v1  ;;  %v967_v48 = vsel %vm864_vm5, %v10873_v51, %v10910_v18  ;;  %v842_v62 = vsel %vm812_vm4, %v791_v54, %v10827_v55  ;;  %v10950_v49 = vpop.permute.xlu1 %756  ;;  %v18056_v1 = vld [vmem:[#allocation121_spill] sm:$0xff]  ;;  %v18057_v59 = vld [vmem:[#allocation12_spill] sm:$0xff] }
  0xfa   : > { %v10947_v4 = vor.u32 %v1013_v44, %v1010_v56  ;;  %v1016_v13 = vshrl.u32 %v852_v6, 16  ;;  %v1019_v33 = vshll.u32 %v852_v6, 16  ;;  %8574 = vmatpush3.bf16.xpose.msra.mxu1 %v1117_v12  ;;  %8790 = vmatprep.subr.msk.bf16.mxu0 %vm1064_vm2, %v967_v48  ;;  %v775_v32 = vsel %vm760_vm3, %v18057_v59, %v18056_v1 }
  0xfb   : > { %2570 = vrot.lane.b32.xlu0 %v10658_v57, %s9360_s12  ;;  %8575 = vmatprep.subr.bf16.mxu1 %v18040_v30  ;;  %v10959_v51 = vsel %vm407_vm0, %v10852_v10, %v10811_v11  ;;  %v18059_v55 = vshll.u32 %v10793_v5, 16  ;;  %v10965_v44 = vcombine.low %v2224_v9, %v2225_v58  ;;  %v906_v54 = vrot.slane %v904_v23, 2  ;;  %v18062_v23 = vld [vmem:[#allocation38_spill] sm:$0xff] }
  0xfc   : > { %18058 = vst [vmem:[#allocation118_spill] sm:$0xff] %v10959_v51  ;;  %v909_v6 = vrot.slane %v907_v24, 3  ;;  %v826_v12 = vsel %vm812_vm4, %v775_v32, %v10720_v45  ;;  %2572 = vrot.lane.b32.xlu1 %v10682_v61, %s9360_s12  ;;  %v10971_v48 = vpop.permute.xlu0 %758  ;;  %v10974_v10 = vor.u32 %v973_v16, %v970_v17  ;;  %v976_v1 = vshrl.u32 %v842_v62, 16  ;;  %v18061_v45 = vld [vmem:[#allocation166_spill] sm:$0xff]  ;;  %v18063_v16 = vld [vmem:[#allocation136_spill] sm:$0xff] }
  0xfd   : > { %v10963_v56 = vrot.slane %v18059_v55, 1  ;;  %18060 = vst [vmem:[#allocation119_spill] sm:$0xff] %v10965_v44  ;;  %v979_v55 = vshll.u32 %v842_v62, 16  ;;  %v903_v9 = vsel %vm864_vm5, %v10882_v28, %v10931_v34  ;;  %v803_v24 = vsel %vm760_vm3, %v18062_v23, %v18061_v45  ;;  %v10984_v61 = vpop.permute.xlu1 %1599  ;;  %v18064_v62 = vld [vmem:[#allocation29_spill] sm:$0xff] }
  0xfe   : > { %v1018_v58 = vrot.slane %v1016_v13, 2  ;;  %v1021_v32 = vrot.slane %v1019_v33, 3  ;;  %v1015_v17 = vsel %vm864_vm5, %v1006_v8, %v10947_v4  ;;  %v793_v11 = vsel %vm760_vm3, %v18064_v62, %v18063_v16  ;;  %v2226_v13 = vld [vmem:[%s9453_s11 + $0xc4] sm:$0xf] }
  0xff   : > { %2574 = vrot.lane.b32.xlu0 %v10702_v0, %s9360_s12  ;;  %v854_v0 = vsel %vm812_vm4, %v803_v24, %v751_v47  ;;  %v10994_v28 = vsel %vm407_vm0, %v10902_v14, %v2499_v29  ;;  %v18066_v45 = vshrl.u32 %v10741_v25, 16  ;;  %v11001_v33 = vor.u32 %v909_v6, %v906_v54  ;;  %v2227_v24 = vld [vmem:[%s9453_s11 + $0xc8] sm:$0xf] }
 0x100   : > { %18065 = vst [vmem:[#allocation139_spill] sm:$0xff] %v10994_v28  ;;  %v912_v42 = vshrl.u32 %v826_v12, 16  ;;  %v915_v31 = vshll.u32 %v826_v12, 16  ;;  %2576 = vrot.lane.b32.xlu1 %v10709_v20, %s9360_s12  ;;  %v11005_v8 = vpop.permute.xlu0 %1601  ;;  %v1078_v47 = vsel %vm1064_vm2, %v903_v9, 0  ;;  %v978_v16 = vrot.slane %v976_v1, 2  ;;  %v18067_v9 = vld [vmem:[#allocation123_spill] sm:$0xff] }
 0x101   : > { %v10998_v57 = vor.u32 %v18066_v45, %v2499_v29  ;;  %v981_v14 = vrot.slane %v979_v55, 3  ;;  %v1120_v23 = vsel %vm1064_vm2, %v1015_v17, 0  ;;  %8364 = vmatpush3.bf16.xpose.msra.mxu0 %v1078_v47  ;;  %v975_v29 = vsel %vm864_vm5, %v10910_v18, %v10974_v10  ;;  %v11020_v55 = vpop.permute.xlu1 %1603  ;;  %v18068_v17 = vld [vmem:[#allocation16_spill] sm:$0xff] }
 0x102   : > { %v844_v54 = vsel %vm812_vm4, %v793_v11, %v10847_v19  ;;  %v11017_v6 = vor.u32 %v1021_v32, %v1018_v58  ;;  %v1024_v12 = vshrl.u32 %v854_v0, 16  ;;  %v1027_v1 = vshll.u32 %v854_v0, 16  ;;  %8576 = vmatpush3.bf16.xpose.msra.mxu1 %v1120_v23  ;;  %8791 = vmatprep.subr.msk.bf16.mxu0 %vm1064_vm2, %v975_v29  ;;  %v2228_v0 = vld [vmem:[%s9453_s11 + $0xcc] sm:$0xf]  ;;  %v2229_v23 = vld [vmem:[%s9453_s11 + $0xd0] sm:$0xf] }
 0x103   : > { %2578 = vrot.lane.b32.xlu0 %v10723_v21, %s9360_s12  ;;  %v777_v18 = vsel %vm760_vm3, %v18068_v17, %v18067_v9  ;;  %8577 = vmatprep.subr.bf16.mxu1 %v18040_v30  ;;  %v18069_v45 = vshll.u32 %v10817_v63, 16  ;;  %v11029_v58 = vcombine.low %v2226_v13, %v2227_v24  ;;  %v914_v32 = vrot.slane %v912_v42, 2  ;;  %v2230_v20 = vld [vmem:[%s9453_s11 + $0xd4] sm:$0xf]  ;;  %v2231_v11 = vld [vmem:[%s9453_s11 + $0xd8] sm:$0xf] }
 0x104   : > { %v917_v47 = vrot.slane %v915_v31, 3  ;;  %v828_v29 = vsel %vm812_vm4, %v777_v18, %v10734_v22  ;;  %2580 = vrot.lane.b32.xlu1 %v10726_v39, %s9360_s12  ;;  %v11037_v9 = vpop.permute.xlu0 %1605  ;;  %v18071_v21 = vshrl.u32 %v10793_v5, 16  ;;  %v11044_v13 = vor.u32 %v981_v14, %v978_v16  ;;  %v18072_v42 = vld [vmem:[#allocation171_spill] sm:$0xff]  ;;  %v18073_v31 = vld [vmem:[#allocation40_spill] sm:$0xff] }
 0x105   : > { %v2515_v19 = vrot.slane %v18069_v45, 1  ;;  %18070 = vst [vmem:[#allocation131_spill] sm:$0xff] %v11029_v58  ;;  %v984_v24 = vshrl.u32 %v844_v54, 16  ;;  %v987_v27 = vshll.u32 %v844_v54, 16  ;;  %v911_v22 = vsel %vm864_vm5, %v10931_v34, %v11001_v33 }
 0x106   : > { %v2511_v45 = vor.u32 %v18071_v21, %v10963_v56  ;;  %v805_v18 = vsel %vm760_vm3, %v18073_v31, %v18072_v42  ;;  %v1026_v39 = vrot.slane %v1024_v12, 2  ;;  %v1029_v62 = vrot.slane %v1027_v1, 3  ;;  %v11054_v21 = vpop.permute.xlu1 %1607 }
 0x107   : > { %2582 = vrot.lane.b32.xlu0 %v10731_v46, %s9360_s12  ;;  %v1023_v16 = vsel %vm864_vm5, %v10947_v4, %v11017_v6  ;;  %v856_v14 = vsel %vm812_vm4, %v805_v18, %v10919_v3  ;;  %v17585_v54 = vshll.u32 %v11029_v58, 16  ;;  %v11062_v46 = vcombine.low %v2228_v0, %v2229_v23 }
 0x108   : > { %v11064_v34 = vcombine.low %v2230_v20, %v2231_v11  ;;  %v11066_v38 = vor.u32 %v917_v47, %v914_v32  ;;  %v920_v42 = vshrl.u32 %v828_v29, 16  ;;  %v923_v12 = vshll.u32 %v828_v29, 16  ;;  %2584 = vrot.lane.b32.xlu1 %v10737_v2, %s9360_s12  ;;  %v11070_v1 = vpop.permute.xlu0 %1609 }
 0x109   : > { %18074 = vst [vmem:[#allocation146_spill] sm:$0xff] %v11062_v46  ;;  %v1081_v4 = vsel %vm1064_vm2, %v911_v22, 0  ;;  %v986_v31 = vrot.slane %v984_v24, 2  ;;  %v989_v17 = vrot.slane %v987_v27, 3  ;;  %v1123_v3 = vsel %vm1064_vm2, %v1023_v16, 0 }
 0x10a   : > { %18075 = vst [vmem:[#allocation153_spill] sm:$0xff] %v11064_v34  ;;  %8366 = vmatpush3.bf16.xpose.msra.mxu0 %v1081_v4  ;;  %v983_v20 = vsel %vm864_vm5, %v10974_v10, %v11044_v13  ;;  %v11079_v11 = vor.u32 %v1029_v62, %v1026_v39  ;;  %v1032_v0 = vshrl.u32 %v856_v14, 16  ;;  %v1035_v23 = vshll.u32 %v856_v14, 16  ;;  %8578 = vmatpush3.bf16.xpose.msra.mxu1 %v1123_v3  ;;  %v11082_v32 = vpop.permute.xlu1 %1611  ;;  %v11099_v22 = vld [vmem:[%s9453_s11 + $0xdc] ss:$0 sps:$4 sm:$0x77]  }
 0x10b   : > { %2586 = vrot.lane.b32.xlu0 %v10747_v26, %s9360_s12  ;;  %8792 = vmatprep.subr.msk.bf16.mxu0 %vm1064_vm2, %v983_v20  ;;  %v11089_v10 = vsel %vm407_vm0, %v10998_v57, %v10963_v56  ;;  %v11092_v47 = vsel %vm407_vm0, %v2511_v45, %v2515_v19  ;;  %v18078_v39 = vshrl.u32 %v10817_v63, 16  ;;  %v18079_v29 = vshll.u32 %v10965_v44, 16  ;;  %v18080_v20 = vld [vmem:[#allocation174_spill] sm:$0xff] }
 0x10c   : > { %8579 = vmatprep.subr.bf16.mxu1 %v18040_v30  ;;  %18076 = vst [vmem:[#allocation160_spill] sm:$0xff] %v11089_v10  ;;  %18077 = vst [vmem:[#allocation133_spill] sm:$0xff] %v11092_v47  ;;  %2588 = vrot.lane.b32.xlu1 %v10833_v35, %s9360_s12  ;;  %v11103_v18 = vpop.permute.xlu0 %1613  ;;  %v2531_v57 = vrot.slane %v17585_v54, 1  ;;  %v17590_v45 = vshll.u32 %v11062_v46, 16  ;;  %v925_v14 = vrot.slane %v923_v12, 3  ;;  %v990_v4 = vor.u32 %v989_v17, %v986_v31 }
 0x10d   : > { %v2519_v62 = vor.u32 %v18078_v39, %v2515_v19  ;;  %v2523_v24 = vrot.slane %v18079_v29, 1  ;;  %v922_v19 = vrot.slane %v920_v42, 2  ;;  %v919_v3 = vsel %vm864_vm5, %v11001_v33, %v11066_v38  ;;  %v18081_v39 = vld [vmem:[#allocation43_spill] sm:$0xff] }
 0x10e   : > { %v807_v29 = vsel %vm760_vm3, %v18081_v39, %v18080_v20  ;;  %v1034_v54 = vrot.slane %v1032_v0, 2  ;;  %v1037_v56 = vrot.slane %v1035_v23, 3  ;;  %v11118_v27 = vpop.permute.xlu1 %1615  ;;  %v1031_v42 = vsel %vm864_vm5, %v11017_v6, %v11079_v11 }
 0x10f   : > { %2590 = vrot.lane.b32.xlu0 %v10959_v51, %s9360_s12  ;;  %v858_v17 = vsel %vm812_vm4, %v807_v29, %v10935_v40  ;;  %v18082_v31 = vshrl.u32 %v10965_v44, 16  ;;  %v2553_v16 = vshll.u32 %v11099_v22, 16  ;;  %v1084_v23 = vsel %vm1064_vm2, %v919_v3, 0 }
 0x110   : > { %2592 = vrot.lane.b32.xlu1 %v10994_v28, %s9360_s12  ;;  %v11131_v0 = vpop.permute.xlu0 %1617  ;;  %v18083_v20 = vshrl.u32 %v11029_v58, 16  ;;  %v2539_v40 = vrot.slane %v17590_v45, 1  ;;  %v17591_v29 = vshrl.u32 %v11064_v34, 16  ;;  %v1126_v33 = vsel %vm1064_vm2, %v1031_v42, 0 }
 0x111   : > { %v2527_v12 = vor.u32 %v18082_v31, %v2523_v24  ;;  %v926_v31 = vor.u32 %v925_v14, %v922_v19  ;;  %v991_v51 = vsel %vm864_vm5, %v11044_v13, %v990_v4  ;;  %v18084_v3 = vshll.u32 %v11064_v34, 16 }
 0x112   : > { %v2535_v6 = vor.u32 %v18083_v20, %v2531_v57  ;;  %8368 = vmatpush3.bf16.xpose.msra.mxu0 %v1084_v23  ;;  %v1038_v26 = vor.u32 %v1037_v56, %v1034_v54  ;;  %v1040_v20 = vshrl.u32 %v858_v17, 16  ;;  %v1043_v2 = vshll.u32 %v858_v17, 16  ;;  %8580 = vmatpush3.bf16.xpose.msra.mxu1 %v1126_v33  ;;  %v11147_v45 = vpop.permute.xlu1 %1619  ;;  %v18089_v17 = vld [vmem:[#allocation178_spill] sm:$0xff]  ;;  %v18090_v33 = vld [vmem:[#allocation44_spill] sm:$0xff] }
 0x113   : > { %2594 = vrot.lane.b32.xlu0 %v11089_v10, %s9360_s12  ;;  %v2547_v35 = vrot.slane %v18084_v3, 1  ;;  %8793 = vmatprep.subr.msk.bf16.mxu0 %vm1064_vm2, %v991_v51  ;;  %v11150_v19 = vsel %vm407_vm0, %v2519_v62, %v2523_v24  ;;  %v11158_v14 = vsel %vm407_vm0, %v2527_v12, %v2531_v57  ;;  %v2555_v54 = vrot.slane %v2553_v16, 1 }
 0x114   : > { %18085 = vst [vmem:[#allocation121_spill] sm:$0xff] %v11150_v19  ;;  %8581 = vmatprep.subr.bf16.mxu1 %v18040_v30  ;;  %2596 = vrot.lane.b32.xlu1 %v11092_v47, %s9360_s12  ;;  %v11155_v13 = vpop.permute.xlu0 %1621  ;;  %18086 = vst [vmem:[#allocation166_spill] sm:$0xff] %v11158_v14  ;;  %v927_v51 = vsel %vm864_vm5, %v11066_v38, %v926_v31  ;;  %v11165_v62 = vsel %vm407_vm0, %v2535_v6, %v2539_v40  ;;  %v18088_v24 = vshrl.u32 %v11062_v46, 16 }
 0x115   : > { %18087 = vst [vmem:[#allocation136_spill] sm:$0xff] %v11165_v62  ;;  %v2551_v42 = vor.u32 %v17591_v29, %v2547_v35  ;;  %v809_v57 = vsel %vm760_vm3, %v18090_v33, %v18089_v17  ;;  %v1042_v16 = vrot.slane %v1040_v20, 2  ;;  %v1045_v12 = vrot.slane %v1043_v2, 3  ;;  %v18091_v17 = vld [vmem:[#allocation145_spill] sm:$0xff]  ;;  %v11306_v33 = vld [vmem:[%s17297_s1 + $0x1] sm:$0x1] }
 0x116   : > { %v2543_v56 = vor.u32 %v18088_v24, %v2539_v40  ;;  %v11174_v23 = vpop.permute.xlu1 %1623  ;;  %v1039_v38 = vsel %vm864_vm5, %v11079_v11, %v1038_v26  ;;  %v860_v6 = vsel %vm812_vm4, %v809_v57, %v10950_v49  ;;  %v1087_v3 = vsel %vm1064_vm2, %v927_v51, 0  ;;  %v18093_v57 = vld [vmem:[#allocation150_spill] sm:$0xff]  ;;  %18114 = vst [vmem:[#allocation211_spill] sm:$0xff] %v11306_v33 }
 0x117   : > { %2598 = vrot.lane.b32.xlu0 %v11150_v19, %s9360_s12  ;;  %v2557_v24 = vshrl.u32 %v11099_v22, 16  ;;  %v2613_v20 = vrot.slane %v18091_v17, 1  ;;  %v1129_v2 = vsel %vm1064_vm2, %v1039_v38, 0  ;;  %v999_v11 = vsel %vm864_vm5, %v990_v4, %v10912_v41  ;;  %v1224_v17 = vld [vmem:[%s9453_s11 + $0x14] sm:$0xf] }
 0x118   : > { %2600 = vrot.lane.b32.xlu1 %v11158_v14, %s9360_s12  ;;  %v11182_v40 = vpop.permute.xlu0 %1625  ;;  %v11193_v49 = vsel %vm407_vm0, %v2543_v56, %v2547_v35  ;;  %v2614_v29 = vrot.slane %v18093_v57, 1  ;;  %v1046_v14 = vor.u32 %v1045_v12, %v1042_v16  ;;  %v1048_v51 = vshrl.u32 %v860_v6, 16  ;;  %v18098_v12 = vld [vmem:[#allocation159_spill] sm:$0xff] }
 0x119   : > { %18092 = vst [vmem:[#allocation123_spill] sm:$0xff] %v11193_v49  ;;  %v1051_v22 = vshll.u32 %v860_v6, 16  ;;  %v11207_v41 = vor.u32 %v2557_v24, %v2555_v54  ;;  %v935_v4 = vsel %vm864_vm5, %v926_v31, %v10803_v43  ;;  %v2618_v6 = vrot.slane %v18098_v12, 1  ;;  %v11449_v12 = vld [vmem:[%s9453_s11 + $0x38] sm:$0xff]   ;;  %v9120_v57 = vld [vmem:[%s9453_s11 + $0x24] sm:$0xff]  }
 0x11a   : > { %8370 = vmatpush3.bf16.xpose.msra.mxu0 %v1087_v3  ;;  %8582 = vmatpush3.bf16.xpose.msra.mxu1 %v1129_v2  ;;  %v11197_v38 = vpop.permute.xlu1 %1627  ;;  %v11200_v3 = vsel %vm407_vm0, %v2551_v42, %v2555_v54  ;;  %v11214_v56 = vsel %vm660_vm1, %v2613_v20, %v2614_v29  ;;  %v18097_v42 = vld [vmem:[#allocation152_spill] sm:$0xff]  ;;  %v9115_v2 = vld [vmem:[%s9453_s11 + $0xc8] ss:$0 sps:$4 sm:$0x77]   ;;  %v1090_v20 = vsel %vm1064_vm2, %v935_v4, 0  ;;  %v2626_v28 = vrot.slane %v10535_v52, 1 }
 0x11b   : > { %2602 = vrot.lane.b32.xlu0 %v11165_v62, %s9360_s12  ;;  %8794 = vmatprep.subr.msk.bf16.mxu0 %vm1064_vm2, %v999_v11  ;;  %18094 = vst [vmem:[#allocation171_spill] sm:$0xff] %v11200_v3  ;;  %18095 = vst [vmem:[#allocation174_spill] sm:$0xff] %v11207_v41  ;;  %v2616_v16 = vrot.slane %v18097_v42, 1  ;;  %v18099_v11 = vld [vmem:[#allocation182_spill] sm:$0xff]  ;;  %v1050_v62 = vrot.slane %v1048_v51, 2  ;;  %v1053_v54 = vrot.slane %v1051_v22, 3 }
 0x11c   : > { %8583 = vmatprep.subr.bf16.mxu1 %v18040_v30  ;;  %2604 = vrot.lane.b32.xlu1 %v11193_v49, %s9360_s12  ;;  %v11205_v35 = vpop.permute.xlu0 %1629  ;;  %18096 = vst [vmem:[#allocation178_spill] sm:$0xff] %v11214_v56  ;;  %v811_v49 = vsel %vm760_vm3, %v9115_v2, %v18099_v11  ;;  %v18102_v2 = vld [vmem:[#allocation165_spill] sm:$0xff] }
 0x11d   : > { %v862_v43 = vsel %vm812_vm4, %v811_v49, %v10971_v48  ;;  %v11235_v51 = vsel %vm660_vm1, %v2614_v29, %v2616_v16  ;;  %v2622_v48 = vrot.slane %v18102_v2, 1  ;;  %v1054_v49 = vor.u32 %v1053_v54, %v1050_v62 }
 0x11e   : > { %v11221_v24 = vpop.permute.xlu1 %1631  ;;  %18100 = vst [vmem:[#allocation182_spill] sm:$0xff] %v11235_v51  ;;  %v1056_v11 = vshrl.u32 %v862_v43, 16  ;;  %v11242_v4 = vsel %vm660_vm1, %v2616_v16, %v2618_v6 }
 0x11f   : > { %2606 = vrot.lane.b32.xlu0 %v11200_v3, %s9360_s12  ;;  %v1047_v3 = vsel %vm864_vm5, %v1038_v26, %v1046_v14  ;;  %v18101_v26 = vld [vmem:[#allocation163_spill] sm:$0xff]  ;;  %18103 = vst [vmem:[#allocation205_spill] sm:$0xff] %v11242_v4  ;;  %v1055_v10 = vsel %vm864_vm5, %v1046_v14, %v1054_v49  ;;  %v2628_v14 = vrot.slane %v10544_v15, 1 }
 0x120   : > { %2608 = vrot.lane.b32.xlu1 %v11207_v41, %s9360_s12  ;;  %v11228_v31 = vpop.permute.xlu0 %1633  ;;  %v1132_v19 = vsel %vm1064_vm2, %v1047_v3, 0  ;;  %v2620_v22 = vrot.slane %v18101_v26, 1  ;;  %v1059_v41 = vshll.u32 %v862_v43, 16  ;;  %v18106_v3 = vld [vmem:[#allocation169_spill] sm:$0xff]  ;;  %v1058_v16 = vrot.slane %v1056_v11, 2  ;;  %v11446_v26 = vld [vmem:[%s9453_s11 + $0x30] sm:$0xff]  }
 0x121   : > { %v2624_v54 = vrot.slane %v18106_v3, 1 }
 0x122   : > { %8372 = vmatpush3.bf16.xpose.msra.mxu0 %v1090_v20  ;;  %8584 = vmatpush3.bf16.xpose.msra.mxu1 %v1132_v19  ;;  %v11239_v47 = vpop.permute.xlu1 %1635  ;;  %v11252_v62 = vsel %vm660_vm1, %v2618_v6, %v2620_v22  ;;  %v11255_v19 = vsel %vm660_vm1, %v2620_v22, %v2622_v48  ;;  %v1061_v43 = vrot.slane %v1059_v41, 3  ;;  %v18107_v6 = vld [vmem:[#allocation184_spill] sm:$0xff]  ;;  %v1135_v22 = vsel %vm1064_vm2, %v1055_v10, 0 }
 0x123   : > { %2662 = vrot.lane.b32.xlu0 %v11214_v56, %s9361_s13  ;;  %8585 = vmatprep.subr.bf16.mxu1 %v18040_v30  ;;  %18104 = vst [vmem:[#allocation206_spill] sm:$0xff] %v11252_v62  ;;  %18105 = vst [vmem:[#allocation207_spill] sm:$0xff] %v11255_v19  ;;  %v11272_v41 = vsel %vm660_vm1, %v2622_v48, %v2624_v54  ;;  %v18110_v56 = vld [vmem:[#allocation179_spill] sm:$0xff]  ;;  %v11289_v48 = vsel %vm660_vm1, %v2626_v28, %v2628_v14 }
 0x124   : > { %2664 = vrot.lane.b32.xlu1 %v11235_v51, %s9361_s13  ;;  %v11247_v29 = vpop.permute.xlu0 %1637  ;;  %18108 = vst [vmem:[#allocation184_spill] sm:$0xff] %v11272_v41  ;;  %v1062_v11 = vor.u32 %v1061_v43, %v1058_v16  ;;  %18111 = vst [vmem:[#allocation209_spill] sm:$0xff] %v11289_v48  ;;  %v18112_v16 = vld [vmem:[#allocation180_spill] sm:$0xff] }
 0x125   : > { %v2632_v43 = vrot.slane %v18112_v16, 1 }
 0x126   : > { %v11258_v20 = vpop.permute.xlu1 %1639 }
 0x127   : > { %2666 = vrot.lane.b32.xlu0 %v11242_v4, %s9361_s13 }
 0x128   : > { %2668 = vrot.lane.b32.xlu1 %v11252_v62, %s9361_s13  ;;  %v11264_v4 = vpop.permute.xlu0 %1641  ;;  %v11278_v62 = vsel %vm660_vm1, %v2624_v54, %v2626_v28  ;;  %v2636_v28 = vrot.slane %v10578_v36, 1  ;;  %v9116_v36 = vld [vmem:[%s9453_s11 + $0x18] sm:$0xf] }
 0x129   : > { %8374 = vmatmul.mubr.msk.bf16.vlgmr.msra.gmra.mrb[0].mxu0 %vm1064_vm2, %v18107_v6  ;;  %18109 = vst [vmem:[#allocation208_spill] sm:$0xff] %v11278_v62  ;;  %v2630_v6 = vrot.slane %v18110_v56, 1  ;;  %v11425_v56 = vld [vmem:[%s9453_s11 + $0x20] sm:$0xff]  }
 0x12a   : > { %8586 = vmatpush3.bf16.xpose.msra.mxu1 %v1135_v22  ;;  %v11275_v51 = vpop.permute.xlu1 %1643  ;;  %v1063_v22 = vsel %vm864_vm5, %v1054_v49, %v1062_v11  ;;  %v2638_v11 = vrot.slane %v10594_v50, 1  ;;  %8400 = vmatprep.mubr.msk.bf16.mxu0 %vm1064_vm2, %v11306_v33  ;;  %v1757_v33 = vsel %vm760_vm3, %v9120_v57, %v11020_v55 }
 0x12b   : > { %2670 = vrot.lane.b32.xlu0 %v11255_v19, %s9361_s13  ;;  %8587 = vmatprep.subr.bf16.mxu1 %v18040_v30  ;;  %v11296_v19 = vsel %vm660_vm1, %v2628_v14, %v2630_v6  ;;  %v1138_v49 = vsel %vm1064_vm2, %v1063_v22, 0  ;;  %v11312_v14 = vsel %vm660_vm1, %v2630_v6, %v2632_v43  ;;  %v11322_v22 = vcombine.low %v1224_v17, %v9116_v36  ;;  %v3228_v36 = vld [vmem:[%s9453_s11] sm:$0xe] }
 0x12c   : > { %2672 = vrot.lane.b32.xlu1 %v11272_v41, %s9361_s13  ;;  %v11284_v10 = vpop.permute.xlu0 %1645  ;;  %18113 = vst [vmem:[#allocation210_spill] sm:$0xff] %v11296_v19  ;;  %v2634_v41 = vrot.slane %v10570_v53, 1  ;;  %18115 = vst [vmem:[#allocation212_spill] sm:$0xff] %v11312_v14  ;;  %v11341_v17 = vsel %vm660_vm1, %v2636_v28, %v2638_v11 }
 0x12d   : > { %18117 = vst [vmem:[#allocation214_spill] sm:$0xff] %v11322_v22  ;;  %18120 = vst [vmem:[#allocation217_spill] sm:$0xff] %v11341_v17 }
 0x12e   : > { %v11292_v54 = vpop.permute.xlu1 %1647  ;;  %v11319_v59 = vsel %vm660_vm1, %v2632_v43, %v2634_v41  ;;  %v11331_v50 = vsel %vm660_vm1, %v2634_v41, %v2636_v28  ;;  %v2644_v43 = vrot.slane %v10706_v7, 1  ;;  %v2650_v41 = vrot.slane %v10817_v63, 1  ;;  %v3180_v28 = vld [vmem:[%s9453_s11 + $0x4] sm:$0xf] }
 0x12f   : > { %2674 = vrot.lane.b32.xlu0 %v11278_v62, %s9361_s13  ;;  %18116 = vst [vmem:[#allocation213_spill] sm:$0xff] %v11319_v59  ;;  %18118 = vst [vmem:[#allocation215_spill] sm:$0xff] %v11331_v50  ;;  %v2656_v7 = vrot.slane %v11062_v46, 1 }
 0x130   : > { %2676 = vrot.lane.b32.xlu1 %v11289_v48, %s9361_s13  ;;  %v1702_v62 = vpop.permute.xlu0 %1701  ;;  %v2234_v48 = vld [vmem:[%s9453_s11 + $0xdc] sm:$0xf] }
 0x131   : > { %v11335_v53 = vcombine.low %v2234_v48, %v2234_v48  ;;  %v2654_v48 = vrot.slane %v11029_v58, 1  ;;  %v11416_v58 = vld [vmem:[%s9453_s11 + $0x18] sm:$0xff]  }
 0x132   : > { %8588 = vmatpush3.bf16.xpose.msra.mxu1 %v1138_v49  ;;  %v1704_v39 = vpop.permute.xlu1 %1703  ;;  %v2642_v49 = vrot.slane %v10696_v60, 1  ;;  %v2652_v60 = vrot.slane %v10965_v44, 1 }
 0x133   : > { %2678 = vrot.lane.b32.xlu0 %v11296_v19, %s9361_s13  ;;  %v2640_v19 = vrot.slane %v10631_v37, 1  ;;  %8593 = vmatprep.subr.bf16.mxu1 %v18040_v30  ;;  %18119 = vst [vmem:[#allocation216_spill] sm:$0xff] %v11335_v53  ;;  %v2648_v37 = vrot.slane %v10793_v5, 1  ;;  %v11361_v5 = vcombine.low %v3228_v36, %v3180_v28  ;;  %v3179_v36 = vld [vmem:[%s9453_s11] sm:$0xf] }
 0x134   : > { %2680 = vrot.lane.b32.xlu1 %v11312_v14, %s9361_s13  ;;  %v11328_v6 = vpop.permute.xlu0 %1705  ;;  %v2646_v14 = vrot.slane %v10741_v25, 1  ;;  %v1753_v25 = vsel %vm760_vm3, %v11322_v22, %v10984_v61  ;;  %v11374_v61 = vsel %vm660_vm1, %v2642_v49, %v2644_v43  ;;  %v11412_v22 = vld [vmem:[%s9453_s11 + $0x10] sm:$0xff]   ;;  %v11455_v52 = vcombine.low %v3179_v36, %v3180_v28  ;;  %v9124_v36 = vld [vmem:[%s9453_s11 + $0x44] sm:$0xff]  }
 0x135   : > { %v11359_v63 = vsel %vm660_vm1, %v2638_v11, %v2640_v19  ;;  %v11364_v44 = vsel %vm812_vm4, %v1753_v25, %v1702_v62  ;;  %18124 = vst [vmem:[#allocation221_spill] sm:$0xff] %v11374_v61  ;;  %v11394_v11 = vld [vmem:[%s9453_s11 + $0x8] sm:$0xff]   ;;  %v3601_v15 = vrot.slane %v11361_v5, 1 }
 0x136   : > { %v11346_v16 = vpop.permute.xlu1 %1707  ;;  %18122 = vst [vmem:[#allocation219_spill] sm:$0xff] %v11359_v63  ;;  %v11380_v25 = vsel %vm660_vm1, %v2644_v43, %v2646_v14  ;;  %v11383_v62 = vsel %vm660_vm1, %v2646_v14, %v2648_v37  ;;  %v11402_v14 = vsel %vm660_vm1, %v2652_v60, %v2654_v48  ;;  %v18135_v57 = vrot.slane %v11394_v11, 1 }
 0x137   : > { %2682 = vrot.lane.b32.xlu0 %v11319_v59, %s9361_s13  ;;  %v11352_v59 = vrot.slane %v11064_v34, 1  ;;  %v11371_v34 = vsel %vm660_vm1, %v2640_v19, %v2642_v49  ;;  %18125 = vst [vmem:[#allocation222_spill] sm:$0xff] %v11380_v25  ;;  %18126 = vst [vmem:[#allocation223_spill] sm:$0xff] %v11383_v62  ;;  %v11386_v19 = vsel %vm660_vm1, %v2648_v37, %v2650_v41  ;;  %v9117_v49 = vld [vmem:[%s17297_s1] sm:$0x1] }
 0x138   : > { %2684 = vrot.lane.b32.xlu1 %v11331_v50, %s9361_s13  ;;  %v11368_v46 = vpop.permute.xlu0 %1709  ;;  %18123 = vst [vmem:[#allocation220_spill] sm:$0xff] %v11371_v34  ;;  %18127 = vst [vmem:[#allocation224_spill] sm:$0xff] %v11386_v19  ;;  %v11405_v37 = vsel %vm660_vm1, %v2654_v48, %v2656_v7  ;;  %v1856_v48 = vshll.u32 %v11364_v44, 16 }
 0x139   : > { %18121 = vst [vmem:[#allocation218_spill] sm:$0xff] %v11352_v59  ;;  %8590 = vmatmul.mubr.msk.bf16.vlgmr.msra.gmra.mrb[0].mxu1 %vm1064_vm2, %v9117_v49  ;;  %18129 = vst [vmem:[#allocation226_spill] sm:$0xff] %v11402_v14  ;;  %v11409_v50 = vsel %vm660_vm1, %v2656_v7, %v11352_v59  ;;  %v2184_v49 = vld [vmem:[%s9453_s11 + $0x1c] sm:$0xc]  ;;  %v11428_v7 = vld [vmem:[%s9453_s11 + $0x28] sm:$0xff]  }
 0x13a   : > { %v11396_v43 = vpop.permute.xlu1 %1711  ;;  %18130 = vst [vmem:[#allocation227_spill] sm:$0xff] %v11405_v37  ;;  %18131 = vst [vmem:[#allocation228_spill] sm:$0xff] %v11409_v50  ;;  %8609 = vmatprep.mubr.msk.bf16.mxu1 %vm9363_vm6, %v18040_v30 }
 0x13b   : > { %2686 = vrot.lane.b32.xlu0 %v11341_v17, %s9361_s13  ;;  %v11399_v17 = vsel %vm660_vm1, %v2650_v41, %v2652_v60  ;;  %v9118_v41 = vld [vmem:[%s9453_s11 + $0x1c] sm:$0xff]  }
 0x13c   : > { %18128 = vst [vmem:[#allocation225_spill] sm:$0xff] %v11399_v17  ;;  %v1755_v60 = vsel %vm760_vm3, %v9118_v41, %v11005_v8  ;;  %2688 = vrot.lane.b32.xlu1 %v11359_v63, %s9361_s13  ;;  %v11437_v8 = vpop.permute.xlu0 %1713  ;;  %v18132_v41 = vrot.slane %v11335_v53, 1  ;;  %v9119_v63 = vld [vmem:[%s9453_s11 + $0x20] sm:$0xf] }
 0x13d   : > { %v11433_v3 = vsel %vm812_vm4, %v1755_v60, %v1704_v39  ;;  %v3604_v39 = vrot.slane %v11412_v22, 1  ;;  %v11458_v42 = vcombine.low %v2184_v49, %v9119_v63  ;;  %v9121_v60 = vld [vmem:[%s9453_s11 + $0x2c] sm:$0xff]   ;;  %v9122_v49 = vld [vmem:[%s9453_s11 + $0x34] sm:$0xff]  }
 0x13e   : > { %v11443_v2 = vsel %vm660_vm1, %v11352_v59, %v18132_v41  ;;  %v11470_v28 = vpop.permute.xlu1 %1715  ;;  %v11477_v41 = vsel %vm760_vm3, %v9122_v49, %v11054_v21  ;;  %v1858_v59 = vrot.slane %v1856_v48, 1  ;;  %v1860_v55 = vshll.u32 %v11433_v3, 16  ;;  %v9125_v48 = vld [vmem:[%s9453_s11 + $0x54] sm:$0xff]  }
 0x13f   : > { %2690 = vrot.lane.b32.xlu0 %v11371_v34, %s9361_s13  ;;  %18133 = vst [vmem:[#allocation229_spill] sm:$0xff] %v11458_v42  ;;  %v11468_v34 = vsel %vm760_vm3, %v9121_v60, %v11037_v9  ;;  %18134 = vst [vmem:[#allocation230_spill] sm:$0xff] %v11470_v28  ;;  %v11483_v9 = vsel %vm660_vm1, %v3601_v15, %v18135_v57  ;;  %v9123_v60 = vld [vmem:[%s9453_s11 + $0x3c] sm:$0xff]   ;;  %v11493_v21 = vsel %vm760_vm3, %v9124_v36, %v11082_v32 }
 0x140   : > { %18136 = vst [vmem:[#allocation231_spill] sm:$0xff] %v11483_v9  ;;  %v11488_v63 = vsel %vm760_vm3, %v9123_v60, %v11070_v1  ;;  %v1769_v49 = vsel %vm760_vm3, %v9125_v48, %v11118_v27  ;;  %2692 = vrot.lane.b32.xlu1 %v11374_v61, %s9361_s13  ;;  %v1718_v15 = vpop.permute.xlu0 %1717  ;;  %v18137_v57 = vrot.slane %v11416_v58, 1  ;;  %v9126_v60 = vld [vmem:[%s9453_s11 + $0x4c] sm:$0xff]   ;;  %v1854_v32 = vshrl.u32 %v11364_v44, 16  ;;  %v9127_v61 = vld [vmem:[%s9453_s11 + $0x5c] sm:$0xff]  }
 0x141   : > { %v11508_v42 = vsel %vm760_vm3, %v9126_v60, %v11103_v18  ;;  %v1819_v27 = vsel %vm812_vm4, %v1769_v49, %v1718_v15  ;;  %v18140_v36 = vrot.slane %v11428_v7, 1  ;;  %v18141_v48 = vrot.slane %v11425_v56, 1  ;;  %v9128_v60 = vld [vmem:[%s9453_s11 + $0x64] sm:$0xff]  }
 0x142   : > { %v11503_v1 = vsel %vm660_vm1, %v3604_v39, %v18137_v57  ;;  %18139 = vst [vmem:[#allocation233_spill] sm:$0xff] %v11508_v42  ;;  %v1771_v18 = vsel %vm760_vm3, %v9127_v61, %v11131_v0  ;;  %v1773_v44 = vsel %vm760_vm3, %v9128_v60, %v11147_v45  ;;  %v1909_v49 = vshll.u32 %v1819_v27, 16  ;;  %v1720_v15 = vpop.permute.xlu1 %1719  ;;  %v11539_v42 = vld [vmem:[%s9453_s11 + $0x40] sm:$0xff]   ;;  %v11542_v45 = vld [vmem:[%s9453_s11 + $0x48] sm:$0xff]  }
 0x143   : > { %18138 = vst [vmem:[#allocation232_spill] sm:$0xff] %v11503_v1  ;;  %2694 = vrot.lane.b32.xlu0 %v11380_v25, %s9361_s13  ;;  %v11519_v57 = vsel %vm660_vm1, %v18141_v48, %v18140_v36  ;;  %v18143_v1 = vrot.slane %v11449_v12, 1  ;;  %v18144_v25 = vrot.slane %v11446_v26, 1  ;;  %v9129_v36 = vld [vmem:[%s9453_s11 + $0x6c] sm:$0xff]   ;;  %v1862_v0 = vrot.slane %v1860_v55, 1 }
 0x144   : > { %18142 = vst [vmem:[#allocation234_spill] sm:$0xff] %v11519_v57  ;;  %v1775_v48 = vsel %vm760_vm3, %v9129_v36, %v11155_v13  ;;  %v1859_v57 = vor.u32 %v1858_v59, %v1854_v32  ;;  %v1821_v61 = vsel %vm812_vm4, %v1771_v18, %v1720_v15  ;;  %v11546_v60 = vsel %vm812_vm4, %v1757_v33, %v11328_v6  ;;  %v1722_v59 = vpop.permute.xlu0 %1721  ;;  %v11558_v55 = vld [vmem:[%s9453_s11 + $0x50] sm:$0xff]  }
 0x145   : > { %v11532_v9 = vsel %vm660_vm1, %v18144_v25, %v18143_v1  ;;  %v11548_v28 = vrot.slane %v1909_v49, 1  ;;  %v1913_v25 = vshrl.u32 %v1819_v27, 16  ;;  %v1916_v1 = vshll.u32 %v1821_v61, 16  ;;  %2696 = vrot.lane.b32.xlu1 %v11383_v62, %s9361_s13 }
 0x146   : > { %18145 = vst [vmem:[#allocation235_spill] sm:$0xff] %v11532_v9  ;;  %v11553_v13 = vsel %vm812_vm4, %v1773_v44, %v1722_v59  ;;  %v18147_v33 = vrot.slane %v11394_v11, 1  ;;  %v1920_v44 = vshrl.u32 %v1821_v61, 16  ;;  %v1724_v36 = vpop.permute.xlu1 %1723  ;;  %v11570_v59 = vld [vmem:[%s9453_s11 + $0x58] sm:$0xff]   ;;  %v1863_v32 = vsel %vm407_vm0, %v1859_v57, %v1862_v0  ;;  %v11584_v9 = vld [vmem:[%s9453_s11 + $0x60] sm:$0xff]  }
 0x147   : > { %18146 = vst [vmem:[#allocation236_spill] sm:$0xff] %v11548_v28  ;;  %2698 = vrot.lane.b32.xlu0 %v11386_v19, %s9361_s13  ;;  %v1915_v18 = vor.u32 %v1913_v25, %v11548_v28  ;;  %v1918_v49 = vrot.slane %v1916_v1, 1  ;;  %v1923_v15 = vshll.u32 %v11553_v13, 16  ;;  %v9130_v19 = vld [vmem:[%s9453_s11 + $0x74] sm:$0xff]   ;;  %v11579_v61 = vsel %vm812_vm4, %v1775_v48, %v1724_v36 }
 0x148   : > { %v11563_v6 = vsel %vm660_vm1, %v18147_v33, %v3604_v39  ;;  %v1777_v39 = vsel %vm760_vm3, %v9130_v19, %v11174_v23  ;;  %v1867_v33 = vshll.u32 %v11546_v60, 16  ;;  %v1726_v62 = vpop.permute.xlu0 %1725  ;;  %v9131_v19 = vld [vmem:[%s9453_s11 + $0x7c] sm:$0xff]   ;;  %v18150_v36 = vrot.slane %v11539_v42, 1  ;;  %v9134_v23 = vld [vmem:[%s9453_s11 + $0x94] sm:$0xff]  }
 0x149   : > { %18148 = vst [vmem:[#allocation237_spill] sm:$0xff] %v11563_v6  ;;  %v1922_v27 = vor.u32 %v1920_v44, %v1918_v49  ;;  %v1925_v1 = vrot.slane %v1923_v15, 1  ;;  %2700 = vrot.lane.b32.xlu1 %v11399_v17, %s9361_s13  ;;  %v11587_v6 = vld [vmem:[%s9453_s11 + $0x68] sm:$0xff]   ;;  %v11593_v57 = vsel %vm760_vm3, %v9131_v19, %v11182_v40  ;;  %v1864_v44 = vshrl.u32 %v11433_v3, 16 }
 0x14a   : > { %v1919_v48 = vsel %vm407_vm0, %v1915_v18, %v1918_v49  ;;  %v18149_v15 = vrot.slane %v11542_v45, 1  ;;  %v11607_v40 = vpop.permute.xlu1 %1727  ;;  %v2029_v3 = vsel %vm1064_vm2, %v1863_v32, 0  ;;  %v18152_v19 = vrot.slane %v11425_v56, 1  ;;  %v11622_v32 = vld [vmem:[%s9453_s11 + $0x70] sm:$0xff]  }
 0x14b   : > { %2702 = vrot.lane.b32.xlu0 %v11402_v14, %s9361_s13  ;;  %8795 = vmatprep.subr.msk.bf16.mxu0 %vm1064_vm2, %v1919_v48  ;;  %v18153_v18 = vrot.slane %v11416_v58, 1  ;;  %v1930_v48 = vshll.u32 %v11579_v61, 16  ;;  %v1926_v17 = vsel %vm407_vm0, %v1922_v27, %v1925_v1  ;;  %v18159_v14 = vrot.slane %v11428_v7, 1 }
 0x14c   : > { %v11604_v25 = vsel %vm660_vm1, %v18150_v36, %v18149_v15  ;;  %v1866_v15 = vor.u32 %v1864_v44, %v1862_v0  ;;  %v1869_v36 = vrot.slane %v1867_v33, 1  ;;  %8385 = vmatpush3.bf16.xpose.msra.mxu0 %v2029_v3  ;;  %v11635_v0 = vsel %vm812_vm4, %v11468_v34, %v11346_v16  ;;  %v11640_v27 = vpop.permute.xlu0 %1729 }
 0x14d   : > { %18151 = vst [vmem:[#allocation238_spill] sm:$0xff] %v11604_v25  ;;  %v11615_v49 = vsel %vm660_vm1, %v18153_v18, %v18152_v19  ;;  %v11625_v25 = vld [vmem:[%s9453_s11 + $0x78] sm:$0xff]   ;;  %v9132_v19 = vld [vmem:[%s9453_s11 + $0x84] sm:$0xff]   ;;  %8796 = vmatprep.subr.msk.bf16.mxu0 %vm1064_vm2, %v1926_v17  ;;  %2704 = vrot.lane.b32.xlu1 %v11405_v37, %s9361_s13  ;;  %v18155_v33 = vrot.slane %v11570_v59, 1  ;;  %v18156_v44 = vrot.slane %v11558_v55, 1  ;;  %v1927_v34 = vshrl.u32 %v11553_v13, 16 }
 0x14e   : > { %18154 = vst [vmem:[#allocation239_spill] sm:$0xff] %v11615_v49  ;;  %v11630_v18 = vsel %vm760_vm3, %v9132_v19, %v11197_v38  ;;  %v9133_v38 = vld [vmem:[%s9453_s11 + $0x8c] sm:$0xff]   ;;  %v18158_v13 = vrot.slane %v11446_v26, 1  ;;  %v18161_v17 = vrot.slane %v11587_v6, 1  ;;  %v1870_v37 = vsel %vm407_vm0, %v1866_v15, %v1869_v36  ;;  %v9136_v49 = vld [vmem:[%s9453_s11 + $0xa4] sm:$0xff]  }
 0x14f   : > { %v11647_v3 = vsel %vm660_vm1, %v18156_v44, %v18155_v33  ;;  %v11652_v19 = vsel %vm760_vm3, %v9133_v38, %v11205_v35  ;;  %2706 = vrot.lane.b32.xlu0 %v11409_v50, %s9361_s13  ;;  %v1785_v33 = vsel %vm760_vm3, %v9134_v23, %v11221_v24  ;;  %v9135_v44 = vld [vmem:[%s9453_s11 + $0x9c] sm:$0xff]   ;;  %v11665_v38 = vpop.permute.xlu1 %1731  ;;  %v18162_v50 = vrot.slane %v11584_v9, 1 }
 0x150   : > { %18157 = vst [vmem:[#allocation240_spill] sm:$0xff] %v11647_v3  ;;  %v1787_v35 = vsel %vm760_vm3, %v9135_v44, %v11228_v31  ;;  %v11672_v16 = vsel %vm660_vm1, %v18159_v14, %v18158_v13  ;;  %v1874_v23 = vshll.u32 %v11635_v0, 16  ;;  %v1929_v31 = vor.u32 %v1927_v34, %v1925_v1  ;;  %v11684_v3 = vld [vmem:[%s9453_s11 + $0x80] sm:$0xff]   ;;  %v9137_v34 = vld [vmem:[%s9453_s11 + $0xac] sm:$0xff]  }
 0x151   : > { %18160 = vst [vmem:[#allocation241_spill] sm:$0xff] %v11672_v16  ;;  %v11679_v24 = vsel %vm660_vm1, %v18162_v50, %v18161_v17  ;;  %v1932_v44 = vrot.slane %v1930_v48, 1  ;;  %v1789_v14 = vsel %vm760_vm3, %v9136_v49, %v11239_v47  ;;  %v1871_v13 = vshrl.u32 %v11546_v60, 16  ;;  %2708 = vrot.lane.b32.xlu1 %v11443_v2, %s9361_s13  ;;  %v1734_v50 = vpop.permute.xlu0 %1733  ;;  %v11696_v17 = vld [vmem:[%s9453_s11 + $0x88] sm:$0xff]   ;;  %v3173_v60 = vld [vmem:[%s17300_s4] sm:$0x3] }
 0x152   : > { %18163 = vst [vmem:[#allocation242_spill] sm:$0xff] %v11679_v24  ;;  %v11691_v16 = vsel %vm812_vm4, %v1777_v39, %v1726_v62  ;;  %v18164_v1 = vrot.slane %v11539_v42, 1  ;;  %v18165_v15 = vrot.slane %v11449_v12, 1  ;;  %v11708_v47 = vsel %vm760_vm3, %v9137_v34, %v11247_v29  ;;  %v11739_v29 = vld [vmem:[%s9453_s11 + $0x90] sm:$0xff]  }
 0x153   : > { %v1835_v62 = vsel %vm812_vm4, %v1785_v33, %v1734_v50  ;;  %v18167_v2 = vrot.slane %v11335_v53, 1  ;;  %v18168_v39 = vrot.slane %v11625_v25, 1  ;;  %v18169_v49 = vrot.slane %v11622_v32, 1  ;;  %v1736_v33 = vpop.permute.xlu1 %1735 }
 0x154   : > { %v11703_v48 = vsel %vm660_vm1, %v18165_v15, %v18164_v1  ;;  %v1873_v15 = vor.u32 %v1871_v13, %v1869_v36  ;;  %v1965_v34 = vshll.u32 %v1835_v62, 16  ;;  %v2032_v50 = vsel %vm1064_vm2, %v1870_v37, 0 }
 0x155   : > { %18166 = vst [vmem:[#allocation243_spill] sm:$0xff] %v11703_v48  ;;  %2710 = vrot.lane.b32.xlu0 %v18167_v2, %s9361_s13  ;;  %v11722_v1 = vsel %vm660_vm1, %v18169_v49, %v18168_v39  ;;  %v1876_v53 = vrot.slane %v1874_v23, 1  ;;  %v1937_v24 = vshll.u32 %v11691_v16, 16  ;;  %v1837_v48 = vsel %vm812_vm4, %v1787_v35, %v1736_v33  ;;  %8387 = vmatpush3.bf16.xpose.msra.mxu0 %v2032_v50  ;;  %v1738_v23 = vpop.permute.xlu0 %1737  ;;  %v11742_v2 = vld [vmem:[%s9453_s11 + $0x98] sm:$0xff]  }
 0x156   : > { %18170 = vst [vmem:[#allocation244_spill] sm:$0xff] %v11722_v1  ;;  %v1933_v39 = vsel %vm407_vm0, %v1929_v31, %v1932_v44  ;;  %v11733_v36 = vsel %vm812_vm4, %v11477_v41, %v11368_v46  ;;  %v11735_v13 = vrot.slane %v1965_v34, 1  ;;  %v1969_v49 = vshrl.u32 %v1835_v62, 16  ;;  %3176 = vperm.xlu1 %8901, %v3173_v60   ;;  %v9138_v35 = vld [vmem:[%s9453_s11 + $0xb4] sm:$0xff]  }
 0x157   : > { %v1972_v37 = vshll.u32 %v1837_v48, 16  ;;  %8797 = vmatprep.subr.msk.bf16.mxu0 %vm1064_vm2, %v1933_v39  ;;  %v11747_v31 = vsel %vm760_vm3, %v9138_v35, %v11258_v20  ;;  %v1934_v46 = vshrl.u32 %v11579_v61, 16  ;;  %v11751_v41 = vsel %vm812_vm4, %v1789_v14, %v1738_v23  ;;  %v1740_v61 = vpop.permute.xlu1 %1739 }
 0x158   : > { %18171 = vst [vmem:[#allocation245_spill] sm:$0xff] %v11735_v13  ;;  %v18172_v62 = vrot.slane %v11558_v55, 1  ;;  %v18173_v60 = vrot.slane %v11542_v45, 1  ;;  %v1971_v20 = vor.u32 %v1969_v49, %v11735_v13  ;;  %v1881_v39 = vshll.u32 %v11733_v36, 16 }
 0x159   : > { %3351 = vrot.lane.b32.xlu0 %v11455_v52, %s9364_s6  ;;  %v1974_v33 = vrot.slane %v1972_v37, 1  ;;  %v1936_v23 = vor.u32 %v1934_v46, %v1932_v44  ;;  %v1939_v35 = vrot.slane %v1937_v24, 1  ;;  %v1877_v1 = vsel %vm407_vm0, %v1873_v15, %v1876_v53  ;;  %v11774_v37 = vpop.permute.xlu0 %1741 }
 0x15a   : > { %v11760_v34 = vsel %vm660_vm1, %v18173_v60, %v18172_v62  ;;  %v1878_v28 = vshrl.u32 %v11635_v0, 16  ;;  %v11771_v62 = vsel %vm812_vm4, %v11593_v57, %v11607_v40  ;;  %v1979_v49 = vshll.u32 %v11751_v41, 16  ;;  %3353 = vrot.lane.b32.xlu1 %v11394_v11, %s9364_s6  ;;  %v9139_v0 = vld [vmem:[%s9453_s11 + $0xbc] sm:$0xff]   ;;  %v9140_v57 = vld [vmem:[%s9453_s11 + $0xc4] sm:$0xff]  }
 0x15b   : > { %18174 = vst [vmem:[#allocation246_spill] sm:$0xff] %v11760_v34  ;;  %v18175_v60 = vrot.slane %v11696_v17, 1  ;;  %v18176_v24 = vrot.slane %v11684_v3, 1  ;;  %v11788_v15 = vsel %vm760_vm3, %v9139_v0, %v11264_v4  ;;  %v11793_v40 = vsel %vm760_vm3, %v9140_v57, %v11275_v51  ;;  %v11805_v50 = vpop.permute.xlu1 %1743 }
 0x15c   : > { %v1975_v46 = vsel %vm407_vm0, %v1971_v20, %v1974_v33  ;;  %v18178_v14 = vrot.slane %v11584_v9, 1  ;;  %v1880_v4 = vor.u32 %v1878_v28, %v1876_v53  ;;  %v1976_v0 = vshrl.u32 %v1837_v48, 16  ;;  %v9141_v48 = vld [vmem:[%s9453_s11 + $0xcc] sm:$0xff]  }
 0x15d   : > { %v11783_v44 = vsel %vm660_vm1, %v18176_v24, %v18175_v60  ;;  %3355 = vrot.lane.b32.xlu0 %v11412_v22, %s9364_s6  ;;  %v18179_v60 = vrot.slane %v11570_v59, 1  ;;  %v2035_v51 = vsel %vm1064_vm2, %v1877_v1, 0  ;;  %v18181_v57 = vrot.slane %v11742_v2, 1 }
 0x15e   : > { %18177 = vst [vmem:[#allocation247_spill] sm:$0xff] %v11783_v44  ;;  %v18182_v44 = vrot.slane %v11739_v29, 1  ;;  %v1883_v34 = vrot.slane %v1881_v39, 1  ;;  %v1944_v13 = vshll.u32 %v11771_v62, 16  ;;  %8389 = vmatpush3.bf16.xpose.msra.mxu0 %v2035_v51  ;;  %v2077_v53 = vsel %vm1064_vm2, %v1975_v46, 0  ;;  %v11829_v39 = vpop.permute.xlu0 %1745  ;;  %v11832_v46 = vld [vmem:[%s9453_s11 + $0xa0] sm:$0xff]   ;;  %3357 = vrot.lane.b32.xlu1 %v11416_v58, %s9364_s6 }
 0x15f   : > { %v11803_v24 = vsel %vm660_vm1, %v18179_v60, %v18178_v14  ;;  %v1940_v28 = vsel %vm407_vm0, %v1936_v23, %v1939_v35  ;;  %v11821_v1 = vsel %vm760_vm3, %v9141_v48, %v11284_v10  ;;  %v11826_v14 = vsel %vm812_vm4, %v11488_v63, %v11396_v43  ;;  %8594 = vmatpush3.bf16.xpose.msra.mxu1 %v2077_v53  ;;  %v11835_v23 = vld [vmem:[%s9453_s11 + $0xa8] sm:$0xff]  }
 0x160   : > { %18180 = vst [vmem:[#allocation248_spill] sm:$0xff] %v11803_v24  ;;  %v11813_v20 = vsel %vm660_vm1, %v18182_v44, %v18181_v57  ;;  %v1978_v44 = vor.u32 %v1976_v0, %v1974_v33  ;;  %v1981_v60 = vrot.slane %v1979_v49, 1  ;;  %8798 = vmatprep.subr.msk.bf16.mxu0 %vm1064_vm2, %v1940_v28  ;;  %18184 = vst [vmem:[#allocation250_spill] sm:$0xff] %v11835_v23  ;;  %v1941_v51 = vshrl.u32 %v11691_v16, 16  ;;  %v11847_v33 = vpop.permute.xlu1 %1747 }
 0x161   : > { %18183 = vst [vmem:[#allocation249_spill] sm:$0xff] %v11813_v20  ;;  %v11840_v10 = vsel %vm812_vm4, %v11708_v47, %v1740_v61  ;;  %3359 = vrot.lane.b32.xlu0 %v11425_v56, %s9364_s6  ;;  %8595 = vmatprep.subr.bf16.mxu1 %v18040_v30  ;;  %v3703_v63 = vshrl.u32 %v11361_v5, 16  ;;  %v3706_v49 = vshll.u32 %v11361_v5, 16  ;;  %v1888_v0 = vshll.u32 %v11826_v14, 16 }
 0x162   : > { %v1943_v57 = vor.u32 %v1941_v51, %v1939_v35  ;;  %v1946_v53 = vrot.slane %v1944_v13, 1  ;;  %v1884_v28 = vsel %vm407_vm0, %v1880_v4, %v1883_v34  ;;  %v1885_v48 = vshrl.u32 %v11733_v36, 16  ;;  %v11864_v47 = vpop.permute.xlu0 %1749  ;;  %v9142_v5 = vld [vmem:[%s9453_s11 + $0xd4] ss:$0 sps:$4 sm:$0x11]   ;;  %3361 = vrot.lane.b32.xlu1 %v11428_v7, %s9364_s6 }
 0x163   : > { %v11861_v43 = vsel %vm812_vm4, %v11630_v18, %v11640_v27  ;;  %v1986_v16 = vshll.u32 %v11840_v10, 16  ;;  %v1982_v61 = vsel %vm407_vm0, %v1978_v44, %v1981_v60  ;;  %v11870_v35 = vsel %vm760_vm3, %v9142_v5, %v11292_v54 }
 0x164   : > { %v18185_v36 = vrot.slane %v11622_v32, 1  ;;  %v18186_v18 = vrot.slane %v11587_v6, 1  ;;  %v11881_v13 = vrot.slane %v3703_v63, 1  ;;  %v18188_v4 = vshrl.u32 %v11394_v11, 16  ;;  %v11891_v20 = vpop.permute.xlu1 %2560 }
 0x165   : > { %3363 = vrot.lane.b32.xlu0 %v11446_v26, %s9364_s6  ;;  %v1887_v51 = vor.u32 %v1885_v48, %v1883_v34  ;;  %v11888_v54 = vsel %vm812_vm4, %v11493_v21, %v11437_v8  ;;  %v1983_v5 = vshrl.u32 %v11751_v41, 16  ;;  %v2038_v24 = vsel %vm1064_vm2, %v1884_v28, 0  ;;  %v11900_v8 = vld [vmem:[%s9453_s11 + $0xb0] sm:$0xff]   ;;  %v11906_v28 = vld [vmem:[%s9453_s11 + $0xb8] sm:$0xff]  }
 0x166   : > { %v11879_v27 = vsel %vm660_vm1, %v18186_v18, %v18185_v36  ;;  %v3710_v44 = vrot.slane %v18188_v4, 1  ;;  %v1890_v63 = vrot.slane %v1888_v0, 1  ;;  %v1951_v36 = vshll.u32 %v11861_v43, 16  ;;  %8391 = vmatpush3.bf16.xpose.msra.mxu0 %v2038_v24  ;;  %18189 = vst [vmem:[#allocation252_spill] sm:$0xff] %v11900_v8  ;;  %v11903_v41 = vpop.permute.xlu0 %2562  ;;  %3365 = vrot.lane.b32.xlu1 %v11449_v12, %s9364_s6 }
 0x167   : > { %18187 = vst [vmem:[#allocation251_spill] sm:$0xff] %v11879_v27  ;;  %v2080_v34 = vsel %vm1064_vm2, %v1982_v61, 0  ;;  %v1947_v48 = vsel %vm407_vm0, %v1943_v57, %v1946_v53  ;;  %v1985_v21 = vor.u32 %v1983_v5, %v1981_v60  ;;  %v1988_v18 = vrot.slane %v1986_v16, 1  ;;  %18190 = vst [vmem:[#allocation253_spill] sm:$0xff] %v11903_v41 }
 0x168   : > { %8596 = vmatpush3.bf16.xpose.msra.mxu1 %v2080_v34  ;;  %8799 = vmatprep.subr.msk.bf16.mxu0 %vm1064_vm2, %v1947_v48  ;;  %v11908_v4 = vrot.slane %v3706_v49, 2  ;;  %v18191_v0 = vshll.u32 %v11394_v11, 16  ;;  %v1948_v61 = vshrl.u32 %v11771_v62, 16  ;;  %v11916_v57 = vsel %vm812_vm4, %v11747_v31, %v11774_v37  ;;  %v11931_v31 = vpop.permute.xlu1 %2564 }
 0x169   : > { %3367 = vrot.lane.b32.xlu0 %v11539_v42, %s9364_s6  ;;  %8597 = vmatprep.subr.bf16.mxu1 %v18040_v30  ;;  %v18192_v60 = vrot.slane %v11835_v23, 1  ;;  %v18193_v16 = vrot.slane %v11832_v46, 1  ;;  %v1892_v62 = vshrl.u32 %v11826_v14, 16  ;;  %v1895_v34 = vshll.u32 %v11888_v54, 16  ;;  %18195 = vst [vmem:[#allocation255_spill] sm:$0xff] %v11931_v31 }
 0x16a   : > { %v3711_v24 = vrot.slane %v18191_v0, 2  ;;  %v18196_v37 = vrot.slane %v11684_v3, 1  ;;  %v18197_v48 = vrot.slane %v11625_v25, 1  ;;  %v1953_v5 = vrot.slane %v1951_v36, 1  ;;  %v11950_v31 = vpop.permute.xlu0 %2566  ;;  %v18199_v36 = vld [vmem:[#allocation230_spill] sm:$0xff]  ;;  %3369 = vrot.lane.b32.xlu1 %v11542_v45, %s9364_s6 }
 0x16b   : > { %v11926_v49 = vsel %vm660_vm1, %v18193_v16, %v18192_v60  ;;  %v1950_v16 = vor.u32 %v1948_v61, %v1946_v53  ;;  %v11946_v14 = vsel %vm812_vm4, %v11652_v19, %v11665_v38  ;;  %v1993_v27 = vshll.u32 %v11916_v57, 16  ;;  %v18200_v61 = vld [vmem:[#allocation233_spill] sm:$0xff] }
 0x16c   : > { %18194 = vst [vmem:[#allocation254_spill] sm:$0xff] %v11926_v49  ;;  %v11940_v0 = vsel %vm660_vm1, %v18197_v48, %v18196_v37  ;;  %v1891_v49 = vsel %vm407_vm0, %v1887_v51, %v1890_v63  ;;  %v1989_v41 = vsel %vm407_vm0, %v1985_v21, %v1988_v18  ;;  %v11955_v48 = vor.u32 %v3711_v24, %v3710_v44  ;;  %v11968_v44 = vpop.permute.xlu1 %2568 }
 0x16d   : > { %18198 = vst [vmem:[#allocation256_spill] sm:$0xff] %v11940_v0  ;;  %v1894_v53 = vor.u32 %v1892_v62, %v1890_v63  ;;  %v11960_v60 = vsel %vm812_vm4, %v18200_v61, %v18199_v36  ;;  %3371 = vrot.lane.b32.xlu0 %v11558_v55, %s9364_s6  ;;  %v3403_v19 = vshrl.u32 %v11455_v52, 16  ;;  %v3405_v38 = vshll.u32 %v11455_v52, 16 }
 0x16e   : > { %v1897_v51 = vrot.slane %v1895_v34, 1  ;;  %v1958_v21 = vshll.u32 %v11946_v14, 16  ;;  %v1990_v37 = vshrl.u32 %v11840_v10, 16  ;;  %v2041_v63 = vsel %vm1064_vm2, %v1891_v49, 0  ;;  %v11981_v49 = vpop.permute.xlu0 %2570  ;;  %3373 = vrot.lane.b32.xlu1 %v11570_v59, %s9364_s6 }
 0x16f   : > { %8393 = vmatpush3.bf16.xpose.msra.mxu0 %v2041_v63  ;;  %v2083_v24 = vsel %vm1064_vm2, %v1989_v41, 0  ;;  %v1954_v62 = vsel %vm407_vm0, %v1950_v16, %v1953_v5  ;;  %v3407_v36 = vrot.slane %v3405_v38, 1  ;;  %v18201_v52 = vshll.u32 %v11394_v11, 16 }
 0x170   : > { %v1899_v61 = vshrl.u32 %v11888_v54, 16  ;;  %v1992_v10 = vor.u32 %v1990_v37, %v1988_v18  ;;  %v1995_v0 = vrot.slane %v1993_v27, 1  ;;  %8598 = vmatpush3.bf16.xpose.msra.mxu1 %v2083_v24  ;;  %8800 = vmatprep.subr.msk.bf16.mxu0 %vm1064_vm2, %v1954_v62  ;;  %v17663_v63 = vshll.u32 %v11412_v22, 16  ;;  %v11994_v54 = vpop.permute.xlu1 %2572 }
 0x171   : > { %v11977_v34 = vrot.slane %v18201_v52, 1  ;;  %v1902_v41 = vshll.u32 %v11960_v60, 16  ;;  %v1955_v16 = vshrl.u32 %v11861_v43, 16  ;;  %v11989_v38 = vsel %vm812_vm4, %v11788_v15, %v11805_v50  ;;  %3375 = vrot.lane.b32.xlu0 %v11584_v9, %s9364_s6  ;;  %8599 = vmatprep.subr.bf16.mxu1 %v18040_v30  ;;  %18202 = vst [vmem:[#allocation230_spill] sm:$0xff] %v11994_v54 }
 0x172   : > { %v3408_v27 = vor.u32 %v3407_v36, %v3403_v19  ;;  %v1898_v18 = vsel %vm407_vm0, %v1894_v53, %v1897_v51  ;;  %v3422_v43 = vshrl.u32 %v11412_v22, 16  ;;  %v12003_v50 = vrot.slane %v17663_v63, 1  ;;  %v12011_v36 = vpop.permute.xlu0 %2574  ;;  %3377 = vrot.lane.b32.xlu1 %v11587_v6, %s9364_s6 }
 0x173   : > { %v1957_v15 = vor.u32 %v1955_v16, %v1953_v5  ;;  %v1960_v24 = vrot.slane %v1958_v21, 1  ;;  %v2000_v53 = vshll.u32 %v11989_v38, 16  ;;  %18204 = vst [vmem:[#allocation257_spill] sm:$0xff] %v12011_v36  ;;  %v1996_v52 = vsel %vm407_vm0, %v1992_v10, %v1995_v0 }
 0x174   : > { %v12008_v19 = vsel %vm407_vm0, %v3408_v27, %v11977_v34  ;;  %v3424_v37 = vor.u32 %v3422_v43, %v12003_v50  ;;  %v18205_v54 = vshll.u32 %v11416_v58, 16  ;;  %v1901_v5 = vor.u32 %v1899_v61, %v1897_v51 }
 0x175   : > { %18203 = vst [vmem:[#allocation233_spill] sm:$0xff] %v12008_v19  ;;  %v1904_v21 = vrot.slane %v1902_v41, 1  ;;  %3379 = vrot.lane.b32.xlu0 %v11622_v32, %s9364_s6  ;;  %v2044_v16 = vsel %vm1064_vm2, %v1898_v18, 0  ;;  %v1997_v62 = vshrl.u32 %v11916_v57, 16  ;;  %v12024_v19 = vpop.permute.xlu1 %2576  ;;  %v18208_v61 = vshll.u32 %v11425_v56, 16 }
 0x176   : > { %v12017_v63 = vrot.slane %v18205_v54, 1  ;;  %18206 = vst [vmem:[#allocation258_spill] sm:$0xff] %v12024_v19  ;;  %v1906_v54 = vshrl.u32 %v11960_v60, 16  ;;  %v1962_v18 = vshrl.u32 %v11946_v14, 16  ;;  %v2086_v57 = vsel %vm1064_vm2, %v1996_v52, 0  ;;  %3381 = vrot.lane.b32.xlu1 %v11625_v25, %s9364_s6 }
 0x177   : > { %v12035_v41 = vrot.slane %v18208_v61, 1  ;;  %8395 = vmatpush3.bf16.xpose.msra.mxu0 %v2044_v16  ;;  %v1961_v27 = vsel %vm407_vm0, %v1957_v15, %v1960_v24  ;;  %v1999_v19 = vor.u32 %v1997_v62, %v1995_v0  ;;  %v2002_v36 = vrot.slane %v2000_v53, 1 }
 0x178   : > { %v12031_v51 = vsel %vm407_vm0, %v3424_v37, %v12017_v63  ;;  %8600 = vmatpush3.bf16.xpose.msra.mxu1 %v2086_v57  ;;  %8801 = vmatprep.subr.msk.bf16.mxu0 %vm1064_vm2, %v1961_v27  ;;  %v12042_v37 = vpop.permute.xlu0 %2578  ;;  %v18209_v61 = vshrl.u32 %v11425_v56, 16  ;;  %v18210_v60 = vshll.u32 %v11428_v7, 16  ;;  %v1908_v14 = vor.u32 %v1906_v54, %v1904_v21 }
 0x179   : > { %18207 = vst [vmem:[#allocation259_spill] sm:$0xff] %v12031_v51  ;;  %v12054_v15 = vsel %vm812_vm4, %v11793_v40, %v11829_v39  ;;  %3383 = vrot.lane.b32.xlu0 %v11684_v3, %s9364_s6  ;;  %8601 = vmatprep.subr.bf16.mxu1 %v18040_v30  ;;  %v18211_v0 = vrot.slane %v11906_v28, 1  ;;  %v18212_v62 = vrot.slane %v11900_v8, 1  ;;  %v17664_v52 = vshll.u32 %v11446_v26, 16  ;;  %v12067_v27 = vpop.permute.xlu1 %2580 }
 0x17a   : > { %v3440_v10 = vor.u32 %v18209_v61, %v12035_v41  ;;  %v12049_v51 = vrot.slane %v18210_v60, 1  ;;  %v1964_v16 = vor.u32 %v1962_v18, %v1960_v24  ;;  %v1905_v40 = vsel %vm407_vm0, %v1901_v5, %v1904_v21  ;;  %3385 = vrot.lane.b32.xlu1 %v11696_v17, %s9364_s6 }
 0x17b   : > { %v12064_v53 = vsel %vm660_vm1, %v18212_v62, %v18211_v0  ;;  %v17665_v39 = vshll.u32 %v11449_v12, 16  ;;  %v18215_v57 = vrot.slane %v11739_v29, 1  ;;  %v18216_v61 = vrot.slane %v11696_v17, 1 }
 0x17c   : > { %18213 = vst [vmem:[#allocation260_spill] sm:$0xff] %v12064_v53  ;;  %v12075_v54 = vsel %vm407_vm0, %v3440_v10, %v12049_v51  ;;  %v18218_v24 = vor.u32 %v11908_v4, %v11881_v13  ;;  %v17666_v21 = vshrl.u32 %v11446_v26, 16  ;;  %v12094_v10 = vrot.slane %v17664_v52, 1  ;;  %v12097_v0 = vpop.permute.xlu0 %2582  ;;  %v18221_v53 = vld [vmem:[#allocation245_spill] sm:$0xff] }
 0x17d   : > { %18214 = vst [vmem:[#allocation261_spill] sm:$0xff] %v12075_v54  ;;  %v12082_v60 = vsel %vm660_vm1, %v18216_v61, %v18215_v57  ;;  %v2007_v18 = vshll.u32 %v12054_v15, 16  ;;  %v2003_v62 = vsel %vm407_vm0, %v1999_v19, %v2002_v36  ;;  %v3430_v57 = vshrl.u32 %v11416_v58, 16  ;;  %3387 = vrot.lane.b32.xlu0 %v11739_v29, %s9364_s6  ;;  %v18220_v61 = vld [vmem:[#allocation236_spill] sm:$0xff] }
 0x17e   : > { %18217 = vst [vmem:[#allocation262_spill] sm:$0xff] %v12082_v60  ;;  %v12089_v5 = vsel %vm3701_vm7, %v18218_v24, %v11955_v48  ;;  %v12103_v13 = vrot.slane %v17665_v39, 1  ;;  %v2047_v4 = vsel %vm1064_vm2, %v1905_v40, 0  ;;  %v1912_v24 = vsel %vm407_vm0, %v1908_v14, %v18220_v61  ;;  %3389 = vrot.lane.b32.xlu1 %v11742_v2, %s9364_s6 }
 0x17f   : > { %18219 = vst [vmem:[#allocation263_spill] sm:$0xff] %v12089_v5  ;;  %v3714_v52 = vrot.slane %v3422_v43, 1  ;;  %v3456_v54 = vor.u32 %v17666_v21, %v12094_v10  ;;  %v2004_v19 = vshrl.u32 %v11989_v38, 16  ;;  %v12114_v5 = vpop.permute.xlu1 %2584  ;;  %v1968_v39 = vsel %vm407_vm0, %v1964_v16, %v18221_v53  ;;  %8397 = vmatpush3.bf16.xpose.msra.mxu0 %v2047_v4 }
 0x180   : > { %v18222_v40 = vshll.u32 %v11412_v22, 16  ;;  %v12126_v43 = vsel %vm812_vm4, %v11821_v1, %v11847_v33  ;;  %v2089_v38 = vsel %vm1064_vm2, %v2003_v62, 0  ;;  %v17667_v61 = vshll.u32 %v11539_v42, 16  ;;  %8802 = vmatprep.subr.msk.bf16.mxu0 %vm1064_vm2, %v1968_v39  ;;  %v12135_v22 = vpop.permute.xlu0 %2586 }
 0x181   : > { %v12132_v53 = vsel %vm407_vm0, %v3456_v54, %v12103_v13  ;;  %v2006_v16 = vor.u32 %v2004_v19, %v2002_v36  ;;  %v2009_v21 = vrot.slane %v2007_v18, 1  ;;  %8602 = vmatpush3.bf16.xpose.msra.mxu1 %v2089_v38  ;;  %v18224_v1 = vshrl.u32 %v11394_v11, 16  ;;  %3391 = vrot.lane.b32.xlu0 %v11832_v46, %s9364_s6 }
 0x182   : > { %v3715_v60 = vrot.slane %v18222_v40, 2  ;;  %18223 = vst [vmem:[#allocation236_spill] sm:$0xff] %v12132_v53  ;;  %v17668_v40 = vshll.u32 %v11542_v45, 16  ;;  %8603 = vmatprep.subr.bf16.mxu1 %v18040_v30  ;;  %v2050_v54 = vsel %vm1064_vm2, %v1912_v24, 0  ;;  %v3718_v36 = vrot.slane %v3430_v57, 1  ;;  %3393 = vrot.lane.b32.xlu1 %v11835_v23, %s9364_s6 }
 0x183   : > { %v3416_v33 = vor.u32 %v18224_v1, %v11977_v34  ;;  %v12148_v39 = vrot.slane %v17667_v61, 1  ;;  %v2014_v62 = vshll.u32 %v12126_v43, 16  ;;  %v12151_v4 = vpop.permute.xlu1 %2588  ;;  %v18226_v11 = vshll.u32 %v11416_v58, 16 }
 0x184   : > { %18225 = vst [vmem:[#allocation245_spill] sm:$0xff] %v12151_v4  ;;  %v12163_v19 = vrot.slane %v17668_v40, 1  ;;  %v1851_v38 = vsel %vm812_vm4, %v11870_v35, %v11864_v47  ;;  %v18228_v1 = vshrl.u32 %v11425_v56, 16  ;;  %v18229_v14 = vshll.u32 %v11425_v56, 16 }
 0x185   : > { %v3719_v34 = vrot.slane %v18226_v11, 2  ;;  %v12159_v24 = vsel %vm407_vm0, %v3416_v33, %v12003_v50  ;;  %v18230_v58 = vshrl.u32 %v11539_v42, 16  ;;  %v2011_v50 = vshrl.u32 %v12054_v15, 16  ;;  %v12176_v33 = vpop.permute.xlu0 %2590  ;;  %3395 = vrot.lane.b32.xlu0 %v11900_v8, %s9364_s6 }
 0x186   : > { %18227 = vst [vmem:[#allocation264_spill] sm:$0xff] %v12159_v24  ;;  %v3722_v61 = vrot.slane %v18228_v1, 1  ;;  %v3723_v18 = vrot.slane %v18229_v14, 2  ;;  %18231 = vst [vmem:[#allocation265_spill] sm:$0xff] %v12176_v33  ;;  %v2010_v40 = vsel %vm407_vm0, %v2006_v16, %v2009_v21  ;;  %v18232_v53 = vshrl.u32 %v11428_v7, 16  ;;  %3397 = vrot.lane.b32.xlu1 %v11906_v28, %s9364_s6 }
 0x187   : > { %v3472_v11 = vor.u32 %v18230_v58, %v12148_v39  ;;  %v3432_v47 = vor.u32 %v3430_v57, %v12017_v63  ;;  %v18233_v56 = vshll.u32 %v11428_v7, 16  ;;  %v9008_v14 = vld [vmem:[%s9453_s11 + $0xc0] ss:$0 sps:$4 sm:$0x11]   ;;  %v17669_v1 = vshll.u32 %v11558_v55, 16  ;;  %v12193_v4 = vpop.permute.xlu1 %2592  ;;  %8399 = vmatpush3.bf16.xpose.msra.mxu0 %v2050_v54 }
 0x188   : > { %v3726_v24 = vrot.slane %v18232_v53, 1  ;;  %v17670_v15 = vshll.u32 %v11570_v59, 16  ;;  %v2013_v16 = vor.u32 %v2011_v50, %v2009_v21  ;;  %v2016_v33 = vrot.slane %v2014_v62, 1 }
 0x189   : > { %v3727_v35 = vrot.slane %v18233_v56, 2  ;;  %v12191_v58 = vsel %vm407_vm0, %v3472_v11, %v12163_v19  ;;  %v2021_v53 = vshll.u32 %v1851_v38, 16  ;;  %v12199_v63 = vsel %vm407_vm0, %v3432_v47, %v12035_v41  ;;  %v12211_v62 = vpop.permute.xlu0 %2594 }
 0x18a   : > { %18234 = vst [vmem:[#allocation266_spill] sm:$0xff] %v12191_v58  ;;  %18235 = vst [vmem:[#allocation267_spill] sm:$0xff] %v12199_v63  ;;  %v2092_v57 = vsel %vm1064_vm2, %v2010_v40, 0  ;;  %v12205_v11 = vrot.slane %v17669_v1, 1  ;;  %v12209_v21 = vrot.slane %v17670_v15, 1  ;;  %v18236_v38 = vrot.slane %v11832_v46, 1 }
 0x18b   : > { %8604 = vmatpush3.bf16.xpose.msra.mxu1 %v2092_v57  ;;  %v18237_v41 = vrot.slane %v11742_v2, 1  ;;  %v3716_v40 = vor.u32 %v3715_v60, %v3714_v52  ;;  %v12220_v50 = vor.u32 %v3719_v34, %v3718_v36  ;;  %v12222_v47 = vor.u32 %v3723_v18, %v3722_v61  ;;  %v18238_v15 = vld [vmem:[#allocation231_spill] sm:$0xff] }
 0x18c   : > { %v2018_v1 = vshrl.u32 %v12126_v43, 16  ;;  %3650 = vrot.lane.b32.xlu0 %v18238_v15, %s9360_s12  ;;  %8605 = vmatprep.subr.bf16.mxu1 %v18040_v30  ;;  %v12228_v57 = vor.u32 %v3727_v35, %v3726_v24  ;;  %v3648_v56 = vrot.slane %v9008_v14, 1  ;;  %v18239_v63 = vshrl.u32 %v11558_v55, 16 }
 0x18d   : > { %v12218_v54 = vsel %vm660_vm1, %v18237_v41, %v18236_v38  ;;  %v12233_v41 = vpop.permute.xlu1 %2596  ;;  %v3462_v52 = vshrl.u32 %v11449_v12, 16  ;;  %v17672_v60 = vshll.u32 %v11584_v9, 16  ;;  %v17671_v43 = vshll.u32 %v11587_v6, 16  ;;  %v12248_v14 = vpop.permute.xlu0 %2598 }
 0x18e   : > { %v3488_v38 = vor.u32 %v18239_v63, %v12205_v11  ;;  %v18240_v61 = vshrl.u32 %v11428_v7, 16  ;;  %v2020_v18 = vor.u32 %v2018_v1, %v2016_v33  ;;  %v2023_v34 = vrot.slane %v2021_v53, 1  ;;  %18242 = vst [vmem:[#allocation268_spill] sm:$0xff] %v12248_v14  ;;  %v18244_v1 = vld [vmem:[#allocation232_spill] sm:$0xff] }
 0x18f   : > { %v2017_v24 = vsel %vm407_vm0, %v2013_v16, %v2016_v33  ;;  %v12257_v7 = vrot.slane %v17672_v60, 1  ;;  %v8206_v33 = vld [vmem:[%s17297_s1 + $0x2] sm:$0x1]  ;;  %v12270_v16 = vsel %vm3701_vm7, %v3716_v40, %v12220_v50  ;;  %v18246_v53 = vrot.slane %v11835_v23, 1 }
 0x190   : > { %v3448_v36 = vor.u32 %v18240_v61, %v12049_v51  ;;  %v12246_v35 = vsel %vm407_vm0, %v3488_v38, %v12209_v21  ;;  %v12261_v51 = vrot.slane %v17671_v43, 1  ;;  %3654 = vrot.lane.b32.xlu0 %v18244_v1, %s9360_s12  ;;  %v12282_v61 = vsel %vm3701_vm7, %v12222_v47, %v12228_v57  ;;  %v18248_v43 = vld [vmem:[#allocation229_spill] sm:$0xff] }
 0x191   : > { %18241 = vst [vmem:[#allocation231_spill] sm:$0xff] %v12246_v35  ;;  %v12292_v60 = vsel %vm760_vm3, %v18248_v43, %v11891_v20  ;;  %v12294_v15 = vpop.permute.xlu1 %2600  ;;  %v18254_v20 = vshll.u32 %v11446_v26, 16  ;;  %v17676_v58 = vshll.u32 %v11622_v32, 16 }
 0x192   : > { %v12253_v63 = vsel %vm407_vm0, %v3448_v36, %v12094_v10  ;;  %v18245_v10 = vrot.slane %v11900_v8, 1  ;;  %v18247_v36 = vrot.slane %v11906_v28, 1  ;;  %18249 = vst [vmem:[#allocation232_spill] sm:$0xff] %v12294_v15  ;;  %v18252_v28 = vshrl.u32 %v11446_v26, 16 }
 0x193   : > { %18243 = vst [vmem:[#allocation269_spill] sm:$0xff] %v12253_v63  ;;  %v18251_v63 = vld [vmem:[#allocation211_spill] sm:$0xff]  ;;  %v3731_v43 = vrot.slane %v18254_v20, 2  ;;  %v3464_v15 = vor.u32 %v3462_v52, %v12103_v13  ;;  %v18256_v8 = vshll.u32 %v11449_v12, 16  ;;  %v18258_v20 = vld [vmem:[#allocation234_spill] sm:$0xff]  ;;  %v17677_v13 = vshrl.u32 %v11622_v32, 16 }
 0x194   : > { %v12277_v38 = vsel %vm660_vm1, %v18246_v53, %v18245_v10  ;;  %v12287_v1 = vsel %vm660_vm1, %v18247_v36, %v3648_v56  ;;  %v2095_v10 = vsel %vm1064_vm2, %v2017_v24, 0  ;;  %v18250_v53 = vld [vmem:[#allocation237_spill] sm:$0xff]  ;;  %8401 = vmatmul.mubr.msk.bf16.vlgmr.msra.gmra.mrb[0].mxu0 %vm1064_vm2, %v18251_v63  ;;  %v3730_v35 = vrot.slane %v18252_v28, 1  ;;  %v12312_v63 = vpop.permute.xlu0 %2602  ;;  %3658 = vrot.lane.b32.xlu0 %v18258_v20, %s9360_s12 }
 0x195   : > { %3652 = vrot.lane.b32.xlu1 %v18250_v53, %s9360_s12  ;;  %v18253_v56 = vshrl.u32 %v11584_v9, 16  ;;  %v17675_v24 = vshll.u32 %v11625_v25, 16  ;;  %8427 = vmatprep.mubr.msk.bf16.mxu0 %vm1064_vm2, %v8206_v33  ;;  %18255 = vst [vmem:[#allocation237_spill] sm:$0xff] %v12312_v63  ;;  %v2024_v53 = vsel %vm407_vm0, %v2020_v18, %v2023_v34  ;;  %v3734_v28 = vrot.slane %v3462_v52, 1  ;;  %v18261_v18 = vld [vmem:[#allocation150_spill] sm:$0xff] }
 0x196   : > { %8606 = vmatpush3.bf16.xpose.msra.mxu1 %v2095_v10  ;;  %v12327_v33 = vsel %vm407_vm0, %v3464_v15, %v12148_v39  ;;  %v12331_v52 = vrot.slane %v17676_v58, 1  ;;  %v12342_v10 = vpop.permute.xlu1 %2604  ;;  %v12348_v39 = vsel %vm3701_vm7, %v11955_v48, %v3716_v40  ;;  %v3478_v15 = vshrl.u32 %v11542_v45, 16 }
 0x197   : > { %v3504_v36 = vor.u32 %v18253_v56, %v12257_v7  ;;  %v3735_v56 = vrot.slane %v18256_v8, 2  ;;  %8607 = vmatprep.subr.bf16.mxu1 %v18040_v30  ;;  %18259 = vst [vmem:[#allocation234_spill] sm:$0xff] %v12327_v33  ;;  %v12335_v12 = vrot.slane %v17675_v24, 1  ;;  %v18260_v8 = vld [vmem:[#allocation253_spill] sm:$0xff]  ;;  %v17678_v20 = vshll.u32 %v11684_v3, 16 }
 0x198   : > { %v12340_v34 = vsel %vm760_vm3, %v18261_v18, %v18260_v8  ;;  %18262 = vst [vmem:[#allocation253_spill] sm:$0xff] %v12342_v10  ;;  %v2098_v24 = vsel %vm1064_vm2, %v2024_v53, 0  ;;  %v12353_v58 = vor.u32 %v3731_v43, %v3730_v35  ;;  %v17679_v8 = vshll.u32 %v11696_v17, 16  ;;  %v12359_v33 = vpop.permute.xlu0 %2606  ;;  %v18266_v43 = vld [vmem:[#allocation235_spill] sm:$0xff] }
 0x199   : > { %v12319_v26 = vsel %vm407_vm0, %v3504_v36, %v12261_v51  ;;  %v18263_v36 = vld [vmem:[#allocation239_spill] sm:$0xff]  ;;  %v3520_v18 = vor.u32 %v17677_v13, %v12331_v52  ;;  %v3480_v40 = vor.u32 %v3478_v15, %v12163_v19  ;;  %3662 = vrot.lane.b32.xlu0 %v18266_v43, %s9360_s12  ;;  %v3494_v35 = vshrl.u32 %v11570_v59, 16 }
 0x19a   : > { %18257 = vst [vmem:[#allocation211_spill] sm:$0xff] %v12319_v26  ;;  %3656 = vrot.lane.b32.xlu1 %v18263_v36, %s9360_s12  ;;  %18264 = vst [vmem:[#allocation239_spill] sm:$0xff] %v12359_v33  ;;  %v12361_v36 = vor.u32 %v3735_v56, %v3734_v28  ;;  %v12367_v26 = vrot.slane %v17678_v20, 1  ;;  %v12379_v28 = vrot.slane %v17679_v8, 1  ;;  %v12381_v19 = vpop.permute.xlu1 %2608  ;;  %v18270_v56 = vld [vmem:[#allocation241_spill] sm:$0xff]  ;;  %v18271_v20 = vshrl.u32 %v11539_v42, 16 }
 0x19b   : > { %v12375_v13 = vsel %vm407_vm0, %v3520_v18, %v12335_v12  ;;  %18269 = vst [vmem:[#allocation272_spill] sm:$0xff] %v12381_v19  ;;  %v18272_v48 = vshll.u32 %v11539_v42, 16  ;;  %v12391_v53 = vsel %vm407_vm0, %v3480_v40, %v12205_v11  ;;  %v18274_v18 = vshrl.u32 %v11684_v3, 16 }
 0x19c   : > { %18265 = vst [vmem:[#allocation270_spill] sm:$0xff] %v12367_v26  ;;  %18267 = vst [vmem:[#allocation235_spill] sm:$0xff] %v12375_v13  ;;  %v3738_v43 = vrot.slane %v18271_v20, 1  ;;  %v3742_v13 = vrot.slane %v3478_v15, 1  ;;  %v17680_v19 = vshll.u32 %v11742_v2, 16  ;;  %v3496_v10 = vor.u32 %v3494_v35, %v12209_v21  ;;  %v2663_v42 = vpop.permute.xlu0 %2662 }
 0x19d   : > { %18268 = vst [vmem:[#allocation271_spill] sm:$0xff] %v12379_v28  ;;  %v3739_v33 = vrot.slane %v18272_v48, 2  ;;  %18273 = vst [vmem:[#allocation241_spill] sm:$0xff] %v12391_v53  ;;  %v3536_v8 = vor.u32 %v18274_v18, %v12367_v26  ;;  %v18277_v20 = vshll.u32 %v11542_v45, 16  ;;  %v3510_v11 = vshrl.u32 %v11587_v6, 16  ;;  %v18279_v18 = vld [vmem:[#allocation238_spill] sm:$0xff] }
 0x19e   : > { %3660 = vrot.lane.b32.xlu1 %v18270_v56, %s9360_s12  ;;  %v18275_v56 = vshll.u32 %v11739_v29, 16  ;;  %8608 = vmatpush3.bf16.xpose.msra.mxu1 %v2098_v24  ;;  %v12417_v45 = vsel %vm407_vm0, %v3496_v10, %v12257_v7  ;;  %v18285_v24 = vshrl.u32 %v11739_v29, 16  ;;  %v3750_v10 = vrot.slane %v3494_v35, 1  ;;  %v18293_v26 = vld [vmem:[#allocation240_spill] sm:$0xff] }
 0x19f   : > { %v3743_v48 = vrot.slane %v18277_v20, 2  ;;  %v12408_v15 = vsel %vm407_vm0, %v3536_v8, %v12379_v28  ;;  %3666 = vrot.lane.b32.xlu0 %v18279_v18, %s9360_s12  ;;  %8613 = vmatprep.subr.bf16.mxu1 %v18040_v30  ;;  %18280 = vst [vmem:[#allocation238_spill] sm:$0xff] %v12417_v45  ;;  %v2665_v20 = vpop.permute.xlu1 %2664  ;;  %v18282_v8 = vld [vmem:[#allocation243_spill] sm:$0xff]  ;;  %v18283_v18 = vshrl.u32 %v11558_v55, 16  ;;  %v3512_v7 = vor.u32 %v3510_v11, %v12261_v51 }
 0x1a0   : > { %v12400_v63 = vrot.slane %v18275_v56, 1  ;;  %18278 = vst [vmem:[#allocation274_spill] sm:$0xff] %v12408_v15  ;;  %v12421_v56 = vrot.slane %v17680_v19, 1  ;;  %v18284_v15 = vshll.u32 %v11558_v55, 16  ;;  %v18286_v45 = vshll.u32 %v11832_v46, 16 }
 0x1a1   : > { %v3746_v40 = vrot.slane %v18283_v18, 1  ;;  %v12442_v18 = vpop.permute.xlu0 %2666  ;;  %v18290_v55 = vshll.u32 %v11570_v59, 16  ;;  %v18292_v51 = vshll.u32 %v11584_v9, 16  ;;  %v3758_v19 = vrot.slane %v3510_v11, 1  ;;  %v18299_v11 = vld [vmem:[#allocation152_spill] sm:$0xff] }
 0x1a2   : > { %18276 = vst [vmem:[#allocation273_spill] sm:$0xff] %v12400_v63  ;;  %18281 = vst [vmem:[#allocation275_spill] sm:$0xff] %v12421_v56  ;;  %3664 = vrot.lane.b32.xlu1 %v18282_v8, %s9360_s12  ;;  %v3747_v21 = vrot.slane %v18284_v15, 2  ;;  %v3552_v53 = vor.u32 %v18285_v24, %v12400_v63  ;;  %v12436_v28 = vrot.slane %v18286_v45, 1  ;;  %v18288_v8 = vshll.u32 %v11835_v23, 16 }
 0x1a3   : > { %v3751_v15 = vrot.slane %v18290_v55, 2  ;;  %v18291_v24 = vshrl.u32 %v11584_v9, 16  ;;  %v3755_v35 = vrot.slane %v18292_v51, 2  ;;  %3670 = vrot.lane.b32.xlu0 %v18293_v26, %s9360_s12  ;;  %v18294_v45 = vshll.u32 %v11587_v6, 16  ;;  %v18300_v26 = vld [vmem:[#allocation159_spill] sm:$0xff] }
 0x1a4   : > { %18287 = vst [vmem:[#allocation243_spill] sm:$0xff] %v12436_v28  ;;  %v12440_v14 = vrot.slane %v18288_v8, 1  ;;  %v12456_v8 = vsel %vm407_vm0, %v3552_v53, %v12421_v56  ;;  %v12460_v59 = vsel %vm407_vm0, %v3512_v7, %v12331_v52  ;;  %v18297_v55 = vshrl.u32 %v11832_v46, 16  ;;  %v18301_v53 = vld [vmem:[#allocation246_spill] sm:$0xff] }
 0x1a5   : > { %v3754_v63 = vrot.slane %v18291_v24, 1  ;;  %v3759_v23 = vrot.slane %v18294_v45, 2  ;;  %18295 = vst [vmem:[#allocation240_spill] sm:$0xff] %v12456_v8  ;;  %18296 = vst [vmem:[#allocation277_spill] sm:$0xff] %v12460_v59  ;;  %v18298_v24 = vld [vmem:[#allocation255_spill] sm:$0xff]  ;;  %v12471_v6 = vsel %vm760_vm3, %v18300_v26, %v11950_v31  ;;  %v12473_v45 = vpop.permute.xlu1 %2668  ;;  %v12480_v52 = vsel %vm3701_vm7, %v12353_v58, %v12361_v36  ;;  %v18304_v59 = vld [vmem:[#allocation165_spill] sm:$0xff]  ;;  %v12501_v8 = vpop.permute.xlu0 %2670 }
 0x1a6   : > { %18289 = vst [vmem:[#allocation276_spill] sm:$0xff] %v12440_v14  ;;  %v3568_v9 = vor.u32 %v18297_v55, %v12436_v28  ;;  %v2718_v51 = vsel %vm760_vm3, %v18299_v11, %v18298_v24  ;;  %3668 = vrot.lane.b32.xlu1 %v18301_v53, %s9360_s12  ;;  %v18302_v55 = vld [vmem:[#allocation163_spill] sm:$0xff]  ;;  %v9143_v31 = vld [vmem:[%s17297_s1 + $0x1] sm:$0x1]  ;;  %v3740_v26 = vor.u32 %v3739_v33, %v3738_v43 }
 0x1a7   : > { %v12486_v24 = vsel %vm760_vm3, %v18302_v55, %v11968_v44  ;;  %8610 = vmatmul.mubr.msk.bf16.vlgmr.msra.gmra.mrb[0].mxu1 %vm1064_vm2, %v9143_v31  ;;  %v3744_v53 = vor.u32 %v3743_v48, %v3742_v13  ;;  %v12499_v7 = vsel %vm760_vm3, %v18304_v59, %v11981_v49  ;;  %v12506_v44 = vsel %vm3701_vm7, %v12220_v50, %v12222_v47  ;;  %v18305_v33 = vld [vmem:[#allocation242_spill] sm:$0xff] }
 0x1a8   : > { %v12494_v11 = vsel %vm407_vm0, %v3568_v9, %v12440_v14  ;;  %v3748_v55 = vor.u32 %v3747_v21, %v3746_v40  ;;  %v12508_v31 = vor.u32 %v3751_v15, %v3750_v10  ;;  %8629 = vmatprep.mubr.msk.bf16.mxu1 %vm9363_vm6, %v18040_v30  ;;  %v2764_v13 = vsel %vm812_vm4, %v12292_v60, %v2663_v42  ;;  %v18307_v21 = vld [vmem:[#allocation248_spill] sm:$0xff]  ;;  %v18311_v15 = vld [vmem:[#allocation230_spill] sm:$0xff]  ;;  %v18324_v14 = vld [vmem:[#allocation251_spill] sm:$0xff] }
 0x1a9   : > { %18303 = vst [vmem:[#allocation255_spill] sm:$0xff] %v12494_v11  ;;  %3674 = vrot.lane.b32.xlu0 %v18305_v33, %s9360_s12  ;;  %v12516_v49 = vor.u32 %v3755_v35, %v3754_v63  ;;  %v12518_v43 = vor.u32 %v3759_v23, %v3758_v19  ;;  %v18306_v48 = vshll.u32 %v11622_v32, 16  ;;  %v2766_v47 = vsel %vm812_vm4, %v12340_v34, %v2665_v20  ;;  %v12524_v40 = vpop.permute.xlu1 %2672  ;;  %v18312_v35 = vld [vmem:[#allocation169_spill] sm:$0xff]  ;;  %v18314_v20 = vld [vmem:[#allocation176_spill] sm:$0xff] }
 0x1aa   : > { %3672 = vrot.lane.b32.xlu1 %v18307_v21, %s9360_s12  ;;  %v18308_v60 = vshrl.u32 %v11622_v32, 16  ;;  %v18309_v10 = vshrl.u32 %v11625_v25, 16  ;;  %v18310_v23 = vshll.u32 %v11625_v25, 16  ;;  %v12537_v9 = vsel %vm760_vm3, %v18312_v35, %v18311_v15  ;;  %v18313_v34 = vld [vmem:[#allocation257_spill] sm:$0xff]  ;;  %v18316_v21 = vld [vmem:[#allocation258_spill] sm:$0xff]  ;;  %v12555_v35 = vpop.permute.xlu0 %2674 }
 0x1ab   : > { %v3763_v50 = vrot.slane %v18306_v48, 2  ;;  %v12542_v33 = vsel %vm760_vm3, %v18314_v20, %v18313_v34  ;;  %v12545_v48 = vsel %vm3701_vm7, %v3740_v26, %v3744_v53  ;;  %v12550_v32 = vsel %vm3701_vm7, %v12228_v57, %v12353_v58  ;;  %v18319_v20 = vld [vmem:[#allocation179_spill] sm:$0xff]  ;;  %v18320_v58 = vld [vmem:[#allocation244_spill] sm:$0xff] }
 0x1ac   : > { %v3762_v42 = vrot.slane %v18308_v60, 1  ;;  %v3766_v63 = vrot.slane %v18309_v10, 1  ;;  %v3767_v19 = vrot.slane %v18310_v23, 2  ;;  %18315 = vst [vmem:[#allocation246_spill] sm:$0xff] %v12542_v33  ;;  %v18317_v60 = vld [vmem:[#allocation177_spill] sm:$0xff]  ;;  %v2815_v23 = vshrl.u32 %v2764_v13, 16 }
 0x1ad   : > { %v2730_v10 = vsel %vm760_vm3, %v18317_v60, %v18316_v21  ;;  %v2818_v15 = vshll.u32 %v2764_v13, 16  ;;  %v12559_v34 = vsel %vm3701_vm7, %v3748_v55, %v12508_v31  ;;  %v2732_v59 = vsel %vm760_vm3, %v18319_v20, %v12042_v37  ;;  %3678 = vrot.lane.b32.xlu0 %v18320_v58, %s9360_s12  ;;  %v18322_v13 = vld [vmem:[#allocation180_spill] sm:$0xff]  ;;  %v12573_v60 = vpop.permute.xlu1 %2676 }
 0x1ae   : > { %18318 = vst [vmem:[#allocation242_spill] sm:$0xff] %v12559_v34  ;;  %v2822_v11 = vshrl.u32 %v2766_v47, 16  ;;  %v2825_v28 = vshll.u32 %v2766_v47, 16  ;;  %v12568_v57 = vsel %vm3701_vm7, %v12361_v36, %v3740_v26  ;;  %v2734_v21 = vsel %vm760_vm3, %v18322_v13, %v12067_v27  ;;  %18323 = vst [vmem:[#allocation230_spill] sm:$0xff] %v12573_v60  ;;  %3676 = vrot.lane.b32.xlu1 %v18324_v14, %s9360_s12  ;;  %v18327_v36 = vld [vmem:[#allocation181_spill] sm:$0xff]  ;;  %v18328_v27 = vld [vmem:[#allocation183_spill] sm:$0xff] }
 0x1af   : > { %18321 = vst [vmem:[#allocation248_spill] sm:$0xff] %v12568_v57  ;;  %v12580_v37 = vsel %vm3701_vm7, %v12516_v49, %v12518_v43  ;;  %v12582_v47 = vor.u32 %v3763_v50, %v3762_v42  ;;  %v12584_v58 = vor.u32 %v3767_v19, %v3766_v63  ;;  %v2736_v26 = vsel %vm760_vm3, %v18327_v36, %v12097_v0  ;;  %v2679_v42 = vpop.permute.xlu0 %2678  ;;  %v18334_v20 = vld [vmem:[#allocation256_spill] sm:$0xff] }
 0x1b0   : > { %18325 = vst [vmem:[#allocation257_spill] sm:$0xff] %v12580_v37  ;;  %v12592_v13 = vsel %vm760_vm3, %v18328_v27, %v12114_v5  ;;  %v12595_v14 = vsel %vm3701_vm7, %v3744_v53, %v3748_v55  ;;  %v2817_v56 = vrot.slane %v2815_v23, 2  ;;  %v2820_v37 = vrot.slane %v2818_v15, 3  ;;  %v18331_v5 = vld [vmem:[#allocation247_spill] sm:$0xff]  ;;  %v18333_v23 = vld [vmem:[#allocation185_spill] sm:$0xff] }
 0x1b1   : > { %18326 = vst [vmem:[#allocation258_spill] sm:$0xff] %v12584_v58  ;;  %18329 = vst [vmem:[#allocation244_spill] sm:$0xff] %v12595_v14  ;;  %v2768_v50 = vsel %vm812_vm4, %v2718_v51, %v12442_v18  ;;  %v18330_v63 = vshrl.u32 %v11684_v3, 16  ;;  %v2824_v0 = vrot.slane %v2822_v11, 2  ;;  %v2827_v36 = vrot.slane %v2825_v28, 3  ;;  %3682 = vrot.lane.b32.xlu0 %v18331_v5, %s9360_s12  ;;  %v2681_v51 = vpop.permute.xlu1 %2680 }
 0x1b2   : > { %v2780_v33 = vsel %vm812_vm4, %v2730_v10, %v2679_v42  ;;  %v18332_v55 = vshll.u32 %v11684_v3, 16  ;;  %v12610_v15 = vsel %vm760_vm3, %v18333_v23, %v12135_v22  ;;  %3680 = vrot.lane.b32.xlu1 %v18334_v20, %s9360_s12  ;;  %v12617_v28 = vsel %vm3701_vm7, %v12582_v47, %v12584_v58 }
 0x1b3   : > { %v3770_v19 = vrot.slane %v18330_v63, 1  ;;  %v2878_v18 = vshrl.u32 %v2780_v33, 16  ;;  %18335 = vst [vmem:[#allocation251_spill] sm:$0xff] %v12617_v28  ;;  %v18336_v11 = vshll.u32 %v11696_v17, 16  ;;  %v2830_v3 = vshrl.u32 %v2768_v50, 16  ;;  %v2683_v27 = vpop.permute.xlu0 %2682 }
 0x1b4   : > { %v3771_v53 = vrot.slane %v18332_v55, 2  ;;  %v2833_v42 = vshll.u32 %v2768_v50, 16  ;;  %v2881_v63 = vshll.u32 %v2780_v33, 16  ;;  %v2782_v5 = vsel %vm812_vm4, %v2732_v59, %v2681_v51 }
 0x1b5   : > { %v3775_v10 = vrot.slane %v18336_v11, 2  ;;  %v2821_v22 = vor.u32 %v2820_v37, %v2817_v56  ;;  %v2886_v55 = vshrl.u32 %v2782_v5, 16  ;;  %v2889_v23 = vshll.u32 %v2782_v5, 16  ;;  %v18338_v11 = vld [vmem:[#allocation249_spill] sm:$0xff]  ;;  %v2685_v56 = vpop.permute.xlu1 %2684  ;;  %v18339_v37 = vld [vmem:[#allocation262_spill] sm:$0xff] }
 0x1b6   : > { %v18337_v60 = vshrl.u32 %v11696_v17, 16  ;;  %v12624_v14 = vor.u32 %v2827_v36, %v2824_v0  ;;  %v2880_v34 = vrot.slane %v2878_v18, 2  ;;  %v2883_v58 = vrot.slane %v2881_v63, 3  ;;  %3686 = vrot.lane.b32.xlu0 %v18338_v11, %s9360_s12  ;;  %3684 = vrot.lane.b32.xlu1 %v18339_v37, %s9360_s12  ;;  %v18341_v11 = vld [vmem:[#allocation245_spill] sm:$0xff] }
 0x1b7   : > { %v2784_v28 = vsel %vm812_vm4, %v2734_v21, %v2683_v27  ;;  %v2888_v50 = vrot.slane %v2886_v55, 2  ;;  %v2891_v33 = vrot.slane %v2889_v23, 3  ;;  %v2832_v51 = vrot.slane %v2830_v3, 2  ;;  %v2687_v63 = vpop.permute.xlu0 %2686  ;;  %v18340_v55 = vld [vmem:[#allocation254_spill] sm:$0xff] }
 0x1b8   : > { %v3774_v20 = vrot.slane %v18337_v60, 1  ;;  %v2894_v57 = vshrl.u32 %v2784_v28, 16  ;;  %v2897_v59 = vshll.u32 %v2784_v28, 16  ;;  %v2835_v5 = vrot.slane %v2833_v42, 3 }
 0x1b9   : > { %v2770_v60 = vsel %vm812_vm4, %v12471_v6, %v12473_v45  ;;  %v2786_v36 = vsel %vm812_vm4, %v2736_v26, %v2685_v56  ;;  %v2892_v21 = vor.u32 %v2891_v33, %v2888_v50  ;;  %v12635_v23 = vor.u32 %v2883_v58, %v2880_v34  ;;  %v18342_v6 = vld [vmem:[#allocation188_spill] sm:$0xff]  ;;  %v2689_v26 = vpop.permute.xlu1 %2688 }
 0x1ba   : > { %v2896_v27 = vrot.slane %v2894_v57, 2  ;;  %v2899_v0 = vrot.slane %v2897_v59, 3  ;;  %v2902_v18 = vshrl.u32 %v2786_v36, 16  ;;  %v2905_v28 = vshll.u32 %v2786_v36, 16  ;;  %3690 = vrot.lane.b32.xlu0 %v18340_v55, %s9360_s12  ;;  %3688 = vrot.lane.b32.xlu1 %v12218_v54, %s9360_s12  ;;  %v18346_v36 = vld [vmem:[#allocation265_spill] sm:$0xff] }
 0x1bb   : > { %v2829_v3 = vsel %vm864_vm5, %v2821_v22, %v12624_v14  ;;  %v12641_v42 = vor.u32 %v3771_v53, %v3770_v19  ;;  %v12646_v45 = vsel %vm760_vm3, %v18342_v6, %v18341_v11  ;;  %v12653_v34 = vsel %vm3701_vm7, %v12508_v31, %v12516_v49  ;;  %v12663_v54 = vpop.permute.xlu0 %2690  ;;  %v9169_v6 = vld [vmem:[%s9453_s11 + $0xa0] sm:$0xff]  }
 0x1bc   : > { %v2900_v57 = vor.u32 %v2899_v0, %v2896_v27  ;;  %v17689_v58 = vshrl.u32 %v11742_v2, 16  ;;  %v2838_v22 = vshrl.u32 %v2770_v60, 16  ;;  %v2841_v19 = vshll.u32 %v2770_v60, 16  ;;  %v18343_v60 = vld [vmem:[#allocation260_spill] sm:$0xff]  ;;  %v18347_v27 = vld [vmem:[#allocation193_spill] sm:$0xff] }
 0x1bd   : > { %v2893_v53 = vsel %vm864_vm5, %v12635_v23, %v2892_v21  ;;  %v12658_v50 = vor.u32 %v3775_v10, %v3774_v20  ;;  %v12660_v33 = vor.u32 %v2835_v5, %v2832_v51  ;;  %v2904_v59 = vrot.slane %v2902_v18, 2  ;;  %v18348_v18 = vld [vmem:[#allocation195_spill] sm:$0xff] }
 0x1be   : > { %v2907_v56 = vrot.slane %v2905_v28, 3  ;;  %8803 = vmatprep.subr.msk.bf16.mxu0 %vm1064_vm2, %v2893_v53  ;;  %v3018_v31 = vsel %vm1064_vm2, %v2829_v3, 0  ;;  %v2788_v49 = vsel %vm812_vm4, %v12592_v13, %v2687_v63  ;;  %v2901_v37 = vsel %vm864_vm5, %v2892_v21, %v2900_v57  ;;  %3694 = vrot.lane.b32.xlu0 %v18343_v60, %s9360_s12  ;;  %v12684_v21 = vpop.permute.xlu1 %2692 }
 0x1bf   : > { %8412 = vmatpush3.bf16.xpose.msra.mxu0 %v3018_v31  ;;  %v18344_v10 = vshrl.u32 %v11739_v29, 16  ;;  %v18345_v51 = vshll.u32 %v11739_v29, 16  ;;  %v12678_v0 = vsel %vm760_vm3, %v18347_v27, %v18346_v36  ;;  %v2746_v13 = vsel %vm760_vm3, %v18348_v18, %v12193_v4  ;;  %3692 = vrot.lane.b32.xlu1 %v12277_v38, %s9360_s12 }
 0x1c0   : > { %8804 = vmatprep.subr.msk.bf16.mxu0 %vm1064_vm2, %v2901_v37  ;;  %v3782_v29 = vrot.slane %v17689_v58, 1  ;;  %v18349_v63 = vshll.u32 %v11742_v2, 16  ;;  %v2840_v55 = vrot.slane %v2838_v22, 2  ;;  %v2843_v3 = vrot.slane %v2841_v19, 3  ;;  %v2695_v37 = vpop.permute.xlu0 %2694  ;;  %v18350_v22 = vld [vmem:[#allocation201_spill] sm:$0xff] }
 0x1c1   : > { %v3778_v20 = vrot.slane %v18344_v10, 1  ;;  %v3779_v5 = vrot.slane %v18345_v51, 2  ;;  %v2772_v11 = vsel %vm812_vm4, %v12486_v24, %v12501_v8  ;;  %v12698_v4 = vsel %vm3701_vm7, %v12518_v43, %v12582_v47  ;;  %v18351_v8 = vld [vmem:[#allocation203_spill] sm:$0xff] }
 0x1c2   : > { %v3783_v28 = vrot.slane %v18349_v63, 2  ;;  %v12700_v53 = vor.u32 %v2907_v56, %v2904_v59  ;;  %v2910_v38 = vshrl.u32 %v2788_v49, 16  ;;  %v2913_v31 = vshll.u32 %v2788_v49, 16  ;;  %v18352_v47 = vld [vmem:[#allocation263_spill] sm:$0xff] }
 0x1c3   : > { %v2837_v60 = vsel %vm864_vm5, %v12624_v14, %v12660_v33  ;;  %v2748_v19 = vsel %vm760_vm3, %v18350_v22, %v12211_v62  ;;  %v2750_v24 = vsel %vm760_vm3, %v18351_v8, %v12233_v41  ;;  %v2796_v43 = vsel %vm812_vm4, %v2746_v13, %v2695_v37  ;;  %3811 = vrot.lane.b32.xlu0 %v18352_v47, %s9361_s13  ;;  %v2697_v14 = vpop.permute.xlu1 %2696  ;;  %v18431_v22 = vld [vmem:[#allocation16_spill] sm:$0xff] }
 0x1c4   : > { %v12714_v59 = vor.u32 %v3779_v5, %v3778_v20  ;;  %v2846_v56 = vshrl.u32 %v2772_v11, 16  ;;  %v2849_v49 = vshll.u32 %v2772_v11, 16  ;;  %v2942_v10 = vshrl.u32 %v2796_v43, 16  ;;  %3696 = vrot.lane.b32.xlu1 %v12287_v1, %s9360_s12  ;;  %v2699_v37 = vpop.permute.xlu0 %2698 }
 0x1c5   : > { %v2945_v51 = vshll.u32 %v2796_v43, 16  ;;  %v12718_v62 = vor.u32 %v2843_v3, %v2840_v55  ;;  %v2790_v41 = vsel %vm812_vm4, %v12610_v15, %v2689_v26  ;;  %v2798_v36 = vsel %vm812_vm4, %v2748_v19, %v2697_v14 }
 0x1c6   : > { %v3021_v13 = vsel %vm1064_vm2, %v2837_v60, 0  ;;  %v2912_v63 = vrot.slane %v2910_v38, 2  ;;  %v2915_v20 = vrot.slane %v2913_v31, 3  ;;  %v2950_v5 = vshrl.u32 %v2798_v36, 16 }
 0x1c7   : > { %v2909_v11 = vsel %vm864_vm5, %v2900_v57, %v12700_v53  ;;  %v2944_v43 = vrot.slane %v2942_v10, 2  ;;  %v2947_v47 = vrot.slane %v2945_v51, 3  ;;  %v2953_v58 = vshll.u32 %v2798_v36, 16  ;;  %8414 = vmatpush3.bf16.xpose.msra.mxu0 %v3021_v13  ;;  %3815 = vrot.lane.b32.xlu0 %v12270_v16, %s9361_s13  ;;  %v2701_v51 = vpop.permute.xlu1 %2700 }
 0x1c8   : > { %v2800_v1 = vsel %vm812_vm4, %v2750_v24, %v2699_v37  ;;  %v2952_v15 = vrot.slane %v2950_v5, 2  ;;  %8805 = vmatprep.subr.msk.bf16.mxu0 %vm1064_vm2, %v2909_v11  ;;  %3813 = vrot.lane.b32.xlu1 %v12348_v39, %s9361_s13  ;;  %v12732_v3 = vor.u32 %v3783_v28, %v3782_v29  ;;  %v2848_v57 = vrot.slane %v2846_v56, 2  ;;  %v2703_v14 = vpop.permute.xlu0 %2702 }
 0x1c9   : > { %v2958_v26 = vshrl.u32 %v2800_v1, 16  ;;  %v2961_v55 = vshll.u32 %v2800_v1, 16  ;;  %v2774_v38 = vsel %vm812_vm4, %v12499_v7, %v12524_v40  ;;  %v2955_v31 = vrot.slane %v2953_v58, 3  ;;  %v18356_v40 = vld [vmem:[#allocation268_spill] sm:$0xff] }
 0x1ca   : > { %v18353_v60 = vshrl.u32 %v11625_v25, 16  ;;  %v2851_v19 = vrot.slane %v2849_v49, 3  ;;  %v2918_v24 = vshrl.u32 %v2790_v41, 16  ;;  %v2921_v10 = vshll.u32 %v2790_v41, 16  ;;  %v18354_v25 = vld [vmem:[#allocation270_spill] sm:$0xff]  ;;  %v18357_v58 = vld [vmem:[#allocation204_spill] sm:$0xff] }
 0x1cb   : > { %v2845_v39 = vsel %vm864_vm5, %v12660_v33, %v12718_v62  ;;  %v12743_v29 = vor.u32 %v2915_v20, %v2912_v63  ;;  %v12745_v28 = vor.u32 %v2947_v47, %v2944_v43  ;;  %v2956_v7 = vor.u32 %v2955_v31, %v2952_v15  ;;  %3819 = vrot.lane.b32.xlu0 %v12282_v61, %s9361_s13  ;;  %v12759_v33 = vld [vmem:[%s9453_s11 + $0xa8] sm:$0xff]   ;;  %v18358_v20 = vld [vmem:[#allocation252_spill] sm:$0xff] }
 0x1cc   : > { %v3528_v16 = vor.u32 %v18353_v60, %v12335_v12  ;;  %v2752_v56 = vsel %vm760_vm3, %v18357_v58, %v18356_v40  ;;  %v2960_v49 = vrot.slane %v2958_v26, 2  ;;  %v2963_v41 = vrot.slane %v2961_v55, 3  ;;  %3817 = vrot.lane.b32.xlu1 %v12506_v44, %s9361_s13  ;;  %v12771_v44 = vpop.permute.xlu0 %2706  ;;  %v18430_v58 = vld [vmem:[#allocation17_spill] sm:$0xff] }
 0x1cd   : > { %v3574_v36 = vshrl.u32 %v12759_v33, 16  ;;  %v2854_v13 = vshrl.u32 %v2774_v38, 16  ;;  %v2802_v61 = vsel %vm812_vm4, %v2752_v56, %v2701_v51  ;;  %v2957_v63 = vsel %vm864_vm5, %v12745_v28, %v2956_v7 }
 0x1ce   : > { %v12751_v12 = vsel %vm407_vm0, %v3528_v16, %v18354_v25  ;;  %v17691_v5 = vshll.u32 %v18358_v20, 16  ;;  %v12766_v37 = vor.u32 %v2851_v19, %v2848_v57  ;;  %v2857_v11 = vshll.u32 %v2774_v38, 16  ;;  %v12799_v16 = vld [vmem:[%s9453_s11 + $0xb0] sm:$0xff]  }
 0x1cf   : > { %18355 = vst [vmem:[#allocation247_spill] sm:$0xff] %v12751_v12  ;;  %v2792_v43 = vsel %vm812_vm4, %v12646_v45, %v12663_v54  ;;  %v3024_v47 = vsel %vm1064_vm2, %v2845_v39, 0  ;;  %v2920_v1 = vrot.slane %v2918_v24, 2  ;;  %v2923_v15 = vrot.slane %v2921_v10, 3  ;;  %3823 = vrot.lane.b32.xlu0 %v12480_v52, %s9361_s13  ;;  %v18445_v12 = vld [vmem:[#allocation34_spill] sm:$0xff] }
 0x1d0   : > { %v3066_v26 = vsel %vm1064_vm2, %v2957_v63, 0  ;;  %8416 = vmatpush3.bf16.xpose.msra.mxu0 %v3024_v47  ;;  %v2917_v55 = vsel %vm864_vm5, %v12700_v53, %v12743_v29  ;;  %v12780_v57 = vor.u32 %v2963_v41, %v2960_v49  ;;  %v2966_v45 = vshrl.u32 %v2802_v61, 16  ;;  %3821 = vrot.lane.b32.xlu1 %v12550_v32, %s9361_s13  ;;  %v12809_v39 = vpop.permute.xlu0 %2710  ;;  %v12819_v49 = vld [vmem:[%s9453_s11 + $0xb8] sm:$0xff]  }
 0x1d1   : > { %v2969_v54 = vshll.u32 %v2802_v61, 16  ;;  %8614 = vmatpush3.bf16.xpose.msra.mxu1 %v3066_v26  ;;  %8806 = vmatprep.subr.msk.bf16.mxu0 %vm1064_vm2, %v2917_v55  ;;  %v18359_v38 = vshrl.u32 %v11832_v46, 16  ;;  %v18360_v53 = vshll.u32 %v11832_v46, 16  ;;  %v12796_v60 = vrot.slane %v3574_v36, 1  ;;  %18361 = vst [vmem:[#allocation256_spill] sm:$0xff] %v12819_v49  ;;  %v18363_v61 = vld [vmem:[#allocation119_spill] sm:$0xff] }
 0x1d2   : > { %8615 = vmatprep.subr.bf16.mxu1 %v18040_v30  ;;  %v17692_v19 = vshrl.u32 %v12799_v16, 16  ;;  %v12804_v24 = vrot.slane %v17691_v5, 1  ;;  %v2856_v10 = vrot.slane %v2854_v13, 2  ;;  %v2859_v51 = vrot.slane %v2857_v11, 3  ;;  %v18362_v13 = vld [vmem:[#allocation232_spill] sm:$0xff]  ;;  %v18377_v5 = vld [vmem:[#allocation257_spill] sm:$0xff] }
 0x1d3   : > { %v12785_v31 = vrot.slane %v18359_v38, 1  ;;  %v12792_v52 = vrot.slane %v18360_v53, 2  ;;  %v2776_v46 = vsel %vm812_vm4, %v12537_v9, %v12555_v35  ;;  %v2926_v32 = vshrl.u32 %v2792_v43, 16  ;;  %3827 = vrot.lane.b32.xlu0 %v12545_v48, %s9361_s13 }
 0x1d4   : > { %v12811_v25 = vor.u32 %v2923_v15, %v2920_v1  ;;  %v2929_v40 = vshll.u32 %v2792_v43, 16  ;;  %v2853_v56 = vsel %vm864_vm5, %v12718_v62, %v12766_v37  ;;  %v17690_v41 = vshll.u32 %v12819_v49, 16  ;;  %v18364_v1 = vld [vmem:[#allocation248_spill] sm:$0xff] }
 0x1d5   : > { %v2754_v35 = vsel %vm760_vm3, %v18363_v61, %v18362_v13  ;;  %v2968_v9 = vrot.slane %v2966_v45, 2  ;;  %v2971_v63 = vrot.slane %v2969_v54, 3  ;;  %v2965_v11 = vsel %vm864_vm5, %v2956_v7, %v12780_v57  ;;  %3825 = vrot.lane.b32.xlu1 %v18364_v1, %s9361_s13  ;;  %v12838_v45 = vpop.permute.xlu0 %3351  ;;  %v18369_v13 = vld [vmem:[#allocation237_spill] sm:$0xff] }
 0x1d6   : > { %v2862_v43 = vshrl.u32 %v2776_v46, 16  ;;  %v2865_v47 = vshll.u32 %v2776_v46, 16  ;;  %v2804_v48 = vsel %vm812_vm4, %v2754_v35, %v2703_v14  ;;  %v3584_v62 = vor.u32 %v17692_v19, %v12804_v24  ;;  %v2705_v14 = vpop.permute.xlu1 %2704  ;;  %v18370_v35 = vld [vmem:[#allocation131_spill] sm:$0xff] }
 0x1d7   : > { %v12833_v15 = vor.u32 %v2859_v51, %v2856_v10  ;;  %v2928_v26 = vrot.slane %v2926_v32, 2  ;;  %v2794_v55 = vsel %vm812_vm4, %v12678_v0, %v12684_v21  ;;  %v3027_v7 = vsel %vm1064_vm2, %v2853_v56, 0  ;;  %v18365_v10 = vld [vmem:[#allocation242_spill] sm:$0xff] }
 0x1d8   : > { %v2931_v54 = vrot.slane %v2929_v40, 3  ;;  %v3069_v38 = vsel %vm1064_vm2, %v2965_v11, 0  ;;  %8418 = vmatpush3.bf16.xpose.msra.mxu0 %v3027_v7  ;;  %v2925_v53 = vsel %vm864_vm5, %v12743_v29, %v12811_v25  ;;  %3831 = vrot.lane.b32.xlu0 %v18365_v10, %s9361_s13  ;;  %v12849_v51 = vrot.slane %v17690_v41, 1  ;;  %v18367_v32 = vld [vmem:[#allocation250_spill] sm:$0xff]  ;;  %v18371_v11 = vld [vmem:[#allocation244_spill] sm:$0xff] }
 0x1d9   : > { %v12851_v0 = vor.u32 %v2971_v63, %v2968_v9  ;;  %v2974_v21 = vshrl.u32 %v2804_v48, 16  ;;  %v2977_v46 = vshll.u32 %v2804_v48, 16  ;;  %8616 = vmatpush3.bf16.xpose.msra.mxu1 %v3069_v38  ;;  %8807 = vmatprep.subr.msk.bf16.mxu0 %vm1064_vm2, %v2925_v53  ;;  %v18368_v40 = vshll.u32 %v18367_v32, 16  ;;  %v18373_v48 = vld [vmem:[#allocation271_spill] sm:$0xff]  ;;  %v18375_v10 = vld [vmem:[#allocation230_spill] sm:$0xff]  ;;  %v12873_v41 = vpop.permute.xlu0 %3355 }
 0x1da   : > { %18366 = vst [vmem:[#allocation249_spill] sm:$0xff] %v12849_v51  ;;  %v2756_v29 = vsel %vm760_vm3, %v18370_v35, %v18369_v13  ;;  %8617 = vmatprep.subr.bf16.mxu1 %v18040_v30  ;;  %3829 = vrot.lane.b32.xlu1 %v18371_v11, %s9361_s13  ;;  %v12865_v63 = vsel %vm407_vm0, %v3584_v62, %v12849_v51  ;;  %v18374_v1 = vshrl.u32 %v11696_v17, 16  ;;  %v2864_v38 = vrot.slane %v2862_v43, 2  ;;  %v18376_v32 = vld [vmem:[#allocation246_spill] sm:$0xff]  ;;  %v18378_v62 = vld [vmem:[#allocation273_spill] sm:$0xff]  ;;  %v12893_v19 = vpop.permute.xlu1 %2708 }
 0x1db   : > { %v3791_v56 = vrot.slane %v18368_v40, 2  ;;  %18372 = vst [vmem:[#allocation262_spill] sm:$0xff] %v12865_v63  ;;  %v2867_v53 = vrot.slane %v2865_v47, 3  ;;  %v2778_v40 = vsel %vm812_vm4, %v18376_v32, %v18375_v10  ;;  %v2934_v13 = vshrl.u32 %v2794_v55, 16  ;;  %v18437_v63 = vld [vmem:[#allocation22_spill] sm:$0xff] }
 0x1dc   : > { %v3544_v7 = vor.u32 %v18374_v1, %v18373_v48  ;;  %v12875_v11 = vor.u32 %v2931_v54, %v2928_v26  ;;  %v2937_v9 = vshll.u32 %v2794_v55, 16  ;;  %3835 = vrot.lane.b32.xlu0 %v18377_v5, %s9361_s13  ;;  %v2861_v17 = vsel %vm864_vm5, %v12766_v37, %v12833_v15  ;;  %v18379_v26 = vld [vmem:[#allocation275_spill] sm:$0xff]  ;;  %v18381_v37 = vld [vmem:[#allocation276_spill] sm:$0xff] }
 0x1dd   : > { %v2976_v47 = vrot.slane %v2974_v21, 2  ;;  %v2979_v48 = vrot.slane %v2977_v46, 3  ;;  %v2973_v1 = vsel %vm864_vm5, %v12780_v57, %v12851_v0  ;;  %v18380_v55 = vshrl.u32 %v11742_v2, 16 }
 0x1de   : > { %v12884_v43 = vsel %vm407_vm0, %v3544_v7, %v18378_v62  ;;  %v2870_v10 = vshrl.u32 %v2778_v40, 16  ;;  %v2873_v5 = vshll.u32 %v2778_v40, 16  ;;  %v2806_v32 = vsel %vm812_vm4, %v2756_v29, %v2705_v14  ;;  %3833 = vrot.lane.b32.xlu1 %v12653_v34, %s9361_s13  ;;  %v12902_v7 = vpop.permute.xlu0 %3359  ;;  %v18382_v62 = vld [vmem:[#allocation243_spill] sm:$0xff] }
 0x1df   : > { %v3560_v54 = vor.u32 %v18380_v55, %v18379_v26  ;;  %v3576_v21 = vor.u32 %v3574_v36, %v18381_v37  ;;  %v12900_v46 = vor.u32 %v2867_v53, %v2864_v38  ;;  %v2936_v57 = vrot.slane %v2934_v13, 2  ;;  %v18384_v36 = vld [vmem:[#allocation251_spill] sm:$0xff] }
 0x1e0   : > { %v3030_v2 = vsel %vm1064_vm2, %v2861_v17, 0  ;;  %v2939_v14 = vrot.slane %v2937_v9, 3  ;;  %v3072_v29 = vsel %vm1064_vm2, %v2973_v1, 0  ;;  %v2933_v34 = vsel %vm864_vm5, %v12811_v25, %v12875_v11  ;;  %3839 = vrot.lane.b32.xlu0 %v18384_v36, %s9361_s13  ;;  %v12925_v25 = vpop.permute.xlu1 %3176 }
 0x1e1   : > { %v12907_v40 = vsel %vm407_vm0, %v3560_v54, %v18382_v62  ;;  %8420 = vmatpush3.bf16.xpose.msra.mxu0 %v3030_v2  ;;  %v12917_v38 = vsel %vm407_vm0, %v3576_v21, %v12804_v24  ;;  %v12919_v53 = vor.u32 %v2979_v48, %v2976_v47  ;;  %v2982_v13 = vshrl.u32 %v2806_v32, 16  ;;  %8618 = vmatpush3.bf16.xpose.msra.mxu1 %v3072_v29  ;;  %v12950_v29 = vld [vmem:[%s9453_s11 + $0xc0] ss:$0 sps:$4 sm:$0x33]  }
 0x1e2   : > { %18383 = vst [vmem:[#allocation254_spill] sm:$0xff] %v12907_v40  ;;  %18385 = vst [vmem:[#allocation245_spill] sm:$0xff] %v12917_v38  ;;  %v2985_v17 = vshll.u32 %v2806_v32, 16  ;;  %8808 = vmatprep.subr.msk.bf16.mxu0 %vm1064_vm2, %v2933_v34  ;;  %v3777_v9 = vsel %vm3701_vm7, %v12641_v42, %v12658_v50  ;;  %8619 = vmatprep.subr.bf16.mxu1 %v18040_v30  ;;  %v18387_v24 = vshrl.u32 %v12799_v16, 16  ;;  %v18388_v48 = vshll.u32 %v18358_v20, 16  ;;  %v12938_v37 = vpop.permute.xlu0 %3363  ;;  %v18392_v20 = vld [vmem:[#allocation258_spill] sm:$0xff] }
 0x1e3   : > { %18386 = vst [vmem:[#allocation260_spill] sm:$0xff] %v12925_v25  ;;  %3837 = vrot.lane.b32.xlu1 %v12698_v4, %s9361_s13  ;;  %v18389_v26 = vshrl.u32 %v12819_v49, 16  ;;  %v18390_v54 = vshll.u32 %v12819_v49, 16  ;;  %18391 = vst [vmem:[#allocation265_spill] sm:$0xff] %v12938_v37  ;;  %v3785_v21 = vsel %vm3701_vm7, %v12714_v59, %v12732_v3  ;;  %v3788_v4 = vor.u32 %v12792_v52, %v12785_v31  ;;  %v18411_v25 = vld [vmem:[#allocation6_spill] sm:$0xff]  ;;  %v18453_v40 = vld [vmem:[#allocation40_spill] sm:$0xff] }
 0x1e4   : > { %v3794_v47 = vrot.slane %v18387_v24, 1  ;;  %v3795_v1 = vrot.slane %v18388_v48, 2  ;;  %v3792_v2 = vor.u32 %v3791_v56, %v12796_v60  ;;  %v3773_v62 = vsel %vm3701_vm7, %v18392_v20, %v12641_v42  ;;  %3843 = vrot.lane.b32.xlu0 %v3777_v9, %s9361_s13  ;;  %v3230_v56 = vld [vmem:[%s9453_s11] sm:$0xc] }
 0x1e5   : > { %v3798_v55 = vrot.slane %v18389_v26, 1  ;;  %v3799_v32 = vrot.slane %v18390_v54, 2  ;;  %v2872_v34 = vrot.slane %v2870_v10, 2  ;;  %v2875_v36 = vrot.slane %v2873_v5, 3  ;;  %v18393_v26 = vld [vmem:[#allocation253_spill] sm:$0xff]  ;;  %v18394_v54 = vld [vmem:[#allocation146_spill] sm:$0xff]  ;;  %v12965_v5 = vpop.permute.xlu1 %3353 }
 0x1e6   : > { %v2940_v24 = vor.u32 %v2939_v14, %v2936_v57  ;;  %v2869_v48 = vsel %vm864_vm5, %v12833_v15, %v12900_v46  ;;  %v2758_v31 = vsel %vm760_vm3, %v18394_v54, %v18393_v26  ;;  %v2984_v52 = vrot.slane %v2982_v13, 2  ;;  %v12970_v14 = vpop.permute.xlu0 %3367 }
 0x1e7   : > { %v2987_v60 = vrot.slane %v2985_v17, 3  ;;  %v2981_v42 = vsel %vm864_vm5, %v12851_v0, %v12919_v53  ;;  %v2808_v10 = vsel %vm812_vm4, %v2758_v31, %v12771_v44  ;;  %3841 = vrot.lane.b32.xlu1 %v3773_v62, %s9361_s13  ;;  %v3796_v15 = vor.u32 %v3795_v1, %v3794_v47  ;;  %v9147_v1 = vld [vmem:[%s9453_s11 + $0x4] sm:$0xf] }
 0x1e8   : > { %v12968_v57 = vor.u32 %v3799_v32, %v3798_v55  ;;  %v3033_v13 = vsel %vm1064_vm2, %v2869_v48, 0  ;;  %v3781_v0 = vsel %vm3701_vm7, %v12658_v50, %v12714_v59  ;;  %v3803_v17 = vshrl.u32 %v12950_v29, 16  ;;  %3847 = vrot.lane.b32.xlu0 %v3785_v21, %s9361_s13 }
 0x1e9   : > { %v3806_v9 = vshll.u32 %v12950_v29, 16  ;;  %v2876_v44 = vor.u32 %v2875_v36, %v2872_v34  ;;  %v3075_v20 = vsel %vm1064_vm2, %v2981_v42, 0  ;;  %8422 = vmatpush3.bf16.xpose.msra.mxu0 %v3033_v13  ;;  %v2941_v47 = vsel %vm864_vm5, %v12875_v11, %v2940_v24  ;;  %v12987_v34 = vpop.permute.xlu1 %3357 }
 0x1ea   : > { %v8236_v55 = vcombine.low %v3230_v56, %v9147_v1  ;;  %v12983_v32 = vor.u32 %v2987_v60, %v2984_v52  ;;  %v2990_v62 = vshrl.u32 %v2808_v10, 16  ;;  %v2993_v50 = vshll.u32 %v2808_v10, 16  ;;  %8620 = vmatpush3.bf16.xpose.msra.mxu1 %v3075_v20  ;;  %8809 = vmatprep.subr.msk.bf16.mxu0 %vm1064_vm2, %v2941_v47  ;;  %v12991_v11 = vpop.permute.xlu0 %3371  ;;  %v9148_v60 = vld [vmem:[%s9453_s11 + $0x8] sm:$0xff]   ;;  %v18396_v10 = vld [vmem:[#allocation153_spill] sm:$0xff] }
 0x1eb   : > { %v3793_v59 = vsel %vm3701_vm7, %v3788_v4, %v3792_v2  ;;  %8621 = vmatprep.subr.bf16.mxu1 %v18040_v30  ;;  %3845 = vrot.lane.b32.xlu1 %v3781_v0, %s9361_s13  ;;  %v3789_v21 = vsel %vm3701_vm7, %v12732_v3, %v3788_v4  ;;  %v3805_v36 = vrot.slane %v3803_v17, 1  ;;  %v3808_v48 = vrot.slane %v3806_v9, 2  ;;  %v18395_v56 = vld [vmem:[#allocation239_spill] sm:$0xff] }
 0x1ec   : > { %3851 = vrot.lane.b32.xlu0 %v3793_v59, %s9361_s13  ;;  %v2877_v26 = vsel %vm864_vm5, %v12900_v46, %v2876_v44  ;;  %v3801_v31 = vsel %vm3701_vm7, %v3796_v15, %v12968_v57  ;;  %v3863_v52 = vrot.slane %v8236_v55, 2  ;;  %v3864_v42 = vrot.slane %v9148_v60, 2 }
 0x1ed   : > { %v2760_v13 = vsel %vm760_vm3, %v18396_v10, %v18395_v56  ;;  %v2992_v0 = vrot.slane %v2990_v62, 2  ;;  %v2995_v3 = vrot.slane %v2993_v50, 3  ;;  %v2989_v4 = vsel %vm864_vm5, %v12919_v53, %v12983_v32  ;;  %v13009_v17 = vpop.permute.xlu1 %3361  ;;  %v9150_v50 = vld [vmem:[%s9453_s11 + $0x18] sm:$0xff]  }
 0x1ee   : > { %v2810_v46 = vsel %vm812_vm4, %v2760_v13, %v12893_v19  ;;  %18397 = vst [vmem:[#allocation263_spill] sm:$0xff] %v13009_v17  ;;  %v13012_v9 = vpop.permute.xlu0 %3375  ;;  %v3036_v20 = vsel %vm1064_vm2, %v2877_v26, 0  ;;  %v3797_v47 = vsel %vm3701_vm7, %v3792_v2, %v3796_v15  ;;  %v3809_v1 = vor.u32 %v3808_v48, %v3805_v36  ;;  %v9149_v19 = vld [vmem:[%s9453_s11 + $0x10] sm:$0xff]   ;;  %v9152_v13 = vld [vmem:[%s9453_s11 + $0x20] sm:$0xff]  }
 0x1ef   : > { %3849 = vrot.lane.b32.xlu1 %v3789_v21, %s9361_s13  ;;  %v3078_v55 = vsel %vm1064_vm2, %v2989_v4, 0  ;;  %v2949_v53 = vsel %vm864_vm5, %v2940_v24, %v12745_v28  ;;  %v3866_v62 = vrot.slane %v9149_v19, 2  ;;  %v3868_v59 = vrot.slane %v9150_v50, 2  ;;  %v9151_v28 = vld [vmem:[%s9453_s11 + $0xdc] ss:$0 sps:$4 sm:$0x77]  }
 0x1f0   : > { %3855 = vrot.lane.b32.xlu0 %v3801_v31, %s9361_s13  ;;  %v2996_v21 = vor.u32 %v2995_v3, %v2992_v0  ;;  %v2998_v60 = vshrl.u32 %v2810_v46, 16  ;;  %v3001_v26 = vshll.u32 %v2810_v46, 16  ;;  %v3865_v2 = vsel %vm3862_vm8, %v3863_v52, %v3864_v42  ;;  %v18399_v24 = vld [vmem:[#allocation272_spill] sm:$0xff]  ;;  %v9153_v3 = vld [vmem:[%s9453_s11 + $0x28] sm:$0xff]  }
 0x1f1   : > { %8424 = vmatpush3.bf16.xpose.msra.mxu0 %v3036_v20  ;;  %v13024_v15 = vpop.permute.xlu1 %3365  ;;  %v2762_v36 = vsel %vm760_vm3, %v9151_v28, %v18399_v24  ;;  %v3810_v31 = vsel %vm3701_vm7, %v12968_v57, %v3809_v1  ;;  %v2885_v52 = vsel %vm864_vm5, %v2876_v44, %v12635_v23  ;;  %v3869_v56 = vsel %vm3862_vm8, %v3866_v62, %v3868_v59 }
 0x1f2   : > { %8622 = vmatpush3.bf16.xpose.msra.mxu1 %v3078_v55  ;;  %8810 = vmatprep.subr.msk.bf16.mxu0 %vm1064_vm2, %v2949_v53  ;;  %18398 = vst [vmem:[#allocation270_spill] sm:$0xff] %v13024_v15  ;;  %v13031_v48 = vpop.permute.xlu0 %3379  ;;  %v3870_v0 = vrot.slane %v9152_v13, 2  ;;  %v3872_v4 = vrot.slane %v9153_v3, 2  ;;  %v3000_v46 = vrot.slane %v2998_v60, 2  ;;  %v3003_v20 = vrot.slane %v3001_v26, 3  ;;  %v9155_v60 = vld [vmem:[%s9453_s11 + $0x38] sm:$0xff]  }
 0x1f3   : > { %8623 = vmatprep.subr.bf16.mxu1 %v18040_v30  ;;  %3853 = vrot.lane.b32.xlu1 %v3797_v47, %s9361_s13  ;;  %18400 = vst [vmem:[#allocation268_spill] sm:$0xff] %v13031_v48  ;;  %v2812_v47 = vsel %vm812_vm4, %v2762_v36, %v12809_v39  ;;  %v2997_v57 = vsel %vm864_vm5, %v12983_v32, %v2996_v21  ;;  %v3039_v44 = vsel %vm1064_vm2, %v2885_v52, 0  ;;  %v9154_v39 = vld [vmem:[%s9453_s11 + $0x30] sm:$0xff]   ;;  %v3876_v32 = vrot.slane %v9155_v60, 2  ;;  %v9156_v13 = vld [vmem:[%s9453_s11 + $0x40] sm:$0xff]   ;;  %v18441_v15 = vld [vmem:[#allocation25_spill] sm:$0xff] }
 0x1f4   : > { %3912 = vrot.lane.b32.xlu0 %v3865_v2, %s9365_s14  ;;  %v3867_v55 = vsel %vm3862_vm8, %v3864_v42, %v3866_v62  ;;  %v3006_v53 = vshrl.u32 %v2812_v47, 16  ;;  %v3081_v19 = vsel %vm1064_vm2, %v2997_v57, 0  ;;  %v3874_v50 = vrot.slane %v9154_v39, 2  ;;  %v9160_v39 = vld [vmem:[%s9453_s11 + $0x58] sm:$0xff]   ;;  %v18449_v48 = vld [vmem:[#allocation36_spill] sm:$0xff] }
 0x1f5   : > { %v13045_v1 = vpop.permute.xlu1 %3369  ;;  %v3004_v26 = vor.u32 %v3003_v20, %v3000_v46  ;;  %v3009_v2 = vshll.u32 %v2812_v47, 16  ;;  %v3873_v28 = vsel %vm3862_vm8, %v3870_v0, %v3872_v4  ;;  %v3871_v62 = vsel %vm3862_vm8, %v3868_v59, %v3870_v0  ;;  %v9157_v46 = vld [vmem:[%s9453_s11 + $0x48] sm:$0xff]   ;;  %v9158_v59 = vld [vmem:[%s17297_s1 + $0x2] sm:$0x1] }
 0x1f6   : > { %v13048_v23 = vpop.permute.xlu0 %3383  ;;  %v3008_v36 = vrot.slane %v3006_v53, 2  ;;  %v3878_v3 = vrot.slane %v9156_v13, 2  ;;  %v3880_v20 = vrot.slane %v9157_v46, 2  ;;  %v9159_v53 = vld [vmem:[%s9453_s11 + $0x50] sm:$0xff]   ;;  %v3884_v60 = vrot.slane %v9160_v39, 2 }
 0x1f7   : > { %3857 = vrot.lane.b32.xlu1 %v3810_v31, %s9361_s13  ;;  %v3877_v31 = vsel %vm3862_vm8, %v3874_v50, %v3876_v32  ;;  %v3011_v52 = vrot.slane %v3009_v2, 3  ;;  %v18412_v10 = vshll.u32 %v18411_v25, 16  ;;  %v3904_v35 = vrot.slane %v12759_v33, 2 }
 0x1f8   : > { %3916 = vrot.lane.b32.xlu0 %v3869_v56, %s9365_s14  ;;  %v3005_v56 = vsel %vm864_vm5, %v2996_v21, %v3004_v26  ;;  %v3875_v21 = vsel %vm3862_vm8, %v3872_v4, %v3874_v50  ;;  %v3879_v50 = vsel %vm3862_vm8, %v3876_v32, %v3878_v3 }
 0x1f9   : > { %8426 = vmatpush3.bf16.xpose.msra.mxu0 %v3039_v44  ;;  %v13057_v24 = vpop.permute.xlu1 %3373  ;;  %v3084_v57 = vsel %vm1064_vm2, %v3005_v56, 0  ;;  %v3012_v44 = vor.u32 %v3011_v52, %v3008_v36  ;;  %v9161_v36 = vld [vmem:[%s9453_s11 + $0x60] sm:$0xff]   ;;  %v9162_v52 = vld [vmem:[%s9453_s11 + $0x68] sm:$0xff]  }
 0x1fa   : > { %8624 = vmatpush3.bf16.xpose.msra.mxu1 %v3081_v19  ;;  %v13061_v42 = vpop.permute.xlu0 %3387  ;;  %v3882_v19 = vrot.slane %v9159_v53, 2  ;;  %v3888_v56 = vrot.slane %v9162_v52, 2 }
 0x1fb   : > { %8625 = vmatprep.subr.bf16.mxu1 %v18040_v30  ;;  %3914 = vrot.lane.b32.xlu1 %v3867_v55, %s9365_s14  ;;  %18401 = vst [vmem:[#allocation252_spill] sm:$0xff] %v13061_v42  ;;  %v3881_v55 = vsel %vm3862_vm8, %v3878_v3, %v3880_v20 }
 0x1fc   : > { %3920 = vrot.lane.b32.xlu0 %v3873_v28, %s9365_s14  ;;  %v3013_v28 = vsel %vm864_vm5, %v3004_v26, %v3012_v44  ;;  %v3883_v32 = vsel %vm3862_vm8, %v3880_v20, %v3882_v19  ;;  %v9164_v44 = vld [vmem:[%s9453_s11 + $0x78] sm:$0xff]  }
 0x1fd   : > { %v13069_v47 = vpop.permute.xlu1 %3377  ;;  %v3087_v3 = vsel %vm1064_vm2, %v3013_v28, 0 }
 0x1fe   : > { %18402 = vst [vmem:[#allocation232_spill] sm:$0xff] %v13069_v47  ;;  %v13076_v0 = vpop.permute.xlu0 %3391 }
 0x1ff   : > { %3918 = vrot.lane.b32.xlu1 %v3871_v62, %s9365_s14  ;;  %18403 = vst [vmem:[#allocation248_spill] sm:$0xff] %v13076_v0  ;;  %v3885_v62 = vsel %vm3862_vm8, %v3882_v19, %v3884_v60 }
 0x200   : > { %8428 = vmatmul.mubr.msk.bf16.vlgmr.msra.gmra.mrb[0].mxu0 %vm1064_vm2, %v9158_v59  ;;  %3924 = vrot.lane.b32.xlu0 %v3877_v31, %s9365_s14  ;;  %v3886_v31 = vrot.slane %v9161_v36, 2 }
 0x201   : > { %v13084_v2 = vpop.permute.xlu1 %3381 }
 0x202   : > { %8626 = vmatpush3.bf16.xpose.msra.mxu1 %v3084_v57  ;;  %18404 = vst [vmem:[#allocation242_spill] sm:$0xff] %v13084_v2  ;;  %v13088_v4 = vpop.permute.xlu0 %3395  ;;  %v3889_v26 = vsel %vm3862_vm8, %v3886_v31, %v3888_v56  ;;  %v3887_v19 = vsel %vm3862_vm8, %v3884_v60, %v3886_v31  ;;  %v9167_v31 = vld [vmem:[%s9453_s11 + $0x90] sm:$0xff]  }
 0x203   : > { %8627 = vmatprep.subr.bf16.mxu1 %v18040_v30  ;;  %3922 = vrot.lane.b32.xlu1 %v3875_v21, %s9365_s14  ;;  %18405 = vst [vmem:[#allocation250_spill] sm:$0xff] %v13088_v4  ;;  %v9163_v21 = vld [vmem:[%s9453_s11 + $0x70] sm:$0xff]  }
 0x204   : > { %3928 = vrot.lane.b32.xlu0 %v3881_v55, %s9365_s14  ;;  %v3890_v57 = vrot.slane %v9163_v21, 2  ;;  %v3892_v55 = vrot.slane %v9164_v44, 2  ;;  %v9168_v21 = vld [vmem:[%s9453_s11 + $0x98] sm:$0xff]  }
 0x205   : > { %v13096_v13 = vpop.permute.xlu1 %3385  ;;  %v3900_v44 = vrot.slane %v9168_v21, 2 }
 0x206   : > { %v13099_v46 = vpop.permute.xlu0 %3650  ;;  %v3893_v39 = vsel %vm3862_vm8, %v3890_v57, %v3892_v55 }
 0x207   : > { %3926 = vrot.lane.b32.xlu1 %v3879_v50, %s9365_s14  ;;  %v9165_v50 = vld [vmem:[%s9453_s11 + $0x80] sm:$0xff]  }
 0x208   : > { %3932 = vrot.lane.b32.xlu0 %v3885_v62, %s9365_s14  ;;  %v3894_v28 = vrot.slane %v9165_v50, 2  ;;  %v9166_v62 = vld [vmem:[%s9453_s11 + $0x88] sm:$0xff]   ;;  %v18409_v50 = vld [vmem:[#allocation5_spill] sm:$0xff] }
 0x209   : > { %v13107_v53 = vpop.permute.xlu1 %3389  ;;  %v3896_v36 = vrot.slane %v9166_v62, 2 }
 0x20a   : > { %8628 = vmatpush3.bf16.xpose.msra.mxu1 %v3087_v3  ;;  %18406 = vst [vmem:[#allocation237_spill] sm:$0xff] %v13107_v53  ;;  %v13111_v20 = vpop.permute.xlu0 %3654  ;;  %v3891_v3 = vsel %vm3862_vm8, %v3888_v56, %v3890_v57  ;;  %v4435_v56 = vrot.slane %v18412_v10, 2  ;;  %v3895_v54 = vsel %vm3862_vm8, %v3892_v55, %v3894_v28  ;;  %v3902_v10 = vrot.slane %v9169_v6, 2 }
 0x20b   : > { %3930 = vrot.lane.b32.xlu1 %v3883_v32, %s9365_s14  ;;  %8633 = vmatprep.subr.bf16.mxu1 %v18040_v30  ;;  %v3897_v60 = vsel %vm3862_vm8, %v3894_v28, %v3896_v36  ;;  %v3906_v28 = vrot.slane %v12799_v16, 2 }
 0x20c   : > { %3936 = vrot.lane.b32.xlu0 %v3889_v26, %s9365_s14  ;;  %v3898_v26 = vrot.slane %v9167_v31, 2  ;;  %v18415_v31 = vshrl.u32 %v18411_v25, 16  ;;  %v3905_v33 = vsel %vm3862_vm8, %v3902_v10, %v3904_v35 }
 0x20d   : > { %v13118_v52 = vpop.permute.xlu1 %3393  ;;  %v3907_v16 = vsel %vm3862_vm8, %v3904_v35, %v3906_v28 }
 0x20e   : > { %18407 = vst [vmem:[#allocation244_spill] sm:$0xff] %v13118_v52  ;;  %v13121_v32 = vpop.permute.xlu0 %3658  ;;  %v4434_v27 = vrot.slane %v18415_v31, 1  ;;  %v3899_v55 = vsel %vm3862_vm8, %v3896_v36, %v3898_v26  ;;  %v3903_v36 = vsel %vm3862_vm8, %v3900_v44, %v3902_v10  ;;  %v18439_v52 = vld [vmem:[#allocation27_spill] sm:$0xff] }
 0x20f   : > { %3934 = vrot.lane.b32.xlu1 %v3887_v19, %s9365_s14  ;;  %18408 = vst [vmem:[#allocation271_spill] sm:$0xff] %v13121_v32  ;;  %v18410_v19 = vshrl.u32 %v18409_v50, 16  ;;  %v18476_v32 = vld [vmem:[#allocation67_spill] sm:$0xff] }
 0x210   : > { %3940 = vrot.lane.b32.xlu0 %v3893_v39, %s9365_s14 }
 0x211   : > { %8630 = vmatmul.mubr.msk.bf16.vlgmr.msra.gmra.mrb[0].mxu1 %vm1064_vm2, %v9158_v59  ;;  %v4430_v62 = vrot.slane %v18410_v19, 1  ;;  %v13135_v57 = vpop.permute.xlu1 %3397  ;;  %v18414_v59 = vshll.u32 %v18409_v50, 16  ;;  %v3901_v19 = vsel %vm3862_vm8, %v3898_v26, %v3900_v44 }
 0x212   : > { %8649 = vmatprep.mubr.msk.bf16.mxu1 %vm9363_vm6, %v18040_v30  ;;  %18413 = vst [vmem:[#allocation230_spill] sm:$0xff] %v13135_v57  ;;  %v13142_v21 = vpop.permute.xlu0 %3662 }
 0x213   : > { %3938 = vrot.lane.b32.xlu1 %v3891_v3, %s9365_s14  ;;  %v4431_v39 = vrot.slane %v18414_v59, 2  ;;  %18416 = vst [vmem:[#allocation246_spill] sm:$0xff] %v13142_v21  ;;  %v13154_v59 = vor.u32 %v4435_v56, %v4434_v27  ;;  %v18444_v21 = vld [vmem:[#allocation29_spill] sm:$0xff] }
 0x214   : > { %3944 = vrot.lane.b32.xlu0 %v3897_v60, %s9365_s14 }
 0x215   : > { %v13149_v61 = vpop.permute.xlu1 %3652  ;;  %v13152_v3 = vor.u32 %v4431_v39, %v4430_v62  ;;  %v3910_v39 = vrot.slane %v12950_v29, 2 }
 0x216   : > { %v13156_v31 = vpop.permute.xlu0 %3666 }
 0x217   : > { %3942 = vrot.lane.b32.xlu1 %v3895_v54, %s9365_s14  ;;  %v13163_v6 = vsel %vm3701_vm7, %v13152_v3, %v13154_v59  ;;  %v3908_v54 = vrot.slane %v12819_v49, 2  ;;  %v18434_v49 = vld [vmem:[#allocation18_spill] sm:$0xff] }
 0x218   : > { %3948 = vrot.lane.b32.xlu0 %v3901_v19, %s9365_s14 }
 0x219   : > { %v13168_v60 = vpop.permute.xlu1 %3656  ;;  %v3909_v26 = vsel %vm3862_vm8, %v3906_v28, %v3908_v54  ;;  %v3911_v10 = vsel %vm3862_vm8, %v3908_v54, %v3910_v39  ;;  %v18422_v54 = vld [vmem:[#allocation10_spill] sm:$0xff]  ;;  %v18426_v39 = vld [vmem:[#allocation12_spill] sm:$0xff] }
 0x21a   : > { %v13171_v27 = vpop.permute.xlu0 %3670 }
 0x21b   : > { %3946 = vrot.lane.b32.xlu1 %v3899_v55, %s9365_s14  ;;  %v18420_v55 = vld [vmem:[#allocation135_spill] sm:$0xff] }
 0x21c   : > { %3952 = vrot.lane.b32.xlu0 %v3905_v33, %s9365_s14 }
 0x21d   : > { %v13176_v62 = vpop.permute.xlu1 %3660 }
 0x21e   : > { %18417 = vst [vmem:[#allocation257_spill] sm:$0xff] %v13176_v62  ;;  %v13179_v56 = vpop.permute.xlu0 %3674  ;;  %v18451_v62 = vld [vmem:[#allocation43_spill] sm:$0xff] }
 0x21f   : > { %3950 = vrot.lane.b32.xlu1 %v3903_v36, %s9365_s14 }
 0x220   : > { %3956 = vrot.lane.b32.xlu0 %v3909_v26, %s9365_s14  ;;  %v18424_v26 = vld [vmem:[#allocation8_spill] sm:$0xff] }
 0x221   : > { %v13184_v19 = vpop.permute.xlu1 %3664 }
 0x222   : > { %18418 = vst [vmem:[#allocation273_spill] sm:$0xff] %v13184_v19  ;;  %v13187_v44 = vpop.permute.xlu0 %3678 }
 0x223   : > { %3954 = vrot.lane.b32.xlu1 %v3907_v16, %s9365_s14  ;;  %18419 = vst [vmem:[#allocation275_spill] sm:$0xff] %v13187_v44 }
 0x224   : > { %4318 = vrot.lane.b32.xlu0 %v18420_v55, %s9364_s6  ;;  %v18432_v55 = vld [vmem:[#allocation21_spill] sm:$0xff] }
 0x225   : > { %v13192_v33 = vpop.permute.xlu1 %3668 }
 0x226   : > { %v13195_v35 = vpop.permute.xlu0 %3682 }
 0x227   : > { %3958 = vrot.lane.b32.xlu1 %v3911_v10, %s9365_s14  ;;  %v18428_v10 = vld [vmem:[#allocation11_spill] sm:$0xff] }
 0x228   : > { %4322 = vrot.lane.b32.xlu0 %v18411_v25, %s9364_s6 }
 0x229   : > { %v13199_v29 = vpop.permute.xlu1 %3672 }
 0x22a   : > { %v13203_v28 = vpop.permute.xlu0 %3686 }
 0x22b   : > { %4320 = vrot.lane.b32.xlu1 %v18409_v50, %s9364_s6  ;;  %18421 = vst [vmem:[#allocation276_spill] sm:$0xff] %v13203_v28  ;;  %v18474_v28 = vld [vmem:[#allocation64_spill] sm:$0xff] }
 0x22c   : > { %4326 = vrot.lane.b32.xlu0 %v18422_v54, %s9364_s6 }
 0x22d   : > { %v13207_v36 = vpop.permute.xlu1 %3676 }
 0x22e   : > { %18423 = vst [vmem:[#allocation243_spill] sm:$0xff] %v13207_v36  ;;  %v13211_v16 = vpop.permute.xlu0 %3690  ;;  %v9011_v36 = vld [vmem:[%s9453_s11 + $0xc8] ss:$0 sps:$4 sm:$0x33]  }
 0x22f   : > { %4324 = vrot.lane.b32.xlu1 %v18424_v26, %s9364_s6  ;;  %18425 = vst [vmem:[#allocation251_spill] sm:$0xff] %v13211_v16  ;;  %v18443_v16 = vld [vmem:[#allocation31_spill] sm:$0xff] }
 0x230   : > { %4330 = vrot.lane.b32.xlu0 %v18426_v39, %s9364_s6 }
 0x231   : > { %v13215_v25 = vpop.permute.xlu1 %3680 }
 0x232   : > { %18427 = vst [vmem:[#allocation258_spill] sm:$0xff] %v13215_v25  ;;  %v13219_v50 = vpop.permute.xlu0 %3694 }
 0x233   : > { %4328 = vrot.lane.b32.xlu1 %v18428_v10, %s9364_s6  ;;  %18429 = vst [vmem:[#allocation253_spill] sm:$0xff] %v13219_v50  ;;  %v18435_v50 = vld [vmem:[#allocation23_spill] sm:$0xff] }
 0x234   : > { %4334 = vrot.lane.b32.xlu0 %v18430_v58, %s9364_s6 }
 0x235   : > { %v13223_v8 = vpop.permute.xlu1 %3684 }
 0x236   : > { %v13227_v18 = vpop.permute.xlu0 %3811 }
 0x237   : > { %4332 = vrot.lane.b32.xlu1 %v18431_v22, %s9364_s6 }
 0x238   : > { %4338 = vrot.lane.b32.xlu0 %v18432_v55, %s9364_s6 }
 0x239   : > { %v13231_v57 = vpop.permute.xlu1 %3688 }
 0x23a   : > { %18433 = vst [vmem:[#allocation239_spill] sm:$0xff] %v13231_v57  ;;  %v13235_v51 = vpop.permute.xlu0 %3815 }
 0x23b   : > { %4336 = vrot.lane.b32.xlu1 %v18434_v49, %s9364_s6 }
 0x23c   : > { %4342 = vrot.lane.b32.xlu0 %v18435_v50, %s9364_s6 }
 0x23d   : > { %v13239_v4 = vpop.permute.xlu1 %3692 }
 0x23e   : > { %18436 = vst [vmem:[#allocation272_spill] sm:$0xff] %v13239_v4  ;;  %v13243_v19 = vpop.permute.xlu0 %3819 }
 0x23f   : > { %4340 = vrot.lane.b32.xlu1 %v18437_v63, %s9364_s6  ;;  %18438 = vst [vmem:[#allocation5_spill] sm:$0xff] %v13243_v19  ;;  %v18463_v19 = vld [vmem:[#allocation59_spill] sm:$0xff] }
 0x240   : > { %4346 = vrot.lane.b32.xlu0 %v18439_v52, %s9364_s6  ;;  %v18501_v52 = vshrl.u32 %v18428_v10, 16 }
 0x241   : > { %v13247_v38 = vpop.permute.xlu1 %3696 }
 0x242   : > { %18440 = vst [vmem:[#allocation6_spill] sm:$0xff] %v13247_v38  ;;  %v13251_v25 = vpop.permute.xlu0 %3823  ;;  %v18446_v38 = vld [vmem:[#allocation32_spill] sm:$0xff] }
 0x243   : > { %4344 = vrot.lane.b32.xlu1 %v18441_v15, %s9364_s6  ;;  %18442 = vst [vmem:[#allocation10_spill] sm:$0xff] %v13251_v25  ;;  %v18447_v25 = vld [vmem:[#allocation38_spill] sm:$0xff] }
 0x244   : > { %4350 = vrot.lane.b32.xlu0 %v18443_v16, %s9364_s6  ;;  %v18465_v16 = vld [vmem:[#allocation58_spill] sm:$0xff] }
 0x245   : > { %v13255_v4 = vpop.permute.xlu1 %3813 }
 0x246   : > { %v3828_v2 = vpop.permute.xlu0 %3827 }
 0x247   : > { %4348 = vrot.lane.b32.xlu1 %v18444_v21, %s9364_s6 }
 0x248   : > { %4354 = vrot.lane.b32.xlu0 %v18445_v12, %s9364_s6  ;;  %v18456_v12 = vld [vmem:[#allocation55_spill] sm:$0xff] }
 0x249   : > { %v13261_v0 = vpop.permute.xlu1 %3817 }
 0x24a   : > { %v13265_v37 = vpop.permute.xlu0 %3831 }
 0x24b   : > { %4352 = vrot.lane.b32.xlu1 %v18446_v38, %s9364_s6  ;;  %v18461_v38 = vld [vmem:[#allocation56_spill] sm:$0xff] }
 0x24c   : > { %4358 = vrot.lane.b32.xlu0 %v18447_v25, %s9364_s6 }
 0x24d   : > { %v13269_v44 = vpop.permute.xlu1 %3821 }
 0x24e   : > { %18448 = vst [vmem:[#allocation8_spill] sm:$0xff] %v13269_v44  ;;  %v13273_v57 = vpop.permute.xlu0 %3835  ;;  %v18455_v44 = vld [vmem:[#allocation44_spill] sm:$0xff] }
 0x24f   : > { %4356 = vrot.lane.b32.xlu1 %v18449_v48, %s9364_s6  ;;  %18450 = vst [vmem:[#allocation12_spill] sm:$0xff] %v13273_v57 }
 0x250   : > { %4362 = vrot.lane.b32.xlu0 %v18451_v62, %s9364_s6 }
 0x251   : > { %v13278_v53 = vpop.permute.xlu1 %3825 }
 0x252   : > { %18452 = vst [vmem:[#allocation11_spill] sm:$0xff] %v13278_v53  ;;  %v13282_v17 = vpop.permute.xlu0 %3839  ;;  %v18457_v53 = vld [vmem:[#allocation54_spill] sm:$0xff] }
 0x253   : > { %4360 = vrot.lane.b32.xlu1 %v18453_v40, %s9364_s6  ;;  %18454 = vst [vmem:[#allocation17_spill] sm:$0xff] %v13282_v17  ;;  %v18459_v17 = vld [vmem:[#allocation57_spill] sm:$0xff] }
 0x254   : > { %4366 = vrot.lane.b32.xlu0 %v9011_v36, %s9364_s6 }
 0x255   : > { %v13285_v25 = vpop.permute.xlu1 %3829 }
 0x256   : > { %v13289_v48 = vpop.permute.xlu0 %3843 }
 0x257   : > { %4364 = vrot.lane.b32.xlu1 %v18455_v44, %s9364_s6 }
 0x258   : > { %4379 = vrot.lane.b32.xlu0 %v18456_v12, %s9360_s12 }
 0x259   : > { %v13293_v62 = vpop.permute.xlu1 %3833 }
 0x25a   : > { %v13297_v40 = vpop.permute.xlu0 %3847 }
 0x25b   : > { %4377 = vrot.lane.b32.xlu1 %v18457_v53, %s9360_s12  ;;  %18458 = vst [vmem:[#allocation16_spill] sm:$0xff] %v13297_v40  ;;  %v18467_v40 = vld [vmem:[#allocation61_spill] sm:$0xff] }
 0x25c   : > { %4383 = vrot.lane.b32.xlu0 %v18459_v17, %s9360_s12 }
 0x25d   : > { %v13301_v36 = vpop.permute.xlu1 %3837 }
 0x25e   : > { %18460 = vst [vmem:[#allocation21_spill] sm:$0xff] %v13301_v36  ;;  %v13305_v44 = vpop.permute.xlu0 %3851  ;;  %v18468_v36 = vld [vmem:[#allocation60_spill] sm:$0xff] }
 0x25f   : > { %4381 = vrot.lane.b32.xlu1 %v18461_v38, %s9360_s12  ;;  %18462 = vst [vmem:[#allocation18_spill] sm:$0xff] %v13305_v44  ;;  %v18469_v44 = vld [vmem:[#allocation63_spill] sm:$0xff] }
 0x260   : > { %4387 = vrot.lane.b32.xlu0 %v18463_v19, %s9360_s12 }
 0x261   : > { %v13309_v12 = vpop.permute.xlu1 %3841 }
 0x262   : > { %18464 = vst [vmem:[#allocation23_spill] sm:$0xff] %v13309_v12  ;;  %v13313_v53 = vpop.permute.xlu0 %3855  ;;  %v18471_v12 = vld [vmem:[#allocation62_spill] sm:$0xff] }
 0x263   : > { %4385 = vrot.lane.b32.xlu1 %v18465_v16, %s9360_s12  ;;  %18466 = vst [vmem:[#allocation22_spill] sm:$0xff] %v13313_v53  ;;  %v18472_v53 = vld [vmem:[#allocation65_spill] sm:$0xff] }
 0x264   : > { %4391 = vrot.lane.b32.xlu0 %v18467_v40, %s9360_s12 }
 0x265   : > { %v13317_v17 = vpop.permute.xlu1 %3845 }
 0x266   : > { %v3913_v38 = vpop.permute.xlu0 %3912 }
 0x267   : > { %4389 = vrot.lane.b32.xlu1 %v18468_v36, %s9360_s12 }
 0x268   : > { %4395 = vrot.lane.b32.xlu0 %v18469_v44, %s9360_s12 }
 0x269   : > { %v13323_v19 = vpop.permute.xlu1 %3849 }
 0x26a   : > { %18470 = vst [vmem:[#allocation25_spill] sm:$0xff] %v13323_v19  ;;  %v13327_v16 = vpop.permute.xlu0 %3916  ;;  %v18478_v19 = vld [vmem:[#allocation66_spill] sm:$0xff] }
 0x26b   : > { %4393 = vrot.lane.b32.xlu1 %v18471_v12, %s9360_s12  ;;  %v18479_v12 = vld [vmem:[#allocation233_spill] sm:$0xff] }
 0x26c   : > { %4399 = vrot.lane.b32.xlu0 %v18472_v53, %s9360_s12  ;;  %v3962_v47 = vsel %vm760_vm3, %v12838_v45, %v18479_v12 }
 0x26d   : > { %v13331_v40 = vpop.permute.xlu1 %3853 }
 0x26e   : > { %18473 = vst [vmem:[#allocation55_spill] sm:$0xff] %v13331_v40  ;;  %v13335_v36 = vpop.permute.xlu0 %3920  ;;  %v18481_v40 = vld [vmem:[#allocation69_spill] sm:$0xff] }
 0x26f   : > { %4397 = vrot.lane.b32.xlu1 %v18474_v28, %s9360_s12  ;;  %18475 = vst [vmem:[#allocation54_spill] sm:$0xff] %v13335_v36  ;;  %v4033_v28 = vsel %vm812_vm4, %v3962_v47, %v13099_v46  ;;  %v18482_v36 = vld [vmem:[#allocation266_spill] sm:$0xff]  ;;  %v18483_v47 = vld [vmem:[#allocation68_spill] sm:$0xff] }
 0x270   : > { %4403 = vrot.lane.b32.xlu0 %v18476_v32, %s9360_s12  ;;  %v3986_v32 = vsel %vm760_vm3, %v12970_v14, %v18482_v36  ;;  %v18484_v14 = vld [vmem:[#allocation71_spill] sm:$0xff] }
 0x271   : > { %v13339_v44 = vpop.permute.xlu1 %3857 }
 0x272   : > { %18477 = vst [vmem:[#allocation57_spill] sm:$0xff] %v13339_v44  ;;  %v13346_v53 = vpop.permute.xlu0 %3924  ;;  %v4049_v44 = vsel %vm812_vm4, %v3986_v32, %v13156_v31  ;;  %v18487_v32 = vld [vmem:[#allocation7_spill] sm:$0xff] }
 0x273   : > { %4401 = vrot.lane.b32.xlu1 %v18478_v19, %s9360_s12  ;;  %18480 = vst [vmem:[#allocation56_spill] sm:$0xff] %v13346_v53  ;;  %v4081_v19 = vsel %vm1064_vm2, %v4033_v28, %v13227_v18  ;;  %v4097_v46 = vsel %vm1064_vm2, %v4049_v44, %v3828_v2  ;;  %v18486_v28 = vld [vmem:[#allocation76_spill] sm:$0xff]  ;;  %v9170_v2 = vld [vmem:[%s9453_s11 + $0xc8] ss:$0 sps:$4 sm:$0x77]  }
 0x274   : > { %4407 = vrot.lane.b32.xlu0 %v18481_v40, %s9360_s12  ;;  %v4130_v45 = vsel %vm4128_vm9, %v4081_v19, %v3913_v38  ;;  %v18485_v38 = vld [vmem:[#allocation70_spill] sm:$0xff]  ;;  %v4375_v44 = vrot.slane %v9170_v2, 1  ;;  %v18488_v19 = vshrl.u32 %v18487_v32, 16  ;;  %v18495_v2 = vld [vmem:[#allocation81_spill] sm:$0xff] }
 0x275   : > { %v3915_v12 = vpop.permute.xlu1 %3914  ;;  %v4182_v18 = vsel %vm4178_vm10, %v4130_v45, 0 }
 0x276   : > { %v3929_v40 = vpop.permute.xlu0 %3928 }
 0x277   : > { %4405 = vrot.lane.b32.xlu1 %v18483_v47, %s9360_s12  ;;  %v4146_v53 = vsel %vm4128_vm9, %v4097_v46, %v3929_v40  ;;  %v4427_v47 = vrot.slane %v18488_v19, 1  ;;  %v18489_v46 = vshll.u32 %v18487_v32, 16  ;;  %v18496_v19 = vld [vmem:[#allocation264_spill] sm:$0xff] }
 0x278   : > { %4411 = vrot.lane.b32.xlu0 %v18484_v14, %s9360_s12  ;;  %8811 = vmatprep.subr.msk.bf16.mxu0 %vm4178_vm10, %v4146_v53  ;;  %v18490_v53 = vshrl.u32 %v18424_v26, 16  ;;  %v18491_v14 = vshll.u32 %v18424_v26, 16  ;;  %v3965_v32 = vsel %vm760_vm3, %v12965_v5, %v18496_v19  ;;  %v4446_v5 = vrot.slane %v18501_v52, 1 }
 0x279   : > { %v13368_v31 = vpop.permute.xlu1 %3918  ;;  %8439 = vmatpush3.bf16.xpose.msra.mxu0 %v4182_v18  ;;  %v4428_v45 = vrot.slane %v18489_v46, 2  ;;  %v18497_v46 = vld [vmem:[#allocation77_spill] sm:$0xff]  ;;  %v18502_v19 = vshll.u32 %v18428_v10, 16 }
 0x27a   : > { %v3933_v36 = vpop.permute.xlu0 %3932  ;;  %v4438_v40 = vrot.slane %v18490_v53, 1  ;;  %v4439_v18 = vrot.slane %v18491_v14, 2  ;;  %v4376_v53 = vsel %vm660_vm1, %v18497_v46, %v4375_v44 }
 0x27b   : > { %4409 = vrot.lane.b32.xlu1 %v18485_v38, %s9360_s12  ;;  %v18493_v38 = vld [vmem:[#allocation73_spill] sm:$0xff]  ;;  %v4429_v57 = vor.u32 %v4428_v45, %v4427_v47  ;;  %v4447_v46 = vrot.slane %v18502_v19, 2  ;;  %v18503_v47 = vld [vmem:[#allocation259_spill] sm:$0xff] }
 0x27c   : > { %4415 = vrot.lane.b32.xlu0 %v18486_v28, %s9360_s12  ;;  %v13396_v26 = vor.u32 %v4439_v18, %v4438_v40  ;;  %v3968_v45 = vsel %vm760_vm3, %v12873_v41, %v18503_v47  ;;  %v4035_v40 = vsel %vm812_vm4, %v3965_v32, %v13149_v61  ;;  %v18504_v18 = vld [vmem:[#allocation231_spill] sm:$0xff] }
 0x27d   : > { %v13383_v42 = vpop.permute.xlu1 %3922  ;;  %v4083_v41 = vsel %vm1064_vm2, %v4035_v40, %v13255_v4  ;;  %v13443_v47 = vor.u32 %v4447_v46, %v4446_v5  ;;  %v18510_v46 = vshrl.u32 %v18431_v22, 16 }
 0x27e   : > { %18492 = vst [vmem:[#allocation59_spill] sm:$0xff] %v13383_v42  ;;  %v13387_v28 = vpop.permute.xlu0 %3936  ;;  %v18498_v42 = vld [vmem:[#allocation79_spill] sm:$0xff]  ;;  %v4132_v32 = vsel %vm4128_vm9, %v4083_v41, %v3915_v12  ;;  %v18513_v41 = vshll.u32 %v18430_v58, 16 }
 0x27f   : > { %4413 = vrot.lane.b32.xlu1 %v18493_v38, %s9360_s12  ;;  %18494 = vst [vmem:[#allocation58_spill] sm:$0xff] %v13387_v28  ;;  %v18499_v38 = vshrl.u32 %v18422_v54, 16 }
 0x280   : > { %4419 = vrot.lane.b32.xlu0 %v18495_v2, %s9360_s12  ;;  %v18500_v2 = vshll.u32 %v18422_v54, 16  ;;  %v3992_v54 = vsel %vm760_vm3, %v12991_v11, %v18504_v18  ;;  %v4433_v11 = vsel %vm3701_vm7, %v4429_v57, %v13152_v3  ;;  %v4184_v18 = vsel %vm4178_vm10, %v4132_v32, 0 }
 0x281   : > { %v13398_v14 = vpop.permute.xlu1 %3926  ;;  %v4442_v28 = vrot.slane %v18499_v38, 1  ;;  %v18505_v38 = vld [vmem:[#allocation241_spill] sm:$0xff]  ;;  %v4053_v57 = vsel %vm812_vm4, %v3992_v54, %v13171_v27  ;;  %v18509_v27 = vshll.u32 %v18426_v39, 16  ;;  %v4454_v54 = vrot.slane %v18510_v46, 1 }
 0x282   : > { %v4443_v21 = vrot.slane %v18500_v2, 2  ;;  %v3989_v52 = vsel %vm760_vm3, %v13045_v1, %v18505_v38  ;;  %v18506_v2 = vld [vmem:[#allocation274_spill] sm:$0xff]  ;;  %v4441_v1 = vsel %vm3701_vm7, %v13154_v59, %v13396_v26  ;;  %v18524_v46 = vshrl.u32 %v18441_v15, 16 }
 0x283   : > { %4417 = vrot.lane.b32.xlu1 %v18498_v42, %s9360_s12  ;;  %v13415_v42 = vpop.permute.xlu0 %3940  ;;  %v4010_v10 = vsel %vm760_vm3, %v13048_v23, %v18506_v2  ;;  %v4051_v61 = vsel %vm812_vm4, %v3989_v52, %v13192_v33  ;;  %v4037_v52 = vsel %vm812_vm4, %v3968_v45, %v13111_v20  ;;  %v18515_v20 = vshll.u32 %v18434_v49, 16 }
 0x284   : > { %4423 = vrot.lane.b32.xlu0 %v4376_v53, %s9360_s12  ;;  %v4065_v23 = vsel %vm812_vm4, %v4010_v10, %v13195_v35  ;;  %v4099_v4 = vsel %vm1064_vm2, %v4051_v61, %v13285_v25  ;;  %v18507_v53 = vld [vmem:[#allocation83_spill] sm:$0xff]  ;;  %v4444_v33 = vor.u32 %v4443_v21, %v4442_v28  ;;  %v18508_v35 = vshrl.u32 %v18426_v39, 16 }
 0x285   : > { %v3931_v19 = vpop.permute.xlu1 %3930  ;;  %v4113_v3 = vsel %vm1064_vm2, %v4065_v23, %v13289_v48  ;;  %v4101_v25 = vsel %vm1064_vm2, %v4053_v57, %v13265_v37  ;;  %v4451_v48 = vrot.slane %v18509_v27, 2  ;;  %v18511_v37 = vshll.u32 %v18431_v22, 16  ;;  %v18517_v57 = vld [vmem:[#allocation238_spill] sm:$0xff] }
 0x286   : > { %v4148_v59 = vsel %vm4128_vm9, %v4099_v4, %v3931_v19  ;;  %v4450_v40 = vrot.slane %v18508_v35, 1  ;;  %v4150_v28 = vsel %vm4128_vm9, %v4101_v25, %v3933_v36  ;;  %v18512_v36 = vshrl.u32 %v18430_v58, 16  ;;  %v18516_v19 = vld [vmem:[#allocation267_spill] sm:$0xff] }
 0x287   : > { %4421 = vrot.lane.b32.xlu1 %v18507_v53, %s9360_s12  ;;  %v3945_v12 = vpop.permute.xlu0 %3944  ;;  %8812 = vmatprep.subr.msk.bf16.mxu0 %vm4178_vm10, %v4148_v59  ;;  %v4455_v38 = vrot.slane %v18511_v37, 2  ;;  %v4459_v22 = vrot.slane %v18513_v41, 2  ;;  %v18514_v61 = vshrl.u32 %v18434_v49, 16  ;;  %v4463_v45 = vrot.slane %v18515_v20, 2 }
 0x288   : > { %v4162_v21 = vsel %vm4128_vm9, %v4113_v3, %v3945_v12  ;;  %4531 = vrot.lane.b32.xlu0 %v4433_v11, %s9361_s13  ;;  %8441 = vmatpush3.bf16.xpose.msra.mxu0 %v4184_v18  ;;  %v4458_v10 = vrot.slane %v18512_v36, 1  ;;  %v4085_v11 = vsel %vm1064_vm2, %v4037_v52, %v13235_v51  ;;  %v4449_v23 = vsel %vm3701_vm7, %v4444_v33, %v13443_v47  ;;  %v18526_v52 = vld [vmem:[#allocation261_spill] sm:$0xff] }
 0x289   : > { %v4214_v5 = vsel %vm4178_vm10, %v4162_v21, 0  ;;  %v3935_v2 = vpop.permute.xlu1 %3934  ;;  %8813 = vmatprep.subr.msk.bf16.mxu0 %vm4178_vm10, %v4150_v28  ;;  %v4462_v32 = vrot.slane %v18514_v61, 1  ;;  %v4452_v4 = vor.u32 %v4451_v48, %v4450_v40  ;;  %v4456_v58 = vor.u32 %v4455_v38, %v4454_v54 }
 0x28a   : > { %8634 = vmatpush3.bf16.xpose.msra.mxu1 %v4214_v5  ;;  %v3971_v53 = vsel %vm760_vm3, %v12987_v34, %v18516_v19  ;;  %v3995_v49 = vsel %vm760_vm3, %v13057_v24, %v18517_v57  ;;  %v18518_v12 = vshrl.u32 %v18432_v55, 16  ;;  %v18519_v40 = vshll.u32 %v18432_v55, 16 }
 0x28b   : > { %v13469_v39 = vpop.permute.xlu0 %3948  ;;  %4425 = vrot.lane.b32.xlu1 %v4375_v44, %s9360_s12  ;;  %8635 = vmatprep.subr.bf16.mxu1 %v18040_v30  ;;  %v4134_v44 = vsel %vm4128_vm9, %v4085_v11, %v13327_v16  ;;  %v4055_v51 = vsel %vm812_vm4, %v3995_v49, %v13199_v29  ;;  %v4460_v16 = vor.u32 %v4459_v22, %v4458_v10  ;;  %v18520_v21 = vshrl.u32 %v18437_v63, 16  ;;  %v18528_v11 = vld [vmem:[#allocation27_spill] sm:$0xff]  ;;  %v18534_v49 = vld [vmem:[#allocation12_spill] sm:$0xff] }
 0x28c   : > { %4535 = vrot.lane.b32.xlu0 %v4441_v1, %s9361_s13  ;;  %v13502_v59 = vor.u32 %v4463_v45, %v4462_v32  ;;  %v4466_v34 = vrot.slane %v18518_v12, 1  ;;  %v4103_v35 = vsel %vm1064_vm2, %v4055_v51, %v13293_v62  ;;  %v4186_v24 = vsel %vm4178_vm10, %v4134_v44, 0 }
 0x28d   : > { %v13494_v3 = vpop.permute.xlu1 %3938  ;;  %v4445_v29 = vsel %vm3701_vm7, %v13396_v26, %v4444_v33  ;;  %v4467_v25 = vrot.slane %v18519_v40, 2  ;;  %v4457_v18 = vsel %vm3701_vm7, %v4452_v4, %v4456_v58  ;;  %v4470_v27 = vrot.slane %v18520_v21, 1  ;;  %v18538_v21 = vld [vmem:[#allocation277_spill] sm:$0xff] }
 0x28e   : > { %v18521_v62 = vshll.u32 %v18437_v63, 16  ;;  %v18522_v26 = vshrl.u32 %v18435_v50, 16  ;;  %v18523_v55 = vshll.u32 %v18435_v50, 16  ;;  %v4478_v54 = vrot.slane %v18524_v46, 1 }
 0x28f   : > { %v13498_v1 = vpop.permute.xlu0 %3952  ;;  %4533 = vrot.lane.b32.xlu1 %v13163_v6, %s9361_s13  ;;  %v4152_v6 = vsel %vm4128_vm9, %v4103_v35, %v3935_v2  ;;  %v18525_v37 = vshll.u32 %v18441_v15, 16  ;;  %v3974_v63 = vsel %vm760_vm3, %v12902_v7, %v18526_v52  ;;  %v18527_v2 = vld [vmem:[#allocation211_spill] sm:$0xff]  ;;  %v4013_v10 = vsel %vm760_vm3, %v13096_v13, %v12884_v43 }
 0x290   : > { %4539 = vrot.lane.b32.xlu0 %v4449_v23, %s9361_s13  ;;  %8443 = vmatpush3.bf16.xpose.msra.mxu0 %v4186_v24  ;;  %v4471_v48 = vrot.slane %v18521_v62, 2  ;;  %v4474_v33 = vrot.slane %v18522_v26, 1  ;;  %v4475_v5 = vrot.slane %v18523_v55, 2  ;;  %v3998_v36 = vsel %vm760_vm3, %v13012_v9, %v18527_v2  ;;  %v18535_v24 = vld [vmem:[#allocation240_spill] sm:$0xff] }
 0x291   : > { %v13520_v28 = vpop.permute.xlu1 %3942  ;;  %8814 = vmatprep.subr.msk.bf16.mxu0 %vm4178_vm10, %v4152_v6  ;;  %v4479_v38 = vrot.slane %v18525_v37, 2  ;;  %v4039_v50 = vsel %vm812_vm4, %v3971_v53, %v13168_v60  ;;  %v4465_v7 = vsel %vm3701_vm7, %v4460_v16, %v13502_v59  ;;  %v4468_v9 = vor.u32 %v4467_v25, %v4466_v34  ;;  %v18537_v25 = vld [vmem:[#allocation58_spill] sm:$0xff]  ;;  %v18542_v37 = vld [vmem:[#allocation31_spill] sm:$0xff] }
 0x292   : > { %v4087_v15 = vsel %vm1064_vm2, %v4039_v50, %v13261_v0  ;;  %v4453_v22 = vsel %vm3701_vm7, %v13443_v47, %v4452_v4  ;;  %v4057_v43 = vsel %vm812_vm4, %v3998_v36, %v13179_v56  ;;  %v4067_v13 = vsel %vm812_vm4, %v4013_v10, %v13223_v8  ;;  %v18531_v4 = vld [vmem:[#allocation29_spill] sm:$0xff]  ;;  %v18545_v36 = vld [vmem:[#allocation16_spill] sm:$0xff] }
 0x293   : > { %v13542_v41 = vpop.permute.xlu0 %3956  ;;  %4537 = vrot.lane.b32.xlu1 %v4445_v29, %s9361_s13  ;;  %v4136_v60 = vsel %vm4128_vm9, %v4087_v15, %v13368_v31  ;;  %v4472_v61 = vor.u32 %v4471_v48, %v4470_v27  ;;  %v4115_v0 = vsel %vm1064_vm2, %v4067_v13, %v13317_v17  ;;  %v4476_v20 = vor.u32 %v4475_v5, %v4474_v33  ;;  %v18536_v29 = vld [vmem:[#allocation252_spill] sm:$0xff]  ;;  %v18540_v48 = vld [vmem:[#allocation271_spill] sm:$0xff] }
 0x294   : > { %4543 = vrot.lane.b32.xlu0 %v4457_v18, %s9361_s13  ;;  %v13560_v45 = vor.u32 %v4479_v38, %v4478_v54  ;;  %v18529_v44 = vshrl.u32 %v18528_v11, 16  ;;  %v18530_v8 = vshll.u32 %v18528_v11, 16  ;;  %v18532_v19 = vshrl.u32 %v18531_v4, 16  ;;  %v18539_v27 = vld [vmem:[#allocation232_spill] sm:$0xff] }
 0x295   : > { %v3947_v32 = vpop.permute.xlu1 %3946  ;;  %v18533_v17 = vshll.u32 %v18531_v4, 16  ;;  %v4105_v51 = vsel %vm1064_vm2, %v4057_v43, %v18534_v49  ;;  %v4188_v12 = vsel %vm4178_vm10, %v4136_v60, 0  ;;  %v4461_v35 = vsel %vm3701_vm7, %v4456_v58, %v4460_v16  ;;  %v18541_v16 = vld [vmem:[#allocation276_spill] sm:$0xff]  ;;  %v18558_v49 = vld [vmem:[#allocation263_spill] sm:$0xff] }
 0x296   : > { %v4482_v47 = vrot.slane %v18529_v44, 1  ;;  %v4164_v23 = vsel %vm4128_vm9, %v4115_v0, %v3947_v32  ;;  %v4483_v31 = vrot.slane %v18530_v8, 2  ;;  %v4486_v53 = vrot.slane %v18532_v19, 1  ;;  %v18548_v60 = vld [vmem:[#allocation32_spill] sm:$0xff] }
 0x297   : > { %v13565_v56 = vpop.permute.xlu0 %4318  ;;  %4541 = vrot.lane.b32.xlu1 %v4453_v22, %s9361_s13  ;;  %v4487_v57 = vrot.slane %v18533_v17, 2  ;;  %v4216_v34 = vsel %vm4178_vm10, %v4164_v23, 0  ;;  %v4016_v40 = vsel %vm760_vm3, %v18536_v29, %v18535_v24  ;;  %v4154_v6 = vsel %vm4128_vm9, %v4105_v51, %v18537_v25  ;;  %v18547_v22 = vld [vmem:[#allocation54_spill] sm:$0xff]  ;;  %v18554_v4 = vld [vmem:[#allocation36_spill] sm:$0xff]  ;;  %v18561_v24 = vld [vmem:[#allocation243_spill] sm:$0xff] }
 0x298   : > { %4547 = vrot.lane.b32.xlu0 %v4465_v7, %s9361_s13  ;;  %8636 = vmatpush3.bf16.xpose.msra.mxu1 %v4216_v34  ;;  %v4473_v18 = vsel %vm3701_vm7, %v4468_v9, %v4472_v61  ;;  %v4001_v62 = vsel %vm760_vm3, %v18539_v27, %v18538_v21  ;;  %v4041_v26 = vsel %vm812_vm4, %v3974_v63, %v18540_v48  ;;  %v18543_v38 = vshrl.u32 %v18542_v37, 16  ;;  %v18544_v63 = vld [vmem:[#allocation5_spill] sm:$0xff]  ;;  %v18551_v23 = vld [vmem:[#allocation34_spill] sm:$0xff] }
 0x299   : > { %8445 = vmatpush3.bf16.xpose.msra.mxu0 %v4188_v12  ;;  %v3951_v33 = vpop.permute.xlu1 %3950  ;;  %8637 = vmatprep.subr.bf16.mxu1 %v18040_v30  ;;  %v4481_v58 = vsel %vm3701_vm7, %v4476_v20, %v13560_v45  ;;  %v4069_v55 = vsel %vm812_vm4, %v4016_v40, %v18541_v16  ;;  %v4484_v46 = vor.u32 %v4483_v31, %v4482_v47  ;;  %v18546_v15 = vshll.u32 %v18542_v37, 16  ;;  %v18559_v12 = vld [vmem:[#allocation254_spill] sm:$0xff]  ;;  %v18560_v34 = vld [vmem:[#allocation237_spill] sm:$0xff] }
 0x29a   : > { %8815 = vmatprep.subr.msk.bf16.mxu0 %vm4178_vm10, %v4154_v6  ;;  %v13600_v54 = vor.u32 %v4487_v57, %v4486_v53  ;;  %v4490_v52 = vrot.slane %v18543_v38, 1  ;;  %v4089_v2 = vsel %vm1064_vm2, %v4041_v26, %v18544_v63  ;;  %v4117_v10 = vsel %vm1064_vm2, %v4069_v55, %v18545_v36  ;;  %v18557_v57 = vld [vmem:[#allocation269_spill] sm:$0xff] }
 0x29b   : > { %v13597_v5 = vpop.permute.xlu0 %4322  ;;  %4545 = vrot.lane.b32.xlu1 %v4461_v35, %s9361_s13  ;;  %v4469_v50 = vsel %vm3701_vm7, %v13502_v59, %v4468_v9  ;;  %v4491_v7 = vrot.slane %v18546_v15, 2  ;;  %v4138_v43 = vsel %vm4128_vm9, %v4089_v2, %v18547_v22  ;;  %v4166_v13 = vsel %vm4128_vm9, %v4117_v10, %v13469_v39  ;;  %v18562_v6 = vld [vmem:[#allocation21_spill] sm:$0xff]  ;;  %v18568_v15 = vld [vmem:[#allocation40_spill] sm:$0xff] }
 0x29c   : > { %4551 = vrot.lane.b32.xlu0 %v4473_v18, %s9361_s13  ;;  %v18549_v0 = vshrl.u32 %v18548_v60, 16  ;;  %v18550_v11 = vshll.u32 %v18548_v60, 16  ;;  %v18552_v8 = vshrl.u32 %v18551_v23, 16  ;;  %v18553_v9 = vshll.u32 %v18551_v23, 16  ;;  %v18563_v55 = vld [vmem:[#allocation257_spill] sm:$0xff]  ;;  %v18571_v60 = vld [vmem:[#allocation8_spill] sm:$0xff] }
 0x29d   : > { %v13621_v47 = vpop.permute.xlu1 %3954  ;;  %v18555_v19 = vshrl.u32 %v18554_v4, 16  ;;  %v18556_v17 = vshll.u32 %v18554_v4, 16  ;;  %v3977_v51 = vsel %vm760_vm3, %v18558_v49, %v18557_v57  ;;  %v4019_v35 = vsel %vm760_vm3, %v18560_v34, %v18559_v12  ;;  %v18573_v23 = vld [vmem:[#allocation235_spill] sm:$0xff]  ;;  %v18579_v34 = vld [vmem:[#allocation17_spill] sm:$0xff] }
 0x29e   : > { %v4494_v32 = vrot.slane %v18549_v0, 1  ;;  %v4495_v44 = vrot.slane %v18550_v11, 2  ;;  %v4498_v59 = vrot.slane %v18552_v8, 1  ;;  %v4499_v31 = vrot.slane %v18553_v9, 2  ;;  %v18574_v8 = vld [vmem:[#allocation268_spill] sm:$0xff]  ;;  %v18575_v9 = vld [vmem:[#allocation59_spill] sm:$0xff] }
 0x29f   : > { %v4502_v53 = vrot.slane %v18555_v19, 1  ;;  %v4503_v39 = vrot.slane %v18556_v17, 2  ;;  %v4059_v29 = vsel %vm812_vm4, %v4001_v62, %v18561_v24  ;;  %v13639_v40 = vpop.permute.xlu0 %4326  ;;  %v4489_v25 = vsel %vm3701_vm7, %v4484_v46, %v13600_v54  ;;  %4549 = vrot.lane.b32.xlu1 %v4469_v50, %s9361_s13 }
 0x2a0   : > { %v4107_v18 = vsel %vm1064_vm2, %v4059_v29, %v18562_v6  ;;  %v4190_v21 = vsel %vm4178_vm10, %v4138_v43, 0  ;;  %v4218_v27 = vsel %vm4178_vm10, %v4166_v13, 0  ;;  %4555 = vrot.lane.b32.xlu0 %v4481_v58, %s9361_s13  ;;  %v4477_v48 = vsel %vm3701_vm7, %v4472_v61, %v4476_v20  ;;  %v18564_v61 = vld [vmem:[#allocation38_spill] sm:$0xff] }
 0x2a1   : > { %v4156_v62 = vsel %vm4128_vm9, %v4107_v18, %v13494_v3  ;;  %8638 = vmatpush3.bf16.xpose.msra.mxu1 %v4218_v27  ;;  %8447 = vmatpush3.bf16.xpose.msra.mxu0 %v4190_v21  ;;  %v4492_v26 = vor.u32 %v4491_v7, %v4490_v52  ;;  %v4496_v16 = vor.u32 %v4495_v44, %v4494_v32  ;;  %v13654_v38 = vpop.permute.xlu1 %3958  ;;  %v18565_v20 = vshrl.u32 %v18564_v61, 16  ;;  %v18566_v3 = vld [vmem:[#allocation239_spill] sm:$0xff]  ;;  %v18572_v32 = vld [vmem:[#allocation25_spill] sm:$0xff]  ;;  %v18581_v27 = vld [vmem:[#allocation44_spill] sm:$0xff] }
 0x2a2   : > { %v4043_v37 = vsel %vm812_vm4, %v3977_v51, %v18563_v55  ;;  %8816 = vmatprep.subr.msk.bf16.mxu0 %vm4178_vm10, %v4156_v62  ;;  %8639 = vmatprep.subr.bf16.mxu1 %v18040_v30  ;;  %v4500_v63 = vor.u32 %v4499_v31, %v4498_v59  ;;  %v13658_v58 = vor.u32 %v4503_v39, %v4502_v53  ;;  %v18567_v10 = vshll.u32 %v18564_v61, 16  ;;  %v18576_v53 = vld [vmem:[#allocation275_spill] sm:$0xff]  ;;  %v18584_v61 = vld [vmem:[#allocation236_spill] sm:$0xff] }
 0x2a3   : > { %v4506_v2 = vrot.slane %v18565_v20, 1  ;;  %v4071_v36 = vsel %vm812_vm4, %v4019_v35, %v18566_v3  ;;  %v13664_v52 = vpop.permute.xlu0 %4330  ;;  %4553 = vrot.lane.b32.xlu1 %v4477_v48, %s9361_s13  ;;  %v18569_v7 = vshrl.u32 %v18568_v15, 16  ;;  %v18570_v43 = vshll.u32 %v18568_v15, 16  ;;  %v18577_v51 = vld [vmem:[#allocation43_spill] sm:$0xff]  ;;  %v18585_v20 = vld [vmem:[#allocation265_spill] sm:$0xff]  ;;  %v18590_v15 = vld [vmem:[#allocation246_spill] sm:$0xff] }
 0x2a4   : > { %v4507_v50 = vrot.slane %v18567_v10, 2  ;;  %v4091_v0 = vsel %vm1064_vm2, %v4043_v37, %v18571_v60  ;;  %v4119_v11 = vsel %vm1064_vm2, %v4071_v36, %v18572_v32  ;;  %4559 = vrot.lane.b32.xlu0 %v4489_v25, %s9361_s13  ;;  %v4485_v44 = vsel %vm3701_vm7, %v13560_v45, %v4484_v46  ;;  %v18586_v3 = vld [vmem:[#allocation255_spill] sm:$0xff]  ;;  %v18589_v36 = vld [vmem:[#allocation242_spill] sm:$0xff] }
 0x2a5   : > { %v4510_v22 = vrot.slane %v18569_v7, 1  ;;  %v4511_v13 = vrot.slane %v18570_v43, 2  ;;  %v4004_v59 = vsel %vm760_vm3, %v18574_v8, %v18573_v23  ;;  %v4140_v31 = vsel %vm4128_vm9, %v4091_v0, %v18575_v9  ;;  %v13689_v39 = vpop.permute.xlu1 %4320  ;;  %v18592_v60 = vld [vmem:[#allocation78_spill] sm:$0xff] }
 0x2a6   : > { %v4168_v4 = vsel %vm4128_vm9, %v4119_v11, %v3951_v33  ;;  %v4497_v19 = vsel %vm3701_vm7, %v4492_v26, %v4496_v16  ;;  %v4061_v17 = vsel %vm812_vm4, %v4004_v59, %v18576_v53  ;;  %v4505_v45 = vsel %vm3701_vm7, %v4500_v63, %v13658_v58  ;;  %v18593_v11 = vld [vmem:[#allocation10_spill] sm:$0xff] }
 0x2a7   : > { %v13691_v57 = vpop.permute.xlu0 %4334  ;;  %4557 = vrot.lane.b32.xlu1 %v4485_v44, %s9361_s13  ;;  %v4508_v46 = vor.u32 %v4507_v50, %v4506_v2  ;;  %v13696_v49 = vor.u32 %v4511_v13, %v4510_v22  ;;  %v18578_v12 = vshrl.u32 %v18577_v51, 16  ;;  %v4109_v35 = vsel %vm1064_vm2, %v4061_v17, %v18579_v34  ;;  %v18591_v22 = vld [vmem:[#allocation251_spill] sm:$0xff]  ;;  %v18594_v23 = vld [vmem:[#allocation18_spill] sm:$0xff] }
 0x2a8   : > { %v4192_v24 = vsel %vm4178_vm10, %v4140_v31, 0  ;;  %v4220_v29 = vsel %vm4178_vm10, %v4168_v4, 0  ;;  %4563 = vrot.lane.b32.xlu0 %v4497_v19, %s9361_s13  ;;  %v4493_v25 = vsel %vm3701_vm7, %v13600_v54, %v4492_v26  ;;  %v4158_v6 = vsel %vm4128_vm9, %v4109_v35, %v13415_v42  ;;  %v18587_v54 = vld [vmem:[#allocation248_spill] sm:$0xff]  ;;  %v18588_v42 = vld [vmem:[#allocation247_spill] sm:$0xff] }
 0x2a9   : > { %v4514_v33 = vrot.slane %v18578_v12, 1  ;;  %8640 = vmatpush3.bf16.xpose.msra.mxu1 %v4220_v29  ;;  %8449 = vmatpush3.bf16.xpose.msra.mxu0 %v4192_v24  ;;  %v18580_v18 = vshll.u32 %v18577_v51, 16  ;;  %v18582_v48 = vshrl.u32 %v18581_v27, 16  ;;  %v18583_v55 = vshll.u32 %v18581_v27, 16  ;;  %v13724_v50 = vpop.permute.xlu1 %4324  ;;  %v18595_v31 = vld [vmem:[#allocation56_spill] sm:$0xff]  ;;  %v18596_v51 = vld [vmem:[#allocation258_spill] sm:$0xff] }
 0x2aa   : > { %v3980_v2 = vsel %vm760_vm3, %v18585_v20, %v18584_v61  ;;  %v4022_v26 = vsel %vm760_vm3, %v18587_v54, %v18586_v3  ;;  %v4007_v10 = vsel %vm760_vm3, %v18589_v36, %v18588_v42  ;;  %8817 = vmatprep.subr.msk.bf16.mxu0 %vm4178_vm10, %v4158_v6  ;;  %8641 = vmatprep.subr.bf16.mxu1 %v18040_v30  ;;  %v4523_v0 = vshrl.u32 %v18592_v60, 16  ;;  %v9174_v6 = vld [vmem:[%s9453_s11 + $0x18] sm:$0xf]  ;;  %v18601_v3 = vld [vmem:[#allocation244_spill] sm:$0xff] }
 0x2ab   : > { %v4515_v21 = vrot.slane %v18580_v18, 2  ;;  %v4518_v62 = vrot.slane %v18582_v48, 1  ;;  %v4519_v37 = vrot.slane %v18583_v55, 2  ;;  %v4045_v7 = vsel %vm812_vm4, %v3980_v2, %v18590_v15  ;;  %v13732_v13 = vpop.permute.xlu0 %4338  ;;  %4561 = vrot.lane.b32.xlu1 %v4493_v25, %s9361_s13  ;;  %v9173_v25 = vld [vmem:[%s9453_s11 + $0x14] sm:$0xf]  ;;  %v18599_v55 = vld [vmem:[#allocation270_spill] sm:$0xff] }
 0x2ac   : > { %v4073_v43 = vsel %vm812_vm4, %v4022_v26, %v18591_v22  ;;  %v4526_v32 = vshll.u32 %v18592_v60, 16  ;;  %v4093_v44 = vsel %vm1064_vm2, %v4045_v7, %v18593_v11  ;;  %4567 = vrot.lane.b32.xlu0 %v4505_v45, %s9361_s13  ;;  %v4513_v59 = vsel %vm3701_vm7, %v4508_v46, %v13696_v49  ;;  %v18600_v2 = vld [vmem:[#allocation245_spill] sm:$0xff]  ;;  %v18606_v7 = vld [vmem:[#allocation11_spill] sm:$0xff] }
 0x2ad   : > { %v4121_v8 = vsel %vm1064_vm2, %v4073_v43, %v18594_v23  ;;  %v4501_v9 = vsel %vm3701_vm7, %v4496_v16, %v4500_v63  ;;  %v4142_v4 = vsel %vm4128_vm9, %v4093_v44, %v18595_v31  ;;  %v4516_v53 = vor.u32 %v4515_v21, %v4514_v33  ;;  %v13751_v34 = vpop.permute.xlu1 %4328  ;;  %v9171_v16 = vld [vmem:[%s9453_s11 + $0x10] sm:$0xf]  ;;  %v9172_v63 = vld [vmem:[%s9453_s11 + $0xc] sm:$0xf]  ;;  %v18602_v26 = vld [vmem:[#allocation273_spill] sm:$0xff] }
 0x2ae   : > { %v4170_v19 = vsel %vm4128_vm9, %v4121_v8, %v13498_v1  ;;  %v4520_v17 = vor.u32 %v4519_v37, %v4518_v62  ;;  %v4063_v12 = vsel %vm812_vm4, %v4007_v10, %v18596_v51  ;;  %v4525_v35 = vrot.slane %v4523_v0, 1  ;;  %v18597_v1 = vld [vmem:[#allocation23_spill] sm:$0xff]  ;;  %v18598_v62 = vld [vmem:[#allocation234_spill] sm:$0xff]  ;;  %v9175_v23 = vld [vmem:[%s9453_s11 + $0x1c] sm:$0xf] }
 0x2af   : > { %v13753_v45 = vpop.permute.xlu0 %4342  ;;  %4565 = vrot.lane.b32.xlu1 %v4501_v9, %s9361_s13  ;;  %v4528_v24 = vrot.slane %v4526_v32, 2  ;;  %v8240_v29 = vcombine.low %v9172_v63, %v9171_v16  ;;  %v8241_v18 = vcombine.low %v9173_v25, %v9174_v6  ;;  %v4111_v33 = vsel %vm1064_vm2, %v4063_v12, %v18597_v1  ;;  %v18607_v43 = vld [vmem:[#allocation55_spill] sm:$0xff]  ;;  %v9176_v8 = vld [vmem:[%s9453_s11 + $0x20] sm:$0xf]  ;;  %v9177_v9 = vld [vmem:[%s9453_s11 + $0x24] sm:$0xf] }
 0x2b0   : > { %v4194_v21 = vsel %vm4178_vm10, %v4142_v4, 0  ;;  %v4222_v27 = vsel %vm4178_vm10, %v4170_v19, 0  ;;  %4571 = vrot.lane.b32.xlu0 %v4513_v59, %s9361_s13  ;;  %v4509_v48 = vsel %vm3701_vm7, %v13658_v58, %v4508_v46  ;;  %v3983_v37 = vsel %vm760_vm3, %v18599_v55, %v18598_v62  ;;  %v9178_v31 = vld [vmem:[%s9453_s11 + $0x28] sm:$0xf]  ;;  %v9180_v63 = vld [vmem:[%s9453_s11 + $0x2c] sm:$0xf] }
 0x2b1   : > { %v4160_v61 = vsel %vm4128_vm9, %v4111_v33, %v13520_v28  ;;  %8642 = vmatpush3.bf16.xpose.msra.mxu1 %v4222_v27  ;;  %8451 = vmatpush3.bf16.xpose.msra.mxu0 %v4194_v21  ;;  %v4521_v20 = vsel %vm3701_vm7, %v4516_v53, %v4520_v17  ;;  %v4025_v54 = vsel %vm760_vm3, %v18601_v3, %v18600_v2  ;;  %v13778_v36 = vpop.permute.xlu1 %4332  ;;  %v18604_v28 = vld [vmem:[#allocation272_spill] sm:$0xff]  ;;  %v4606_v15 = vrot.slane %v8240_v29, 6  ;;  %v9179_v51 = vld [vmem:[%s9453_s11 + $0xc0] ss:$0 sps:$4 sm:$0x11]  }
 0x2b2   : > { %v4047_v42 = vsel %vm812_vm4, %v3983_v37, %v18602_v26  ;;  %18603 = vst [vmem:[#allocation61_spill] sm:$0xff] %v13778_v36  ;;  %8818 = vmatprep.subr.msk.bf16.mxu0 %vm4178_vm10, %v4160_v61  ;;  %8643 = vmatprep.subr.bf16.mxu1 %v18040_v30  ;;  %v4075_v58 = vsel %vm812_vm4, %v4025_v54, %v18604_v28  ;;  %v4607_v0 = vrot.slane %v8241_v18, 6  ;;  %v3594_v12 = vshll.u32 %v9179_v51, 16  ;;  %v9181_v29 = vld [vmem:[%s9453_s11 + $0x30] sm:$0xf]  ;;  %v18608_v33 = vld [vmem:[#allocation262_spill] sm:$0xff] }
 0x2b3   : > { %v13784_v46 = vpop.permute.xlu0 %4346  ;;  %v4529_v10 = vor.u32 %v4528_v24, %v4525_v35  ;;  %4569 = vrot.lane.b32.xlu1 %v4509_v48, %s9361_s13  ;;  %v4095_v22 = vsel %vm1064_vm2, %v4047_v42, %v18606_v7  ;;  %v4123_v60 = vsel %vm1064_vm2, %v4075_v58, %v18607_v43  ;;  %v4517_v32 = vsel %vm3701_vm7, %v13696_v49, %v4516_v53  ;;  %v9182_v6 = vld [vmem:[%s9453_s11 + $0x34] sm:$0xf]  ;;  %v9183_v18 = vld [vmem:[%s9453_s11 + $0x38] sm:$0xf]  ;;  %v18609_v21 = vld [vmem:[#allocation250_spill] sm:$0xff] }
 0x2b4   : > { %18605 = vst [vmem:[#allocation60_spill] sm:$0xff] %v13784_v46  ;;  %4575 = vrot.lane.b32.xlu0 %v4521_v20, %s9361_s13  ;;  %v4144_v11 = vsel %vm4128_vm9, %v4095_v22, %v13398_v14  ;;  %v4172_v44 = vsel %vm4128_vm9, %v4123_v60, %v13621_v47  ;;  %v8242_v59 = vcombine.low %v9175_v23, %v9176_v8  ;;  %v18611_v62 = vld [vmem:[#allocation256_spill] sm:$0xff]  ;;  %v3596_v61 = vrot.slane %v3594_v12, 1  ;;  %v18613_v20 = vld [vmem:[#allocation253_spill] sm:$0xff]  ;;  %v9185_v26 = vld [vmem:[%s9453_s11 + $0x40] sm:$0xf] }
 0x2b5   : > { %v8243_v4 = vcombine.low %v9177_v9, %v9178_v31  ;;  %v13802_v19 = vpop.permute.xlu1 %4336  ;;  %v4196_v14 = vsel %vm4178_vm10, %v4144_v11, 0  ;;  %v4224_v47 = vsel %vm4178_vm10, %v4172_v44, 0  ;;  %v4608_v53 = vsel %vm4605_vm11, %v4606_v15, %v4607_v0  ;;  %v9184_v54 = vld [vmem:[%s9453_s11 + $0x3c] sm:$0xf]  ;;  %v18614_v28 = vld [vmem:[#allocation22_spill] sm:$0xff] }
 0x2b6   : > { %v4530_v35 = vsel %vm3701_vm7, %v4520_v17, %v4529_v10  ;;  %v4609_v24 = vrot.slane %v8242_v59, 6  ;;  %v8244_v25 = vcombine.low %v9180_v63, %v9181_v29  ;;  %v8245_v1 = vcombine.low %v9182_v6, %v9183_v18  ;;  %v18610_v17 = vld [vmem:[#allocation249_spill] sm:$0xff]  ;;  %v9187_v7 = vld [vmem:[%s9453_s11 + $0x48] sm:$0xf]  ;;  %v9189_v51 = vld [vmem:[%s9453_s11 + $0x50] sm:$0xf] }
 0x2b7   : > { %v13805_v49 = vpop.permute.xlu0 %4350  ;;  %4573 = vrot.lane.b32.xlu1 %v4517_v32, %s9361_s13  ;;  %v4611_v16 = vrot.slane %v8243_v4, 6  ;;  %v4028_v27 = vsel %vm760_vm3, %v18609_v21, %v18608_v33  ;;  %v18612_v55 = vshrl.u32 %v18611_v62, 16  ;;  %v8246_v42 = vcombine.low %v9184_v54, %v9185_v26  ;;  %v9188_v4 = vld [vmem:[%s9453_s11 + $0x4c] sm:$0xf]  ;;  %v18620_v6 = vld [vmem:[#allocation57_spill] sm:$0xff] }
 0x2b8   : > { %4579 = vrot.lane.b32.xlu0 %v4529_v10, %s9361_s13  ;;  %v4077_v2 = vsel %vm812_vm4, %v4028_v27, %v18613_v20  ;;  %v9186_v10 = vld [vmem:[%s9453_s11 + $0x44] sm:$0xf]  ;;  %v4613_v32 = vrot.slane %v8244_v25, 6  ;;  %v4615_v11 = vrot.slane %v8245_v1, 6  ;;  %v4610_v31 = vsel %vm4605_vm11, %v4607_v0, %v4609_v24  ;;  %v9192_v62 = vld [vmem:[%s9453_s11 + $0x5c] sm:$0xf] }
 0x2b9   : > { %8644 = vmatpush3.bf16.xpose.msra.mxu1 %v4224_v47  ;;  %8453 = vmatpush3.bf16.xpose.msra.mxu0 %v4196_v14  ;;  %v13820_v48 = vpop.permute.xlu1 %4340  ;;  %v3592_v37 = vor.u32 %v18612_v55, %v18610_v17  ;;  %v4125_v58 = vsel %vm1064_vm2, %v4077_v2, %v18614_v28  ;;  %v8247_v22 = vcombine.low %v9186_v10, %v9187_v7  ;;  %v4617_v59 = vrot.slane %v8246_v42, 6  ;;  %v9190_v47 = vld [vmem:[%s9453_s11 + $0x54] sm:$0xf]  ;;  %v18618_v0 = vld [vmem:[#allocation6_spill] sm:$0xff]  ;;  %v9195_v20 = vld [vmem:[%s9453_s11 + $0x68] sm:$0xf] }
 0x2ba   : > { %8645 = vmatprep.subr.bf16.mxu1 %v18040_v30  ;;  %v4174_v43 = vsel %vm4128_vm9, %v4125_v58, %v13542_v41  ;;  %v4612_v60 = vsel %vm4605_vm11, %v4609_v24, %v4611_v16  ;;  %v8248_v12 = vcombine.low %v9188_v4, %v9189_v51  ;;  %v4616_v14 = vsel %vm4605_vm11, %v4613_v32, %v4615_v11  ;;  %v9193_v55 = vld [vmem:[%s9453_s11 + $0x60] sm:$0xf]  ;;  %v9196_v42 = vld [vmem:[%s9453_s11 + $0x6c] sm:$0xf]  ;;  %v9197_v28 = vld [vmem:[%s9453_s11 + $0x70] sm:$0xf] }
 0x2bb   : > { %v13828_v3 = vpop.permute.xlu0 %4354  ;;  %4577 = vrot.lane.b32.xlu1 %v4530_v35, %s9361_s13  ;;  %v3597_v23 = vsel %vm407_vm0, %v3592_v37, %v3596_v61  ;;  %v4226_v9 = vsel %vm4178_vm10, %v4174_v43, 0  ;;  %v4619_v41 = vrot.slane %v8247_v22, 6  ;;  %v4614_v21 = vsel %vm4605_vm11, %v4611_v16, %v4613_v32  ;;  %v9194_v61 = vld [vmem:[%s9453_s11 + $0x64] sm:$0xf]  ;;  %v9198_v10 = vld [vmem:[%s9453_s11 + $0x74] sm:$0xf] }
 0x2bc   : > { %4655 = vrot.lane.b32.xlu0 %v4608_v53, %s9365_s14  ;;  %v9191_v53 = vld [vmem:[%s9453_s11 + $0x58] sm:$0xf]  ;;  %v4621_v33 = vrot.slane %v8248_v12, 6  ;;  %v8250_v37 = vcombine.low %v9192_v62, %v9193_v55  ;;  %v8251_v2 = vcombine.low %v9194_v61, %v9195_v20  ;;  %v8252_v58 = vcombine.low %v9196_v42, %v9197_v28  ;;  %v9200_v51 = vld [vmem:[%s9453_s11 + $0x7c] sm:$0xf] }
 0x2bd   : > { %v13841_v44 = vpop.permute.xlu1 %4344  ;;  %v8249_v35 = vcombine.low %v9190_v47, %v9191_v53  ;;  %v4620_v1 = vsel %vm4605_vm11, %v4617_v59, %v4619_v41  ;;  %v9199_v7 = vld [vmem:[%s9453_s11 + $0x78] sm:$0xf]  ;;  %v9201_v12 = vld [vmem:[%s9453_s11 + $0x80] sm:$0xf]  ;;  %v9202_v47 = vld [vmem:[%s9453_s11 + $0x84] sm:$0xf] }
 0x2be   : > { %v8253_v22 = vcombine.low %v9198_v10, %v9199_v7  ;;  %v4627_v32 = vrot.slane %v8251_v2, 6  ;;  %v9203_v53 = vld [vmem:[%s9453_s11 + $0x88] sm:$0xf]  ;;  %v9207_v62 = vld [vmem:[%s9453_s11 + $0x98] sm:$0xf] }
 0x2bf   : > { %v13844_v8 = vpop.permute.xlu0 %4358  ;;  %4653 = vrot.lane.b32.xlu1 %v4606_v15, %s9365_s14  ;;  %v18616_v15 = vld [vmem:[#allocation230_spill] sm:$0xff]  ;;  %v4623_v17 = vrot.slane %v8249_v35, 6  ;;  %v8255_v35 = vcombine.low %v9202_v47, %v9203_v53  ;;  %v9212_v47 = vld [vmem:[%s9453_s11 + $0xac] sm:$0xf]  ;;  %v9213_v53 = vld [vmem:[%s9453_s11 + $0xb0] sm:$0xf] }
 0x2c0   : > { %18615 = vst [vmem:[#allocation63_spill] sm:$0xff] %v13844_v8  ;;  %4659 = vrot.lane.b32.xlu0 %v4612_v60, %s9365_s14  ;;  %v4031_v63 = vsel %vm760_vm3, %v18616_v15, %v3597_v23  ;;  %v4625_v60 = vrot.slane %v8250_v37, 6  ;;  %v9210_v28 = vld [vmem:[%s9453_s11 + $0xa4] sm:$0xf]  ;;  %v18654_v36 = vld [vmem:[#allocation141_spill] sm:$0xff]  ;;  %v18665_v8 = vld [vmem:[#allocation155_spill] sm:$0xff] }
 0x2c1   : > { %8646 = vmatpush3.bf16.xpose.msra.mxu1 %v4226_v9  ;;  %v13857_v29 = vpop.permute.xlu1 %4348  ;;  %v4079_v24 = vsel %vm812_vm4, %v4031_v63, %v18618_v0  ;;  %v4624_v43 = vsel %vm4605_vm11, %v4621_v33, %v4623_v17  ;;  %v4631_v9 = vrot.slane %v8253_v22, 6 }
 0x2c2   : > { %18617 = vst [vmem:[#allocation62_spill] sm:$0xff] %v13857_v29  ;;  %8647 = vmatprep.subr.bf16.mxu1 %v18040_v30  ;;  %v4127_v18 = vsel %vm1064_vm2, %v4079_v24, %v18620_v6  ;;  %v4628_v4 = vsel %vm4605_vm11, %v4625_v60, %v4627_v32  ;;  %v4626_v0 = vsel %vm4605_vm11, %v4623_v17, %v4625_v60  ;;  %v4177_v24 = vld [vmem:[%s17299_s3] sm:$0x1] }
 0x2c3   : > { %v13862_v25 = vpop.permute.xlu0 %4362  ;;  %4657 = vrot.lane.b32.xlu1 %v4610_v31, %s9365_s14  ;;  %v4176_v27 = vsel %vm4128_vm9, %v4127_v18, %v13654_v38  ;;  %v4618_v38 = vsel %vm4605_vm11, %v4615_v11, %v4617_v59  ;;  %v4629_v59 = vrot.slane %v8252_v58, 6  ;;  %v4622_v31 = vsel %vm4605_vm11, %v4619_v41, %v4621_v33  ;;  %v9205_v33 = vld [vmem:[%s9453_s11 + $0x90] sm:$0xf]  ;;  %8454 = vmatprep.mubr.msk.bf16.mxu0 %vm4178_vm10, %v4177_v24  ;;  %v9211_v58 = vld [vmem:[%s9453_s11 + $0xa8] sm:$0xf] }
 0x2c4   : > { %18619 = vst [vmem:[#allocation65_spill] sm:$0xff] %v13862_v25  ;;  %4663 = vrot.lane.b32.xlu0 %v4616_v14, %s9365_s14  ;;  %v4228_v16 = vsel %vm4178_vm10, %v4176_v27, 0  ;;  %v8254_v14 = vcombine.low %v9200_v51, %v9201_v12  ;;  %v4635_v18 = vrot.slane %v8255_v35, 6  ;;  %v9206_v27 = vld [vmem:[%s9453_s11 + $0x94] sm:$0xf]  ;;  %8455 = vmatmul.mubr.msk.bf16.vlgmr.msra.gmra.mrb[4].mxu0 %vm4178_vm10, %v4177_v24  ;;  %v8259_v10 = vcombine.low %v9210_v28, %v9211_v58 }
 0x2c5   : > { %v13876_v54 = vpop.permute.xlu1 %4352  ;;  %v4632_v41 = vsel %vm4605_vm11, %v4629_v59, %v4631_v9  ;;  %v8257_v55 = vcombine.low %v9206_v27, %v9207_v62  ;;  %v4630_v2 = vsel %vm4605_vm11, %v4627_v32, %v4629_v59  ;;  %v8260_v35 = vcombine.low %v9212_v47, %v9213_v53  ;;  %v9216_v62 = vld [vmem:[%s9453_s11 + $0xbc] sm:$0xf] }
 0x2c6   : > { %v4633_v6 = vrot.slane %v8254_v14, 6  ;;  %v4643_v59 = vrot.slane %v8259_v10, 6 }
 0x2c7   : > { %v13878_v26 = vpop.permute.xlu0 %4366  ;;  %4661 = vrot.lane.b32.xlu1 %v4614_v21, %s9365_s14  ;;  %v4639_v60 = vrot.slane %v8257_v55, 6  ;;  %v9217_v55 = vld [vmem:[%s9453_s11 + $0xc0] sm:$0xf] }
 0x2c8   : > { %18621 = vst [vmem:[#allocation64_spill] sm:$0xff] %v13878_v26  ;;  %4667 = vrot.lane.b32.xlu0 %v4620_v1, %s9365_s14  ;;  %v9204_v1 = vld [vmem:[%s9453_s11 + $0x8c] sm:$0xf]  ;;  %v4636_v22 = vsel %vm4605_vm11, %v4633_v6, %v4635_v18  ;;  %v4634_v12 = vsel %vm4605_vm11, %v4631_v9, %v4633_v6 }
 0x2c9   : > { %8648 = vmatpush3.bf16.xpose.msra.mxu1 %v4228_v16  ;;  %v13889_v23 = vpop.permute.xlu1 %4356  ;;  %v8256_v21 = vcombine.low %v9204_v1, %v9205_v33  ;;  %v9208_v16 = vld [vmem:[%s9453_s11 + $0x9c] sm:$0xf] }
 0x2ca   : > { %18622 = vst [vmem:[#allocation67_spill] sm:$0xff] %v13889_v23  ;;  %8653 = vmatprep.subr.bf16.mxu1 %v18040_v30 }
 0x2cb   : > { %v13892_v11 = vpop.permute.xlu0 %4379  ;;  %4665 = vrot.lane.b32.xlu1 %v4618_v38, %s9365_s14  ;;  %v9209_v38 = vld [vmem:[%s9453_s11 + $0xa0] sm:$0xf] }
 0x2cc   : > { %4671 = vrot.lane.b32.xlu0 %v4624_v43, %s9365_s14  ;;  %v8258_v42 = vcombine.low %v9208_v16, %v9209_v38  ;;  %v4637_v43 = vrot.slane %v8256_v21, 6  ;;  %v4645_v21 = vrot.slane %v8260_v35, 6  ;;  %v9218_v16 = vld [vmem:[%s9453_s11 + $0xc4] sm:$0xf]  ;;  %v9219_v38 = vld [vmem:[%s9453_s11 + $0xc8] sm:$0xf] }
 0x2cd   : > { %v13902_v15 = vpop.permute.xlu1 %4360 }
 0x2ce   : > { %18623 = vst [vmem:[#allocation66_spill] sm:$0xff] %v13902_v15  ;;  %v4641_v32 = vrot.slane %v8258_v42, 6  ;;  %v4640_v14 = vsel %vm4605_vm11, %v4637_v43, %v4639_v60  ;;  %v4638_v6 = vsel %vm4605_vm11, %v4635_v18, %v4637_v43  ;;  %v8263_v42 = vcombine.low %v9218_v16, %v9219_v38  ;;  %v9042_v38 = vld [vmem:[%s9453_s11 + $0x2c] sm:$0xff]   ;;  %v18650_v15 = vld [vmem:[#allocation138_spill] sm:$0xff] }
 0x2cf   : > { %v13904_v63 = vpop.permute.xlu0 %4383  ;;  %4669 = vrot.lane.b32.xlu1 %v4622_v31, %s9365_s14 }
 0x2d0   : > { %4675 = vrot.lane.b32.xlu0 %v4628_v4, %s9365_s14  ;;  %8650 = vmatmul.mubr.msk.bf16.vlgmr.msra.gmra.mrb[4].mxu1 %vm4178_vm10, %v4177_v24  ;;  %v4644_v9 = vsel %vm4605_vm11, %v4641_v32, %v4643_v59  ;;  %v4642_v10 = vsel %vm4605_vm11, %v4639_v60, %v4641_v32 }
 0x2d1   : > { %v13921_v37 = vpop.permute.xlu1 %4364  ;;  %8669 = vmatprep.mubr.msk.bf16.mxu1 %vm9363_vm6, %v18040_v30 }
 0x2d2   : > { %18625 = vst [vmem:[#allocation69_spill] sm:$0xff] %v13921_v37 }
 0x2d3   : > { %v13919_v17 = vpop.f32.mrb[0].mxu0  ;;  %v13928_v20 = vpop.permute.xlu0 %4387  ;;  %4673 = vrot.lane.b32.xlu1 %v4626_v0, %s9365_s14  ;;  %v9215_v0 = vld [vmem:[%s9453_s11 + $0xb8] sm:$0xf] }
 0x2d4   : > { %18624 = vst [vmem:[#allocation233_spill] sm:$0xff] %v13919_v17  ;;  %v13926_v61 = vpop.f32.mrb[1].mxu0  ;;  %18627 = vst [vmem:[#allocation68_spill] sm:$0xff] %v13928_v20  ;;  %4679 = vrot.lane.b32.xlu0 %v4632_v41, %s9365_s14  ;;  %v9214_v41 = vld [vmem:[%s9453_s11 + $0xb4] sm:$0xf] }
 0x2d5   : > { %18626 = vst [vmem:[#allocation266_spill] sm:$0xff] %v13926_v61  ;;  %v3127_v7 = vpop.f32.mrb[2].mxu0  ;;  %v13938_v4 = vpop.permute.xlu1 %4377  ;;  %v8261_v24 = vcombine.low %v9214_v41, %v9215_v0  ;;  %v9036_v0 = vld [vmem:[%s9453_s11 + $0x14] sm:$0xff]   ;;  %v9051_v61 = vld [vmem:[%s9453_s11 + $0xa4] sm:$0xff]  }
 0x2d6   : > { %v3128_v31 = vpop.f32.mrb[3].mxu0 }
 0x2d7   : > { %v13940_v51 = vpop.permute.xlu0 %4391  ;;  %4677 = vrot.lane.b32.xlu1 %v4630_v2, %s9365_s14  ;;  %v4647_v27 = vrot.slane %v8261_v24, 6  ;;  %v8262_v2 = vcombine.low %v9216_v62, %v9217_v55  ;;  %v9040_v55 = vld [vmem:[%s9453_s11 + $0x1c] sm:$0xff]  }
 0x2d8   : > { %18628 = vst [vmem:[#allocation71_spill] sm:$0xff] %v13940_v51  ;;  %4683 = vrot.lane.b32.xlu0 %v4636_v22, %s9365_s14  ;;  %v4651_v22 = vrot.slane %v8263_v42, 6  ;;  %v9039_v42 = vld [vmem:[%s9453_s11 + $0x44] sm:$0xff]  }
 0x2d9   : > { %v13950_v1 = vpop.permute.xlu1 %4381  ;;  %v4648_v18 = vsel %vm4605_vm11, %v4645_v21, %v4647_v27  ;;  %v4649_v7 = vrot.slane %v8262_v2, 6 }
 0x2db   : > { %v13952_v33 = vpop.permute.xlu0 %4395  ;;  %4681 = vrot.lane.b32.xlu1 %v4634_v12, %s9365_s14  ;;  %v4652_v60 = vsel %vm4605_vm11, %v4649_v7, %v4651_v22  ;;  %v4650_v24 = vsel %vm4605_vm11, %v4647_v27, %v4649_v7  ;;  %v9038_v27 = vld [vmem:[%s9453_s11 + $0x34] sm:$0xff]   ;;  %v9044_v7 = vld [vmem:[%s9453_s11 + $0x3c] sm:$0xff]  }
 0x2dc   : > { %4687 = vrot.lane.b32.xlu0 %v4640_v14, %s9365_s14  ;;  %v4646_v14 = vsel %vm4605_vm11, %v4643_v59, %v4645_v21 }
 0x2dd   : > { %v13962_v28 = vpop.permute.xlu1 %4385 }
 0x2df   : > { %v13964_v58 = vpop.permute.xlu0 %4399  ;;  %4685 = vrot.lane.b32.xlu1 %v4638_v6, %s9365_s14  ;;  %v9037_v6 = vld [vmem:[%s9453_s11 + $0x24] sm:$0xff]  }
 0x2e0   : > { %4691 = vrot.lane.b32.xlu0 %v4644_v9, %s9365_s14 }
 0x2e1   : > { %v13970_v43 = vpop.permute.xlu1 %4389 }
 0x2e2   : > { %18629 = vst [vmem:[#allocation70_spill] sm:$0xff] %v13970_v43 }
 0x2e3   : > { %v13974_v12 = vpop.permute.xlu0 %4403  ;;  %4689 = vrot.lane.b32.xlu1 %v4642_v10, %s9365_s14 }
 0x2e4   : > { %v13972_v31 = vpop.f32.mrb[0].mxu1  ;;  %18631 = vst [vmem:[#allocation7_spill] sm:$0xff] %v13974_v12  ;;  %4695 = vrot.lane.b32.xlu0 %v4648_v18, %s9365_s14 }
 0x2e5   : > { %18630 = vst [vmem:[#allocation76_spill] sm:$0xff] %v13972_v31  ;;  %v8631_v47 = vpop.f32.mrb[1].mxu1  ;;  %v13980_v53 = vpop.permute.xlu1 %4393 }
 0x2e6   : > { %v3167_v32 = vpop.f32.mrb[2].mxu1 }
 0x2e7   : > { %v8632_v35 = vpop.f32.mrb[3].mxu1  ;;  %v13982_v41 = vpop.permute.xlu0 %4407  ;;  %4693 = vrot.lane.b32.xlu1 %v4646_v14, %s9365_s14  ;;  %v9043_v32 = vld [vmem:[%s9453_s11 + $0x64] sm:$0xff]  }
 0x2e8   : > { %18632 = vst [vmem:[#allocation73_spill] sm:$0xff] %v13982_v41  ;;  %4699 = vrot.lane.b32.xlu0 %v4652_v60, %s9365_s14  ;;  %v9046_v60 = vld [vmem:[%s9453_s11 + $0x4c] sm:$0xff]  }
 0x2e9   : > { %v13988_v59 = vpop.permute.xlu1 %4397 }
 0x2eb   : > { %v13990_v9 = vpop.permute.xlu0 %4411  ;;  %4697 = vrot.lane.b32.xlu1 %v4650_v24, %s9365_s14  ;;  %v9048_v24 = vld [vmem:[%s9453_s11 + $0x5c] sm:$0xff]  }
 0x2ec   : > { %5332 = vrot.lane.b32.xlu0 %v9036_v0, %s9364_s6 }
 0x2ed   : > { %v13995_v21 = vpop.permute.xlu1 %4401 }
 0x2ef   : > { %v13997_v62 = vpop.permute.xlu0 %4415  ;;  %4701 = vrot.lane.b32.xlu1 %v4651_v22, %s9365_s14  ;;  %v9041_v22 = vld [vmem:[%s9453_s11 + $0x54] sm:$0xff]  }
 0x2f0   : > { %18633 = vst [vmem:[#allocation81_spill] sm:$0xff] %v13997_v62  ;;  %5336 = vrot.lane.b32.xlu0 %v9037_v6, %s9364_s6  ;;  %v9045_v6 = vld [vmem:[%s9453_s11 + $0x74] sm:$0xff]  }
 0x2f1   : > { %v14003_v2 = vpop.permute.xlu1 %4405 }
 0x2f2   : > { %18634 = vst [vmem:[#allocation264_spill] sm:$0xff] %v14003_v2 }
 0x2f3   : > { %v14005_v16 = vpop.permute.xlu0 %4419  ;;  %5334 = vrot.lane.b32.xlu1 %v9040_v55, %s9364_s6 }
 0x2f4   : > { %18635 = vst [vmem:[#allocation77_spill] sm:$0xff] %v14005_v16  ;;  %5340 = vrot.lane.b32.xlu0 %v9038_v27, %s9364_s6  ;;  %v18645_v16 = vld [vmem:[#allocation137_spill] sm:$0xff] }
 0x2f5   : > { %v14011_v10 = vpop.permute.xlu1 %4409 }
 0x2f7   : > { %v14013_v18 = vpop.permute.xlu0 %4423  ;;  %5338 = vrot.lane.b32.xlu1 %v9042_v38, %s9364_s6  ;;  %v9050_v38 = vld [vmem:[%s9453_s11 + $0x6c] sm:$0xff]  }
 0x2f8   : > { %18636 = vst [vmem:[#allocation79_spill] sm:$0xff] %v14013_v18  ;;  %5344 = vrot.lane.b32.xlu0 %v9039_v42, %s9364_s6  ;;  %v9047_v42 = vld [vmem:[%s9453_s11 + $0x84] sm:$0xff]  }
 0x2f9   : > { %v14019_v14 = vpop.permute.xlu1 %4413 }
 0x2fa   : > { %18637 = vst [vmem:[#allocation259_spill] sm:$0xff] %v14019_v14 }
 0x2fb   : > { %v14021_v47 = vpop.permute.xlu0 %4531  ;;  %5342 = vrot.lane.b32.xlu1 %v9044_v7, %s9364_s6 }
 0x2fc   : > { %5348 = vrot.lane.b32.xlu0 %v9041_v22, %s9364_s6 }
 0x2fd   : > { %v14027_v35 = vpop.permute.xlu1 %4417 }
 0x2fe   : > { %18638 = vst [vmem:[#allocation231_spill] sm:$0xff] %v14027_v35 }
 0x2ff   : > { %v14029_v0 = vpop.permute.xlu0 %4535  ;;  %5346 = vrot.lane.b32.xlu1 %v9046_v60, %s9364_s6  ;;  %v9052_v60 = vld [vmem:[%s9453_s11 + $0x7c] sm:$0xff]  }
 0x300   : > { %5352 = vrot.lane.b32.xlu0 %v9043_v32, %s9364_s6  ;;  %v9049_v32 = vld [vmem:[%s9453_s11 + $0x94] sm:$0xff]  }
 0x301   : > { %v14035_v55 = vpop.permute.xlu1 %4421 }
 0x302   : > { %18639 = vst [vmem:[#allocation241_spill] sm:$0xff] %v14035_v55 }
 0x303   : > { %v14037_v27 = vpop.permute.xlu0 %4539  ;;  %5350 = vrot.lane.b32.xlu1 %v9048_v24, %s9364_s6 }
 0x304   : > { %5356 = vrot.lane.b32.xlu0 %v9045_v6, %s9364_s6  ;;  %v9054_v6 = vld [vmem:[%s9453_s11 + $0x8c] sm:$0xff]  }
 0x305   : > { %v14043_v7 = vpop.permute.xlu1 %4425 }
 0x306   : > { %18640 = vst [vmem:[#allocation274_spill] sm:$0xff] %v14043_v7  ;;  %v9053_v7 = vld [vmem:[%s9453_s11 + $0xb4] sm:$0xff]  }
 0x307   : > { %v14045_v22 = vpop.permute.xlu0 %4543  ;;  %5354 = vrot.lane.b32.xlu1 %v9050_v38, %s9364_s6 }
 0x308   : > { %18641 = vst [vmem:[#allocation83_spill] sm:$0xff] %v14045_v22  ;;  %5360 = vrot.lane.b32.xlu0 %v9047_v42, %s9364_s6  ;;  %v9056_v42 = vld [vmem:[%s9453_s11 + $0x9c] sm:$0xff]  }
 0x309   : > { %v14051_v31 = vpop.permute.xlu1 %4533 }
 0x30b   : > { %v14053_v24 = vpop.permute.xlu0 %4547  ;;  %5358 = vrot.lane.b32.xlu1 %v9052_v60, %s9364_s6  ;;  %v9057_v60 = vld [vmem:[%s9453_s11 + $0xac] sm:$0xff]  }
 0x30c   : > { %5364 = vrot.lane.b32.xlu0 %v9049_v32, %s9364_s6  ;;  %v9055_v32 = vld [vmem:[%s9453_s11 + $0xc4] sm:$0xff]  }
 0x30d   : > { %v14059_v17 = vpop.permute.xlu1 %4537 }
 0x30f   : > { %v14061_v38 = vpop.permute.xlu0 %4551  ;;  %5362 = vrot.lane.b32.xlu1 %v9054_v6, %s9364_s6  ;;  %v9058_v6 = vld [vmem:[%s9453_s11 + $0xbc] sm:$0xff]  }
 0x310   : > { %5368 = vrot.lane.b32.xlu0 %v9051_v61, %s9364_s6 }
 0x311   : > { %v14067_v26 = vpop.permute.xlu1 %4541 }
 0x312   : > { %18642 = vst [vmem:[#allocation267_spill] sm:$0xff] %v14067_v26 }
 0x313   : > { %v14069_v18 = vpop.permute.xlu0 %4555  ;;  %5366 = vrot.lane.b32.xlu1 %v9056_v42, %s9364_s6  ;;  %v9059_v42 = vld [vmem:[%s9453_s11 + $0xcc] sm:$0xff]  }
 0x314   : > { %5372 = vrot.lane.b32.xlu0 %v9053_v7, %s9364_s6 }
 0x315   : > { %v14075_v37 = vpop.permute.xlu1 %4545 }
 0x316   : > { %18643 = vst [vmem:[#allocation238_spill] sm:$0xff] %v14075_v37 }
 0x317   : > { %v14077_v55 = vpop.permute.xlu0 %4559  ;;  %5370 = vrot.lane.b32.xlu1 %v9057_v60, %s9364_s6  ;;  %v18647_v60 = vld [vmem:[#allocation140_spill] sm:$0xff] }
 0x318   : > { %18644 = vst [vmem:[#allocation261_spill] sm:$0xff] %v14077_v55  ;;  %5376 = vrot.lane.b32.xlu0 %v9055_v32, %s9364_s6 }
 0x319   : > { %v14082_v61 = vpop.permute.xlu1 %4549 }
 0x31b   : > { %v14084_v25 = vpop.permute.xlu0 %4563  ;;  %5374 = vrot.lane.b32.xlu1 %v9058_v6, %s9364_s6  ;;  %v18651_v6 = vld [vmem:[#allocation142_spill] sm:$0xff] }
 0x31c   : > { %5389 = vrot.lane.b32.xlu0 %v18645_v16, %s9360_s12 }
 0x31d   : > { %v14090_v7 = vpop.permute.xlu1 %4553 }
 0x31f   : > { %v14092_v37 = vpop.permute.xlu0 %4567  ;;  %5378 = vrot.lane.b32.xlu1 %v9059_v42, %s9364_s6  ;;  %v18655_v42 = vld [vmem:[#allocation144_spill] sm:$0xff] }
 0x320   : > { %18646 = vst [vmem:[#allocation211_spill] sm:$0xff] %v14092_v37  ;;  %5393 = vrot.lane.b32.xlu0 %v18647_v60, %s9360_s12 }
 0x321   : > { %v14097_v32 = vpop.permute.xlu1 %4557 }
 0x322   : > { %18648 = vst [vmem:[#allocation27_spill] sm:$0xff] %v14097_v32 }
 0x323   : > { %v14099_v51 = vpop.permute.xlu0 %4571  ;;  %5391 = vrot.lane.b32.xlu1 %v18650_v15, %s9360_s12  ;;  %v18658_v15 = vld [vmem:[#allocation148_spill] sm:$0xff] }
 0x324   : > { %18649 = vst [vmem:[#allocation29_spill] sm:$0xff] %v14099_v51  ;;  %5397 = vrot.lane.b32.xlu0 %v18651_v6, %s9360_s12  ;;  %v18657_v51 = vld [vmem:[#allocation143_spill] sm:$0xff] }
 0x325   : > { %v14105_v16 = vpop.permute.xlu1 %4561 }
 0x326   : > { %18652 = vst [vmem:[#allocation12_spill] sm:$0xff] %v14105_v16 }
 0x327   : > { %v14107_v41 = vpop.permute.xlu0 %4575  ;;  %5395 = vrot.lane.b32.xlu1 %v18654_v36, %s9360_s12  ;;  %v18661_v36 = vld [vmem:[#allocation135_spill] sm:$0xff] }
 0x328   : > { %18653 = vst [vmem:[#allocation240_spill] sm:$0xff] %v14107_v41  ;;  %5401 = vrot.lane.b32.xlu0 %v18655_v42, %s9360_s12  ;;  %v18660_v41 = vld [vmem:[#allocation147_spill] sm:$0xff]  ;;  %v4370_v22 = vshll.u32 %v18661_v36, 16 }
 0x329   : > { %v14113_v60 = vpop.permute.xlu1 %4565  ;;  %v18662_v42 = vld [vmem:[#allocation151_spill] sm:$0xff] }
 0x32a   : > { %v4372_v43 = vrot.slane %v4370_v22, 1  ;;  %v18672_v22 = vld [vmem:[#allocation9_spill] sm:$0xff] }
 0x32b   : > { %v14115_v29 = vpop.permute.xlu0 %4579  ;;  %5399 = vrot.lane.b32.xlu1 %v18657_v51, %s9360_s12  ;;  %v18664_v51 = vld [vmem:[#allocation149_spill] sm:$0xff] }
 0x32c   : > { %18656 = vst [vmem:[#allocation252_spill] sm:$0xff] %v14115_v29  ;;  %5405 = vrot.lane.b32.xlu0 %v18658_v15, %s9360_s12  ;;  %v4368_v15 = vshrl.u32 %v18661_v36, 16  ;;  %v18671_v36 = vld [vmem:[#allocation156_spill] sm:$0xff] }
 0x32d   : > { %v14121_v6 = vpop.permute.xlu1 %4569 }
 0x32e   : > { %18659 = vst [vmem:[#allocation58_spill] sm:$0xff] %v14121_v6  ;;  %v18668_v6 = vld [vmem:[#allocation154_spill] sm:$0xff] }
 0x32f   : > { %v14123_v16 = vpop.permute.xlu0 %4655  ;;  %5403 = vrot.lane.b32.xlu1 %v18660_v41, %s9360_s12 }
 0x330   : > { %5409 = vrot.lane.b32.xlu0 %v18662_v42, %s9360_s12  ;;  %v4373_v42 = vor.u32 %v4372_v43, %v4368_v15  ;;  %v18677_v15 = vld [vmem:[#allocation74_spill] sm:$0xff] }
 0x331   : > { %v14130_v35 = vpop.permute.xlu1 %4573 }
 0x332   : > { %18663 = vst [vmem:[#allocation277_spill] sm:$0xff] %v14130_v35  ;;  %v18669_v35 = vld [vmem:[#allocation157_spill] sm:$0xff] }
 0x333   : > { %v14132_v29 = vpop.permute.xlu0 %4659  ;;  %5407 = vrot.lane.b32.xlu1 %v18664_v51, %s9360_s12  ;;  %v18673_v51 = vld [vmem:[#allocation161_spill] sm:$0xff] }
 0x334   : > { %5413 = vrot.lane.b32.xlu0 %v18665_v8, %s9360_s12  ;;  %v4374_v8 = vsel %vm407_vm0, %v4373_v42, %v18672_v22  ;;  %v18680_v42 = vld [vmem:[#allocation158_spill] sm:$0xff]  ;;  %v18681_v22 = vld [vmem:[#allocation75_spill] sm:$0xff] }
 0x335   : > { %v14139_v55 = vpop.permute.xlu1 %4577 }
 0x336   : > { %18666 = vst [vmem:[#allocation232_spill] sm:$0xff] %v14139_v55  ;;  %v18674_v55 = vld [vmem:[#allocation72_spill] sm:$0xff] }
 0x337   : > { %v14141_v41 = vpop.permute.xlu0 %4663  ;;  %5411 = vrot.lane.b32.xlu1 %v18668_v6, %s9360_s12  ;;  %v18676_v43 = vshll.u32 %v18674_v55, 16 }
 0x338   : > { %18667 = vst [vmem:[#allocation271_spill] sm:$0xff] %v14141_v41  ;;  %5417 = vrot.lane.b32.xlu0 %v18669_v35, %s9360_s12  ;;  %v18675_v41 = vshrl.u32 %v18674_v55, 16  ;;  %v18678_v35 = vshrl.u32 %v18677_v15, 16  ;;  %v18684_v55 = vld [vmem:[#allocation80_spill] sm:$0xff] }
 0x339   : > { %v4654_v26 = vpop.permute.xlu1 %4653  ;;  %v5438_v6 = vrot.slane %v18676_v43, 2  ;;  %v18685_v43 = vshrl.u32 %v18684_v55, 16 }
 0x33a   : > { %v5437_v62 = vrot.slane %v18675_v41, 1  ;;  %v5440_v20 = vrot.slane %v18678_v35, 1  ;;  %v18683_v41 = vshll.u32 %v18681_v22, 16  ;;  %v18686_v35 = vshll.u32 %v18684_v55, 16 }
 0x33b   : > { %v14147_v2 = vpop.permute.xlu0 %4667  ;;  %5415 = vrot.lane.b32.xlu1 %v18671_v36, %s9360_s12  ;;  %v5448_v46 = vrot.slane %v18685_v43, 1  ;;  %v18692_v43 = vld [vmem:[#allocation13_spill] sm:$0xff] }
 0x33c   : > { %18670 = vst [vmem:[#allocation276_spill] sm:$0xff] %v14147_v2  ;;  %5421 = vrot.lane.b32.xlu0 %v18673_v51, %s9360_s12  ;;  %v18679_v2 = vshll.u32 %v18677_v15, 16  ;;  %v18682_v51 = vshrl.u32 %v18681_v22, 16  ;;  %v5445_v12 = vrot.slane %v18683_v41, 2  ;;  %v5449_v37 = vrot.slane %v18686_v35, 2  ;;  %v18687_v15 = vld [vmem:[#allocation14_spill] sm:$0xff] }
 0x33d   : > { %v14163_v30 = vpop.permute.xlu1 %4657  ;;  %v4711_v14 = vsel %vm760_vm3, %v13597_v5, %v18687_v15  ;;  %v18689_v22 = vld [vmem:[#allocation164_spill] sm:$0xff]  ;;  %v18694_v15 = vld [vmem:[#allocation15_spill] sm:$0xff] }
 0x33e   : > { %v5441_v23 = vrot.slane %v18679_v2, 2  ;;  %v5444_v32 = vrot.slane %v18682_v51, 1  ;;  %v4705_v2 = vsel %vm760_vm3, %v13565_v56, %v4374_v8  ;;  %v18690_v41 = vld [vmem:[#allocation24_spill] sm:$0xff]  ;;  %v4708_v56 = vsel %vm760_vm3, %v13689_v39, %v18692_v43  ;;  %v18700_v43 = vld [vmem:[#allocation30_spill] sm:$0xff] }
 0x33f   : > { %v4672_v36 = vpop.permute.xlu0 %4671  ;;  %5419 = vrot.lane.b32.xlu1 %v18680_v42, %s9360_s12  ;;  %v18688_v42 = vld [vmem:[#allocation19_spill] sm:$0xff]  ;;  %v14190_v55 = vsel %vm760_vm3, %v13664_v52, %v18690_v41  ;;  %v5439_v8 = vor.u32 %v5438_v6, %v5437_v62  ;;  %v18693_v5 = vld [vmem:[#allocation28_spill] sm:$0xff] }
 0x340   : > { %v14183_v51 = vsel %vm760_vm3, %v13639_v40, %v18688_v42  ;;  %5425 = vrot.lane.b32.xlu0 %v18689_v22, %s9360_s12  ;;  %18691 = vst [vmem:[#allocation31_spill] sm:$0xff] %v14190_v55  ;;  %v14195_v35 = vor.u32 %v5441_v23, %v5440_v20  ;;  %v4729_v40 = vsel %vm760_vm3, %v13691_v57, %v18693_v5  ;;  %v18695_v22 = vld [vmem:[#allocation33_spill] sm:$0xff]  ;;  %v18696_v41 = vld [vmem:[#allocation20_spill] sm:$0xff] }
 0x341   : > { %v14203_v42 = vsel %vm760_vm3, %v13724_v50, %v18694_v15  ;;  %v4735_v52 = vsel %vm760_vm3, %v13732_v13, %v18695_v22  ;;  %v14211_v39 = vsel %vm760_vm3, %v13751_v34, %v18696_v41  ;;  %v14213_v23 = vpop.permute.xlu1 %4661  ;;  %v18698_v20 = vld [vmem:[#allocation37_spill] sm:$0xff]  ;;  %v4779_v50 = vsel %vm812_vm4, %v4705_v2, %v13938_v4  ;;  %v18699_v13 = vld [vmem:[#allocation162_spill] sm:$0xff]  ;;  %v9220_v41 = vld [vmem:[%s9453_s11 + $0xd4] ss:$0 sps:$4 sm:$0x11]  }
 0x342   : > { %18697 = vst [vmem:[#allocation5_spill] sm:$0xff] %v14211_v39  ;;  %v14218_v57 = vsel %vm760_vm3, %v13753_v45, %v18698_v20  ;;  %v14226_v6 = vor.u32 %v5445_v12, %v5444_v32  ;;  %v14228_v34 = vor.u32 %v5449_v37, %v5448_v46  ;;  %v4732_v5 = vsel %vm760_vm3, %v13802_v19, %v18700_v43  ;;  %v18701_v15 = vld [vmem:[#allocation45_spill] sm:$0xff]  ;;  %v18702_v12 = vld [vmem:[#allocation170_spill] sm:$0xff]  ;;  %v18718_v55 = vld [vmem:[#allocation168_spill] sm:$0xff] }
 0x343   : > { %v14222_v62 = vpop.permute.xlu0 %4675  ;;  %5423 = vrot.lane.b32.xlu1 %v18699_v13, %s9360_s12  ;;  %v14236_v45 = vsel %vm760_vm3, %v13805_v49, %v18701_v15  ;;  %v4781_v4 = vsel %vm812_vm4, %v4708_v56, %v13892_v11  ;;  %v4829_v2 = vsel %vm1064_vm2, %v4779_v50, %v14021_v47  ;;  %v5443_v37 = vsel %vm3701_vm7, %v5439_v8, %v14195_v35  ;;  %v18703_v19 = vld [vmem:[#allocation82_spill] sm:$0xff]  ;;  %v18707_v50 = vld [vmem:[#allocation84_spill] sm:$0xff] }
 0x344   : > { %5429 = vrot.lane.b32.xlu0 %v18702_v12, %s9360_s12  ;;  %v4879_v46 = vsel %vm4128_vm9, %v4829_v2, %v4654_v26  ;;  %v18704_v32 = vshrl.u32 %v18703_v19, 16  ;;  %v5387_v49 = vrot.slane %v9220_v41, 1  ;;  %v4831_v20 = vsel %vm1064_vm2, %v4781_v4, %v14051_v31  ;;  %v18711_v31 = vld [vmem:[#allocation167_spill] sm:$0xff] }
 0x345   : > { %v14252_v11 = vpop.permute.xlu1 %4665  ;;  %v18706_v47 = vshll.u32 %v18703_v19, 16  ;;  %v18708_v13 = vshrl.u32 %v18707_v50, 16  ;;  %v18709_v26 = vshll.u32 %v18707_v50, 16  ;;  %v4797_v8 = vsel %vm812_vm4, %v4732_v5, %v13952_v33  ;;  %v18712_v19 = vld [vmem:[#allocation86_spill] sm:$0xff]  ;;  %v18714_v5 = vld [vmem:[#allocation175_spill] sm:$0xff] }
 0x346   : > { %v5452_v22 = vrot.slane %v18704_v32, 1  ;;  %18705 = vst [vmem:[#allocation16_spill] sm:$0xff] %v14252_v11  ;;  %v14264_v2 = vsel %vm4128_vm9, %v4831_v20, %v14123_v16  ;;  %v5451_v4 = vsel %vm3701_vm7, %v14226_v6, %v14228_v34  ;;  %v18713_v32 = vshrl.u32 %v18712_v19, 16  ;;  %v18716_v50 = vld [vmem:[#allocation87_spill] sm:$0xff] }
 0x347   : > { %v5453_v56 = vrot.slane %v18706_v47, 2  ;;  %v5456_v43 = vrot.slane %v18708_v13, 1  ;;  %v5457_v15 = vrot.slane %v18709_v26, 2  ;;  %v14266_v12 = vpop.permute.xlu0 %4679  ;;  %5427 = vrot.lane.b32.xlu1 %v18711_v31, %s9360_s12  ;;  %v4847_v47 = vsel %vm1064_vm2, %v4797_v8, %v14082_v61 }
 0x348   : > { %18710 = vst [vmem:[#allocation54_spill] sm:$0xff] %v14266_v12  ;;  %v5460_v41 = vrot.slane %v18713_v32, 1  ;;  %v4955_v33 = vrot.slane %v4879_v46, 2  ;;  %5433 = vrot.lane.b32.xlu0 %v18714_v5, %s9360_s12  ;;  %v18715_v16 = vshll.u32 %v18712_v19, 16  ;;  %v18717_v13 = vshrl.u32 %v18716_v50, 16 }
 0x349   : > { %v4795_v31 = vsel %vm812_vm4, %v4729_v40, %v13980_v53  ;;  %v4897_v11 = vsel %vm4128_vm9, %v4847_v47, %v4672_v36  ;;  %v5388_v32 = vsel %vm660_vm1, %v18718_v55, %v5387_v49  ;;  %v18719_v61 = vshll.u32 %v18716_v50, 16  ;;  %v4670_v5 = vpop.permute.xlu1 %4669  ;;  %v18723_v49 = vld [vmem:[#allocation173_spill] sm:$0xff] }
 0x34a   : > { %v5461_v20 = vrot.slane %v18715_v16, 2  ;;  %v5464_v26 = vrot.slane %v18717_v13, 1  ;;  %v4845_v8 = vsel %vm1064_vm2, %v4795_v31, %v14053_v24  ;;  %v4956_v19 = vrot.slane %v14264_v2, 2  ;;  %v18720_v16 = vld [vmem:[#allocation88_spill] sm:$0xff]  ;;  %v18724_v24 = vld [vmem:[#allocation90_spill] sm:$0xff] }
 0x34b   : > { %v5465_v46 = vrot.slane %v18719_v61, 2  ;;  %v18721_v12 = vshrl.u32 %v18720_v16, 16  ;;  %v18722_v39 = vshll.u32 %v18720_v16, 16  ;;  %v4783_v36 = vsel %vm812_vm4, %v4711_v14, %v13950_v1  ;;  %v14302_v40 = vpop.permute.xlu0 %4683  ;;  %5431 = vrot.lane.b32.xlu1 %v18723_v49, %s9360_s12  ;;  %v18727_v49 = vld [vmem:[#allocation35_spill] sm:$0xff] }
 0x34c   : > { %v14300_v55 = vsel %vm4128_vm9, %v4845_v8, %v4670_v5  ;;  %v18725_v2 = vshrl.u32 %v18724_v24, 16  ;;  %v18726_v50 = vshll.u32 %v18724_v24, 16  ;;  %v4972_v31 = vrot.slane %v4897_v11, 2  ;;  %5541 = vrot.lane.b32.xlu0 %v5443_v37, %s9361_s13 }
 0x34d   : > { %v5468_v13 = vrot.slane %v18721_v12, 1  ;;  %v5469_v53 = vrot.slane %v18722_v39, 2  ;;  %v4833_v39 = vsel %vm1064_vm2, %v4783_v36, %v14029_v0  ;;  %v4970_v1 = vrot.slane %v14300_v55, 2  ;;  %v4674_v36 = vpop.permute.xlu1 %4673 }
 0x34e   : > { %v5472_v47 = vrot.slane %v18725_v2, 1  ;;  %v5473_v12 = vrot.slane %v18726_v50, 2  ;;  %v4957_v14 = vsel %vm3862_vm8, %v4955_v33, %v4956_v19  ;;  %v4799_v61 = vsel %vm812_vm4, %v4735_v52, %v13988_v59 }
 0x34f   : > { %v14319_v8 = vsel %vm4128_vm9, %v4833_v39, %v14163_v30  ;;  %v5454_v5 = vor.u32 %v5453_v56, %v5452_v22  ;;  %v5458_v16 = vor.u32 %v5457_v15, %v5456_v43  ;;  %v4738_v0 = vsel %vm760_vm3, %v13820_v48, %v18727_v49  ;;  %v4688_v30 = vpop.permute.xlu0 %4687  ;;  %5435 = vrot.lane.b32.xlu1 %v5388_v32, %s9360_s12  ;;  %v9224_v49 = vld [vmem:[%s9453_s11 + $0x18] sm:$0xf] }
 0x350   : > { %v4849_v11 = vsel %vm1064_vm2, %v4799_v61, %v14061_v38  ;;  %v4973_v37 = vsel %vm3862_vm8, %v4970_v1, %v4972_v31  ;;  %v5462_v33 = vor.u32 %v5461_v20, %v5460_v41  ;;  %v5008_v52 = vsel %vm4178_vm10, %v4957_v14, 0  ;;  %5545 = vrot.lane.b32.xlu0 %v5451_v4, %s9361_s13  ;;  %v14400_v14 = vld [vmem:[%s9453_s11 + $0x94] sm:$0xff]  }
 0x351   : > { %v4899_v59 = vsel %vm4128_vm9, %v4849_v11, %v4674_v36  ;;  %8819 = vmatprep.subr.msk.bf16.mxu0 %vm4178_vm10, %v4973_v37  ;;  %v5466_v48 = vor.u32 %v5465_v46, %v5464_v26  ;;  %v5470_v22 = vor.u32 %v5469_v53, %v5468_v13  ;;  %v4958_v38 = vrot.slane %v14319_v8, 2  ;;  %v14344_v26 = vld [vmem:[%s9453_s11 + $0x54] sm:$0xff]   ;;  %v14348_v46 = vld [vmem:[%s9453_s11 + $0x5c] sm:$0xff]   ;;  %v18728_v13 = vld [vmem:[#allocation47_spill] sm:$0xff]  ;;  %v4678_v24 = vpop.permute.xlu1 %4677 }
 0x352   : > { %v4974_v56 = vrot.slane %v4899_v59, 2  ;;  %8466 = vmatpush3.bf16.xpose.msra.mxu0 %v5008_v52  ;;  %v5447_v43 = vsel %vm3701_vm7, %v14195_v35, %v14226_v6  ;;  %v14338_v15 = vor.u32 %v5473_v12, %v5472_v47  ;;  %v4801_v41 = vsel %vm812_vm4, %v4738_v0, %v13964_v58  ;;  %v18729_v6 = vld [vmem:[#allocation39_spill] sm:$0xff]  ;;  %v18730_v47 = vld [vmem:[#allocation46_spill] sm:$0xff] }
 0x353   : > { %v5459_v20 = vsel %vm3701_vm7, %v5454_v5, %v5458_v16  ;;  %v5607_v32 = vrot.slane %v14344_v26, 2  ;;  %v5609_v4 = vrot.slane %v14348_v46, 2  ;;  %v14354_v35 = vsel %vm760_vm3, %v13828_v3, %v18728_v13  ;;  %5543 = vrot.lane.b32.xlu1 %v5447_v43, %s9361_s13 }
 0x354   : > { %v14359_v58 = vsel %vm760_vm3, %v13841_v44, %v18729_v6  ;;  %v4851_v53 = vsel %vm1064_vm2, %v4801_v41, %v14090_v7  ;;  %v4975_v2 = vsel %vm3862_vm8, %v4972_v31, %v4974_v56  ;;  %v4756_v50 = vsel %vm760_vm3, %v13876_v54, %v18730_v47  ;;  %v14374_v44 = vpop.permute.xlu0 %4691  ;;  %v5211_v7 = vld [vmem:[%s9453_s11 + $0x14] sm:$0xc]  ;;  %5549 = vrot.lane.b32.xlu0 %v5459_v20, %s9361_s13  ;;  %v14448_v41 = vld [vmem:[%s9453_s11 + $0x24] sm:$0xff]  }
 0x355   : > { %v4785_v3 = vsel %vm812_vm4, %v14203_v42, %v13904_v63  ;;  %v14372_v12 = vsel %vm4128_vm9, %v4851_v53, %v14222_v62  ;;  %8820 = vmatprep.subr.msk.bf16.mxu0 %vm4178_vm10, %v4975_v2  ;;  %v4959_v54 = vsel %vm3862_vm8, %v4956_v19, %v4958_v38  ;;  %v5467_v63 = vsel %vm3701_vm7, %v5462_v33, %v5466_v48  ;;  %v18731_v6 = vld [vmem:[#allocation104_spill] sm:$0xff] }
 0x356   : > { %v5475_v42 = vsel %vm3701_vm7, %v5470_v22, %v14338_v15  ;;  %v5455_v62 = vsel %vm3701_vm7, %v14228_v34, %v5454_v5  ;;  %v4787_v39 = vsel %vm812_vm4, %v14183_v51, %v13962_v28  ;;  %v14396_v31 = vsel %vm3862_vm8, %v5607_v32, %v5609_v4  ;;  %v14406_v28 = vpop.permute.xlu1 %4681 }
 0x357   : > { %v5463_v19 = vsel %vm3701_vm7, %v5458_v16, %v5462_v33  ;;  %v5623_v61 = vrot.slane %v14400_v14, 2  ;;  %v4835_v34 = vsel %vm1064_vm2, %v4785_v3, %v14059_v17  ;;  %v4976_v5 = vrot.slane %v14372_v12, 2  ;;  %5547 = vrot.lane.b32.xlu1 %v5455_v62, %s9361_s13  ;;  %v18734_v12 = vld [vmem:[#allocation259_spill] sm:$0xff] }
 0x358   : > { %v5471_v51 = vsel %vm3701_vm7, %v5466_v48, %v5470_v22  ;;  %v8291_v0 = vcombine.low %v5211_v7, %v9224_v49  ;;  %v4813_v11 = vsel %vm812_vm4, %v4756_v50, %v13990_v9  ;;  %v4803_v16 = vsel %vm812_vm4, %v14218_v57, %v13995_v21  ;;  %v14419_v36 = vpop.permute.xlu0 %4695  ;;  %5553 = vrot.lane.b32.xlu0 %v5467_v63, %s9361_s13  ;;  %v18735_v63 = vld [vmem:[#allocation106_spill] sm:$0xff]  ;;  %v18738_v49 = vld [vmem:[#allocation211_spill] sm:$0xff] }
 0x359   : > { %v14417_v17 = vsel %vm4128_vm9, %v4835_v34, %v14132_v29  ;;  %v5011_v37 = vsel %vm4178_vm10, %v4959_v54, 0  ;;  %v4853_v33 = vsel %vm1064_vm2, %v4803_v16, %v14069_v18  ;;  %v4863_v9 = vsel %vm1064_vm2, %v4813_v11, %v14113_v60  ;;  %v14430_v29 = vld [vmem:[%s9453_s11 + $0x9c] sm:$0xff]  }
 0x35a   : > { %8468 = vmatpush3.bf16.xpose.msra.mxu0 %v5011_v37  ;;  %v4977_v21 = vsel %vm3862_vm8, %v4974_v56, %v4976_v5  ;;  %v5625_v57 = vrot.slane %v14430_v29, 2  ;;  %v4811_v59 = vsel %vm812_vm4, %v14236_v45, %v14011_v10  ;;  %v14437_v52 = vsel %vm4128_vm9, %v4863_v9, %v4688_v30  ;;  %v9226_v60 = vld [vmem:[%s9453_s11 + $0x1c] sm:$0xff]   ;;  %v4686_v43 = vpop.permute.xlu1 %4685 }
 0x35b   : > { %v14440_v18 = vsel %vm4128_vm9, %v4853_v33, %v4678_v24  ;;  %8821 = vmatprep.subr.msk.bf16.mxu0 %vm4178_vm10, %v4977_v21  ;;  %v5593_v48 = vrot.slane %v9226_v60, 2  ;;  %v4861_v22 = vsel %vm1064_vm2, %v4811_v59, %v14084_v25  ;;  %v4960_v56 = vrot.slane %v14417_v17, 2  ;;  %5551 = vrot.lane.b32.xlu1 %v5463_v19, %s9361_s13  ;;  %v18781_v29 = vld [vmem:[#allocation50_spill] sm:$0xff] }
 0x35c   : > { %v5595_v10 = vrot.slane %v14448_v41, 2  ;;  %v5592_v45 = vrot.slane %v8291_v0, 2  ;;  %v4837_v30 = vsel %vm1064_vm2, %v4787_v39, %v14037_v27  ;;  %v14454_v20 = vsel %vm4128_vm9, %v4861_v22, %v4686_v43  ;;  %v14456_v13 = vpop.permute.xlu0 %4699  ;;  %5557 = vrot.lane.b32.xlu0 %v5475_v42, %s9361_s13  ;;  %v18739_v0 = vld [vmem:[#allocation107_spill] sm:$0xff]  ;;  %v14509_v43 = vld [vmem:[%s17299_s3 + $0x1] sm:$0x1] }
 0x35d   : > { %v18732_v25 = vshrl.u32 %v18731_v6, 16  ;;  %v18733_v24 = vshll.u32 %v18731_v6, 16  ;;  %v4988_v47 = vrot.slane %v14437_v52, 2  ;;  %v4978_v50 = vrot.slane %v14440_v18, 2  ;;  %v18744_v6 = vld [vmem:[#allocation7_spill] sm:$0xff]  ;;  %8481 = vmatprep.mubr.msk.bf16.mxu0 %vm4178_vm10, %v14509_v43 }
 0x35e   : > { %v4986_v3 = vrot.slane %v14454_v20, 2  ;;  %v4961_v27 = vsel %vm3862_vm8, %v4958_v38, %v4960_v56  ;;  %v4815_v7 = vsel %vm812_vm4, %v14354_v35, %v18734_v12  ;;  %v14475_v54 = vsel %vm4128_vm9, %v4837_v30, %v14213_v23  ;;  %v4690_v8 = vpop.permute.xlu1 %4689  ;;  %v18743_v30 = vld [vmem:[#allocation60_spill] sm:$0xff]  ;;  %v18748_v12 = vld [vmem:[#allocation27_spill] sm:$0xff] }
 0x35f   : > { %v5500_v53 = vrot.slane %v18732_v25, 1  ;;  %v5501_v2 = vrot.slane %v18733_v24, 2  ;;  %v18736_v62 = vshrl.u32 %v18735_v63, 16  ;;  %v18737_v19 = vshll.u32 %v18735_v63, 16  ;;  %5555 = vrot.lane.b32.xlu1 %v5471_v51, %s9361_s13  ;;  %v18742_v51 = vld [vmem:[#allocation41_spill] sm:$0xff]  ;;  %v9228_v18 = vld [vmem:[%s9453_s11 + $0x64] sm:$0xff]  }
 0x360   : > { %v4865_v42 = vsel %vm1064_vm2, %v4815_v7, %v18738_v49  ;;  %v4989_v38 = vsel %vm3862_vm8, %v4986_v3, %v4988_v47  ;;  %v18740_v35 = vshrl.u32 %v18739_v0, 16  ;;  %v18741_v23 = vshll.u32 %v18739_v0, 16  ;;  %v14493_v37 = vpop.permute.xlu0 %5332  ;;  %5657 = vrot.lane.b32.xlu0 %v14396_v31, %s9365_s14  ;;  %v18751_v49 = vld [vmem:[#allocation67_spill] sm:$0xff] }
 0x361   : > { %v5504_v39 = vrot.slane %v18736_v62, 1  ;;  %v5505_v34 = vrot.slane %v18737_v19, 2  ;;  %v14491_v17 = vsel %vm4128_vm9, %v4865_v42, %v4690_v8  ;;  %v5014_v33 = vsel %vm4178_vm10, %v4961_v27, 0  ;;  %v18750_v19 = vld [vmem:[#allocation48_spill] sm:$0xff] }
 0x362   : > { %v5508_v11 = vrot.slane %v18740_v35, 1  ;;  %v5509_v16 = vrot.slane %v18741_v23, 2  ;;  %v5056_v9 = vsel %vm4178_vm10, %v4989_v38, 0  ;;  %v5594_v21 = vsel %vm3862_vm8, %v5592_v45, %v5593_v48  ;;  %8470 = vmatpush3.bf16.xpose.msra.mxu0 %v5014_v33  ;;  %v4694_v63 = vpop.permute.xlu1 %4693  ;;  %v18752_v8 = vld [vmem:[#allocation68_spill] sm:$0xff]  ;;  %v18753_v38 = vld [vmem:[#allocation5_spill] sm:$0xff]  ;;  %v18754_v35 = vld [vmem:[#allocation54_spill] sm:$0xff] }
 0x363   : > { %v4962_v59 = vrot.slane %v14475_v54, 2  ;;  %v4990_v52 = vrot.slane %v14491_v17, 2  ;;  %8654 = vmatpush3.bf16.xpose.msra.mxu1 %v5056_v9  ;;  %v4979_v60 = vsel %vm3862_vm8, %v4976_v5, %v4978_v50  ;;  %v14504_v22 = vor.u32 %v5501_v2, %v5500_v53  ;;  %v18745_v5 = vld [vmem:[#allocation92_spill] sm:$0xff]  ;;  %5641 = vrot.lane.b32.xlu1 %v5594_v21, %s9365_s14  ;;  %v18756_v21 = vld [vmem:[#allocation94_spill] sm:$0xff] }
 0x364   : > { %v4747_v45 = vsel %vm760_vm3, %v18743_v30, %v18742_v51  ;;  %v4805_v25 = vsel %vm812_vm4, %v14359_v58, %v18744_v6  ;;  %8822 = vmatprep.subr.msk.bf16.mxu0 %vm4178_vm10, %v4979_v60  ;;  %v18746_v53 = vshrl.u32 %v18745_v5, 16  ;;  %v18747_v2 = vshll.u32 %v18745_v5, 16  ;;  %v14544_v33 = vpop.permute.xlu0 %5336  ;;  %v18755_v30 = vld [vmem:[#allocation81_spill] sm:$0xff] }
 0x365   : > { %v4855_v7 = vsel %vm1064_vm2, %v4805_v25, %v18748_v12  ;;  %v5626_v58 = vsel %vm3862_vm8, %v5623_v61, %v5625_v57  ;;  %v18749_v62 = vmov 0.0   ;;  %v5506_v31 = vor.u32 %v5505_v34, %v5504_v39  ;;  %v18761_v12 = vld [vmem:[#allocation58_spill] sm:$0xff] }
 0x366   : > { %v5476_v24 = vrot.slane %v18746_v53, 1  ;;  %v5477_v27 = vrot.slane %v18747_v2, 2  ;;  %8655 = vmatprep.subr.bf16.mxu1 %v18749_v62  ;;  %v4762_v42 = vsel %vm760_vm3, %v18751_v49, %v18750_v19  ;;  %v4789_v0 = vsel %vm812_vm4, %v18753_v38, %v18752_v8  ;;  %5673 = vrot.lane.b32.xlu0 %v5626_v58, %s9365_s14  ;;  %v18759_v2 = vld [vmem:[#allocation264_spill] sm:$0xff]  ;;  %v14574_v49 = vpop.permute.xlu1 %4697  ;;  %v18763_v38 = vld [vmem:[#allocation261_spill] sm:$0xff] }
 0x367   : > { %v14542_v23 = vsel %vm4128_vm9, %v4855_v7, %v18754_v35  ;;  %v5596_v39 = vsel %vm3862_vm8, %v5593_v48, %v5595_v10  ;;  %v4963_v34 = vsel %vm3862_vm8, %v4960_v56, %v4962_v59  ;;  %v4991_v9 = vsel %vm3862_vm8, %v4988_v47, %v4990_v52 }
 0x368   : > { %v14556_v60 = vor.u32 %v5509_v16, %v5508_v11  ;;  %v5507_v51 = vsel %vm3701_vm7, %v14504_v22, %v5506_v31  ;;  %v4817_v6 = vsel %vm812_vm4, %v4762_v42, %v18755_v30  ;;  %v5478_v48 = vor.u32 %v5477_v27, %v5476_v24  ;;  %v18760_v11 = vld [vmem:[#allocation267_spill] sm:$0xff] }
 0x369   : > { %v18757_v25 = vshrl.u32 %v18756_v21, 16  ;;  %v18758_v56 = vshll.u32 %v18756_v21, 16  ;;  %v4807_v47 = vsel %vm812_vm4, %v4747_v45, %v18759_v2  ;;  %v4839_v16 = vsel %vm1064_vm2, %v4789_v0, %v18760_v11  ;;  %v18762_v24 = vld [vmem:[#allocation271_spill] sm:$0xff]  ;;  %v14584_v45 = vpop.permute.xlu0 %5340  ;;  %5573 = vrot.lane.b32.xlu1 %v5507_v51, %s9361_s13 }
 0x36a   : > { %v4867_v7 = vsel %vm1064_vm2, %v4817_v6, %v18761_v12  ;;  %v4980_v19 = vrot.slane %v14542_v23, 2  ;;  %v14578_v27 = vsel %vm4128_vm9, %v4839_v16, %v18762_v24  ;;  %v5017_v42 = vsel %vm4178_vm10, %v4963_v34, 0  ;;  %v18764_v23 = vld [vmem:[#allocation49_spill] sm:$0xff]  ;;  %v18765_v30 = vld [vmem:[#allocation63_spill] sm:$0xff]  ;;  %v18766_v6 = vld [vmem:[#allocation70_spill] sm:$0xff]  ;;  %5643 = vrot.lane.b32.xlu0 %v5596_v39, %s9365_s14 }
 0x36b   : > { %v5480_v5 = vrot.slane %v18757_v25, 1  ;;  %v5481_v53 = vrot.slane %v18758_v56, 2  ;;  %v14582_v58 = vsel %vm4128_vm9, %v4867_v7, %v14374_v44  ;;  %v5059_v8 = vsel %vm4178_vm10, %v4991_v9, 0  ;;  %8472 = vmatpush3.bf16.xpose.msra.mxu0 %v5017_v42  ;;  %v18767_v9 = vld [vmem:[#allocation31_spill] sm:$0xff]  ;;  %v14611_v56 = vpop.permute.xlu1 %4701  ;;  %v18771_v7 = vld [vmem:[#allocation29_spill] sm:$0xff] }
 0x36c   : > { %v4857_v0 = vsel %vm1064_vm2, %v4807_v47, %v18763_v38  ;;  %8656 = vmatpush3.bf16.xpose.msra.mxu1 %v5059_v8  ;;  %v4981_v35 = vsel %vm3862_vm8, %v4978_v50, %v4980_v19  ;;  %v5479_v44 = vsel %vm3701_vm7, %v14338_v15, %v5478_v48  ;;  %v4765_v34 = vsel %vm760_vm3, %v18765_v30, %v18764_v23  ;;  %v18768_v47 = vld [vmem:[#allocation231_spill] sm:$0xff]  ;;  %v18773_v38 = vld [vmem:[#allocation42_spill] sm:$0xff] }
 0x36d   : > { %v4791_v51 = vsel %vm812_vm4, %v18767_v9, %v18766_v6  ;;  %v14604_v21 = vsel %vm4128_vm9, %v4857_v0, %v14406_v28  ;;  %8823 = vmatprep.subr.msk.bf16.mxu0 %vm4178_vm10, %v4981_v35  ;;  %v5611_v50 = vrot.slane %v9228_v18, 2  ;;  %v4964_v15 = vrot.slane %v14578_v27, 2  ;;  %8657 = vmatprep.subr.bf16.mxu1 %v18749_v62  ;;  %v18769_v11 = vld [vmem:[#allocation83_spill] sm:$0xff]  ;;  %v14622_v12 = vpop.permute.xlu0 %5344  ;;  %v18774_v0 = vld [vmem:[#allocation62_spill] sm:$0xff] }
 0x36e   : > { %v4992_v25 = vrot.slane %v14582_v58, 2  ;;  %v5511_v2 = vsel %vm3701_vm7, %v5506_v31, %v14556_v60  ;;  %v14616_v28 = vor.u32 %v5481_v53, %v5480_v5  ;;  %v4819_v39 = vsel %vm812_vm4, %v4765_v34, %v18768_v47  ;;  %18770 = vst [vmem:[#allocation32_spill] sm:$0xff] %v14622_v12  ;;  %5559 = vrot.lane.b32.xlu1 %v5479_v44, %s9361_s13  ;;  %v18772_v58 = vld [vmem:[#allocation16_spill] sm:$0xff]  ;;  %v9230_v8 = vld [vmem:[%s9453_s11 + $0xa4] sm:$0xff]  }
 0x36f   : > { %v4841_v16 = vsel %vm1064_vm2, %v4791_v51, %v18769_v11  ;;  %v5612_v31 = vsel %vm3862_vm8, %v5609_v4, %v5611_v50  ;;  %v4869_v24 = vsel %vm1064_vm2, %v4819_v39, %v18771_v7  ;;  %v4982_v5 = vrot.slane %v14604_v21, 2  ;;  %5575 = vrot.lane.b32.xlu0 %v5511_v2, %s9361_s13  ;;  %v14645_v4 = vpop.permute.xlu1 %5334  ;;  %v14663_v30 = vld [vmem:[%s9453_s11 + $0xac] sm:$0xff]   ;;  %v18775_v18 = vld [vmem:[#allocation26_spill] sm:$0xff]  ;;  %v18776_v2 = vld [vmem:[#allocation61_spill] sm:$0xff] }
 0x370   : > { %v4965_v53 = vsel %vm3862_vm8, %v4962_v59, %v4964_v15  ;;  %v4993_v27 = vsel %vm3862_vm8, %v4990_v52, %v4992_v25  ;;  %v14639_v42 = vsel %vm4128_vm9, %v4841_v16, %v18772_v58  ;;  %v14642_v46 = vsel %vm4128_vm9, %v4869_v24, %v4694_v63  ;;  %v14650_v59 = vld [vmem:[%s9453_s11 + $0x6c] sm:$0xff]   ;;  %v18777_v39 = vld [vmem:[#allocation73_spill] sm:$0xff] }
 0x371   : > { %v5483_v54 = vsel %vm3701_vm7, %v5478_v48, %v14616_v28  ;;  %v5613_v17 = vrot.slane %v14650_v59, 2  ;;  %v5627_v52 = vrot.slane %v9230_v8, 2  ;;  %v4750_v35 = vsel %vm760_vm3, %v18774_v0, %v18773_v38  ;;  %v14657_v44 = vpop.permute.xlu0 %5348  ;;  %v18778_v16 = vld [vmem:[#allocation108_spill] sm:$0xff] }
 0x372   : > { %v5020_v63 = vsel %vm4178_vm10, %v4965_v53, 0  ;;  %v5062_v23 = vsel %vm4178_vm10, %v4993_v27, 0  ;;  %5659 = vrot.lane.b32.xlu1 %v5612_v31, %s9365_s14  ;;  %v5629_v48 = vrot.slane %v14663_v30, 2  ;;  %v4966_v34 = vrot.slane %v14639_v42, 2  ;;  %v18782_v53 = vld [vmem:[#allocation66_spill] sm:$0xff]  ;;  %v18783_v27 = vld [vmem:[#allocation12_spill] sm:$0xff] }
 0x373   : > { %v4994_v6 = vrot.slane %v14642_v46, 2  ;;  %8474 = vmatpush3.bf16.xpose.msra.mxu0 %v5020_v63  ;;  %v4983_v9 = vsel %vm3862_vm8, %v4980_v19, %v4982_v5  ;;  %v5628_v51 = vsel %vm3862_vm8, %v5625_v57, %v5627_v52  ;;  %v4726_v47 = vsel %vm760_vm3, %v18776_v2, %v18775_v18  ;;  %5561 = vrot.lane.b32.xlu0 %v5483_v54, %s9361_s13  ;;  %v14690_v8 = vpop.permute.xlu1 %5338  ;;  %v9232_v38 = vld [vmem:[%s9453_s11 + $0x2c] sm:$0xff]   ;;  %v9234_v46 = vld [vmem:[%s9453_s11 + $0x74] sm:$0xff]   ;;  %v9238_v30 = vld [vmem:[%s9453_s11 + $0x3c] sm:$0xff]  }
 0x374   : > { %8658 = vmatpush3.bf16.xpose.msra.mxu1 %v5062_v23  ;;  %v4809_v11 = vsel %vm812_vm4, %v4750_v35, %v18777_v39  ;;  %8824 = vmatprep.subr.msk.bf16.mxu0 %vm4178_vm10, %v4983_v9  ;;  %v18779_v31 = vshrl.u32 %v18778_v16, 16  ;;  %v18780_v19 = vshll.u32 %v18778_v16, 16  ;;  %v4768_v57 = vsel %vm760_vm3, %v18782_v53, %v18781_v29  ;;  %v18784_v35 = vld [vmem:[#allocation71_spill] sm:$0xff]  ;;  %v18785_v23 = vld [vmem:[#allocation77_spill] sm:$0xff]  ;;  %v18797_v21 = vld [vmem:[#allocation96_spill] sm:$0xff] }
 0x375   : > { %v4859_v58 = vsel %vm1064_vm2, %v4809_v11, %v18783_v27  ;;  %v5614_v54 = vsel %vm3862_vm8, %v5611_v50, %v5613_v17  ;;  %8659 = vmatprep.subr.bf16.mxu1 %v18749_v62  ;;  %v5597_v0 = vrot.slane %v9232_v38, 2  ;;  %v4793_v63 = vsel %vm812_vm4, %v4726_v47, %v18784_v35  ;;  %v14705_v2 = vpop.permute.xlu0 %5352  ;;  %v14718_v11 = vld [vmem:[%s9453_s11 + $0x34] sm:$0xff]   ;;  %v18789_v53 = vld [vmem:[#allocation95_spill] sm:$0xff]  ;;  %v18791_v27 = vld [vmem:[#allocation238_spill] sm:$0xff] }
 0x376   : > { %v5512_v7 = vrot.slane %v18779_v31, 1  ;;  %v5513_v24 = vrot.slane %v18780_v19, 2  ;;  %v4821_v9 = vsel %vm812_vm4, %v4768_v57, %v18785_v23  ;;  %v14703_v18 = vsel %vm4128_vm9, %v4859_v58, %v14302_v40  ;;  %5675 = vrot.lane.b32.xlu1 %v5628_v51, %s9365_s14  ;;  %v18786_v51 = vld [vmem:[#allocation110_spill] sm:$0xff]  ;;  %v18792_v38 = vld [vmem:[#allocation277_spill] sm:$0xff] }
 0x377   : > { %v5630_v50 = vsel %vm3862_vm8, %v5627_v52, %v5629_v48  ;;  %v4967_v39 = vsel %vm3862_vm8, %v4964_v15, %v4966_v34  ;;  %v4995_v47 = vsel %vm3862_vm8, %v4992_v25, %v4994_v6  ;;  %v5599_v40 = vrot.slane %v14718_v11, 2  ;;  %5661 = vrot.lane.b32.xlu0 %v5614_v54, %s9365_s14  ;;  %v14736_v35 = vpop.permute.xlu1 %5342  ;;  %v18794_v54 = vld [vmem:[#allocation276_spill] sm:$0xff] }
 0x378   : > { %v5598_v16 = vsel %vm3862_vm8, %v5595_v10, %v5597_v0  ;;  %v5514_v52 = vor.u32 %v5513_v24, %v5512_v7  ;;  %v18787_v31 = vshrl.u32 %v18786_v51, 16  ;;  %v18788_v15 = vshll.u32 %v18786_v51, 16 }
 0x379   : > { %v18790_v57 = vshrl.u32 %v18789_v53, 16  ;;  %v4843_v58 = vsel %vm1064_vm2, %v4793_v63, %v18791_v27  ;;  %v4871_v41 = vsel %vm1064_vm2, %v4821_v9, %v18792_v38  ;;  %v4984_v10 = vrot.slane %v14703_v18, 2 }
 0x37a   : > { %v5516_v19 = vrot.slane %v18787_v31, 1  ;;  %v5517_v29 = vrot.slane %v18788_v15, 2  ;;  %v18793_v7 = vshll.u32 %v18789_v53, 16  ;;  %v4893_v23 = vsel %vm4128_vm9, %v4843_v58, %v18794_v54  ;;  %v14744_v31 = vpop.permute.xlu0 %5356  ;;  %5645 = vrot.lane.b32.xlu1 %v5598_v16, %s9365_s14  ;;  %v18795_v53 = vld [vmem:[#allocation51_spill] sm:$0xff] }
 0x37b   : > { %v5484_v25 = vrot.slane %v18790_v57, 1  ;;  %v4921_v51 = vsel %vm4128_vm9, %v4871_v41, %v14419_v36  ;;  %v5023_v63 = vsel %vm4178_vm10, %v4967_v39, 0  ;;  %v5065_v15 = vsel %vm4178_vm10, %v4995_v47, 0  ;;  %v18796_v57 = vld [vmem:[#allocation65_spill] sm:$0xff]  ;;  %5677 = vrot.lane.b32.xlu0 %v5630_v50, %s9365_s14 }
 0x37c   : > { %v5485_v24 = vrot.slane %v18793_v7, 2  ;;  %8476 = vmatpush3.bf16.xpose.msra.mxu0 %v5023_v63  ;;  %8660 = vmatpush3.bf16.xpose.msra.mxu1 %v5065_v15  ;;  %v4985_v9 = vsel %vm3862_vm8, %v4982_v5, %v4984_v10  ;;  %v5515_v18 = vsel %vm3701_vm7, %v14556_v60, %v5514_v52  ;;  %v4771_v36 = vsel %vm760_vm3, %v18796_v57, %v18795_v53  ;;  %v14766_v60 = vpop.permute.xlu1 %5346  ;;  %v18801_v7 = vld [vmem:[#allocation241_spill] sm:$0xff] }
 0x37d   : > { %8825 = vmatprep.subr.msk.bf16.mxu0 %vm4178_vm10, %v4985_v9  ;;  %v5600_v39 = vsel %vm3862_vm8, %v5597_v0, %v5599_v40  ;;  %v14762_v47 = vor.u32 %v5517_v29, %v5516_v19  ;;  %v18798_v16 = vshrl.u32 %v18797_v21, 16  ;;  %v4968_v27 = vrot.slane %v4893_v23, 2  ;;  %18799 = vst [vmem:[#allocation34_spill] sm:$0xff] %v14766_v60  ;;  %8661 = vmatprep.subr.bf16.mxu1 %v18749_v62  ;;  %v18803_v19 = vld [vmem:[#allocation240_spill] sm:$0xff]  ;;  %v14813_v53 = vld [vmem:[%s9453_s11 + $0x7c] sm:$0xff]  }
 0x37e   : > { %v4996_v58 = vrot.slane %v4921_v51, 2  ;;  %v5486_v38 = vor.u32 %v5485_v24, %v5484_v25  ;;  %v18800_v50 = vshll.u32 %v18797_v21, 16  ;;  %v4823_v54 = vsel %vm812_vm4, %v4771_v36, %v18801_v7  ;;  %v14773_v0 = vpop.permute.xlu0 %5360  ;;  %5577 = vrot.lane.b32.xlu1 %v5515_v18, %s9361_s13  ;;  %v9254_v60 = vld [vmem:[%s9453_s11 + $0x68] sm:$0xf] }
 0x37f   : > { %v5488_v5 = vrot.slane %v18798_v16, 1  ;;  %18802 = vst [vmem:[#allocation36_spill] sm:$0xff] %v14773_v0  ;;  %v4873_v29 = vsel %vm1064_vm2, %v4823_v54, %v18803_v19  ;;  %v4969_v23 = vsel %vm3862_vm8, %v4966_v34, %v4968_v27  ;;  %5647 = vrot.lane.b32.xlu0 %v5600_v39, %s9365_s14  ;;  %v5519_v42 = vsel %vm3701_vm7, %v5514_v52, %v14762_v47  ;;  %v18805_v39 = vld [vmem:[#allocation69_spill] sm:$0xff]  ;;  %v18809_v19 = vld [vmem:[#allocation111_spill] sm:$0xff]  ;;  %v9259_v0 = vld [vmem:[%s9453_s11 + $0xa4] sm:$0xf] }
 0x380   : > { %v5489_v41 = vrot.slane %v18800_v50, 2  ;;  %v4997_v25 = vsel %vm3862_vm8, %v4994_v6, %v4996_v58  ;;  %v5487_v24 = vsel %vm3701_vm7, %v14616_v28, %v5486_v38  ;;  %v14788_v51 = vsel %vm4128_vm9, %v4873_v29, %v14574_v49  ;;  %v14791_v63 = vpop.permute.xlu1 %5350  ;;  %v18806_v50 = vld [vmem:[#allocation79_spill] sm:$0xff]  ;;  %v14842_v54 = vld [vmem:[%s9453_s11 + $0xbc] sm:$0xff]  }
 0x381   : > { %v5615_v15 = vrot.slane %v9234_v46, 2  ;;  %v5026_v28 = vsel %vm4178_vm10, %v4969_v23, 0  ;;  %v5068_v49 = vsel %vm4178_vm10, %v4997_v25, 0  ;;  %v4998_v9 = vrot.slane %v14788_v51, 2 }
 0x382   : > { %v14795_v34 = vor.u32 %v5489_v41, %v5488_v5  ;;  %v14798_v6 = vpop.permute.xlu0 %5364  ;;  %5563 = vrot.lane.b32.xlu1 %v5487_v24, %s9361_s13  ;;  %v4987_v52 = vsel %vm3862_vm8, %v4984_v10, %v4986_v3  ;;  %v5617_v57 = vrot.slane %v14813_v53, 2  ;;  %v9236_v3 = vld [vmem:[%s9453_s11 + $0xb4] sm:$0xff]   ;;  %v4971_v16 = vsel %vm3862_vm8, %v4968_v27, %v4970_v1 }
 0x383   : > { %v5616_v18 = vsel %vm3862_vm8, %v5613_v17, %v5615_v15  ;;  %5579 = vrot.lane.b32.xlu0 %v5519_v42, %s9361_s13  ;;  %v5631_v59 = vrot.slane %v9236_v3, 2  ;;  %v18804_v10 = vld [vmem:[#allocation52_spill] sm:$0xff]  ;;  %v4999_v5 = vsel %vm3862_vm8, %v4996_v58, %v4998_v9  ;;  %v5633_v55 = vrot.slane %v14842_v54, 2 }
 0x384   : > { %8478 = vmatpush3.bf16.xpose.msra.mxu0 %v5026_v28  ;;  %8662 = vmatpush3.bf16.xpose.msra.mxu1 %v5068_v49  ;;  %v14816_v36 = vpop.permute.xlu1 %5354  ;;  %v5491_v20 = vsel %vm3701_vm7, %v5486_v38, %v14795_v34  ;;  %v4774_v21 = vsel %vm760_vm3, %v18805_v39, %v18804_v10  ;;  %v5618_v7 = vsel %vm3862_vm8, %v5615_v15, %v5617_v57  ;;  %v18807_v1 = vld [vmem:[#allocation232_spill] sm:$0xff]  ;;  %v18810_v29 = vshrl.u32 %v18809_v19, 16  ;;  %v18812_v28 = vld [vmem:[#allocation53_spill] sm:$0xff] }
 0x385   : > { %8826 = vmatprep.subr.msk.bf16.mxu0 %vm4178_vm10, %v4987_v52  ;;  %8663 = vmatprep.subr.bf16.mxu1 %v18749_v62  ;;  %v5632_v38 = vsel %vm3862_vm8, %v5629_v48, %v5631_v59  ;;  %v4825_v41 = vsel %vm812_vm4, %v4774_v21, %v18806_v50  ;;  %v5601_v48 = vrot.slane %v9238_v30, 2  ;;  %v18811_v25 = vshll.u32 %v18809_v19, 16  ;;  %v18813_v49 = vld [vmem:[#allocation64_spill] sm:$0xff]  ;;  %v18818_v50 = vld [vmem:[#allocation99_spill] sm:$0xff] }
 0x386   : > { %v14822_v17 = vpop.permute.xlu0 %5368  ;;  %5663 = vrot.lane.b32.xlu1 %v5616_v18, %s9365_s14  ;;  %v4875_v27 = vsel %vm1064_vm2, %v4825_v41, %v18807_v1  ;;  %v5520_v23 = vrot.slane %v18810_v29, 1  ;;  %v5029_v46 = vsel %vm4178_vm10, %v4971_v16, 0  ;;  %v5071_v15 = vsel %vm4178_vm10, %v4999_v5, 0  ;;  %v18814_v10 = vld [vmem:[#allocation112_spill] sm:$0xff] }
 0x387   : > { %5565 = vrot.lane.b32.xlu0 %v5491_v20, %s9361_s13  ;;  %v5521_v24 = vrot.slane %v18811_v25, 2  ;;  %v4925_v51 = vsel %vm4128_vm9, %v4875_v27, %v14456_v13  ;;  %v4777_v52 = vsel %vm760_vm3, %v18813_v49, %v18812_v28  ;;  %v5602_v18 = vsel %vm3862_vm8, %v5599_v40, %v5601_v48  ;;  %v14873_v20 = vld [vmem:[%s9453_s11 + $0x44] sm:$0xff]   ;;  %v18823_v29 = vld [vmem:[#allocation252_spill] sm:$0xff] }
 0x388   : > { %v14847_v58 = vpop.permute.xlu1 %5358  ;;  %v5634_v13 = vsel %vm3862_vm8, %v5631_v59, %v5633_v55  ;;  %v5603_v3 = vrot.slane %v14873_v20, 2  ;;  %v18815_v39 = vshrl.u32 %v18814_v10, 16  ;;  %v18816_v16 = vshll.u32 %v18814_v10, 16  ;;  %v18821_v27 = vld [vmem:[#allocation274_spill] sm:$0xff] }
 0x389   : > { %18808 = vst [vmem:[#allocation269_spill] sm:$0xff] %v14847_v58  ;;  %v5000_v5 = vrot.slane %v4925_v51, 2  ;;  %v18819_v41 = vshrl.u32 %v18818_v50, 16  ;;  %v18820_v59 = vshll.u32 %v18818_v50, 16  ;;  %v4827_v30 = vsel %vm812_vm4, %v4777_v52, %v18821_v27  ;;  %v18824_v52 = vld [vmem:[#allocation101_spill] sm:$0xff]  ;;  %v9240_v50 = vld [vmem:[%s9453_s11 + $0x84] sm:$0xff]  }
 0x38a   : > { %v14856_v42 = vpop.permute.xlu0 %5372  ;;  %5679 = vrot.lane.b32.xlu1 %v5632_v38, %s9365_s14  ;;  %v5524_v21 = vrot.slane %v18815_v39, 1  ;;  %v5525_v11 = vrot.slane %v18816_v16, 2  ;;  %v5522_v38 = vor.u32 %v5521_v24, %v5520_v23  ;;  %v4877_v25 = vsel %vm1064_vm2, %v4827_v30, %v18823_v29  ;;  %v9242_v29 = vld [vmem:[%s9453_s11 + $0xc4] sm:$0xff]  }
 0x38b   : > { %5665 = vrot.lane.b32.xlu0 %v5618_v7, %s9365_s14  ;;  %v5492_v7 = vrot.slane %v18819_v41, 1  ;;  %v5493_v1 = vrot.slane %v18820_v59, 2  ;;  %v5001_v51 = vsel %vm3862_vm8, %v4998_v9, %v5000_v5  ;;  %v4927_v24 = vsel %vm4128_vm9, %v4877_v25, %v14611_v56 }
 0x38c   : > { %8480 = vmatpush3.bf16.xpose.msra.mxu0 %v5029_v46  ;;  %8664 = vmatpush3.bf16.xpose.msra.mxu1 %v5071_v15  ;;  %v14880_v40 = vpop.permute.xlu1 %5362  ;;  %v5523_v23 = vsel %vm3701_vm7, %v14762_v47, %v5522_v38  ;;  %v5604_v46 = vsel %vm3862_vm8, %v5601_v48, %v5603_v3  ;;  %v5526_v28 = vor.u32 %v5525_v11, %v5524_v21  ;;  %v18826_v10 = vshll.u32 %v18824_v52, 16 }
 0x38d   : > { %8665 = vmatprep.subr.bf16.mxu1 %v18749_v62  ;;  %18817 = vst [vmem:[#allocation263_spill] sm:$0xff] %v14880_v40  ;;  %v5494_v49 = vor.u32 %v5493_v1, %v5492_v7  ;;  %v5074_v56 = vsel %vm4178_vm10, %v5001_v51, 0  ;;  %v5002_v48 = vrot.slane %v4927_v24, 2  ;;  %v5619_v41 = vrot.slane %v9240_v50, 2  ;;  %v9241_v1 = vld [vmem:[%s9453_s11 + $0x8c] sm:$0xff]  }
 0x38e   : > { %v14888_v19 = vpop.permute.xlu0 %5376  ;;  %5649 = vrot.lane.b32.xlu1 %v5602_v18, %s9365_s14  ;;  %v18825_v18 = vshrl.u32 %v18824_v52, 16  ;;  %v5497_v47 = vrot.slane %v18826_v10, 2  ;;  %v5527_v16 = vsel %vm3701_vm7, %v5522_v38, %v5526_v28  ;;  %v5621_v27 = vrot.slane %v9241_v1, 2 }
 0x38f   : > { %18822 = vst [vmem:[#allocation254_spill] sm:$0xff] %v14888_v19  ;;  %5681 = vrot.lane.b32.xlu0 %v5634_v13, %s9365_s14  ;;  %v5495_v13 = vsel %vm3701_vm7, %v14795_v34, %v5494_v49  ;;  %v5003_v59 = vsel %vm3862_vm8, %v5000_v5, %v5002_v48  ;;  %v5620_v34 = vsel %vm3862_vm8, %v5617_v57, %v5619_v41  ;;  %v5635_v25 = vrot.slane %v9242_v29, 2 }
 0x390   : > { %v14902_v15 = vpop.permute.xlu1 %5366  ;;  %v5496_v9 = vrot.slane %v18825_v18, 1  ;;  %v5077_v5 = vsel %vm4178_vm10, %v5003_v59, 0  ;;  %v5622_v57 = vsel %vm3862_vm8, %v5619_v41, %v5621_v27  ;;  %v18829_v18 = vld [vmem:[#allocation113_spill] sm:$0xff]  ;;  %v5624_v26 = vsel %vm3862_vm8, %v5621_v27, %v5623_v61  ;;  %v18838_v61 = vld [vmem:[#allocation179_spill] sm:$0xff] }
 0x391   : > { %v5636_v53 = vsel %vm3862_vm8, %v5633_v55, %v5635_v25  ;;  %v18839_v27 = vld [vmem:[#allocation145_spill] sm:$0xff] }
 0x392   : > { %v14908_v39 = vpop.permute.xlu0 %5389  ;;  %5581 = vrot.lane.b32.xlu1 %v5523_v23, %s9361_s13  ;;  %v5498_v11 = vor.u32 %v5497_v47, %v5496_v9  ;;  %v9243_v23 = vld [vmem:[%s9453_s11 + $0xcc] sm:$0xff]   ;;  %v18830_v9 = vshrl.u32 %v18829_v18, 16  ;;  %v18831_v47 = vshll.u32 %v18829_v18, 16  ;;  %v18840_v18 = vshrl.u32 %v18839_v27, 16 }
 0x393   : > { %8482 = vmatmul.mubr.msk.bf16.vlgmr.msra.gmra.mrb[4].mxu0 %vm4178_vm10, %v14509_v43  ;;  %5651 = vrot.lane.b32.xlu0 %v5604_v46, %s9365_s14  ;;  %v5637_v24 = vrot.slane %v9243_v23, 2  ;;  %v9244_v46 = vld [vmem:[%s9453_s11 + $0x4c] sm:$0xff]  }
 0x394   : > { %8666 = vmatpush3.bf16.xpose.msra.mxu1 %v5074_v56  ;;  %v14918_v21 = vpop.permute.xlu1 %5370  ;;  %v5499_v30 = vsel %vm3701_vm7, %v5494_v49, %v5498_v11  ;;  %v5605_v49 = vrot.slane %v9244_v46, 2  ;;  %v5528_v10 = vrot.slane %v18830_v9, 1  ;;  %v5529_v54 = vrot.slane %v18831_v47, 2  ;;  %v9245_v56 = vld [vmem:[%s9453_s11 + $0xd4] ss:$0 sps:$4 sm:$0x33]  }
 0x395   : > { %8667 = vmatprep.subr.bf16.mxu1 %v18749_v62  ;;  %v5533_v55 = vshrl.u32 %v9245_v56, 16  ;;  %v5536_v48 = vshll.u32 %v9245_v56, 16  ;;  %v5638_v41 = vsel %vm3862_vm8, %v5635_v25, %v5637_v24  ;;  %v5639_v14 = vrot.slane %v9245_v56, 2  ;;  %v18844_v56 = vld [vmem:[#allocation177_spill] sm:$0xff] }
 0x396   : > { %v14922_v7 = vpop.permute.xlu0 %5393  ;;  %5567 = vrot.lane.b32.xlu1 %v5495_v13, %s9361_s13  ;;  %v5530_v59 = vor.u32 %v5529_v54, %v5528_v10  ;;  %v5608_v29 = vsel %vm3862_vm8, %v5605_v49, %v5607_v32  ;;  %v6155_v9 = vrot.slane %v18840_v18, 1  ;;  %v18841_v10 = vshll.u32 %v18839_v27, 16 }
 0x397   : > { %5583 = vrot.lane.b32.xlu0 %v5527_v16, %s9361_s13  ;;  %v5606_v16 = vsel %vm3862_vm8, %v5603_v3, %v5605_v49  ;;  %v5538_v1 = vrot.slane %v5536_v48, 2  ;;  %v18837_v49 = vld [vmem:[#allocation229_spill] sm:$0xff]  ;;  %v18849_v27 = vshrl.u32 %v18838_v61, 16 }
 0x398   : > { %v14931_v38 = vpop.permute.xlu1 %5374  ;;  %v5531_v20 = vsel %vm3701_vm7, %v5526_v28, %v5530_v59  ;;  %v6156_v47 = vrot.slane %v18841_v10, 2  ;;  %v18850_v10 = vshll.u32 %v18838_v61, 16 }
 0x399   : > { %18827 = vst [vmem:[#allocation237_spill] sm:$0xff] %v14931_v38  ;;  %v6190_v18 = vrot.slane %v18849_v27, 1  ;;  %v9258_v38 = vld [vmem:[%s9453_s11 + $0xa0] sm:$0xf] }
 0x39a   : > { %v14935_v51 = vpop.permute.xlu0 %5397  ;;  %5667 = vrot.lane.b32.xlu1 %v5620_v34, %s9365_s14  ;;  %v5535_v34 = vrot.slane %v5533_v55, 1 }
 0x39b   : > { %5569 = vrot.lane.b32.xlu0 %v5499_v30, %s9361_s13 }
 0x39c   : > { %8668 = vmatpush3.bf16.xpose.msra.mxu1 %v5077_v5  ;;  %v14947_v52 = vpop.permute.xlu1 %5378  ;;  %v5539_v25 = vor.u32 %v5538_v1, %v5535_v34  ;;  %v5640_v34 = vsel %vm3862_vm8, %v5637_v24, %v5639_v14  ;;  %v18845_v1 = vld [vmem:[#allocation178_spill] sm:$0xff]  ;;  %v18851_v14 = vld [vmem:[#allocation152_spill] sm:$0xff] }
 0x39d   : > { %8673 = vmatprep.subr.bf16.mxu1 %v18749_v62  ;;  %18828 = vst [vmem:[#allocation243_spill] sm:$0xff] %v14947_v52  ;;  %v9250_v52 = vld [vmem:[%s9453_s11 + $0x60] sm:$0xf] }
 0x39e   : > { %v14954_v13 = vpop.permute.xlu0 %5401  ;;  %5683 = vrot.lane.b32.xlu1 %v5636_v53, %s9365_s14  ;;  %v5540_v53 = vsel %vm3701_vm7, %v5530_v59, %v5539_v25 }
 0x39f   : > { %18832 = vst [vmem:[#allocation21_spill] sm:$0xff] %v14954_v13  ;;  %5669 = vrot.lane.b32.xlu0 %v5622_v57, %s9365_s14 }
 0x3a0   : > { %v14961_v50 = vpop.permute.xlu1 %5391 }
 0x3a2   : > { %v14964_v30 = vpop.permute.xlu0 %5405  ;;  %5653 = vrot.lane.b32.xlu1 %v5606_v16, %s9365_s14 }
 0x3a3   : > { %8670 = vmatmul.mubr.msk.bf16.vlgmr.msra.gmra.mrb[4].mxu1 %vm4178_vm10, %v14509_v43  ;;  %5685 = vrot.lane.b32.xlu0 %v5638_v41, %s9365_s14  ;;  %v5503_v43 = vsel %vm3701_vm7, %v5498_v11, %v14504_v22  ;;  %v18836_v22 = vld [vmem:[#allocation150_spill] sm:$0xff] }
 0x3a4   : > { %8689 = vmatprep.mubr.msk.bf16.mxu1 %vm9363_vm6, %v18749_v62  ;;  %v14973_v3 = vpop.permute.xlu1 %5395  ;;  %v18842_v54 = vshrl.u32 %v18836_v22, 16  ;;  %v18843_v48 = vshll.u32 %v18836_v22, 16 }
 0x3a6   : > { %v14978_v5 = vpop.permute.xlu0 %5409  ;;  %5585 = vrot.lane.b32.xlu1 %v5531_v20, %s9361_s13  ;;  %v6158_v55 = vrot.slane %v18842_v54, 1  ;;  %v6159_v16 = vrot.slane %v18843_v48, 2  ;;  %v6157_v20 = vor.u32 %v6156_v47, %v6155_v9  ;;  %v6191_v54 = vrot.slane %v18850_v10, 2  ;;  %v18859_v10 = vld [vmem:[#allocation180_spill] sm:$0xff] }
 0x3a7   : > { %5655 = vrot.lane.b32.xlu0 %v5608_v29, %s9365_s14  ;;  %v18852_v9 = vshrl.u32 %v18851_v14, 16 }
 0x3a8   : > { %v14984_v28 = vpop.permute.xlu1 %5399  ;;  %v6160_v29 = vor.u32 %v6159_v16, %v6158_v55  ;;  %v18853_v55 = vshll.u32 %v18851_v14, 16  ;;  %v18854_v16 = vld [vmem:[#allocation210_spill] sm:$0xff] }
 0x3a9   : > { %18833 = vst [vmem:[#allocation257_spill] sm:$0xff] %v14984_v28  ;;  %v6162_v47 = vrot.slane %v18852_v9, 1  ;;  %v18860_v9 = vshrl.u32 %v18859_v10, 16 }
 0x3aa   : > { %v14987_v57 = vpop.permute.xlu0 %5413  ;;  %5571 = vrot.lane.b32.xlu1 %v5503_v43, %s9361_s13  ;;  %v18847_v43 = vshrl.u32 %v18844_v56, 16  ;;  %v6163_v48 = vrot.slane %v18853_v55, 2 }
 0x3ab   : > { %5587 = vrot.lane.b32.xlu0 %v5540_v53, %s9361_s13  ;;  %v6194_v55 = vrot.slane %v18860_v9, 1 }
 0x3ac   : > { %v14994_v32 = vpop.permute.xlu1 %5403  ;;  %v6186_v53 = vrot.slane %v18847_v43, 1  ;;  %v6192_v43 = vor.u32 %v6191_v54, %v6190_v18  ;;  %v15054_v27 = vor.u32 %v6163_v48, %v6162_v47  ;;  %v18862_v54 = vld [vmem:[#allocation212_spill] sm:$0xff] }
 0x3ad   : > { %18834 = vst [vmem:[#allocation38_spill] sm:$0xff] %v14994_v32 }
 0x3ae   : > { %v14996_v23 = vpop.permute.xlu0 %5417  ;;  %5671 = vrot.lane.b32.xlu1 %v5624_v26, %s9365_s14  ;;  %v18848_v26 = vshll.u32 %v18844_v56, 16  ;;  %v6165_v47 = vsel %vm3701_vm7, %v6160_v29, %v15054_v27 }
 0x3af   : > { %18835 = vst [vmem:[#allocation239_spill] sm:$0xff] %v14996_v23  ;;  %6048 = vrot.lane.b32.xlu0 %v18836_v22, %s9364_s6  ;;  %v9257_v23 = vld [vmem:[%s9453_s11 + $0x9c] sm:$0xf] }
 0x3b0   : > { %v15001_v11 = vpop.permute.xlu1 %5407  ;;  %v6187_v22 = vrot.slane %v18848_v26, 2 }
 0x3b2   : > { %v15003_v46 = vpop.permute.xlu0 %5421  ;;  %6046 = vrot.lane.b32.xlu1 %v18837_v49, %s9364_s6  ;;  %v9249_v49 = vld [vmem:[%s9453_s11 + $0x5c] sm:$0xf] }
 0x3b3   : > { %6064 = vrot.lane.b32.xlu0 %v18838_v61, %s9364_s6  ;;  %v15048_v61 = vor.u32 %v6187_v22, %v6186_v53 }
 0x3b4   : > { %v15017_v41 = vpop.permute.xlu1 %5411 }
 0x3b5   : > { %18856 = vst [vmem:[#allocation25_spill] sm:$0xff] %v15048_v61  ;;  %v6193_v22 = vsel %vm3701_vm7, %v15048_v61, %v6192_v43 }
 0x3b6   : > { %v15019_v59 = vpop.permute.xlu0 %5425  ;;  %6062 = vrot.lane.b32.xlu1 %v18844_v56, %s9364_s6 }
 0x3b7   : > { %6105 = vrot.lane.b32.xlu0 %v18845_v1, %s9360_s12  ;;  %v6161_v1 = vsel %vm3701_vm7, %v6157_v20, %v6160_v29 }
 0x3b8   : > { %v15026_v25 = vpop.permute.xlu1 %5415 }
 0x3b9   : > { %18846 = vst [vmem:[#allocation40_spill] sm:$0xff] %v15026_v25 }
 0x3ba   : > { %v15036_v24 = vpop.permute.xlu0 %5429  ;;  %5687 = vrot.lane.b32.xlu1 %v5640_v34, %s9365_s14  ;;  %v18858_v34 = vld [vmem:[#allocation182_spill] sm:$0xff] }
 0x3bb   : > { %6121 = vrot.lane.b32.xlu0 %v18854_v16, %s9360_s12  ;;  %v18861_v16 = vshll.u32 %v18859_v10, 16 }
 0x3bc   : > { %v15045_v56 = vpop.permute.xlu1 %5419 }
 0x3bd   : > { %18855 = vst [vmem:[#allocation8_spill] sm:$0xff] %v15045_v56  ;;  %v6195_v20 = vrot.slane %v18861_v16, 2  ;;  %v9248_v16 = vld [vmem:[%s9453_s11 + $0x58] sm:$0xf]  ;;  %v9251_v56 = vld [vmem:[%s9453_s11 + $0x64] sm:$0xf] }
 0x3be   : > { %v15050_v26 = vpop.permute.xlu0 %5433  ;;  %6107 = vrot.lane.b32.xlu1 %v18858_v34, %s9360_s12  ;;  %v9247_v34 = vld [vmem:[%s9453_s11 + $0x24] sm:$0xf]  ;;  %v8303_v61 = vcombine.low %v9248_v16, %v9249_v49  ;;  %v8304_v40 = vcombine.low %v9250_v52, %v9251_v56 }
 0x3bf   : > { %18857 = vst [vmem:[#allocation235_spill] sm:$0xff] %v15050_v26  ;;  %6259 = vrot.lane.b32.xlu0 %v6161_v1, %s9361_s13  ;;  %v15071_v48 = vor.u32 %v6195_v20, %v6194_v55  ;;  %v9246_v1 = vld [vmem:[%s9453_s11 + $0x20] sm:$0xf]  ;;  %v9252_v20 = vld [vmem:[%s9453_s11 + $0x28] sm:$0xf] }
 0x3c0   : > { %v15061_v53 = vpop.permute.xlu1 %5423  ;;  %v8296_v9 = vcombine.low %v9246_v1, %v9247_v34  ;;  %v18863_v34 = vld [vmem:[#allocation195_spill] sm:$0xff]  ;;  %v15091_v16 = vrot.slane %v8303_v61, 6  ;;  %v6348_v52 = vrot.slane %v8304_v40, 6 }
 0x3c1   : > { %v6197_v55 = vsel %vm3701_vm7, %v6192_v43, %v15071_v48  ;;  %v9255_v43 = vld [vmem:[%s9453_s11 + $0x6c] sm:$0xf]  ;;  %v18867_v40 = vshrl.u32 %v18863_v34, 16 }
 0x3c2   : > { %v15065_v18 = vpop.permute.xlu0 %5541  ;;  %6123 = vrot.lane.b32.xlu1 %v18862_v54, %s9360_s12  ;;  %v6333_v49 = vrot.slane %v8296_v9, 6  ;;  %18864 = vst [vmem:[#allocation268_spill] sm:$0xff] %v15091_v16  ;;  %v8305_v26 = vcombine.low %v9254_v60, %v9255_v43  ;;  %v6349_v9 = vsel %vm4605_vm11, %v15091_v16, %v6348_v52 }
 0x3c3   : > { %6275 = vrot.lane.b32.xlu0 %v6193_v22, %s9361_s13  ;;  %v9253_v22 = vld [vmem:[%s9453_s11 + $0x2c] sm:$0xf] }
 0x3c4   : > { %v15080_v54 = vpop.permute.xlu1 %5427  ;;  %v8297_v1 = vcombine.low %v9252_v20, %v9253_v22  ;;  %v6218_v20 = vrot.slane %v18867_v40, 1  ;;  %v18868_v22 = vshll.u32 %v18863_v34, 16  ;;  %v15121_v40 = vrot.slane %v8305_v26, 6 }
 0x3c6   : > { %v15082_v29 = vpop.permute.xlu0 %5545  ;;  %6261 = vrot.lane.b32.xlu1 %v6165_v47, %s9361_s13  ;;  %v15098_v47 = vrot.slane %v8297_v1, 6  ;;  %v18869_v1 = vld [vmem:[#allocation201_spill] sm:$0xff]  ;;  %v6351_v26 = vsel %vm4605_vm11, %v6348_v52, %v15121_v40 }
 0x3c7   : > { %6078 = vrot.lane.b32.xlu0 %v18863_v34, %s9364_s6  ;;  %v18870_v19 = vshrl.u32 %v18869_v1, 16  ;;  %v18871_v43 = vshll.u32 %v18869_v1, 16  ;;  %v18873_v34 = vld [vmem:[#allocation214_spill] sm:$0xff] }
 0x3c8   : > { %v15093_v56 = vpop.permute.xlu1 %5431  ;;  %v6335_v16 = vsel %vm4605_vm11, %v6333_v49, %v15098_v47 }
 0x3c9   : > { %18865 = vst [vmem:[#allocation59_spill] sm:$0xff] %v15093_v56  ;;  %v6222_v60 = vrot.slane %v18870_v19, 1  ;;  %v6223_v13 = vrot.slane %v18871_v43, 2  ;;  %v9256_v43 = vld [vmem:[%s9453_s11 + $0x98] sm:$0xf] }
 0x3ca   : > { %v15095_v32 = vpop.permute.xlu0 %5549  ;;  %6277 = vrot.lane.b32.xlu1 %v6197_v55, %s9361_s13  ;;  %v6219_v55 = vrot.slane %v18868_v22, 2 }
 0x3cb   : > { %6380 = vrot.lane.b32.xlu0 %v6333_v49, %s9365_s14  ;;  %v6224_v56 = vor.u32 %v6223_v13, %v6222_v60  ;;  %v18875_v49 = vld [vmem:[#allocation203_spill] sm:$0xff]  ;;  %v5380_v13 = vshrl.u32 %v18873_v34, 16 }
 0x3cc   : > { %v15105_v61 = vpop.permute.xlu1 %5435  ;;  %v15127_v19 = vor.u32 %v6219_v55, %v6218_v20  ;;  %v18876_v58 = vshrl.u32 %v18875_v49, 16  ;;  %v18877_v28 = vshll.u32 %v18875_v49, 16  ;;  %v18878_v55 = vld [vmem:[#allocation105_spill] sm:$0xff] }
 0x3cd   : > { %18866 = vst [vmem:[#allocation275_spill] sm:$0xff] %v15105_v61  ;;  %v5382_v61 = vshll.u32 %v18873_v34, 16 }
 0x3ce   : > { %v15115_v12 = vpop.permute.xlu0 %5553  ;;  %6080 = vrot.lane.b32.xlu1 %v18869_v1, %s9364_s6  ;;  %18874 = vst [vmem:[#allocation17_spill] sm:$0xff] %v15127_v19  ;;  %v8312_v1 = vcombine.low %v9258_v38, %v9259_v0  ;;  %v6227_v20 = vrot.slane %v18877_v28, 2  ;;  %v5715_v0 = vsel %vm760_vm3, %v14657_v44, %v18878_v55  ;;  %v18879_v38 = vld [vmem:[#allocation222_spill] sm:$0xff]  ;;  %v9260_v55 = vld [vmem:[%s9453_s11 + $0xa8] sm:$0xf] }
 0x3cf   : > { %18872 = vst [vmem:[#allocation43_spill] sm:$0xff] %v15115_v12  ;;  %6396 = vrot.lane.b32.xlu0 %v6349_v9, %s9365_s14  ;;  %v8311_v12 = vcombine.low %v9256_v43, %v9257_v23  ;;  %v6226_v9 = vrot.slane %v18876_v58, 1  ;;  %v5384_v23 = vrot.slane %v5382_v61, 1  ;;  %v6225_v58 = vsel %vm3701_vm7, %v15127_v19, %v6224_v56  ;;  %v15159_v44 = vld [vmem:[%s17299_s3 + $0x2] sm:$0x1] }
 0x3d0   : > { %v15125_v22 = vpop.permute.xlu1 %5543  ;;  %v6364_v60 = vrot.slane %v8312_v1, 6  ;;  %8508 = vmatprep.mubr.msk.bf16.mxu0 %vm4178_vm10, %v15159_v44 }
 0x3d1   : > { %v15152_v28 = vrot.slane %v8311_v12, 6  ;;  %v15162_v43 = vor.u32 %v6227_v20, %v6226_v9  ;;  %v5385_v12 = vor.u32 %v5384_v23, %v5380_v13  ;;  %v18881_v9 = vld [vmem:[#allocation223_spill] sm:$0xff] }
 0x3d2   : > { %v5558_v25 = vpop.permute.xlu0 %5557  ;;  %6382 = vrot.lane.b32.xlu1 %v6335_v16, %s9365_s14  ;;  %v5778_v16 = vsel %vm812_vm4, %v5715_v0, %v14964_v30  ;;  %v9261_v0 = vld [vmem:[%s9453_s11 + $0xac] sm:$0xf] }
 0x3d3   : > { %6137 = vrot.lane.b32.xlu0 %v18879_v38, %s9360_s12  ;;  %18880 = vst [vmem:[#allocation44_spill] sm:$0xff] %v15152_v28  ;;  %v5826_v61 = vsel %vm1064_vm2, %v5778_v16, %v5558_v25  ;;  %v8313_v38 = vcombine.low %v9260_v55, %v9261_v0  ;;  %v6365_v1 = vsel %vm4605_vm11, %v15152_v28, %v6364_v60 }
 0x3d4   : > { %v15148_v52 = vpop.permute.xlu1 %5547  ;;  %v6229_v20 = vsel %vm3701_vm7, %v6224_v56, %v15162_v43 }
 0x3d5   : > { %v15178_v16 = vrot.slane %v8313_v38, 6 }
 0x3d6   : > { %v5658_v34 = vpop.permute.xlu0 %5657  ;;  %6398 = vrot.lane.b32.xlu1 %v6351_v26, %s9365_s14 }
 0x3d7   : > { %v5874_v30 = vsel %vm4128_vm9, %v5826_v61, %v5658_v34  ;;  %6291 = vrot.lane.b32.xlu0 %v6225_v58, %s9361_s13  ;;  %v18882_v61 = vld [vmem:[#allocation85_spill] sm:$0xff]  ;;  %v18883_v58 = vld [vmem:[#allocation159_spill] sm:$0xff]  ;;  %v6367_v38 = vsel %vm4605_vm11, %v6364_v60, %v15178_v16 }
 0x3d8   : > { %8827 = vmatprep.subr.msk.bf16.mxu0 %vm4178_vm10, %v5874_v30  ;;  %v15170_v25 = vpop.permute.xlu1 %5551  ;;  %v5386_v13 = vsel %vm407_vm0, %v5385_v12, %v18882_v61  ;;  %v18884_v34 = vshrl.u32 %v18883_v58, 16  ;;  %v18885_v55 = vshll.u32 %v18883_v58, 16  ;;  %v18886_v60 = vld [vmem:[#allocation181_spill] sm:$0xff] }
 0x3d9   : > { %v5691_v56 = vsel %vm760_vm3, %v14493_v37, %v5386_v13  ;;  %v18887_v13 = vshrl.u32 %v18886_v60, 16 }
 0x3da   : > { %v5674_v26 = vpop.permute.xlu0 %5673  ;;  %6139 = vrot.lane.b32.xlu1 %v18881_v9, %s9360_s12  ;;  %v6166_v30 = vrot.slane %v18884_v34, 1  ;;  %v6167_v0 = vrot.slane %v18885_v55, 2  ;;  %v5762_v12 = vsel %vm812_vm4, %v5691_v56, %v14908_v39  ;;  %v18888_v34 = vshll.u32 %v18886_v60, 16  ;;  %v18889_v55 = vld [vmem:[#allocation124_spill] sm:$0xff] }
 0x3db   : > { %6412 = vrot.lane.b32.xlu0 %v6365_v1, %s9365_s14  ;;  %v5810_v1 = vsel %vm1064_vm2, %v5762_v12, %v15065_v18 }
 0x3dc   : > { %v15183_v23 = vpop.permute.xlu1 %5555  ;;  %v15200_v61 = vor.u32 %v6167_v0, %v6166_v30  ;;  %v6199_v18 = vrot.slane %v18888_v34, 2  ;;  %v5739_v30 = vsel %vm760_vm3, %v14798_v6, %v18889_v55  ;;  %v18890_v0 = vld [vmem:[#allocation205_spill] sm:$0xff]  ;;  %v9264_v6 = vld [vmem:[%s9453_s11 + $0x30] sm:$0xf] }
 0x3dd   : > { %v5794_v56 = vsel %vm812_vm4, %v5739_v30, %v15003_v46 }
 0x3de   : > { %v5644_v28 = vpop.permute.xlu0 %5643  ;;  %6293 = vrot.lane.b32.xlu1 %v6229_v20, %s9361_s13  ;;  %v6169_v12 = vsel %vm3701_vm7, %v15054_v27, %v15200_v61  ;;  %v18891_v27 = vld [vmem:[#allocation89_spill] sm:$0xff] }
 0x3df   : > { %6050 = vrot.lane.b32.xlu0 %v18851_v14, %s9364_s6  ;;  %v6198_v14 = vrot.slane %v18887_v13, 1 }
 0x3e0   : > { %v5642_v9 = vpop.permute.xlu1 %5641 }
 0x3e1   : > { %v5858_v20 = vsel %vm4128_vm9, %v5810_v1, %v5642_v9  ;;  %v9262_v1 = vld [vmem:[%s9453_s11 + $0x70] sm:$0xf]  ;;  %v9263_v9 = vld [vmem:[%s9453_s11 + $0x74] sm:$0xf]  ;;  %v15229_v46 = vor.u32 %v6199_v18, %v6198_v14 }
 0x3e2   : > { %v15203_v37 = vpop.permute.xlu0 %5575  ;;  %6414 = vrot.lane.b32.xlu1 %v6367_v38, %s9365_s14  ;;  %v5910_v39 = vsel %vm4178_vm10, %v5858_v20, 0  ;;  %v8306_v20 = vcombine.low %v9262_v1, %v9263_v9  ;;  %v5694_v1 = vsel %vm760_vm3, %v14645_v4, %v18891_v27 }
 0x3e3   : > { %8493 = vmatpush3.bf16.xpose.msra.mxu0 %v5910_v39  ;;  %6109 = vrot.lane.b32.xlu0 %v18890_v0, %s9360_s12  ;;  %v9265_v39 = vld [vmem:[%s9453_s11 + $0x34] sm:$0xf]  ;;  %v5764_v14 = vsel %vm812_vm4, %v5694_v1, %v14961_v50 }
 0x3e4   : > { %v5574_v38 = vpop.permute.xlu1 %5573  ;;  %v8298_v55 = vcombine.low %v9264_v6, %v9265_v39  ;;  %v5812_v39 = vsel %vm1064_vm2, %v5764_v14, %v15125_v22 }
 0x3e5   : > { %v5842_v13 = vsel %vm1064_vm2, %v5794_v56, %v5574_v38  ;;  %v15236_v38 = vrot.slane %v8306_v20, 6 }
 0x3e6   : > { %v5562_v34 = vpop.permute.xlu0 %5561  ;;  %6066 = vrot.lane.b32.xlu1 %v18859_v10, %s9364_s6  ;;  %v5890_v0 = vsel %vm4128_vm9, %v5842_v13, %v5674_v26  ;;  %v18892_v10 = vld [vmem:[#allocation204_spill] sm:$0xff]  ;;  %v15247_v4 = vrot.slane %v8298_v55, 6  ;;  %v18896_v13 = vld [vmem:[#allocation109_spill] sm:$0xff]  ;;  %v18897_v55 = vld [vmem:[#allocation114_spill] sm:$0xff] }
 0x3e7   : > { %v5942_v30 = vsel %vm4178_vm10, %v5890_v0, 0  ;;  %6263 = vrot.lane.b32.xlu0 %v6169_v12, %s9361_s13  ;;  %v18893_v9 = vshrl.u32 %v18892_v10, 16  ;;  %v18894_v6 = vshll.u32 %v18892_v10, 16  ;;  %v18895_v12 = vld [vmem:[#allocation213_spill] sm:$0xff]  ;;  %v5718_v20 = vsel %vm760_vm3, %v14791_v63, %v18896_v13 }
 0x3e8   : > { %v5560_v56 = vpop.permute.xlu1 %5559  ;;  %8674 = vmatpush3.bf16.xpose.msra.mxu1 %v5942_v30  ;;  %v6201_v0 = vsel %vm3701_vm7, %v15071_v48, %v15229_v46  ;;  %v5780_v50 = vsel %vm812_vm4, %v5718_v20, %v15001_v11  ;;  %v5860_v30 = vsel %vm4128_vm9, %v5812_v39, %v5644_v28  ;;  %v5721_v63 = vsel %vm760_vm3, %v14705_v2, %v18897_v55 }
 0x3e9   : > { %v6230_v19 = vrot.slane %v18893_v9, 1  ;;  %v6231_v26 = vrot.slane %v18894_v6, 2  ;;  %8675 = vmatprep.subr.bf16.mxu1 %v18749_v62  ;;  %v5828_v22 = vsel %vm1064_vm2, %v5780_v50, %v5560_v56  ;;  %v6353_v48 = vsel %vm4605_vm11, %v15121_v40, %v15236_v38  ;;  %v18898_v56 = vld [vmem:[#allocation125_spill] sm:$0xff]  ;;  %v9267_v6 = vld [vmem:[%s9453_s11 + $0xb4] sm:$0xf] }
 0x3ea   : > { %v5662_v18 = vpop.permute.xlu0 %5661  ;;  %6125 = vrot.lane.b32.xlu1 %v18895_v12, %s9360_s12  ;;  %v5782_v11 = vsel %vm812_vm4, %v5721_v63, %v14978_v5  ;;  %v6337_v2 = vsel %vm4605_vm11, %v15098_v47, %v15247_v4  ;;  %v5742_v9 = vsel %vm760_vm3, %v14902_v15, %v18898_v56  ;;  %v5912_v40 = vsel %vm4178_vm10, %v5860_v30, 0  ;;  %v9266_v5 = vld [vmem:[%s9453_s11 + $0xb0] sm:$0xf]  ;;  %v18900_v30 = vld [vmem:[#allocation163_spill] sm:$0xff] }
 0x3eb   : > { %6082 = vrot.lane.b32.xlu0 %v18875_v49, %s9364_s6  ;;  %v15269_v1 = vor.u32 %v6231_v26, %v6230_v19  ;;  %v5830_v19 = vsel %vm1064_vm2, %v5782_v11, %v5562_v34  ;;  %v8314_v26 = vcombine.low %v9266_v5, %v9267_v6  ;;  %v5796_v14 = vsel %vm812_vm4, %v5742_v9, %v15061_v53  ;;  %v18899_v53 = vld [vmem:[#allocation91_spill] sm:$0xff] }
 0x3ec   : > { %v5660_v27 = vpop.permute.xlu1 %5659  ;;  %v5878_v12 = vsel %vm4128_vm9, %v5830_v19, %v5662_v18  ;;  %v5844_v15 = vsel %vm1064_vm2, %v5796_v14, %v15203_v37  ;;  %v5697_v18 = vsel %vm760_vm3, %v14544_v33, %v18899_v53  ;;  %v18901_v55 = vshrl.u32 %v18900_v30, 16  ;;  %v9268_v53 = vld [vmem:[%s9453_s11 + $0x78] sm:$0xf] }
 0x3ed   : > { %v5876_v28 = vsel %vm4128_vm9, %v5828_v22, %v5660_v27  ;;  %v6233_v34 = vsel %vm3701_vm7, %v15162_v43, %v15269_v1  ;;  %v5766_v37 = vsel %vm812_vm4, %v5697_v18, %v14922_v7  ;;  %v18902_v33 = vshll.u32 %v18900_v30, 16  ;;  %v18903_v7 = vld [vmem:[#allocation224_spill] sm:$0xff]  ;;  %v9269_v18 = vld [vmem:[%s9453_s11 + $0x7c] sm:$0xf] }
 0x3ee   : > { %v5678_v49 = vpop.permute.xlu0 %5677  ;;  %6279 = vrot.lane.b32.xlu1 %v6201_v0, %s9361_s13  ;;  %8828 = vmatprep.subr.msk.bf16.mxu0 %vm4178_vm10, %v5876_v28  ;;  %v15302_v0 = vrot.slane %v8314_v26, 6  ;;  %v5814_v43 = vsel %vm1064_vm2, %v5766_v37, %v15082_v29  ;;  %v6170_v63 = vrot.slane %v18901_v55, 1  ;;  %v18904_v28 = vld [vmem:[#allocation126_spill] sm:$0xff]  ;;  %v9270_v55 = vld [vmem:[%s9453_s11 + $0x38] sm:$0xf] }
 0x3ef   : > { %8495 = vmatpush3.bf16.xpose.msra.mxu0 %v5912_v40  ;;  %6400 = vrot.lane.b32.xlu0 %v6353_v48, %s9365_s14  ;;  %v6171_v22 = vrot.slane %v18902_v33, 2 }
 0x3f0   : > { %v5676_v47 = vpop.permute.xlu1 %5675  ;;  %8829 = vmatprep.subr.msk.bf16.mxu0 %vm4178_vm10, %v5878_v12  ;;  %v6369_v29 = vsel %vm4605_vm11, %v15178_v16, %v15302_v0  ;;  %v18905_v16 = vld [vmem:[#allocation183_spill] sm:$0xff] }
 0x3f1   : > { %v5892_v13 = vsel %vm4128_vm9, %v5844_v15, %v5676_v47  ;;  %v15328_v40 = vor.u32 %v6171_v22, %v6170_v63  ;;  %v18906_v6 = vshrl.u32 %v18905_v16, 16  ;;  %v18907_v26 = vshll.u32 %v18905_v16, 16  ;;  %v18909_v15 = vld [vmem:[#allocation93_spill] sm:$0xff]  ;;  %v18911_v22 = vld [vmem:[#allocation116_spill] sm:$0xff] }
 0x3f2   : > { %v5648_v20 = vpop.permute.xlu0 %5647  ;;  %6384 = vrot.lane.b32.xlu1 %v6337_v2, %s9365_s14  ;;  %v5944_v39 = vsel %vm4178_vm10, %v5892_v13, 0  ;;  %v5745_v2 = vsel %vm760_vm3, %v14822_v17, %v18904_v28  ;;  %v5700_v47 = vsel %vm760_vm3, %v14690_v8, %v18909_v15  ;;  %v18910_v8 = vld [vmem:[#allocation115_spill] sm:$0xff]  ;;  %v9271_v63 = vld [vmem:[%s9453_s11 + $0x3c] sm:$0xf] }
 0x3f3   : > { %8676 = vmatpush3.bf16.xpose.msra.mxu1 %v5944_v39  ;;  %6295 = vrot.lane.b32.xlu0 %v6233_v34, %s9361_s13  ;;  %v5798_v56 = vsel %vm812_vm4, %v5745_v2, %v15019_v59  ;;  %v6202_v17 = vrot.slane %v18906_v6, 1  ;;  %v6203_v14 = vrot.slane %v18907_v26, 2  ;;  %v18908_v59 = vld [vmem:[#allocation206_spill] sm:$0xff]  ;;  %v6173_v13 = vsel %vm3701_vm7, %v15200_v61, %v15328_v40  ;;  %v18916_v6 = vld [vmem:[#allocation127_spill] sm:$0xff] }
 0x3f4   : > { %v5646_v50 = vpop.permute.xlu1 %5645  ;;  %8677 = vmatprep.subr.bf16.mxu1 %v18749_v62  ;;  %v5768_v39 = vsel %vm812_vm4, %v5700_v47, %v14973_v3  ;;  %v8299_v33 = vcombine.low %v9270_v55, %v9271_v63  ;;  %v5727_v3 = vsel %vm760_vm3, %v14744_v31, %v18911_v22  ;;  %v18917_v47 = vld [vmem:[#allocation97_spill] sm:$0xff] }
 0x3f5   : > { %v5862_v27 = vsel %vm4128_vm9, %v5814_v43, %v5646_v50  ;;  %v15353_v43 = vor.u32 %v6203_v14, %v6202_v17  ;;  %v5724_v50 = vsel %vm760_vm3, %v14816_v36, %v18910_v8  ;;  %v5816_v61 = vsel %vm1064_vm2, %v5768_v39, %v15148_v52  ;;  %v18912_v52 = vld [vmem:[#allocation119_spill] sm:$0xff]  ;;  %v18919_v55 = vld [vmem:[#allocation165_spill] sm:$0xff] }
 0x3f6   : > { %v5580_v48 = vpop.permute.xlu0 %5579  ;;  %6141 = vrot.lane.b32.xlu1 %v18903_v7, %s9360_s12  ;;  %v5914_v11 = vsel %vm4178_vm10, %v5862_v27, 0  ;;  %v5864_v27 = vsel %vm4128_vm9, %v5816_v61, %v5648_v20  ;;  %v18914_v2 = vshll.u32 %v18912_v52, 16  ;;  %v5786_v31 = vsel %vm812_vm4, %v5727_v3, %v14987_v57  ;;  %v18915_v20 = vld [vmem:[#allocation215_spill] sm:$0xff] }
 0x3f7   : > { %8497 = vmatpush3.bf16.xpose.msra.mxu0 %v5914_v11  ;;  %6052 = vrot.lane.b32.xlu0 %v18883_v58, %s9364_s6  ;;  %v5748_v17 = vsel %vm760_vm3, %v14918_v21, %v18916_v6  ;;  %v5916_v26 = vsel %vm4178_vm10, %v5864_v27, 0  ;;  %v15390_v57 = vrot.slane %v8299_v33, 6  ;;  %v18920_v63 = vshrl.u32 %v18919_v55, 16 }
 0x3f8   : > { %v5578_v9 = vpop.permute.xlu1 %5577  ;;  %v18921_v22 = vshll.u32 %v18919_v55, 16 }
 0x3f9   : > { %v5846_v19 = vsel %vm1064_vm2, %v5798_v56, %v5578_v9  ;;  %v6235_v56 = vrot.slane %v18914_v2, 2  ;;  %v6174_v33 = vrot.slane %v18920_v63, 1  ;;  %v18937_v63 = vld [vmem:[#allocation59_spill] sm:$0xff] }
 0x3fa   : > { %v5566_v5 = vpop.permute.xlu0 %5565  ;;  %6416 = vrot.lane.b32.xlu1 %v6369_v29, %s9365_s14  ;;  %v5894_v58 = vsel %vm4128_vm9, %v5846_v19, %v5678_v49  ;;  %v8307_v49 = vcombine.low %v9268_v53, %v9269_v18  ;;  %v18913_v29 = vshrl.u32 %v18912_v52, 16  ;;  %v6205_v19 = vsel %vm3701_vm7, %v15229_v46, %v15353_v43  ;;  %v9273_v53 = vld [vmem:[%s9453_s11 + $0xbc] sm:$0xf] }
 0x3fb   : > { %v5946_v12 = vsel %vm4178_vm10, %v5894_v58, 0  ;;  %6111 = vrot.lane.b32.xlu0 %v18908_v59, %s9360_s12  ;;  %v5834_v14 = vsel %vm1064_vm2, %v5786_v31, %v5566_v5  ;;  %v5800_v58 = vsel %vm812_vm4, %v5748_v17, %v15080_v54  ;;  %v6175_v3 = vrot.slane %v18921_v22, 2  ;;  %v18924_v31 = vld [vmem:[#allocation257_spill] sm:$0xff] }
 0x3fc   : > { %v5564_v34 = vpop.permute.xlu1 %5563  ;;  %8678 = vmatpush3.bf16.xpose.msra.mxu1 %v5946_v12  ;;  %v15370_v11 = vrot.slane %v8307_v49, 6  ;;  %v6234_v28 = vrot.slane %v18913_v29, 1  ;;  %v5848_v21 = vsel %vm1064_vm2, %v5800_v58, %v5580_v48  ;;  %v18923_v29 = vld [vmem:[#allocation98_spill] sm:$0xff]  ;;  %v18930_v58 = vld [vmem:[#allocation40_spill] sm:$0xff] }
 0x3fd   : > { %8679 = vmatprep.subr.bf16.mxu1 %v18749_v62 }
 0x3fe   : > { %v5666_v37 = vpop.permute.xlu0 %5665  ;;  %6068 = vrot.lane.b32.xlu1 %v18886_v60, %s9364_s6  ;;  %v5784_v60 = vsel %vm812_vm4, %v5724_v50, %v15017_v41  ;;  %v6355_v5 = vsel %vm4605_vm11, %v15236_v38, %v15370_v11  ;;  %v15402_v59 = vor.u32 %v6235_v56, %v6234_v28  ;;  %v18918_v50 = vld [vmem:[#allocation128_spill] sm:$0xff]  ;;  %v5706_v28 = vsel %vm760_vm3, %v14736_v35, %v18923_v29 }
 0x3ff   : > { %6265 = vrot.lane.b32.xlu0 %v6173_v13, %s9361_s13  ;;  %v5832_v7 = vsel %vm1064_vm2, %v5784_v60, %v5564_v34  ;;  %v5882_v12 = vsel %vm4128_vm9, %v5834_v14, %v5666_v37  ;;  %v6339_v34 = vsel %vm4605_vm11, %v15247_v4, %v15390_v57  ;;  %v9272_v13 = vld [vmem:[%s9453_s11 + $0xb8] sm:$0xf]  ;;  %v15452_v56 = vor.u32 %v6175_v3, %v6174_v33 }
 0x400   : > { %v5664_v36 = vpop.permute.xlu1 %5663  ;;  %v8315_v38 = vcombine.low %v9272_v13, %v9273_v53  ;;  %v9275_v13 = vld [vmem:[%s9453_s11 + $0x84] sm:$0xf] }
 0x401   : > { %v5880_v41 = vsel %vm4128_vm9, %v5832_v7, %v5664_v36  ;;  %v18922_v7 = vld [vmem:[#allocation225_spill] sm:$0xff] }
 0x402   : > { %v5682_v9 = vpop.permute.xlu0 %5681  ;;  %6127 = vrot.lane.b32.xlu1 %v18915_v20, %s9360_s12  ;;  %8830 = vmatprep.subr.msk.bf16.mxu0 %vm4178_vm10, %v5880_v41  ;;  %v15427_v8 = vrot.slane %v8315_v38, 6  ;;  %v5772_v41 = vsel %vm812_vm4, %v5706_v28, %v18924_v31  ;;  %v18935_v38 = vld [vmem:[#allocation237_spill] sm:$0xff]  ;;  %v18942_v31 = vld [vmem:[#allocation100_spill] sm:$0xff] }
 0x403   : > { %8499 = vmatpush3.bf16.xpose.msra.mxu0 %v5916_v26  ;;  %6084 = vrot.lane.b32.xlu0 %v18892_v10, %s9364_s6  ;;  %v5703_v10 = vsel %vm760_vm3, %v14584_v45, %v18917_v47  ;;  %v6237_v45 = vsel %vm3701_vm7, %v15269_v1, %v15402_v59  ;;  %v5820_v35 = vsel %vm1064_vm2, %v5772_v41, %v15170_v25  ;;  %v18943_v41 = vld [vmem:[#allocation32_spill] sm:$0xff] }
 0x404   : > { %v5680_v46 = vpop.permute.xlu1 %5679  ;;  %8831 = vmatprep.subr.msk.bf16.mxu0 %vm4178_vm10, %v5882_v12  ;;  %v5770_v18 = vsel %vm812_vm4, %v5703_v10, %v14935_v51  ;;  %v6371_v36 = vsel %vm4605_vm11, %v15302_v0, %v15427_v8  ;;  %v18925_v0 = vld [vmem:[#allocation117_spill] sm:$0xff] }
 0x405   : > { %v5896_v54 = vsel %vm4128_vm9, %v5848_v21, %v5680_v46  ;;  %v5818_v49 = vsel %vm1064_vm2, %v5770_v18, %v15095_v32  ;;  %v5751_v32 = vsel %vm760_vm3, %v14856_v42, %v18918_v50  ;;  %v18931_v46 = vld [vmem:[#allocation207_spill] sm:$0xff] }
 0x406   : > { %v5652_v15 = vpop.permute.xlu0 %5651  ;;  %6281 = vrot.lane.b32.xlu1 %v6205_v19, %s9361_s13  ;;  %v5948_v48 = vsel %vm4178_vm10, %v5896_v54, 0  ;;  %v5802_v61 = vsel %vm812_vm4, %v5751_v32, %v15036_v24  ;;  %v18927_v19 = vld [vmem:[#allocation185_spill] sm:$0xff]  ;;  %v18933_v54 = vld [vmem:[#allocation36_spill] sm:$0xff]  ;;  %v9276_v32 = vld [vmem:[%s9453_s11 + $0x40] sm:$0xf] }
 0x407   : > { %8680 = vmatpush3.bf16.xpose.msra.mxu1 %v5948_v48  ;;  %6402 = vrot.lane.b32.xlu0 %v6355_v5, %s9365_s14  ;;  %v18928_v6 = vshrl.u32 %v18927_v19, 16  ;;  %v18929_v26 = vshll.u32 %v18927_v19, 16  ;;  %v5868_v21 = vsel %vm4128_vm9, %v5820_v35, %v5652_v15  ;;  %v18932_v5 = vld [vmem:[#allocation120_spill] sm:$0xff]  ;;  %v6177_v48 = vsel %vm3701_vm7, %v15328_v40, %v15452_v56  ;;  %v18934_v15 = vld [vmem:[#allocation130_spill] sm:$0xff] }
 0x408   : > { %v5650_v39 = vpop.permute.xlu1 %5649  ;;  %8681 = vmatprep.subr.bf16.mxu1 %v18749_v62  ;;  %v5733_v47 = vsel %vm760_vm3, %v18933_v54, %v18932_v5  ;;  %v5754_v18 = vsel %vm760_vm3, %v18935_v38, %v18934_v15  ;;  %v9279_v5 = vld [vmem:[%s9453_s11 + $0xc4] sm:$0xf] }
 0x409   : > { %v5866_v4 = vsel %vm4128_vm9, %v5818_v49, %v5650_v39  ;;  %v6206_v17 = vrot.slane %v18928_v6, 1  ;;  %v6207_v14 = vrot.slane %v18929_v26, 2  ;;  %v18936_v49 = vld [vmem:[#allocation239_spill] sm:$0xff]  ;;  %v5804_v33 = vsel %vm812_vm4, %v5754_v18, %v18937_v63  ;;  %v18954_v63 = vld [vmem:[#allocation38_spill] sm:$0xff] }
 0x40a   : > { %v5584_v37 = vpop.permute.xlu0 %5583  ;;  %6386 = vrot.lane.b32.xlu1 %v6339_v34, %s9365_s14  ;;  %v5918_v51 = vsel %vm4178_vm10, %v5866_v4, 0  ;;  %v9274_v34 = vld [vmem:[%s9453_s11 + $0x80] sm:$0xf]  ;;  %v5790_v39 = vsel %vm812_vm4, %v5733_v47, %v18936_v49  ;;  %v18945_v6 = vld [vmem:[#allocation43_spill] sm:$0xff]  ;;  %v18946_v47 = vld [vmem:[#allocation132_spill] sm:$0xff] }
 0x40b   : > { %8501 = vmatpush3.bf16.xpose.msra.mxu0 %v5918_v51  ;;  %6297 = vrot.lane.b32.xlu0 %v6237_v45, %s9361_s13  ;;  %v8308_v53 = vcombine.low %v9274_v34, %v9275_v13  ;;  %v5920_v51 = vsel %vm4178_vm10, %v5868_v21, 0  ;;  %v15492_v50 = vor.u32 %v6207_v14, %v6206_v17  ;;  %v18949_v49 = vld [vmem:[#allocation102_spill] sm:$0xff] }
 0x40c   : > { %v5582_v1 = vpop.permute.xlu1 %5581 }
 0x40d   : > { %v5850_v60 = vsel %vm1064_vm2, %v5802_v61, %v5582_v1  ;;  %v9277_v61 = vld [vmem:[%s9453_s11 + $0x44] sm:$0xf] }
 0x40e   : > { %v5570_v27 = vpop.permute.xlu0 %5569  ;;  %6143 = vrot.lane.b32.xlu1 %v18922_v7, %s9360_s12  ;;  %v5898_v42 = vsel %vm4128_vm9, %v5850_v60, %v5682_v9  ;;  %v8300_v1 = vcombine.low %v9276_v32, %v9277_v61  ;;  %v15502_v60 = vrot.slane %v8308_v53, 6 }
 0x40f   : > { %v5950_v24 = vsel %vm4178_vm10, %v5898_v42, 0  ;;  %6054 = vrot.lane.b32.xlu0 %v18900_v30, %s9364_s6  ;;  %v18926_v30 = vld [vmem:[#allocation269_spill] sm:$0xff]  ;;  %v5838_v40 = vsel %vm1064_vm2, %v5790_v39, %v5570_v27  ;;  %v18938_v27 = vld [vmem:[#allocation131_spill] sm:$0xff]  ;;  %v18950_v39 = vld [vmem:[#allocation34_spill] sm:$0xff] }
 0x410   : > { %v5568_v2 = vpop.permute.xlu1 %5567  ;;  %8682 = vmatpush3.bf16.xpose.msra.mxu1 %v5950_v24  ;;  %v5730_v20 = vsel %vm760_vm3, %v18926_v30, %v18925_v0  ;;  %v18939_v7 = vshrl.u32 %v18938_v27, 16  ;;  %v6209_v0 = vsel %vm3701_vm7, %v15353_v43, %v15492_v50  ;;  %v15518_v30 = vrot.slane %v8300_v1, 6 }
 0x411   : > { %8683 = vmatprep.subr.bf16.mxu1 %v18749_v62  ;;  %v5788_v12 = vsel %vm812_vm4, %v5730_v20, %v18930_v58  ;;  %v18944_v20 = vld [vmem:[#allocation21_spill] sm:$0xff]  ;;  %v6357_v43 = vsel %vm4605_vm11, %v15370_v11, %v15502_v60 }
 0x412   : > { %v5670_v9 = vpop.permute.xlu0 %5669  ;;  %6418 = vrot.lane.b32.xlu1 %v6371_v36, %s9365_s14  ;;  %v5836_v25 = vsel %vm1064_vm2, %v5788_v12, %v5568_v2  ;;  %v6238_v42 = vrot.slane %v18939_v7, 1  ;;  %v18940_v36 = vshll.u32 %v18938_v27, 16  ;;  %v18941_v2 = vld [vmem:[#allocation217_spill] sm:$0xff]  ;;  %v6341_v21 = vsel %vm4605_vm11, %v15390_v57, %v15518_v30 }
 0x413   : > { %6113 = vrot.lane.b32.xlu0 %v18931_v46, %s9360_s12  ;;  %v5886_v22 = vsel %vm4128_vm9, %v5838_v40, %v5670_v9  ;;  %v9278_v46 = vld [vmem:[%s9453_s11 + $0xc0] sm:$0xf] }
 0x414   : > { %v5668_v10 = vpop.permute.xlu1 %5667  ;;  %v6239_v24 = vrot.slane %v18940_v36, 2  ;;  %v8316_v54 = vcombine.low %v9278_v46, %v9279_v5  ;;  %v9282_v5 = vld [vmem:[%s9453_s11 + $0x48] sm:$0xf] }
 0x415   : > { %v5884_v45 = vsel %vm4128_vm9, %v5836_v25, %v5668_v10  ;;  %v18947_v25 = vld [vmem:[#allocation254_spill] sm:$0xff]  ;;  %v18948_v10 = vld [vmem:[#allocation235_spill] sm:$0xff] }
 0x416   : > { %v5686_v4 = vpop.permute.xlu0 %5685  ;;  %6070 = vrot.lane.b32.xlu1 %v18905_v16, %s9364_s6  ;;  %8832 = vmatprep.subr.msk.bf16.mxu0 %vm4178_vm10, %v5884_v45  ;;  %v5852_v16 = vsel %vm1064_vm2, %v5804_v33, %v5584_v37  ;;  %v5709_v37 = vsel %vm760_vm3, %v18943_v41, %v18942_v31  ;;  %v15530_v14 = vor.u32 %v6239_v24, %v6238_v42  ;;  %v15556_v38 = vrot.slane %v8316_v54, 6  ;;  %v18958_v24 = vld [vmem:[#allocation8_spill] sm:$0xff]  ;;  %v9283_v54 = vld [vmem:[%s9453_s11 + $0x4c] sm:$0xf] }
 0x417   : > { %8503 = vmatpush3.bf16.xpose.msra.mxu0 %v5920_v51  ;;  %6267 = vrot.lane.b32.xlu0 %v6177_v48, %s9361_s13  ;;  %v5774_v35 = vsel %vm812_vm4, %v5709_v37, %v18944_v20  ;;  %v5757_v11 = vsel %vm760_vm3, %v18947_v25, %v18946_v47  ;;  %v5712_v45 = vsel %vm760_vm3, %v18950_v39, %v18949_v49 }
 0x418   : > { %v5684_v3 = vpop.permute.xlu1 %5683  ;;  %8833 = vmatprep.subr.msk.bf16.mxu0 %vm4178_vm10, %v5886_v22  ;;  %v5822_v17 = vsel %vm1064_vm2, %v5774_v35, %v18945_v6  ;;  %v5806_v48 = vsel %vm812_vm4, %v5757_v11, %v18948_v10  ;;  %v6241_v13 = vsel %vm3701_vm7, %v15402_v59, %v15530_v14  ;;  %v18951_v59 = vld [vmem:[#allocation169_spill] sm:$0xff]  ;;  %v18955_v22 = vld [vmem:[#allocation226_spill] sm:$0xff]  ;;  %v6373_v36 = vsel %vm4605_vm11, %v15427_v8, %v15556_v38  ;;  %v18962_v6 = vld [vmem:[#allocation184_spill] sm:$0xff] }
 0x419   : > { %v5900_v29 = vsel %vm4128_vm9, %v5852_v16, %v5684_v3  ;;  %v18952_v40 = vshrl.u32 %v18951_v59, 16  ;;  %v18953_v61 = vshll.u32 %v18951_v59, 16  ;;  %v18956_v16 = vld [vmem:[#allocation122_spill] sm:$0xff]  ;;  %v18957_v3 = vld [vmem:[#allocation263_spill] sm:$0xff]  ;;  %v8301_v47 = vcombine.low %v9282_v5, %v9283_v54 }
 0x41a   : > { %v5656_v28 = vpop.permute.xlu0 %5655  ;;  %6129 = vrot.lane.b32.xlu1 %v18941_v2, %s9360_s12  ;;  %v5952_v9 = vsel %vm4178_vm10, %v5900_v29, 0  ;;  %v5736_v7 = vsel %vm760_vm3, %v18957_v3, %v18956_v16  ;;  %v9285_v16 = vld [vmem:[%s9453_s11 + $0xcc] sm:$0xf] }
 0x41b   : > { %8684 = vmatpush3.bf16.xpose.msra.mxu1 %v5952_v9  ;;  %6086 = vrot.lane.b32.xlu0 %v18912_v52, %s9364_s6  ;;  %v6178_v32 = vrot.slane %v18952_v40, 1  ;;  %v6179_v1 = vrot.slane %v18953_v61, 2  ;;  %v5792_v29 = vsel %vm812_vm4, %v5736_v7, %v18958_v24 }
 0x41c   : > { %v5654_v26 = vpop.permute.xlu1 %5653  ;;  %8685 = vmatprep.subr.bf16.mxu1 %v18749_v62 }
 0x41d   : > { %v5870_v58 = vsel %vm4128_vm9, %v5822_v17, %v5654_v26  ;;  %v15588_v37 = vor.u32 %v6179_v1, %v6178_v32 }
 0x41e   : > { %v15533_v12 = vpop.permute.xlu0 %5587  ;;  %6283 = vrot.lane.b32.xlu1 %v6209_v0, %s9361_s13  ;;  %v5922_v52 = vsel %vm4178_vm10, %v5870_v58, 0  ;;  %v9281_v58 = vld [vmem:[%s9453_s11 + $0x8c] sm:$0xf] }
 0x41f   : > { %8505 = vmatpush3.bf16.xpose.msra.mxu0 %v5922_v52  ;;  %6404 = vrot.lane.b32.xlu0 %v6357_v43, %s9365_s14  ;;  %v6181_v26 = vsel %vm3701_vm7, %v15452_v56, %v15588_v37  ;;  %v9280_v43 = vld [vmem:[%s9453_s11 + $0x88] sm:$0xf]  ;;  %v18963_v56 = vld [vmem:[#allocation146_spill] sm:$0xff] }
 0x420   : > { %v5586_v34 = vpop.permute.xlu1 %5585  ;;  %v8309_v52 = vcombine.low %v9280_v43, %v9281_v58  ;;  %v18964_v10 = vshrl.u32 %v18963_v56, 16 }
 0x421   : > { %v5854_v57 = vsel %vm1064_vm2, %v5806_v48, %v5586_v34  ;;  %v18965_v34 = vshll.u32 %v18963_v56, 16 }
 0x422   : > { %v15552_v53 = vpop.permute.xlu0 %6048  ;;  %6388 = vrot.lane.b32.xlu1 %v6341_v21, %s9365_s14  ;;  %v5902_v15 = vsel %vm4128_vm9, %v5854_v57, %v5686_v4  ;;  %v5776_v4 = vsel %vm812_vm4, %v5712_v45, %v18954_v63  ;;  %v15620_v11 = vrot.slane %v8309_v52, 6  ;;  %v6242_v48 = vrot.slane %v18964_v10, 1  ;;  %v18975_v52 = vld [vmem:[#allocation193_spill] sm:$0xff] }
 0x423   : > { %v5954_v18 = vsel %vm4178_vm10, %v5902_v15, 0  ;;  %6299 = vrot.lane.b32.xlu0 %v6241_v13, %s9361_s13  ;;  %v5824_v42 = vsel %vm1064_vm2, %v5776_v4, %v15183_v23  ;;  %v6243_v13 = vrot.slane %v18965_v34, 2  ;;  %v18967_v15 = vld [vmem:[#allocation134_spill] sm:$0xff]  ;;  %v15636_v45 = vrot.slane %v8301_v47, 6  ;;  %v9287_v34 = vld [vmem:[%s9453_s11 + $0x94] sm:$0xf] }
 0x424   : > { %v5572_v51 = vpop.permute.xlu1 %5571  ;;  %8686 = vmatpush3.bf16.xpose.msra.mxu1 %v5954_v18  ;;  %v5872_v2 = vsel %vm4128_vm9, %v5824_v42, %v5656_v28  ;;  %v18959_v28 = vld [vmem:[#allocation188_spill] sm:$0xff]  ;;  %v18968_v18 = vld [vmem:[#allocation243_spill] sm:$0xff]  ;;  %v6359_v1 = vsel %vm4605_vm11, %v15502_v60, %v15620_v11  ;;  %v18970_v42 = vld [vmem:[#allocation229_spill] sm:$0xff] }
 0x425   : > { %8687 = vmatprep.subr.bf16.mxu1 %v18749_v62  ;;  %v5840_v31 = vsel %vm1064_vm2, %v5792_v29, %v5572_v51  ;;  %v5924_v8 = vsel %vm4178_vm10, %v5872_v2, 0  ;;  %v18961_v20 = vshll.u32 %v18959_v28, 16  ;;  %v5760_v49 = vsel %vm760_vm3, %v18968_v18, %v18967_v15  ;;  %v18969_v51 = vld [vmem:[#allocation275_spill] sm:$0xff]  ;;  %v18971_v2 = vld [vmem:[#allocation176_spill] sm:$0xff] }
 0x426   : > { %v15569_v33 = vpop.permute.xlu0 %6064  ;;  %6145 = vrot.lane.b32.xlu1 %v18955_v22, %s9360_s12  ;;  %v5808_v40 = vsel %vm812_vm4, %v5760_v49, %v18969_v51  ;;  %v9288_v49 = vld [vmem:[%s9453_s11 + $0x50] sm:$0xf] }
 0x427   : > { %6056 = vrot.lane.b32.xlu0 %v18919_v55, %s9364_s6  ;;  %v18960_v55 = vshrl.u32 %v18959_v28, 16  ;;  %v6211_v35 = vrot.slane %v18961_v20, 2  ;;  %v5856_v32 = vsel %vm1064_vm2, %v5808_v40, %v15533_v12  ;;  %v9284_v12 = vld [vmem:[%s9453_s11 + $0xc8] sm:$0xf] }
 0x428   : > { %v5672_v41 = vpop.permute.xlu1 %5671  ;;  %v8317_v3 = vcombine.low %v9284_v12, %v9285_v16  ;;  %v18974_v20 = vld [vmem:[#allocation227_spill] sm:$0xff]  ;;  %v18983_v16 = vld [vmem:[#allocation220_spill] sm:$0xff] }
 0x429   : > { %v5888_v23 = vsel %vm4128_vm9, %v5840_v31, %v5672_v41  ;;  %v6210_v0 = vrot.slane %v18960_v55, 1  ;;  %v18972_v31 = vshrl.u32 %v18971_v2, 16 }
 0x42a   : > { %v15591_v9 = vpop.permute.xlu0 %6105  ;;  %6420 = vrot.lane.b32.xlu1 %v6373_v36, %s9365_s14  ;;  %8834 = vmatprep.subr.msk.bf16.mxu0 %vm4178_vm10, %v5888_v23  ;;  %v6098_v36 = vshll.u32 %v18970_v42, 16  ;;  %v18973_v23 = vshll.u32 %v18971_v2, 16 }
 0x42b   : > { %8507 = vmatpush3.bf16.xpose.msra.mxu0 %v5924_v8  ;;  %6115 = vrot.lane.b32.xlu0 %v18962_v6, %s9360_s12  ;;  %v15613_v46 = vor.u32 %v6211_v35, %v6210_v0  ;;  %v6182_v41 = vrot.slane %v18972_v31, 1  ;;  %v6096_v8 = vshrl.u32 %v18970_v42, 16 }
 0x42c   : > { %v15602_v17 = vpop.permute.xlu1 %6046  ;;  %v6100_v55 = vrot.slane %v6098_v36, 1 }
 0x42d   : > { %v6213_v39 = vsel %vm3701_vm7, %v15492_v50, %v15613_v46  ;;  %v15649_v50 = vor.u32 %v6243_v13, %v6242_v48  ;;  %v9286_v48 = vld [vmem:[%s9453_s11 + $0x90] sm:$0xf] }
 0x42e   : > { %v15609_v21 = vpop.permute.xlu0 %6121  ;;  %6072 = vrot.lane.b32.xlu1 %v18927_v19, %s9364_s6  ;;  %v18966_v19 = vld [vmem:[#allocation219_spill] sm:$0xff]  ;;  %v6101_v43 = vor.u32 %v6100_v55, %v6096_v8  ;;  %v8310_v13 = vcombine.low %v9286_v48, %v9287_v34 }
 0x42f   : > { %6269 = vrot.lane.b32.xlu0 %v6181_v26, %s9361_s13  ;;  %v6245_v7 = vsel %vm3701_vm7, %v15530_v14, %v15649_v50  ;;  %v6183_v14 = vrot.slane %v18973_v23, 2  ;;  %v18987_v48 = vld [vmem:[#allocation139_spill] sm:$0xff] }
 0x430   : > { %v15618_v25 = vpop.permute.xlu1 %6062 }
 0x431   : > { %v15691_v26 = vor.u32 %v6183_v14, %v6182_v41 }
 0x432   : > { %v15626_v57 = vpop.permute.xlu0 %6259  ;;  %6131 = vrot.lane.b32.xlu1 %v18966_v19, %s9360_s12  ;;  %8509 = vmatmul.mubr.msk.bf16.vlgmr.msra.gmra.mrb[4].mxu0 %vm4178_vm10, %v15159_v44  ;;  %v18979_v19 = vld [vmem:[#allocation172_spill] sm:$0xff] }
 0x433   : > { %6088 = vrot.lane.b32.xlu0 %v18938_v27, %s9364_s6  ;;  %v6343_v27 = vsel %vm4605_vm11, %v15518_v30, %v15636_v45  ;;  %v15670_v30 = vrot.slane %v8317_v3, 6  ;;  %v6185_v10 = vsel %vm3701_vm7, %v15588_v37, %v15691_v26  ;;  %v6102_v15 = vsel %vm407_vm0, %v6101_v43, %v18979_v19 }
 0x434   : > { %v5688_v61 = vpop.permute.xlu1 %5687  ;;  %v6432_v37 = vsel %vm760_vm3, %v15602_v17, %v6102_v15  ;;  %v18985_v17 = vld [vmem:[#allocation196_spill] sm:$0xff] }
 0x435   : > { %v5904_v63 = vsel %vm4128_vm9, %v5856_v32, %v5688_v61  ;;  %v6375_v35 = vsel %vm4605_vm11, %v15556_v38, %v15670_v30  ;;  %v18976_v38 = vshrl.u32 %v18975_v52, 16  ;;  %v15718_v61 = vrot.slane %v8310_v13, 6 }
 0x436   : > { %v15652_v4 = vpop.permute.xlu0 %6275  ;;  %6285 = vrot.lane.b32.xlu1 %v6213_v39, %s9361_s13  ;;  %v5956_v22 = vsel %vm4178_vm10, %v5904_v63, 0  ;;  %v9289_v39 = vld [vmem:[%s9453_s11 + $0x54] sm:$0xf]  ;;  %v6456_v36 = vsel %vm760_vm3, %v15618_v25, %v18985_v17  ;;  %v6506_v41 = vsel %vm812_vm4, %v6432_v37, %v15591_v9 }
 0x437   : > { %8688 = vmatpush3.bf16.xpose.msra.mxu1 %v5956_v22  ;;  %6406 = vrot.lane.b32.xlu0 %v6359_v1, %s9365_s14  ;;  %v6214_v5 = vrot.slane %v18976_v38, 1  ;;  %v8302_v51 = vcombine.low %v9288_v49, %v9289_v39  ;;  %v18980_v1 = vld [vmem:[#allocation153_spill] sm:$0xff]  ;;  %v6522_v9 = vsel %vm812_vm4, %v6456_v36, %v15609_v21  ;;  %v18988_v49 = vld [vmem:[#allocation228_spill] sm:$0xff] }
 0x438   : > { %v6108_v60 = vpop.permute.xlu1 %6107  ;;  %8693 = vmatprep.subr.bf16.mxu1 %v18749_v62  ;;  %v18981_v63 = vshrl.u32 %v18980_v1, 16  ;;  %v18992_v17 = vld [vmem:[#allocation216_spill] sm:$0xff] }
 0x439   : > { %v15726_v3 = vrot.slane %v8302_v51, 6  ;;  %v6251_v36 = vshrl.u32 %v18992_v17, 16 }
 0x43a   : > { %v15667_v24 = vpop.permute.xlu0 %6078  ;;  %6390 = vrot.lane.b32.xlu1 %v6343_v27, %s9365_s14  ;;  %v6246_v22 = vrot.slane %v18981_v63, 1  ;;  %v18982_v27 = vshll.u32 %v18980_v1, 16  ;;  %v18989_v63 = vld [vmem:[#allocation160_spill] sm:$0xff] }
 0x43b   : > { %6301 = vrot.lane.b32.xlu0 %v6245_v7, %s9361_s13  ;;  %v18984_v7 = vld [vmem:[#allocation186_spill] sm:$0xff] }
 0x43c   : > { %v15673_v29 = vpop.permute.xlu1 %6123  ;;  %v6247_v12 = vrot.slane %v18982_v27, 2  ;;  %v6435_v42 = vsel %vm760_vm3, %v15552_v53, %v18984_v7  ;;  %v6556_v53 = vsel %vm1064_vm2, %v6506_v41, %v15626_v57  ;;  %v6345_v57 = vsel %vm4605_vm11, %v15636_v45, %v15726_v3  ;;  %v18991_v7 = vld [vmem:[#allocation25_spill] sm:$0xff] }
 0x43d   : > { %v6508_v23 = vsel %vm812_vm4, %v6435_v42, %v6108_v60  ;;  %v6189_v42 = vsel %vm3701_vm7, %v15691_v26, %v18991_v7 }
 0x43e   : > { %v6381_v0 = vpop.permute.xlu0 %6380  ;;  %6147 = vrot.lane.b32.xlu1 %v18974_v20, %s9360_s12  ;;  %8690 = vmatmul.mubr.msk.bf16.vlgmr.msra.gmra.mrb[4].mxu1 %vm4178_vm10, %v15159_v44  ;;  %v18977_v44 = vshll.u32 %v18975_v52, 16  ;;  %v15748_v8 = vor.u32 %v6247_v12, %v6246_v22  ;;  %v18986_v20 = vld [vmem:[#allocation197_spill] sm:$0xff] }
 0x43f   : > { %6058 = vrot.lane.b32.xlu0 %v18951_v59, %s9364_s6  ;;  %8709 = vmatprep.mubr.msk.bf16.mxu1 %vm9363_vm6, %v18749_v62  ;;  %v18978_v59 = vld [vmem:[#allocation208_spill] sm:$0xff]  ;;  %v6606_v60 = vsel %vm4128_vm9, %v6556_v53, %v6381_v0 }
 0x440   : > { %v6262_v6 = vpop.permute.xlu1 %6261  ;;  %v6215_v54 = vrot.slane %v18977_v44, 2  ;;  %v9290_v0 = vld [vmem:[%s9453_s11 + $0xd0] sm:$0xf]  ;;  %v6682_v45 = vrot.slane %v6606_v60, 2  ;;  %v18994_v60 = vld [vmem:[#allocation17_spill] sm:$0xff] }
 0x441   : > { %v6558_v14 = vsel %vm1064_vm2, %v6508_v23, %v6262_v6  ;;  %v9291_v6 = vld [vmem:[%s9453_s11 + $0xd4] sm:$0xf] }
 0x442   : > { %v6397_v58 = vpop.permute.xlu0 %6396  ;;  %6422 = vrot.lane.b32.xlu1 %v6375_v35, %s9365_s14  ;;  %v15713_v40 = vor.u32 %v6215_v54, %v6214_v5  ;;  %v6572_v35 = vsel %vm1064_vm2, %v6522_v9, %v15652_v4  ;;  %v8318_v43 = vcombine.low %v9290_v0, %v9291_v6  ;;  %v6249_v4 = vsel %vm3701_vm7, %v15649_v50, %v15748_v8  ;;  %v18993_v9 = vld [vmem:[#allocation221_spill] sm:$0xff]  ;;  %v18996_v6 = vld [vmem:[#allocation187_spill] sm:$0xff] }
 0x443   : > { %6117 = vrot.lane.b32.xlu0 %v18978_v59, %s9360_s12  ;;  %v15771_v5 = vsel %vm4128_vm9, %v6572_v35, %v6397_v58  ;;  %v6480_v50 = vsel %vm760_vm3, %v15667_v24, %v18987_v48 }
 0x444   : > { %v6278_v47 = vpop.permute.xlu1 %6277  ;;  %v6217_v31 = vsel %vm3701_vm7, %v15613_v46, %v15713_v40  ;;  %v6361_v46 = vsel %vm4605_vm11, %v15620_v11, %v15718_v61  ;;  %v6459_v11 = vsel %vm760_vm3, %v15569_v33, %v18986_v20  ;;  %v18995_v20 = vld [vmem:[#allocation44_spill] sm:$0xff] }
 0x445   : > { %v6524_v38 = vsel %vm812_vm4, %v6459_v11, %v15673_v29  ;;  %v6697_v29 = vrot.slane %v15771_v5, 2  ;;  %v6363_v11 = vsel %vm4605_vm11, %v15718_v61, %v18995_v20 }
 0x446   : > { %v15707_v18 = vpop.permute.xlu0 %6137  ;;  %6074 = vrot.lane.b32.xlu1 %v18959_v28, %s9364_s6  ;;  %v6574_v44 = vsel %vm1064_vm2, %v6524_v38, %v6278_v47  ;;  %v15787_v47 = vrot.slane %v8318_v43, 6  ;;  %v18997_v38 = vld [vmem:[#allocation268_spill] sm:$0xff] }
 0x447   : > { %6271 = vrot.lane.b32.xlu0 %v6185_v10, %s9361_s13  ;;  %v6538_v39 = vsel %vm812_vm4, %v6480_v50, %v15707_v18 }
 0x448   : > { %v6081_v32 = vpop.permute.xlu1 %6080  ;;  %v6377_v24 = vsel %vm4605_vm11, %v15670_v30, %v15787_v47 }
 0x449   : > { %v6483_v22 = vsel %vm760_vm3, %v6081_v32, %v18989_v63  ;;  %v6254_v32 = vshll.u32 %v18992_v17, 16 }
 0x44a   : > { %v6292_v28 = vpop.permute.xlu0 %6291  ;;  %6133 = vrot.lane.b32.xlu1 %v18983_v16, %s9360_s12  ;;  %v18990_v16 = vld [vmem:[#allocation209_spill] sm:$0xff] }
 0x44b   : > { %6090 = vrot.lane.b32.xlu0 %v18963_v56, %s9364_s6  ;;  %v6588_v27 = vsel %vm1064_vm2, %v6538_v39, %v6292_v28  ;;  %v18999_v39 = vld [vmem:[#allocation218_spill] sm:$0xff] }
 0x44c   : > { %v6383_v25 = vpop.permute.xlu1 %6382 }
 0x44d   : > { %v15754_v56 = vsel %vm4128_vm9, %v6558_v14, %v6383_v25  ;;  %v6253_v14 = vrot.slane %v6251_v36, 1  ;;  %v6256_v25 = vrot.slane %v6254_v32, 2 }
 0x44e   : > { %v6413_v55 = vpop.permute.xlu0 %6412  ;;  %6287 = vrot.lane.b32.xlu1 %v6217_v31, %s9361_s13  ;;  %v6683_v21 = vrot.slane %v15754_v56, 2 }
 0x44f   : > { %6408 = vrot.lane.b32.xlu0 %v6361_v46, %s9365_s14  ;;  %v15814_v12 = vsel %vm4128_vm9, %v6588_v27, %v6413_v55  ;;  %v6221_v55 = vsel %vm3701_vm7, %v15713_v40, %v18994_v60  ;;  %v6257_v35 = vor.u32 %v6256_v25, %v6253_v14  ;;  %v6347_v40 = vsel %vm4605_vm11, %v15726_v3, %v18997_v38 }
 0x450   : > { %v6399_v33 = vpop.permute.xlu1 %6398  ;;  %v6684_v10 = vsel %vm3862_vm8, %v6682_v45, %v6683_v21  ;;  %v6713_v41 = vrot.slane %v15814_v12, 2 }
 0x451   : > { %v15779_v54 = vsel %vm4128_vm9, %v6574_v44, %v6399_v33  ;;  %v6735_v19 = vsel %vm4178_vm10, %v6684_v10, 0  ;;  %v9293_v44 = vld [vmem:[%s9453_s11 + $0xd8] sm:$0xf]  ;;  %v9294_v33 = vld [vmem:[%s9453_s11 + $0xdc] sm:$0xf]  ;;  %v18998_v10 = vld [vmem:[#allocation198_spill] sm:$0xff]  ;;  %v6258_v50 = vsel %vm3701_vm7, %v15748_v8, %v6257_v35 }
 0x452   : > { %v6051_v59 = vpop.permute.xlu0 %6050  ;;  %6392 = vrot.lane.b32.xlu1 %v6345_v57, %s9365_s14  ;;  %v6699_v58 = vrot.slane %v15779_v54, 2 }
 0x453   : > { %6303 = vrot.lane.b32.xlu0 %v6249_v4, %s9361_s13  ;;  %v6438_v43 = vsel %vm760_vm3, %v6051_v59, %v18996_v6  ;;  %v8319_v4 = vcombine.low %v9293_v44, %v9294_v33  ;;  %v15944_v33 = vld [vmem:[%s9453_s11 + $0xa8] sm:$0xff]  }
 0x454   : > { %v6140_v34 = vpop.permute.xlu1 %6139  ;;  %v6700_v13 = vsel %vm3862_vm8, %v6697_v29, %v6699_v58 }
 0x455   : > { %8835 = vmatprep.subr.msk.bf16.mxu0 %vm4178_vm10, %v6700_v13  ;;  %v6540_v30 = vsel %vm812_vm4, %v6483_v22, %v6140_v34  ;;  %v6378_v63 = vrot.slane %v8319_v4, 6  ;;  %v15883_v22 = vld [vmem:[%s9453_s11 + $0x30] sm:$0xff]  }
 0x456   : > { %v6110_v15 = vpop.permute.xlu0 %6109  ;;  %6149 = vrot.lane.b32.xlu1 %v18988_v49, %s9360_s12  ;;  %8520 = vmatpush3.bf16.xpose.msra.mxu0 %v6735_v19  ;;  %v15871_v19 = vld [vmem:[%s9453_s11 + $0x2c] sm:$0xf]  ;;  %v6939_v49 = vld [vmem:[%s9453_s11 + $0x28] sm:$0xe]  ;;  %v17735_v17 = vshll.u32 %v15883_v22, 16  ;;  %v17717_v54 = vshrl.u32 %v15883_v22, 16 }
 0x457   : > { %6060 = vrot.lane.b32.xlu0 %v18971_v2, %s9364_s6  ;;  %v6510_v3 = vsel %vm812_vm4, %v6438_v43, %v6110_v15  ;;  %v9084_v15 = vld [vmem:[%s9453_s11 + $0xdc] ss:$0 sps:$4 sm:$0x33]   ;;  %v7313_v60 = vrot.slane %v15883_v22, 1 }
 0x458   : > { %v6294_v51 = vpop.permute.xlu1 %6293  ;;  %v7421_v43 = vrot.slane %v17735_v17, 2 }
 0x459   : > { %v6590_v18 = vsel %vm1064_vm2, %v6540_v30, %v6294_v51 }
 0x45a   : > { %v6264_v37 = vpop.permute.xlu0 %6263  ;;  %6424 = vrot.lane.b32.xlu1 %v6377_v24, %s9365_s14 }
 0x45b   : > { %6119 = vrot.lane.b32.xlu0 %v18990_v16, %s9360_s12  ;;  %v6560_v27 = vsel %vm1064_vm2, %v6510_v3, %v6264_v37  ;;  %v8348_v16 = vcombine.low %v6939_v49, %v15871_v19  ;;  %v6379_v37 = vsel %vm4605_vm11, %v15787_v47, %v6378_v63 }
 0x45c   : > { %v6415_v2 = vpop.permute.xlu1 %6414 }
 0x45d   : > { %v15826_v28 = vsel %vm4128_vm9, %v6590_v18, %v6415_v2  ;;  %v7413_v14 = vshrl.u32 %v8348_v16, 16  ;;  %v7416_v47 = vshll.u32 %v8348_v16, 16 }
 0x45e   : > { %v6083_v31 = vpop.permute.xlu0 %6082  ;;  %6076 = vrot.lane.b32.xlu1 %v18975_v52, %s9364_s6  ;;  %v6715_v23 = vrot.slane %v15826_v28, 2 }
 0x45f   : > { %6273 = vrot.lane.b32.xlu0 %v6189_v42, %s9361_s13  ;;  %v7418_v6 = vrot.slane %v7416_v47, 2 }
 0x460   : > { %v6067_v53 = vpop.permute.xlu1 %6066  ;;  %v6716_v26 = vsel %vm3862_vm8, %v6713_v41, %v6715_v23 }
 0x461   : > { %v6783_v46 = vsel %vm4178_vm10, %v6716_v26, 0  ;;  %v6462_v61 = vsel %vm760_vm3, %v6067_v53, %v18998_v10  ;;  %v6890_v26 = vld [vmem:[%s9453_s11 + $0x28] sm:$0xf] }
 0x462   : > { %v6401_v52 = vpop.permute.xlu0 %6400  ;;  %6135 = vrot.lane.b32.xlu1 %v18993_v9, %s9360_s12  ;;  %8694 = vmatpush3.bf16.xpose.msra.mxu1 %v6783_v46  ;;  %v15919_v9 = vld [vmem:[%s9453_s11 + $0x68] sm:$0xff]   ;;  %v15926_v56 = vcombine.low %v6890_v26, %v15871_v19  ;;  %v19001_v26 = vld [vmem:[#allocation189_spill] sm:$0xff] }
 0x463   : > { %6092 = vrot.lane.b32.xlu0 %v18980_v1, %s9364_s6  ;;  %8695 = vmatprep.subr.bf16.mxu1 %v18749_v62  ;;  %v9292_v1 = vld [vmem:[%s9453_s11 + $0xdc] ss:$0 sps:$4 sm:$0x77]   ;;  %v17706_v3 = vrot.slane %v15919_v9, 1 }
 0x464   : > { %v6126_v57 = vpop.permute.xlu1 %6125  ;;  %v6103_v45 = vrot.slane %v9292_v1, 1  ;;  %v17734_v1 = vshrl.u32 %v15919_v9, 16 }
 0x465   : > { %v6526_v59 = vsel %vm812_vm4, %v6462_v61, %v6126_v57 }
 0x466   : > { %v6296_v0 = vpop.permute.xlu0 %6295  ;;  %6289 = vrot.lane.b32.xlu1 %v6221_v55, %s9361_s13  ;;  %v6104_v51 = vsel %vm660_vm1, %v18999_v39, %v6103_v45  ;;  %v7420_v55 = vrot.slane %v17717_v54, 1 }
 0x467   : > { %6410 = vrot.lane.b32.xlu0 %v6363_v11, %s9365_s14  ;;  %v7415_v11 = vrot.slane %v7413_v14, 1 }
 0x468   : > { %v6280_v48 = vpop.permute.xlu1 %6279 }
 0x469   : > { %v6576_v34 = vsel %vm1064_vm2, %v6526_v59, %v6280_v48  ;;  %v7419_v48 = vor.u32 %v7418_v6, %v7415_v11  ;;  %v17701_v6 = vrot.slane %v15919_v9, 2 }
 0x46a   : > { %v15867_v13 = vpop.permute.xlu0 %6052  ;;  %6394 = vrot.lane.b32.xlu1 %v6347_v40, %s9365_s14  ;;  %v15875_v24 = vsel %vm4128_vm9, %v6576_v34, %v6401_v52  ;;  %v17736_v40 = vshll.u32 %v15919_v9, 16 }
 0x46b   : > { %v6701_v8 = vrot.slane %v15875_v24, 2  ;;  %6305 = vrot.lane.b32.xlu0 %v6258_v50, %s9361_s13  ;;  %v15961_v50 = vor.u32 %v7421_v43, %v7420_v55  ;;  %v6441_v14 = vsel %vm760_vm3, %v15867_v13, %v19001_v26  ;;  %v16066_v24 = vld [vmem:[%s17299_s3 + $0x3] sm:$0x1] }
 0x46c   : > { %v6385_v30 = vpop.permute.xlu1 %6384  ;;  %v7449_v28 = vrot.slane %v17736_v40, 2  ;;  %8535 = vmatprep.mubr.msk.bf16.mxu0 %vm4178_vm10, %v16066_v24 }
 0x46d   : > { %v15888_v18 = vsel %vm4128_vm9, %v6560_v27, %v6385_v30  ;;  %v6702_v2 = vsel %vm3862_vm8, %v6699_v58, %v6701_v8  ;;  %v19000_v58 = vld [vmem:[#allocation133_spill] sm:$0xff]  ;;  %v17725_v27 = vshrl.u32 %v15944_v33, 16  ;;  %v17726_v30 = vshll.u32 %v15944_v33, 16 }
 0x46e   : > { %v15895_v7 = vpop.permute.xlu0 %6111  ;;  %6151 = vrot.lane.b32.xlu1 %v6104_v51, %s9360_s12  ;;  %v6685_v42 = vrot.slane %v15888_v18, 2  ;;  %8836 = vmatprep.subr.msk.bf16.mxu0 %vm4178_vm10, %v6702_v2  ;;  %v6486_v36 = vsel %vm760_vm3, %v6083_v31, %v19000_v58  ;;  %v15922_v31 = vld [vmem:[%s9453_s11 + $0x70] sm:$0xff]   ;;  %v7448_v51 = vrot.slane %v17734_v1, 1  ;;  %v7423_v58 = vsel %vm3701_vm7, %v7419_v48, %v15961_v50 }
 0x46f   : > { %6094 = vrot.lane.b32.xlu0 %v9084_v15, %s9364_s6  ;;  %v17709_v4 = vshrl.u32 %v15922_v31, 16  ;;  %v7329_v39 = vrot.slane %v15922_v31, 1  ;;  %v7589_v43 = vrot.slane %v15922_v31, 2 }
 0x470   : > { %v6142_v32 = vpop.permute.xlu1 %6141  ;;  %v6686_v53 = vsel %vm3862_vm8, %v6683_v21, %v6685_v42  ;;  %v7312_v21 = vrot.slane %v8348_v16, 1 }
 0x471   : > { %v6542_v25 = vsel %vm812_vm4, %v6486_v36, %v6142_v32  ;;  %v6738_v46 = vsel %vm4178_vm10, %v6686_v53, 0  ;;  %v7330_v32 = vsel %vm660_vm1, %v17706_v3, %v7329_v39  ;;  %v15993_v53 = vor.u32 %v7449_v28, %v7448_v51  ;;  %v19005_v3 = vld [vmem:[#allocation200_spill] sm:$0xff] }
 0x472   : > { %v15915_v52 = vpop.permute.xlu0 %6265  ;;  %6426 = vrot.lane.b32.xlu1 %v6379_v37, %s9365_s14  ;;  %8522 = vmatpush3.bf16.xpose.msra.mxu0 %v6738_v46  ;;  %v6592_v20 = vsel %vm1064_vm2, %v6542_v25, %v6296_v0  ;;  %v17727_v0 = vshll.u32 %v15922_v31, 16  ;;  %v7314_v10 = vsel %vm660_vm1, %v7312_v21, %v7313_v60  ;;  %v7480_v46 = vrot.slane %v17725_v27, 1  ;;  %v19002_v21 = vld [vmem:[#allocation199_spill] sm:$0xff] }
 0x473   : > { %6307 = vrot.lane.b32.xlu0 %v6257_v35, %s9361_s13  ;;  %v7573_v28 = vrot.slane %v15883_v22, 2 }
 0x474   : > { %v6417_v57 = vpop.permute.xlu1 %6416  ;;  %v7453_v15 = vrot.slane %v17727_v0, 2 }
 0x475   : > { %v15935_v35 = vsel %vm4128_vm9, %v6592_v20, %v6417_v57  ;;  %v7481_v57 = vrot.slane %v17726_v30, 2 }
 0x476   : > { %v15937_v38 = vpop.permute.xlu0 %6084  ;;  %6153 = vrot.lane.b32.xlu1 %v6103_v45, %s9360_s12  ;;  %v6717_v44 = vrot.slane %v15935_v35, 2  ;;  %v15954_v45 = vld [vmem:[%s9453_s11 + $0xb0] sm:$0xff]  }
 0x477   : > { %7062 = vrot.lane.b32.xlu0 %v15926_v56, %s9364_s6  ;;  %v17718_v16 = vshll.u32 %v15954_v45, 16  ;;  %v17707_v2 = vshrl.u32 %v15954_v45, 16 }
 0x478   : > { %v6069_v61 = vpop.permute.xlu1 %6068  ;;  %v6718_v59 = vsel %vm3862_vm8, %v6715_v23, %v6717_v44  ;;  %v7452_v23 = vrot.slane %v17709_v4, 1 }
 0x479   : > { %v6786_v34 = vsel %vm4178_vm10, %v6718_v59, 0  ;;  %v6465_v55 = vsel %vm760_vm3, %v6069_v61, %v19002_v21  ;;  %v7484_v20 = vrot.slane %v17707_v2, 1  ;;  %v7485_v13 = vrot.slane %v17718_v16, 2 }
 0x47a   : > { %v6403_v49 = vpop.permute.xlu0 %6402  ;;  %6428 = vrot.lane.b32.xlu1 %v6378_v63, %s9365_s14  ;;  %8696 = vmatpush3.bf16.xpose.msra.mxu1 %v6786_v34  ;;  %v6941_v63 = vld [vmem:[%s9453_s11 + $0x28] sm:$0xc]  ;;  %v15998_v47 = vor.u32 %v7453_v15, %v7452_v23  ;;  %v7345_v21 = vrot.slane %v15954_v45, 1 }
 0x47b   : > { %7361 = vrot.lane.b32.xlu0 %v7314_v10, %s9360_s12  ;;  %8697 = vmatprep.subr.bf16.mxu1 %v18749_v62  ;;  %v8350_v25 = vcombine.low %v6941_v63, %v15871_v19  ;;  %v6512_v10 = vsel %vm812_vm4, %v6441_v14, %v15895_v7  ;;  %v16031_v7 = vor.u32 %v7481_v57, %v7480_v46  ;;  %v17705_v46 = vrot.slane %v15944_v33, 1 }
 0x47c   : > { %v6128_v37 = vpop.permute.xlu1 %6127  ;;  %v7455_v34 = vsel %vm3701_vm7, %v15993_v53, %v15998_v47  ;;  %v16033_v15 = vor.u32 %v7485_v13, %v7484_v20 }
 0x47d   : > { %v6528_v11 = vsel %vm812_vm4, %v6465_v55, %v6128_v37  ;;  %v7572_v51 = vrot.slane %v8350_v25, 2  ;;  %v7590_v37 = vsel %vm3862_vm8, %v17701_v6, %v7589_v43  ;;  %v19003_v55 = vld [vmem:[#allocation121_spill] sm:$0xff]  ;;  %v7346_v18 = vsel %vm660_vm1, %v17705_v46, %v7345_v21 }
 0x47e   : > { %v15984_v36 = vpop.permute.xlu0 %6297  ;;  %7078 = vrot.lane.b32.xlu1 %v15919_v9, %s9364_s6  ;;  %v6489_v57 = vsel %vm760_vm3, %v15937_v38, %v19003_v55  ;;  %v7605_v38 = vrot.slane %v15954_v45, 2 }
 0x47f   : > { %7521 = vrot.lane.b32.xlu0 %v7423_v58, %s9361_s13  ;;  %v16043_v58 = vld [vmem:[%s9453_s11 + $0x38] sm:$0xff]   ;;  %v7574_v25 = vsel %vm3862_vm8, %v7572_v51, %v7573_v28 }
 0x480   : > { %v6282_v19 = vpop.permute.xlu1 %6281  ;;  %v16095_v51 = vld [vmem:[%s9453_s11 + $0x78] sm:$0xff]  }
 0x481   : > { %v6578_v61 = vsel %vm1064_vm2, %v6528_v11, %v6282_v19  ;;  %v17716_v11 = vshll.u32 %v16043_v58, 16  ;;  %v17703_v19 = vshrl.u32 %v16043_v58, 16  ;;  %v7591_v4 = vrot.slane %v16095_v51, 2 }
 0x482   : > { %v16018_v59 = vpop.permute.xlu0 %6054  ;;  %7377 = vrot.lane.b32.xlu1 %v7330_v32, %s9360_s12  ;;  %v16022_v48 = vsel %vm4128_vm9, %v6578_v61, %v6403_v49  ;;  %v6562_v49 = vsel %vm1064_vm2, %v6512_v10, %v15915_v52 }
 0x483   : > { %v6703_v23 = vrot.slane %v16022_v48, 2  ;;  %7094 = vrot.lane.b32.xlu0 %v15944_v33, %s9364_s6 }
 0x484   : > { %v6387_v63 = vpop.permute.xlu1 %6386 }
 0x485   : > { %v16046_v32 = vsel %vm4128_vm9, %v6562_v49, %v6387_v63  ;;  %v6704_v26 = vsel %vm3862_vm8, %v6701_v8, %v6703_v23  ;;  %v7487_v8 = vsel %vm3701_vm7, %v16031_v7, %v16033_v15 }
 0x486   : > { %v16053_v14 = vpop.permute.xlu0 %6113  ;;  %7537 = vrot.lane.b32.xlu1 %v7455_v34, %s9361_s13  ;;  %v6687_v52 = vrot.slane %v16046_v32, 2  ;;  %8837 = vmatprep.subr.msk.bf16.mxu0 %vm4178_vm10, %v6704_v26  ;;  %v7424_v26 = vrot.slane %v17703_v19, 1  ;;  %v7331_v19 = vrot.slane %v16095_v51, 1 }
 0x487   : > { %7637 = vrot.lane.b32.xlu0 %v7590_v37, %s9365_s14  ;;  %v7315_v37 = vrot.slane %v16043_v58, 1 }
 0x488   : > { %v6144_v20 = vpop.permute.xlu1 %6143  ;;  %v6688_v13 = vsel %vm3862_vm8, %v6685_v42, %v6687_v52  ;;  %v17702_v42 = vrot.slane %v15944_v33, 2 }
 0x489   : > { %v6544_v10 = vsel %vm812_vm4, %v6489_v57, %v6144_v20  ;;  %v6741_v61 = vsel %vm4178_vm10, %v6688_v13, 0  ;;  %v17708_v20 = vshll.u32 %v16095_v51, 16  ;;  %v17704_v13 = vshrl.u32 %v16095_v51, 16 }
 0x48a   : > { %v6268_v34 = vpop.permute.xlu0 %6267  ;;  %7621 = vrot.lane.b32.xlu1 %v7574_v25, %s9365_s14  ;;  %8524 = vmatpush3.bf16.xpose.msra.mxu0 %v6741_v61  ;;  %v6594_v63 = vsel %vm1064_vm2, %v6544_v10, %v15984_v36  ;;  %v7425_v25 = vrot.slane %v17716_v11, 2  ;;  %v7606_v36 = vsel %vm3862_vm8, %v17702_v42, %v7605_v38  ;;  %v16120_v10 = vld [vmem:[%s9453_s11 + $0xb8] sm:$0xff]  }
 0x48b   : > { %7553 = vrot.lane.b32.xlu0 %v7487_v8, %s9361_s13  ;;  %v7456_v35 = vrot.slane %v17704_v13, 1  ;;  %v7607_v32 = vrot.slane %v16120_v10, 2 }
 0x48c   : > { %v6419_v49 = vpop.permute.xlu1 %6418 }
 0x48d   : > { %v16106_v55 = vsel %vm4128_vm9, %v6594_v63, %v6419_v49  ;;  %v7316_v49 = vsel %vm660_vm1, %v7313_v60, %v7315_v37  ;;  %v16132_v63 = vor.u32 %v7425_v25, %v7424_v26  ;;  %v17715_v60 = vshll.u32 %v16120_v10, 16 }
 0x48e   : > { %v6087_v57 = vpop.permute.xlu0 %6086  ;;  %7393 = vrot.lane.b32.xlu1 %v7346_v18, %s9360_s12  ;;  %v6719_v8 = vrot.slane %v16106_v55, 2  ;;  %v17711_v26 = vshrl.u32 %v16120_v10, 16 }
 0x48f   : > { %7064 = vrot.lane.b32.xlu0 %v15883_v22, %s9364_s6 }
 0x490   : > { %v6071_v61 = vpop.permute.xlu1 %6070  ;;  %v6720_v18 = vsel %vm3862_vm8, %v6717_v44, %v6719_v8  ;;  %v7457_v44 = vrot.slane %v17708_v20, 2  ;;  %v7489_v20 = vrot.slane %v17715_v60, 2  ;;  %v19008_v60 = vld [vmem:[#allocation202_spill] sm:$0xff] }
 0x491   : > { %v6789_v6 = vsel %vm4178_vm10, %v6720_v18, 0  ;;  %v19004_v18 = vld [vmem:[#allocation190_spill] sm:$0xff]  ;;  %v6468_v2 = vsel %vm760_vm3, %v6071_v61, %v19005_v3 }
 0x492   : > { %v6405_v42 = vpop.permute.xlu0 %6404  ;;  %7653 = vrot.lane.b32.xlu1 %v7606_v36, %s9365_s14  ;;  %8698 = vmatpush3.bf16.xpose.msra.mxu1 %v6789_v6  ;;  %v7427_v6 = vsel %vm3701_vm7, %v15961_v50, %v16132_v63  ;;  %v6444_v13 = vsel %vm760_vm3, %v16018_v59, %v19004_v18  ;;  %v16158_v46 = vor.u32 %v7457_v44, %v7456_v35  ;;  %v7488_v50 = vrot.slane %v17711_v26, 1 }
 0x493   : > { %7363 = vrot.lane.b32.xlu0 %v7316_v49, %s9360_s12  ;;  %8699 = vmatprep.subr.bf16.mxu1 %v18749_v62  ;;  %v7332_v49 = vsel %vm660_vm1, %v7329_v39, %v7331_v19  ;;  %v6514_v39 = vsel %vm812_vm4, %v6444_v13, %v16053_v14  ;;  %v7575_v44 = vrot.slane %v16043_v58, 2 }
 0x494   : > { %v6130_v25 = vpop.permute.xlu1 %6129  ;;  %v16185_v14 = vor.u32 %v7489_v20, %v7488_v50  ;;  %v6564_v13 = vsel %vm1064_vm2, %v6514_v39, %v6268_v34 }
 0x495   : > { %v6530_v59 = vsel %vm812_vm4, %v6468_v2, %v6130_v25  ;;  %v7459_v2 = vsel %vm3701_vm7, %v15998_v47, %v16158_v46 }
 0x496   : > { %v6300_v36 = vpop.permute.xlu0 %6299  ;;  %7080 = vrot.lane.b32.xlu1 %v15922_v31, %s9364_s6  ;;  %v7491_v48 = vsel %vm3701_vm7, %v16033_v15, %v16185_v14 }
 0x497   : > { %7523 = vrot.lane.b32.xlu0 %v7427_v6, %s9361_s13 }
 0x498   : > { %v6284_v18 = vpop.permute.xlu1 %6283 }
 0x499   : > { %v6580_v35 = vsel %vm1064_vm2, %v6530_v59, %v6284_v18  ;;  %v7347_v59 = vrot.slane %v16120_v10, 1 }
 0x49a   : > { %v16172_v3 = vpop.permute.xlu0 %6056  ;;  %7379 = vrot.lane.b32.xlu1 %v7332_v49, %s9360_s12  ;;  %v16176_v61 = vsel %vm4128_vm9, %v6580_v35, %v6405_v42  ;;  %v7592_v42 = vsel %vm3862_vm8, %v7589_v43, %v7591_v4  ;;  %v16194_v49 = vld [vmem:[%s9453_s11 + $0x40] sm:$0xff]   ;;  %v7576_v43 = vsel %vm3862_vm8, %v7573_v28, %v7575_v44 }
 0x49b   : > { %v6705_v25 = vrot.slane %v16176_v61, 2  ;;  %7096 = vrot.lane.b32.xlu0 %v15954_v45, %s9364_s6  ;;  %v17712_v28 = vshll.u32 %v16194_v49, 16  ;;  %v7348_v15 = vsel %vm660_vm1, %v7345_v21, %v7347_v59 }
 0x49c   : > { %v6389_v6 = vpop.permute.xlu1 %6388 }
 0x49d   : > { %v16197_v47 = vsel %vm4128_vm9, %v6564_v13, %v6389_v6  ;;  %v6706_v20 = vsel %vm3862_vm8, %v6703_v23, %v6705_v25  ;;  %v19006_v23 = vld [vmem:[#allocation166_spill] sm:$0xff] }
 0x49e   : > { %v16204_v50 = vpop.permute.xlu0 %6115  ;;  %7539 = vrot.lane.b32.xlu1 %v7459_v2, %s9361_s13  ;;  %v6689_v34 = vrot.slane %v16197_v47, 2  ;;  %8838 = vmatprep.subr.msk.bf16.mxu0 %vm4178_vm10, %v6706_v20  ;;  %v6492_v18 = vsel %vm760_vm3, %v6087_v57, %v19006_v23  ;;  %v17710_v2 = vshrl.u32 %v16194_v49, 16  ;;  %v7317_v23 = vrot.slane %v16194_v49, 1 }
 0x49f   : > { %7639 = vrot.lane.b32.xlu0 %v7592_v42, %s9365_s14 }
 0x4a0   : > { %v6146_v39 = vpop.permute.xlu1 %6145  ;;  %v6690_v35 = vsel %vm3862_vm8, %v6687_v52, %v6689_v34  ;;  %v16238_v52 = vld [vmem:[%s9453_s11 + $0x80] sm:$0xff]  }
 0x4a1   : > { %v6546_v13 = vsel %vm812_vm4, %v6492_v18, %v6146_v39  ;;  %v6744_v6 = vsel %vm4178_vm10, %v6690_v35, 0  ;;  %v7429_v18 = vrot.slane %v17712_v28, 2  ;;  %v7333_v28 = vrot.slane %v16238_v52, 1 }
 0x4a2   : > { %v6270_v42 = vpop.permute.xlu0 %6269  ;;  %7623 = vrot.lane.b32.xlu1 %v7576_v43, %s9365_s14  ;;  %8526 = vmatpush3.bf16.xpose.msra.mxu0 %v6744_v6  ;;  %v6596_v20 = vsel %vm1064_vm2, %v6546_v13, %v6300_v36  ;;  %v7428_v43 = vrot.slane %v17710_v2, 1  ;;  %v7608_v36 = vsel %vm3862_vm8, %v7605_v38, %v7607_v32  ;;  %v17713_v13 = vshrl.u32 %v16238_v52, 16  ;;  %v16262_v6 = vld [vmem:[%s9453_s11 + $0xc0] sm:$0xff]  }
 0x4a3   : > { %7555 = vrot.lane.b32.xlu0 %v7491_v48, %s9361_s13  ;;  %v17714_v48 = vshll.u32 %v16238_v52, 16  ;;  %v7318_v38 = vsel %vm660_vm1, %v7315_v37, %v7317_v23  ;;  %v17724_v37 = vshll.u32 %v16262_v6, 16  ;;  %v7593_v16 = vrot.slane %v16238_v52, 2 }
 0x4a4   : > { %v6421_v57 = vpop.permute.xlu1 %6420  ;;  %v7460_v55 = vrot.slane %v17713_v13, 1  ;;  %v7609_v47 = vrot.slane %v16262_v6, 2 }
 0x4a5   : > { %v16248_v21 = vsel %vm4128_vm9, %v6596_v20, %v6421_v57  ;;  %v16274_v20 = vor.u32 %v7429_v18, %v7428_v43  ;;  %v17720_v43 = vshrl.u32 %v16262_v6, 16  ;;  %v7493_v54 = vrot.slane %v17724_v37, 2  ;;  %v19011_v37 = vld [vmem:[#allocation129_spill] sm:$0xff] }
 0x4a6   : > { %v6089_v39 = vpop.permute.xlu0 %6088  ;;  %7395 = vrot.lane.b32.xlu1 %v7348_v15, %s9360_s12  ;;  %v6721_v35 = vrot.slane %v16248_v21, 2 }
 0x4a7   : > { %7066 = vrot.lane.b32.xlu0 %v16043_v58, %s9364_s6 }
 0x4a8   : > { %v6073_v57 = vpop.permute.xlu1 %6072  ;;  %v6722_v15 = vsel %vm3862_vm8, %v6719_v8, %v6721_v35  ;;  %v7461_v8 = vrot.slane %v17714_v48, 2 }
 0x4a9   : > { %v6792_v2 = vsel %vm4178_vm10, %v6722_v15, 0  ;;  %v19007_v15 = vld [vmem:[#allocation191_spill] sm:$0xff]  ;;  %v6471_v11 = vsel %vm760_vm3, %v6073_v57, %v19008_v60 }
 0x4aa   : > { %v6407_v26 = vpop.permute.xlu0 %6406  ;;  %7655 = vrot.lane.b32.xlu1 %v7608_v36, %s9365_s14  ;;  %8700 = vmatpush3.bf16.xpose.msra.mxu1 %v6792_v2  ;;  %v7431_v2 = vsel %vm3701_vm7, %v16132_v63, %v16274_v20  ;;  %v6447_v13 = vsel %vm760_vm3, %v16172_v3, %v19007_v15  ;;  %v16300_v48 = vor.u32 %v7461_v8, %v7460_v55  ;;  %v7492_v63 = vrot.slane %v17720_v43, 1 }
 0x4ab   : > { %7365 = vrot.lane.b32.xlu0 %v7318_v38, %s9360_s12  ;;  %8701 = vmatprep.subr.bf16.mxu1 %v18749_v62  ;;  %v7334_v38 = vsel %vm660_vm1, %v7331_v19, %v7333_v28  ;;  %v6516_v19 = vsel %vm812_vm4, %v6447_v13, %v16204_v50  ;;  %v7577_v8 = vrot.slane %v16194_v49, 2 }
 0x4ac   : > { %v6132_v18 = vpop.permute.xlu1 %6131  ;;  %v16327_v50 = vor.u32 %v7493_v54, %v7492_v63  ;;  %v6566_v13 = vsel %vm1064_vm2, %v6516_v19, %v6270_v42 }
 0x4ad   : > { %v6532_v3 = vsel %vm812_vm4, %v6471_v11, %v6132_v18  ;;  %v7463_v11 = vsel %vm3701_vm7, %v16158_v46, %v16300_v48 }
 0x4ae   : > { %v6302_v36 = vpop.permute.xlu0 %6301  ;;  %7082 = vrot.lane.b32.xlu1 %v16095_v51, %s9364_s6  ;;  %v7495_v61 = vsel %vm3701_vm7, %v16185_v14, %v16327_v50 }
 0x4af   : > { %7525 = vrot.lane.b32.xlu0 %v7431_v2, %s9361_s13 }
 0x4b0   : > { %v6286_v15 = vpop.permute.xlu1 %6285 }
 0x4b1   : > { %v6582_v55 = vsel %vm1064_vm2, %v6532_v3, %v6286_v15  ;;  %v7349_v3 = vrot.slane %v16262_v6, 1 }
 0x4b2   : > { %v16314_v60 = vpop.permute.xlu0 %6058  ;;  %7381 = vrot.lane.b32.xlu1 %v7334_v38, %s9360_s12  ;;  %v16318_v57 = vsel %vm4128_vm9, %v6582_v55, %v6407_v26  ;;  %v7594_v26 = vsel %vm3862_vm8, %v7591_v4, %v7593_v16  ;;  %v16336_v38 = vld [vmem:[%s9453_s11 + $0x48] sm:$0xff]   ;;  %v7578_v4 = vsel %vm3862_vm8, %v7575_v44, %v7577_v8 }
 0x4b3   : > { %v6707_v18 = vrot.slane %v16318_v57, 2  ;;  %7098 = vrot.lane.b32.xlu0 %v16120_v10, %s9364_s6  ;;  %v17721_v44 = vshll.u32 %v16336_v38, 16  ;;  %v7350_v14 = vsel %vm660_vm1, %v7347_v59, %v7349_v3 }
 0x4b4   : > { %v6391_v2 = vpop.permute.xlu1 %6390 }
 0x4b5   : > { %v16339_v46 = vsel %vm4128_vm9, %v6566_v13, %v6391_v2  ;;  %v6708_v54 = vsel %vm3862_vm8, %v6705_v25, %v6707_v18  ;;  %v19009_v25 = vld [vmem:[#allocation136_spill] sm:$0xff] }
 0x4b6   : > { %v16346_v63 = vpop.permute.xlu0 %6117  ;;  %7541 = vrot.lane.b32.xlu1 %v7463_v11, %s9361_s13  ;;  %v6691_v42 = vrot.slane %v16339_v46, 2  ;;  %8839 = vmatprep.subr.msk.bf16.mxu0 %vm4178_vm10, %v6708_v54  ;;  %v6495_v15 = vsel %vm760_vm3, %v6089_v39, %v19009_v25  ;;  %v17719_v11 = vshrl.u32 %v16336_v38, 16  ;;  %v7319_v25 = vrot.slane %v16336_v38, 1 }
 0x4b7   : > { %7641 = vrot.lane.b32.xlu0 %v7594_v26, %s9365_s14 }
 0x4b8   : > { %v6148_v19 = vpop.permute.xlu1 %6147  ;;  %v6692_v55 = vsel %vm3862_vm8, %v6689_v34, %v6691_v42  ;;  %v16380_v34 = vld [vmem:[%s9453_s11 + $0x88] sm:$0xff]  }
 0x4b9   : > { %v6548_v13 = vsel %vm812_vm4, %v6495_v15, %v6148_v19  ;;  %v6747_v2 = vsel %vm4178_vm10, %v6692_v55, 0  ;;  %v7433_v15 = vrot.slane %v17721_v44, 2  ;;  %v7335_v44 = vrot.slane %v16380_v34, 1 }
 0x4ba   : > { %v6272_v26 = vpop.permute.xlu0 %6271  ;;  %7625 = vrot.lane.b32.xlu1 %v7578_v4, %s9365_s14  ;;  %8528 = vmatpush3.bf16.xpose.msra.mxu0 %v6747_v2  ;;  %v6598_v54 = vsel %vm1064_vm2, %v6548_v13, %v6302_v36  ;;  %v7432_v4 = vrot.slane %v17719_v11, 1  ;;  %v7610_v36 = vsel %vm3862_vm8, %v7607_v32, %v7609_v47  ;;  %v17722_v13 = vshrl.u32 %v16380_v34, 16  ;;  %v16404_v2 = vld [vmem:[%s9453_s11 + $0xc8] sm:$0xff]  }
 0x4bb   : > { %7557 = vrot.lane.b32.xlu0 %v7495_v61, %s9361_s13  ;;  %v17723_v61 = vshll.u32 %v16380_v34, 16  ;;  %v7320_v32 = vsel %vm660_vm1, %v7317_v23, %v7319_v25  ;;  %v17733_v23 = vshll.u32 %v16404_v2, 16  ;;  %v7595_v0 = vrot.slane %v16380_v34, 2 }
 0x4bc   : > { %v6423_v39 = vpop.permute.xlu1 %6422  ;;  %v7464_v21 = vrot.slane %v17722_v13, 1  ;;  %v7611_v46 = vrot.slane %v16404_v2, 2 }
 0x4bd   : > { %v16390_v59 = vsel %vm4128_vm9, %v6598_v54, %v6423_v39  ;;  %v16416_v54 = vor.u32 %v7433_v15, %v7432_v4  ;;  %v17729_v4 = vshrl.u32 %v16404_v2, 16  ;;  %v7497_v30 = vrot.slane %v17733_v23, 2  ;;  %v19014_v23 = vld [vmem:[#allocation118_spill] sm:$0xff] }
 0x4be   : > { %v6091_v19 = vpop.permute.xlu0 %6090  ;;  %7397 = vrot.lane.b32.xlu1 %v7350_v14, %s9360_s12  ;;  %v6723_v55 = vrot.slane %v16390_v59, 2 }
 0x4bf   : > { %7068 = vrot.lane.b32.xlu0 %v16194_v49, %s9364_s6 }
 0x4c0   : > { %v6075_v39 = vpop.permute.xlu1 %6074  ;;  %v6724_v14 = vsel %vm3862_vm8, %v6721_v35, %v6723_v55  ;;  %v7465_v35 = vrot.slane %v17723_v61, 2 }
 0x4c1   : > { %v6795_v11 = vsel %vm4178_vm10, %v6724_v14, 0  ;;  %v19010_v14 = vld [vmem:[#allocation192_spill] sm:$0xff]  ;;  %v6474_v27 = vsel %vm760_vm3, %v6075_v39, %v19011_v37 }
 0x4c2   : > { %v6409_v43 = vpop.permute.xlu0 %6408  ;;  %7657 = vrot.lane.b32.xlu1 %v7610_v36, %s9365_s14  ;;  %8702 = vmatpush3.bf16.xpose.msra.mxu1 %v6795_v11  ;;  %v7435_v11 = vsel %vm3701_vm7, %v16274_v20, %v16416_v54  ;;  %v6450_v13 = vsel %vm760_vm3, %v16314_v60, %v19010_v14  ;;  %v16442_v61 = vor.u32 %v7465_v35, %v7464_v21  ;;  %v7496_v20 = vrot.slane %v17729_v4, 1 }
 0x4c3   : > { %7367 = vrot.lane.b32.xlu0 %v7320_v32, %s9360_s12  ;;  %8703 = vmatprep.subr.bf16.mxu1 %v18749_v62  ;;  %v7336_v32 = vsel %vm660_vm1, %v7333_v28, %v7335_v44  ;;  %v6518_v28 = vsel %vm812_vm4, %v6450_v13, %v16346_v63  ;;  %v7579_v35 = vrot.slane %v16336_v38, 2 }
 0x4c4   : > { %v6134_v15 = vpop.permute.xlu1 %6133  ;;  %v16469_v63 = vor.u32 %v7497_v30, %v7496_v20  ;;  %v6568_v13 = vsel %vm1064_vm2, %v6518_v28, %v6272_v26 }
 0x4c5   : > { %v6534_v60 = vsel %vm812_vm4, %v6474_v27, %v6134_v15  ;;  %v7467_v27 = vsel %vm3701_vm7, %v16300_v48, %v16442_v61 }
 0x4c6   : > { %v6304_v36 = vpop.permute.xlu0 %6303  ;;  %7084 = vrot.lane.b32.xlu1 %v16238_v52, %s9364_s6  ;;  %v7499_v57 = vsel %vm3701_vm7, %v16327_v50, %v16469_v63 }
 0x4c7   : > { %7527 = vrot.lane.b32.xlu0 %v7435_v11, %s9361_s13 }
 0x4c8   : > { %v6288_v14 = vpop.permute.xlu1 %6287 }
 0x4c9   : > { %v6584_v21 = vsel %vm1064_vm2, %v6534_v60, %v6288_v14  ;;  %v7351_v60 = vrot.slane %v16404_v2, 1 }
 0x4ca   : > { %v16456_v37 = vpop.permute.xlu0 %6060  ;;  %7383 = vrot.lane.b32.xlu1 %v7336_v32, %s9360_s12  ;;  %v16460_v39 = vsel %vm4128_vm9, %v6584_v21, %v6409_v43  ;;  %v7596_v43 = vsel %vm3862_vm8, %v7593_v16, %v7595_v0  ;;  %v16478_v32 = vld [vmem:[%s9453_s11 + $0x50] sm:$0xff]   ;;  %v7580_v16 = vsel %vm3862_vm8, %v7577_v8, %v7579_v35 }
 0x4cb   : > { %v6709_v15 = vrot.slane %v16460_v39, 2  ;;  %7100 = vrot.lane.b32.xlu0 %v16262_v6, %s9364_s6  ;;  %v17730_v8 = vshll.u32 %v16478_v32, 16  ;;  %v7352_v50 = vsel %vm660_vm1, %v7349_v3, %v7351_v60 }
 0x4cc   : > { %v6393_v11 = vpop.permute.xlu1 %6392 }
 0x4cd   : > { %v16481_v48 = vsel %vm4128_vm9, %v6568_v13, %v6393_v11  ;;  %v6710_v30 = vsel %vm3862_vm8, %v6707_v18, %v6709_v15  ;;  %v19012_v18 = vld [vmem:[#allocation123_spill] sm:$0xff] }
 0x4ce   : > { %v16488_v20 = vpop.permute.xlu0 %6119  ;;  %7543 = vrot.lane.b32.xlu1 %v7467_v27, %s9361_s13  ;;  %v6693_v26 = vrot.slane %v16481_v48, 2  ;;  %8840 = vmatprep.subr.msk.bf16.mxu0 %vm4178_vm10, %v6710_v30  ;;  %v6498_v14 = vsel %vm760_vm3, %v6091_v19, %v19012_v18  ;;  %v17728_v27 = vshrl.u32 %v16478_v32, 16  ;;  %v7321_v18 = vrot.slane %v16478_v32, 1 }
 0x4cf   : > { %7643 = vrot.lane.b32.xlu0 %v7596_v43, %s9365_s14 }
 0x4d0   : > { %v6150_v28 = vpop.permute.xlu1 %6149  ;;  %v6694_v21 = vsel %vm3862_vm8, %v6691_v42, %v6693_v26  ;;  %v16522_v42 = vld [vmem:[%s9453_s11 + $0x90] sm:$0xff]  }
 0x4d1   : > { %v6550_v13 = vsel %vm812_vm4, %v6498_v14, %v6150_v28  ;;  %v6750_v11 = vsel %vm4178_vm10, %v6694_v21, 0  ;;  %v7437_v14 = vrot.slane %v17730_v8, 2  ;;  %v7337_v8 = vrot.slane %v16522_v42, 1 }
 0x4d2   : > { %v6274_v43 = vpop.permute.xlu0 %6273  ;;  %7627 = vrot.lane.b32.xlu1 %v7580_v16, %s9365_s14  ;;  %8530 = vmatpush3.bf16.xpose.msra.mxu0 %v6750_v11  ;;  %v6600_v30 = vsel %vm1064_vm2, %v6550_v13, %v6304_v36  ;;  %v7436_v16 = vrot.slane %v17728_v27, 1  ;;  %v7612_v36 = vsel %vm3862_vm8, %v7609_v47, %v7611_v46  ;;  %v17731_v13 = vshrl.u32 %v16522_v42, 16  ;;  %v16546_v11 = vld [vmem:[%s9453_s11 + $0xd0] sm:$0xff]  }
 0x4d3   : > { %7559 = vrot.lane.b32.xlu0 %v7499_v57, %s9361_s13  ;;  %v17732_v57 = vshll.u32 %v16522_v42, 16  ;;  %v7322_v47 = vsel %vm660_vm1, %v7319_v25, %v7321_v18  ;;  %v7281_v25 = vshll.u32 %v16546_v11, 16  ;;  %v7597_v40 = vrot.slane %v16522_v42, 2 }
 0x4d4   : > { %v6425_v19 = vpop.permute.xlu1 %6424  ;;  %v7468_v59 = vrot.slane %v17731_v13, 1 }
 0x4d5   : > { %v16532_v3 = vsel %vm4128_vm9, %v6600_v30, %v6425_v19  ;;  %v16558_v30 = vor.u32 %v7437_v14, %v7436_v16  ;;  %v7285_v16 = vshrl.u32 %v16546_v11, 16  ;;  %v7501_v17 = vrot.slane %v7281_v25, 2 }
 0x4d6   : > { %v6093_v28 = vpop.permute.xlu0 %6092  ;;  %7399 = vrot.lane.b32.xlu1 %v7352_v50, %s9360_s12  ;;  %v6725_v21 = vrot.slane %v16532_v3, 2 }
 0x4d7   : > { %7070 = vrot.lane.b32.xlu0 %v16336_v38, %s9364_s6 }
 0x4d8   : > { %v6077_v19 = vpop.permute.xlu1 %6076  ;;  %v6726_v50 = vsel %vm3862_vm8, %v6723_v55, %v6725_v21  ;;  %v7469_v55 = vrot.slane %v17732_v57, 2 }
 0x4d9   : > { %v6798_v27 = vsel %vm4178_vm10, %v6726_v50, 0  ;;  %v19013_v50 = vld [vmem:[#allocation194_spill] sm:$0xff]  ;;  %v6477_v1 = vsel %vm760_vm3, %v6077_v19, %v19014_v23 }
 0x4da   : > { %v6411_v4 = vpop.permute.xlu0 %6410  ;;  %7659 = vrot.lane.b32.xlu1 %v7612_v36, %s9365_s14  ;;  %8704 = vmatpush3.bf16.xpose.msra.mxu1 %v6798_v27  ;;  %v7439_v27 = vsel %vm3701_vm7, %v16416_v54, %v16558_v30  ;;  %v6453_v13 = vsel %vm760_vm3, %v16456_v37, %v19013_v50  ;;  %v16584_v57 = vor.u32 %v7469_v55, %v7468_v59  ;;  %v7500_v54 = vrot.slane %v7285_v16, 1 }
 0x4db   : > { %7369 = vrot.lane.b32.xlu0 %v7322_v47, %s9360_s12  ;;  %8705 = vmatprep.subr.bf16.mxu1 %v18749_v62  ;;  %v7338_v47 = vsel %vm660_vm1, %v7335_v44, %v7337_v8  ;;  %v6520_v44 = vsel %vm812_vm4, %v6453_v13, %v16488_v20 }
 0x4dc   : > { %v6136_v14 = vpop.permute.xlu1 %6135  ;;  %v7471_v55 = vsel %vm3701_vm7, %v16442_v61, %v16584_v57  ;;  %v6570_v20 = vsel %vm1064_vm2, %v6520_v44, %v6274_v43  ;;  %v7353_v43 = vrot.slane %v16546_v11, 1 }
 0x4dd   : > { %v6536_v37 = vsel %vm812_vm4, %v6477_v1, %v6136_v14  ;;  %v7581_v1 = vrot.slane %v16478_v32, 2 }
 0x4de   : > { %v6306_v36 = vpop.permute.xlu0 %6305  ;;  %7086 = vrot.lane.b32.xlu1 %v16380_v34, %s9364_s6 }
 0x4df   : > { %7529 = vrot.lane.b32.xlu0 %v7439_v27, %s9361_s13  ;;  %v16606_v27 = vor.u32 %v7501_v17, %v7500_v54 }
 0x4e0   : > { %v6290_v50 = vpop.permute.xlu1 %6289 }
 0x4e1   : > { %v6586_v59 = vsel %vm1064_vm2, %v6536_v37, %v6290_v50  ;;  %v7503_v39 = vsel %vm3701_vm7, %v16469_v63, %v16606_v27  ;;  %v7613_v63 = vrot.slane %v16546_v11, 2 }
 0x4e2   : > { %v6095_v23 = vpop.permute.xlu0 %6094  ;;  %7385 = vrot.lane.b32.xlu1 %v7338_v47, %s9360_s12  ;;  %v6636_v19 = vsel %vm4128_vm9, %v6586_v59, %v6411_v4  ;;  %v7598_v4 = vsel %vm3862_vm8, %v7595_v0, %v7597_v40  ;;  %v16615_v47 = vld [vmem:[%s9453_s11 + $0x58] sm:$0xff]   ;;  %v7582_v0 = vsel %vm3862_vm8, %v7579_v35, %v7581_v1 }
 0x4e3   : > { %v6711_v14 = vrot.slane %v6636_v19, 2  ;;  %7102 = vrot.lane.b32.xlu0 %v16404_v2, %s9364_s6  ;;  %v7161_v19 = vshll.u32 %v16615_v47, 16  ;;  %v17739_v35 = vshrl.u32 %v16615_v47, 16 }
 0x4e4   : > { %v6395_v13 = vpop.permute.xlu1 %6394 }
 0x4e5   : > { %v6620_v61 = vsel %vm4128_vm9, %v6570_v20, %v6395_v13  ;;  %v6712_v37 = vsel %vm3862_vm8, %v6709_v15, %v6711_v14  ;;  %v19015_v15 = vld [vmem:[#allocation171_spill] sm:$0xff]  ;;  %v6714_v48 = vsel %vm3862_vm8, %v6711_v14, %v6713_v41  ;;  %v7440_v12 = vrot.slane %v17739_v35, 1 }
 0x4e6   : > { %v6308_v50 = vpop.permute.xlu0 %6307  ;;  %7545 = vrot.lane.b32.xlu1 %v7471_v55, %s9361_s13  ;;  %v6695_v17 = vrot.slane %v6620_v61, 2  ;;  %8841 = vmatprep.subr.msk.bf16.mxu0 %vm4178_vm10, %v6712_v37  ;;  %v6501_v54 = vsel %vm760_vm3, %v6093_v28, %v19015_v15  ;;  %v16647_v28 = vld [vmem:[%s9453_s11 + $0x98] sm:$0xff]   ;;  %v7323_v37 = vrot.slane %v16615_v47, 1  ;;  %v7441_v41 = vrot.slane %v7161_v19, 2 }
 0x4e7   : > { %7645 = vrot.lane.b32.xlu0 %v7598_v4, %s9365_s14  ;;  %v7339_v3 = vrot.slane %v16647_v28, 1 }
 0x4e8   : > { %v6152_v44 = vpop.permute.xlu1 %6151  ;;  %v6696_v59 = vsel %vm3862_vm8, %v6693_v26, %v6695_v17  ;;  %v7354_v26 = vsel %vm660_vm1, %v7351_v60, %v7353_v43  ;;  %v7614_v60 = vsel %vm3862_vm8, %v7611_v46, %v7613_v63  ;;  %v7324_v5 = vsel %vm660_vm1, %v7321_v18, %v7323_v37 }
 0x4e9   : > { %v6552_v55 = vsel %vm812_vm4, %v6501_v54, %v6152_v44  ;;  %v6753_v20 = vsel %vm4178_vm10, %v6696_v59, 0  ;;  %v6698_v44 = vsel %vm3862_vm8, %v6695_v17, %v6697_v29  ;;  %v17738_v59 = vshrl.u32 %v16647_v28, 16  ;;  %v16695_v29 = vld [vmem:[%s9453_s11 + $0xd8] sm:$0xff]  }
 0x4ea   : > { %v16642_v13 = vpop.permute.xlu0 %7062  ;;  %7629 = vrot.lane.b32.xlu1 %v7582_v0, %s9365_s14  ;;  %8532 = vmatpush3.bf16.xpose.msra.mxu0 %v6753_v20  ;;  %v6602_v61 = vsel %vm1064_vm2, %v6552_v55, %v6306_v36  ;;  %v7225_v36 = vshll.u32 %v16647_v28, 16  ;;  %v7116_v55 = vshll.u32 %v15926_v56, 16 }
 0x4eb   : > { %8842 = vmatprep.subr.msk.bf16.mxu0 %vm4178_vm10, %v6714_v48  ;;  %7561 = vrot.lane.b32.xlu0 %v7503_v39, %s9361_s13  ;;  %v19016_v39 = vld [vmem:[#allocation174_spill] sm:$0xff]  ;;  %v6756_v48 = vsel %vm4178_vm10, %v6698_v44, 0  ;;  %v7472_v18 = vrot.slane %v17738_v59, 1  ;;  %v17744_v44 = vshll.u32 %v16695_v29, 16 }
 0x4ec   : > { %v6427_v4 = vpop.permute.xlu1 %6426  ;;  %v6504_v15 = vsel %vm760_vm3, %v6095_v23, %v19016_v39  ;;  %v16692_v23 = vor.u32 %v7441_v41, %v7440_v12  ;;  %v7118_v12 = vrot.slane %v7116_v55, 1  ;;  %v19017_v41 = vshll.u32 %v15919_v9, 16 }
 0x4ed   : > { %v6652_v14 = vsel %vm4128_vm9, %v6602_v61, %v6427_v4  ;;  %v7114_v61 = vshrl.u32 %v15926_v56, 16  ;;  %v17737_v56 = vshrl.u32 %v16695_v29, 16 }
 0x4ee   : > { %v16666_v0 = vpop.permute.xlu0 %7361  ;;  %7401 = vrot.lane.b32.xlu1 %v7354_v26, %s9360_s12  ;;  %v6727_v54 = vrot.slane %v6652_v14, 2  ;;  %v16711_v14 = vrot.slane %v19017_v41, 1 }
 0x4ef   : > { %7072 = vrot.lane.b32.xlu0 %v16478_v32, %s9364_s6 }
 0x4f0   : > { %v6154_v20 = vpop.permute.xlu1 %6153  ;;  %v6728_v46 = vsel %vm3862_vm8, %v6725_v21, %v6727_v54  ;;  %v7473_v21 = vrot.slane %v7225_v36, 2 }
 0x4f1   : > { %v6554_v17 = vsel %vm812_vm4, %v6504_v15, %v6154_v20  ;;  %v6801_v26 = vsel %vm4178_vm10, %v6728_v46, 0  ;;  %v7443_v15 = vsel %vm3701_vm7, %v16558_v30, %v16692_v23  ;;  %v7119_v30 = vor.u32 %v7118_v12, %v7114_v61 }
 0x4f2   : > { %v16700_v4 = vpop.permute.xlu0 %7521  ;;  %7661 = vrot.lane.b32.xlu1 %v7614_v60, %s9365_s14  ;;  %8534 = vmatpush3.bf16.xpose.msra.mxu0 %v6756_v48  ;;  %v6604_v39 = vsel %vm1064_vm2, %v6554_v17, %v6308_v50  ;;  %v7340_v50 = vsel %vm660_vm1, %v7337_v8, %v7339_v3  ;;  %v19018_v17 = vshll.u32 %v15883_v22, 16  ;;  %v7505_v61 = vrot.slane %v17744_v44, 2 }
 0x4f3   : > { %8706 = vmatpush3.bf16.xpose.msra.mxu1 %v6801_v26  ;;  %7371 = vrot.lane.b32.xlu0 %v7324_v5, %s9360_s12  ;;  %v16731_v5 = vor.u32 %v7473_v21, %v7472_v18  ;;  %v19019_v26 = vshrl.u32 %v15919_v9, 16  ;;  %v7599_v18 = vrot.slane %v16647_v28, 2  ;;  %v7504_v21 = vrot.slane %v17737_v56, 1 }
 0x4f4   : > { %8707 = vmatprep.subr.bf16.mxu1 %v18749_v62  ;;  %v6429_v60 = vpop.permute.xlu1 %6428  ;;  %v16735_v48 = vrot.slane %v19018_v17, 1  ;;  %v19027_v44 = vshll.u32 %v16095_v51, 16 }
 0x4f5   : > { %v6654_v55 = vsel %vm4128_vm9, %v6604_v39, %v6429_v60  ;;  %v7183_v41 = vor.u32 %v19019_v26, %v16711_v14  ;;  %v19020_v60 = vshll.u32 %v15922_v31, 16 }
 0x4f6   : > { %v16722_v20 = vpop.permute.xlu0 %7094  ;;  %7088 = vrot.lane.b32.xlu1 %v16522_v42, %s9364_s6  ;;  %v6729_v46 = vrot.slane %v6654_v55, 2 }
 0x4f7   : > { %v16742_v39 = vrot.slane %v19020_v60, 1  ;;  %7531 = vrot.lane.b32.xlu0 %v7443_v15, %s9361_s13  ;;  %v7583_v15 = vrot.slane %v16615_v47, 2  ;;  %v16771_v60 = vor.u32 %v7505_v61, %v7504_v21  ;;  %v7355_v21 = vrot.slane %v16695_v29, 1 }
 0x4f8   : > { %v7079_v55 = vpop.permute.xlu1 %7078  ;;  %v6730_v8 = vsel %vm3862_vm8, %v6727_v54, %v6729_v46  ;;  %v7475_v54 = vsel %vm3701_vm7, %v16584_v57, %v16731_v5  ;;  %v7124_v46 = vsel %vm407_vm0, %v7119_v30, %v16735_v48  ;;  %v7600_v57 = vsel %vm3862_vm8, %v7597_v40, %v7599_v18 }
 0x4f9   : > { %v6804_v12 = vsel %vm4178_vm10, %v6730_v8, 0  ;;  %8536 = vmatmul.mubr.msk.bf16.vlgmr.msra.gmra.mrb[4].mxu0 %vm4178_vm10, %v16066_v24  ;;  %v16774_v8 = vld [vmem:[%s9453_s11 + $0x60] sm:$0xff]   ;;  %v19021_v30 = vshll.u32 %v15944_v33, 16  ;;  %v7584_v40 = vsel %vm3862_vm8, %v7581_v1, %v7583_v15 }
 0x4fa   : > { %v7638_v17 = vpop.permute.xlu0 %7637  ;;  %7387 = vrot.lane.b32.xlu1 %v7340_v50, %s9360_s12  ;;  %v7188_v50 = vsel %vm407_vm0, %v7183_v41, %v16742_v39  ;;  %v7671_v41 = vsel %vm760_vm3, %v16642_v13, %v7124_v46  ;;  %v7507_v13 = vsel %vm3701_vm7, %v16606_v27, %v16771_v60  ;;  %v17740_v46 = vshrl.u32 %v16774_v8, 16 }
 0x4fb   : > { %8708 = vmatpush3.bf16.xpose.msra.mxu1 %v6804_v12  ;;  %7104 = vrot.lane.b32.xlu0 %v16546_v11, %s9364_s6  ;;  %v16778_v12 = vrot.slane %v19021_v30, 1  ;;  %v7695_v61 = vsel %vm760_vm3, %v7079_v55, %v7188_v50  ;;  %v7742_v1 = vsel %vm812_vm4, %v7671_v41, %v16666_v0  ;;  %v19022_v55 = vshrl.u32 %v15944_v33, 16 }
 0x4fc   : > { %8713 = vmatprep.subr.bf16.mxu1 %v18749_v62  ;;  %v7378_v26 = vpop.permute.xlu1 %7377  ;;  %v7356_v0 = vsel %vm660_vm1, %v7353_v43, %v7355_v21  ;;  %v7615_v41 = vrot.slane %v16695_v29, 2  ;;  %v7444_v43 = vrot.slane %v17740_v46, 1 }
 0x4fd   : > { %v7758_v30 = vsel %vm812_vm4, %v7695_v61, %v7378_v26  ;;  %v7247_v50 = vor.u32 %v19022_v55, %v16778_v12  ;;  %v16820_v55 = vld [vmem:[%s9453_s11 + $0xa0] sm:$0xff]  }
 0x4fe   : > { %v7554_v56 = vpop.permute.xlu0 %7553  ;;  %7547 = vrot.lane.b32.xlu1 %v7475_v54, %s9361_s13  ;;  %v17741_v54 = vshll.u32 %v16774_v8, 16  ;;  %v7341_v46 = vrot.slane %v16820_v55, 1 }
 0x4ff   : > { %7647 = vrot.lane.b32.xlu0 %v7600_v57, %s9365_s14  ;;  %v19023_v57 = vshll.u32 %v15954_v45, 16 }
 0x500   : > { %v7538_v59 = vpop.permute.xlu1 %7537 }
 0x501   : > { %v16804_v35 = vrot.slane %v19023_v57, 1  ;;  %v7806_v26 = vsel %vm1064_vm2, %v7758_v30, %v7538_v59 }
 0x502   : > { %v16807_v61 = vpop.permute.xlu0 %7064  ;;  %7631 = vrot.lane.b32.xlu1 %v7584_v40, %s9365_s14  ;;  %8710 = vmatmul.mubr.msk.bf16.vlgmr.msra.gmra.mrb[4].mxu1 %vm4178_vm10, %v16066_v24  ;;  %v7854_v27 = vsel %vm4128_vm9, %v7806_v26, %v7638_v17  ;;  %v7790_v24 = vsel %vm1064_vm2, %v7742_v1, %v16700_v4  ;;  %v7325_v17 = vrot.slane %v16774_v8, 1  ;;  %v7445_v40 = vrot.slane %v17741_v54, 2 }
 0x503   : > { %8729 = vmatprep.mubr.msk.bf16.mxu1 %vm9363_vm6, %v18749_v62  ;;  %8843 = vmatprep.subr.msk.bf16.mxu0 %vm4178_vm10, %v7854_v27  ;;  %v7252_v30 = vsel %vm407_vm0, %v7247_v50, %v16804_v35  ;;  %v17743_v1 = vshll.u32 %v16820_v55, 16  ;;  %v17742_v27 = vshrl.u32 %v16820_v55, 16 }
 0x504   : > { %7563 = vrot.lane.b32.xlu0 %v7507_v13, %s9361_s13  ;;  %v7622_v59 = vpop.permute.xlu1 %7621  ;;  %v7616_v13 = vsel %vm3862_vm8, %v7613_v63, %v7615_v41  ;;  %v7719_v50 = vsel %vm760_vm3, %v16722_v20, %v7252_v30  ;;  %v16859_v63 = vld [vmem:[%s9453_s11 + $0xe0] sm:$0xff]  }
 0x505   : > { %v7838_v57 = vsel %vm4128_vm9, %v7790_v24, %v7622_v59  ;;  %v7326_v24 = vsel %vm660_vm1, %v7323_v37, %v7325_v17  ;;  %v16856_v59 = vor.u32 %v7445_v40, %v7444_v43  ;;  %v7476_v20 = vrot.slane %v17742_v27, 1 }
 0x506   : > { %v16836_v26 = vpop.permute.xlu0 %7363  ;;  %7403 = vrot.lane.b32.xlu1 %v7356_v0, %s9360_s12  ;;  %v7890_v4 = vsel %vm4178_vm10, %v7838_v57, 0  ;;  %v7477_v30 = vrot.slane %v17743_v1, 2 }
 0x507   : > { %8547 = vmatpush3.bf16.xpose.msra.mxu0 %v7890_v4  ;;  %v7447_v40 = vsel %vm3701_vm7, %v16692_v23, %v16856_v59  ;;  %v19024_v23 = vshrl.u32 %v15883_v22, 16 }
 0x508   : > { %7074 = vrot.lane.b32.xlu0 %v16615_v47, %s9364_s6  ;;  %v7394_v0 = vpop.permute.xlu1 %7393 }
 0x509   : > { %v7774_v57 = vsel %vm812_vm4, %v7719_v50, %v7394_v0  ;;  %v17746_v50 = vshll.u32 %v16859_v63, 16 }
 0x50a   : > { %v7524_v4 = vpop.permute.xlu0 %7523  ;;  %7663 = vrot.lane.b32.xlu1 %v7616_v13, %s9365_s14  ;;  %v7822_v43 = vsel %vm1064_vm2, %v7774_v57, %v7554_v56  ;;  %v17745_v13 = vshrl.u32 %v16859_v63, 16  ;;  %v7342_v56 = vsel %vm660_vm1, %v7339_v3, %v7341_v46  ;;  %v7127_v57 = vor.u32 %v19024_v23, %v16735_v48 }
 0x50b   : > { %v16899_v3 = vrot.slane %v19027_v44, 1  ;;  %v7509_v48 = vrot.slane %v17746_v50, 2  ;;  %v7585_v44 = vrot.slane %v16774_v8, 2 }
 0x50c   : > { %7373 = vrot.lane.b32.xlu0 %v7326_v24, %s9360_s12  ;;  %v7654_v37 = vpop.permute.xlu1 %7653  ;;  %v16884_v24 = vor.u32 %v7477_v30, %v7476_v20  ;;  %v7601_v30 = vrot.slane %v16820_v55, 2  ;;  %v7508_v22 = vrot.slane %v17745_v13, 1 }
 0x50d   : > { %v7870_v0 = vsel %vm4128_vm9, %v7822_v43, %v7654_v37  ;;  %v19025_v37 = vshll.u32 %v16043_v58, 16 }
 0x50e   : > { %v7097_v54 = vpop.permute.xlu0 %7096  ;;  %7090 = vrot.lane.b32.xlu1 %v16647_v28, %s9364_s6  ;;  %v7922_v27 = vsel %vm4178_vm10, %v7870_v0, 0  ;;  %v19026_v0 = vshrl.u32 %v15922_v31, 16  ;;  %v7479_v31 = vsel %vm3701_vm7, %v16731_v5, %v16884_v24 }
 0x50f   : > { %v16891_v43 = vrot.slane %v19025_v37, 1  ;;  %8714 = vmatpush3.bf16.xpose.msra.mxu1 %v7922_v27  ;;  %v16923_v37 = vor.u32 %v7509_v48, %v7508_v22 }
 0x510   : > { %v7191_v1 = vor.u32 %v19026_v0, %v16742_v39  ;;  %7533 = vrot.lane.b32.xlu0 %v7447_v40, %s9361_s13  ;;  %v7081_v20 = vpop.permute.xlu1 %7080  ;;  %8715 = vmatprep.subr.bf16.mxu1 %v18749_v62  ;;  %v7357_v0 = vrot.slane %v16859_v63, 1 }
 0x511   : > { %v7132_v39 = vsel %vm407_vm0, %v7127_v57, %v16891_v43  ;;  %v7511_v48 = vsel %vm3701_vm7, %v16771_v60, %v16923_v37 }
 0x512   : > { %v7640_v27 = vpop.permute.xlu0 %7639  ;;  %7389 = vrot.lane.b32.xlu1 %v7342_v56, %s9360_s12  ;;  %v7196_v40 = vsel %vm407_vm0, %v7191_v1, %v16899_v3  ;;  %v7602_v56 = vsel %vm3862_vm8, %v7599_v18, %v7601_v30  ;;  %v7674_v57 = vsel %vm760_vm3, %v16807_v61, %v7132_v39  ;;  %v7586_v1 = vsel %vm3862_vm8, %v7583_v15, %v7585_v44 }
 0x513   : > { %v7698_v13 = vsel %vm760_vm3, %v7081_v20, %v7196_v40  ;;  %v7744_v61 = vsel %vm812_vm4, %v7674_v57, %v16836_v26  ;;  %v19029_v39 = vshll.u32 %v16120_v10, 16  ;;  %v7358_v60 = vsel %vm660_vm1, %v7355_v21, %v7357_v0 }
 0x514   : > { %7106 = vrot.lane.b32.xlu0 %v16695_v29, %s9364_s6  ;;  %v7380_v23 = vpop.permute.xlu1 %7379 }
 0x515   : > { %v7760_v18 = vsel %vm812_vm4, %v7698_v13, %v7380_v23  ;;  %v16947_v50 = vrot.slane %v19029_v39, 1 }
 0x516   : > { %v7556_v5 = vpop.permute.xlu0 %7555  ;;  %7549 = vrot.lane.b32.xlu1 %v7479_v31, %s9361_s13  ;;  %v19028_v31 = vshrl.u32 %v15954_v45, 16  ;;  %v7617_v45 = vrot.slane %v16859_v63, 2 }
 0x518   : > { %7649 = vrot.lane.b32.xlu0 %v7602_v56, %s9365_s14  ;;  %v7540_v22 = vpop.permute.xlu1 %7539  ;;  %v7255_v15 = vor.u32 %v19028_v31, %v16804_v35  ;;  %v7792_v35 = vsel %vm1064_vm2, %v7744_v61, %v7524_v4  ;;  %v7618_v57 = vsel %vm3862_vm8, %v7615_v41, %v7617_v45 }
 0x519   : > { %v7808_v20 = vsel %vm1064_vm2, %v7760_v18, %v7540_v22  ;;  %v19030_v18 = vrot.slane %v15919_v9, 1 }
 0x51a   : > { %v7067_v40 = vpop.permute.xlu0 %7066  ;;  %7633 = vrot.lane.b32.xlu1 %v7586_v1, %s9365_s14  ;;  %v7856_v13 = vsel %vm4128_vm9, %v7808_v20, %v7640_v27  ;;  %v7260_v23 = vsel %vm407_vm0, %v7255_v15, %v16947_v50 }
 0x51b   : > { %8844 = vmatprep.subr.msk.bf16.mxu0 %vm4178_vm10, %v7856_v13  ;;  %v7722_v4 = vsel %vm760_vm3, %v7097_v54, %v7260_v23  ;;  %v7328_v22 = vsel %vm660_vm1, %v7325_v17, %v19030_v18  ;;  %v7451_v54 = vsel %vm3701_vm7, %v16856_v59, %v15993_v53  ;;  %v19032_v53 = vshrl.u32 %v16043_v58, 16 }
 0x51c   : > { %7565 = vrot.lane.b32.xlu0 %v7511_v48, %s9361_s13  ;;  %v7624_v26 = vpop.permute.xlu1 %7623  ;;  %v16980_v48 = vld [vmem:[%s9453_s11 + $0xe8] ss:$0 sps:$4 sm:$0x33]  }
 0x51d   : > { %v7840_v27 = vsel %vm4128_vm9, %v7792_v35, %v7624_v26  ;;  %v7513_v39 = vshrl.u32 %v16980_v48, 16  ;;  %v7516_v17 = vshll.u32 %v16980_v48, 16  ;;  %v19031_v35 = vrot.slane %v15944_v33, 1 }
 0x51e   : > { %v7366_v56 = vpop.permute.xlu0 %7365  ;;  %7405 = vrot.lane.b32.xlu1 %v7358_v60, %s9360_s12  ;;  %v7892_v21 = vsel %vm4178_vm10, %v7840_v27, 0  ;;  %v7135_v59 = vor.u32 %v19032_v53, %v16891_v43  ;;  %v19033_v26 = vshll.u32 %v16194_v49, 16  ;;  %v19034_v27 = vshrl.u32 %v16095_v51, 16 }
 0x51f   : > { %8549 = vmatpush3.bf16.xpose.msra.mxu0 %v7892_v21  ;;  %v7518_v18 = vrot.slane %v7516_v17, 2  ;;  %v7483_v43 = vsel %vm3701_vm7, %v16884_v24, %v16031_v7  ;;  %v19037_v24 = vrot.slane %v15919_v9, 2  ;;  %v19038_v9 = vshrl.u32 %v16120_v10, 16 }
 0x520   : > { %7076 = vrot.lane.b32.xlu0 %v16774_v8, %s9364_s6  ;;  %v7396_v1 = vpop.permute.xlu1 %7395  ;;  %v7139_v23 = vrot.slane %v19033_v26, 1  ;;  %v7199_v21 = vor.u32 %v19034_v27, %v16899_v3 }
 0x521   : > { %v7776_v61 = vsel %vm812_vm4, %v7722_v4, %v7396_v1  ;;  %v7588_v17 = vsel %vm3862_vm8, %v7585_v44, %v19037_v24  ;;  %v19039_v44 = vshll.u32 %v16262_v6, 16  ;;  %v19042_v24 = vshrl.u32 %v16238_v52, 16 }
 0x522   : > { %v7526_v31 = vpop.permute.xlu0 %7525  ;;  %7665 = vrot.lane.b32.xlu1 %v7618_v57, %s9365_s14  ;;  %v7824_v15 = vsel %vm1064_vm2, %v7776_v61, %v7556_v5  ;;  %v7344_v5 = vsel %vm660_vm1, %v7341_v46, %v19031_v35  ;;  %v19035_v57 = vshll.u32 %v16238_v52, 16  ;;  %v7515_v46 = vrot.slane %v7513_v39, 1 }
 0x523   : > { %v7140_v51 = vsel %vm407_vm0, %v7135_v59, %v7139_v23  ;;  %v7267_v53 = vrot.slane %v19039_v44, 1  ;;  %v19044_v44 = vshrl.u32 %v16262_v6, 16 }
 0x524   : > { %7375 = vrot.lane.b32.xlu0 %v7328_v22, %s9360_s12  ;;  %v7656_v41 = vpop.permute.xlu1 %7655  ;;  %v7203_v4 = vrot.slane %v19035_v57, 1  ;;  %v17017_v22 = vld [vmem:[%s9453_s11 + $0xe8] ss:$0 sps:$4 sm:$0x11]   ;;  %v7677_v7 = vsel %vm760_vm3, %v7067_v40, %v7140_v51 }
 0x525   : > { %v7872_v20 = vsel %vm4128_vm9, %v7824_v15, %v7656_v41  ;;  %v19036_v41 = vrot.slane %v15944_v33, 2  ;;  %v7746_v40 = vsel %vm812_vm4, %v7677_v7, %v7366_v56  ;;  %v7619_v56 = vrot.slane %v16980_v48, 2  ;;  %v17067_v48 = vld [vmem:[%s17299_s3 + $0x4] sm:$0x1] }
 0x526   : > { %v7099_v13 = vpop.permute.xlu0 %7098  ;;  %7092 = vrot.lane.b32.xlu1 %v16820_v55, %s9364_s6  ;;  %v7924_v60 = vsel %vm4178_vm10, %v7872_v20, 0  ;;  %v7204_v3 = vsel %vm407_vm0, %v7199_v21, %v7203_v4  ;;  %v7359_v20 = vrot.slane %v17017_v22, 1  ;;  %v7794_v10 = vsel %vm1064_vm2, %v7746_v40, %v7526_v31  ;;  %8562 = vmatprep.mubr.msk.bf16.mxu0 %vm4178_vm10, %v17067_v48 }
 0x527   : > { %8716 = vmatpush3.bf16.xpose.msra.mxu1 %v7924_v60  ;;  %v7604_v15 = vsel %vm3862_vm8, %v7601_v30, %v19036_v41  ;;  %v19041_v7 = vshll.u32 %v16336_v38, 16 }
 0x528   : > { %7535 = vrot.lane.b32.xlu0 %v7451_v54, %s9361_s13  ;;  %v7083_v1 = vpop.permute.xlu1 %7082  ;;  %8717 = vmatprep.subr.bf16.mxu1 %v18749_v62  ;;  %v7519_v54 = vor.u32 %v7518_v18, %v7515_v46 }
 0x529   : > { %v7701_v33 = vsel %vm760_vm3, %v7083_v1, %v7204_v3 }
 0x52a   : > { %v7642_v58 = vpop.permute.xlu0 %7641  ;;  %7391 = vrot.lane.b32.xlu1 %v7344_v5, %s9360_s12  ;;  %v7520_v35 = vsel %vm3701_vm7, %v16923_v37, %v7519_v54  ;;  %v7263_v5 = vor.u32 %v19038_v9, %v16947_v50  ;;  %v7360_v37 = vsel %vm660_vm1, %v7357_v0, %v7359_v20  ;;  %v7620_v0 = vsel %vm3862_vm8, %v7617_v45, %v7619_v56 }
 0x52b   : > { %v19043_v20 = vshll.u32 %v16380_v34, 16 }
 0x52c   : > { %7108 = vrot.lane.b32.xlu0 %v16859_v63, %s9364_s6  ;;  %v7382_v61 = vpop.permute.xlu1 %7381  ;;  %v7268_v21 = vsel %vm407_vm0, %v7263_v5, %v7267_v53 }
 0x52d   : > { %v7762_v30 = vsel %vm812_vm4, %v7701_v33, %v7382_v61  ;;  %v7725_v31 = vsel %vm760_vm3, %v7099_v13, %v7268_v21  ;;  %v7147_v13 = vrot.slane %v19041_v7, 1  ;;  %v7211_v33 = vrot.slane %v19043_v20, 1 }
 0x52e   : > { %v7558_v39 = vpop.permute.xlu0 %7557  ;;  %7551 = vrot.lane.b32.xlu1 %v7483_v43, %s9361_s13 }
 0x530   : > { %7651 = vrot.lane.b32.xlu0 %v7604_v15, %s9365_s14  ;;  %v7542_v60 = vpop.permute.xlu1 %7541  ;;  %v19040_v15 = vshrl.u32 %v16194_v49, 16 }
 0x531   : > { %v7810_v59 = vsel %vm1064_vm2, %v7762_v30, %v7542_v60 }
 0x532   : > { %v7069_v26 = vpop.permute.xlu0 %7068  ;;  %7635 = vrot.lane.b32.xlu1 %v7588_v17, %s9365_s14  ;;  %v7858_v27 = vsel %vm4128_vm9, %v7810_v59, %v7642_v58  ;;  %v7143_v54 = vor.u32 %v19040_v15, %v7139_v23  ;;  %v7207_v17 = vor.u32 %v19042_v24, %v7203_v4  ;;  %v7271_v59 = vor.u32 %v19044_v44, %v7267_v53 }
 0x533   : > { %8845 = vmatprep.subr.msk.bf16.mxu0 %vm4178_vm10, %v7858_v27  ;;  %v19045_v27 = vshll.u32 %v16404_v2, 16 }
 0x534   : > { %7567 = vrot.lane.b32.xlu0 %v7520_v35, %s9361_s13  ;;  %v7626_v50 = vpop.permute.xlu1 %7625  ;;  %v7148_v60 = vsel %vm407_vm0, %v7143_v54, %v7147_v13  ;;  %v7212_v35 = vsel %vm407_vm0, %v7207_v17, %v7211_v33  ;;  %v19047_v54 = vshll.u32 %v16478_v32, 16  ;;  %v19049_v17 = vshll.u32 %v16522_v42, 16 }
 0x535   : > { %v7842_v57 = vsel %vm4128_vm9, %v7794_v10, %v7626_v50  ;;  %v7680_v40 = vsel %vm760_vm3, %v7069_v26, %v7148_v60 }
 0x536   : > { %v7368_v1 = vpop.permute.xlu0 %7367  ;;  %7407 = vrot.lane.b32.xlu1 %v7360_v37, %s9360_s12  ;;  %v7894_v46 = vsel %vm4178_vm10, %v7842_v57, 0  ;;  %v7275_v37 = vrot.slane %v19045_v27, 1  ;;  %v7155_v7 = vrot.slane %v19047_v54, 1  ;;  %v7219_v20 = vrot.slane %v19049_v17, 1  ;;  %s215_s12 = sand.u32 1, %s9349_s19  }
 0x537   : > { %8551 = vmatpush3.bf16.xpose.msra.mxu0 %v7894_v46  ;;  %v7748_v5 = vsel %vm812_vm4, %v7680_v40, %v7368_v1  ;;  %s8851_s13 = smul.u32 12, %s215_s12  ;;  %s8042_s22 = scalar_lea.sflag [#allocation3], %s215_s12 }
 0x538   : > { %v7398_v18 = vpop.permute.xlu1 %7397  ;;  %v7276_v57 = vsel %vm407_vm0, %v7271_v59, %v7275_v37 }
 0x539   : > { %v7778_v58 = vsel %vm812_vm4, %v7725_v31, %v7398_v18 }
 0x53a   : > { %v7528_v43 = vpop.permute.xlu0 %7527  ;;  %7667 = vrot.lane.b32.xlu1 %v7620_v0, %s9365_s14  ;;  %v7826_v45 = vsel %vm1064_vm2, %v7778_v58, %v7558_v39  ;;  %s217_s14 = scalar_lea.vmem [#allocation2], %s8851_s13 }
 0x53b   : > { %v7796_v26 = vsel %vm1064_vm2, %v7748_v5, %v7528_v43  ;;  %s8056_s15 = sshll.u32 %s217_s14, 4  ;;  %s17253_s15 = int_to_ptr.vmem [resolvable:$true] %s8056_s15 }
 0x53c   : > { %v7658_v51 = vpop.permute.xlu1 %7657  ;;  %s9295_s25 = scalar_lea.vmem %s17253_s15, 192  ;;  %p9302_p0 = scmp.lt.s32.totalorder %s17253_s15, %s9300_s30 }
 0x53d   : > { %v7874_v3 = vsel %vm4128_vm9, %v7826_v45, %v7658_v51  ;;  %p9296_p11 = scmp.ne.s32.totalorder %s17253_s15, %s9295_s25  ;;  %p9303_p1 = scmp.lt.s32.totalorder %s9301_s7, %s9295_s25 }
 0x53e   : > { %v7101_v61 = vpop.permute.xlu0 %7100  ;;  %v7926_v41 = vsel %vm4178_vm10, %v7874_v3, 0 }
 0x53f   : > { %8718 = vmatpush3.bf16.xpose.msra.mxu1 %v7926_v41  ;;  %v7728_v53 = vsel %vm760_vm3, %v7101_v61, %v7276_v57  ;;  %v19046_v41 = vshrl.u32 %v16336_v38, 16  ;;  %v19048_v61 = vshrl.u32 %v16380_v34, 16  ;;  %p9297_p12 = pnand %p9296_p11, %p9435_p5  ;;  %p9304_p2 = por %p9303_p1, %p9302_p0 }
 0x540   : > { %v7085_v30 = vpop.permute.xlu1 %7084  ;;  %8719 = vmatprep.subr.bf16.mxu1 %v18749_v62 }
 0x541   : > { %v7704_v9 = vsel %vm760_vm3, %v7085_v30, %v7212_v35  ;;  %v7151_v15 = vor.u32 %v19046_v41, %v7147_v13  ;;  %v7215_v24 = vor.u32 %v19048_v61, %v7211_v33  ;;  %p9298_p13 = pneg %p9297_p12 }
 0x542   : > { %v7644_v39 = vpop.permute.xlu0 %7643 }
 0x543   : > { %v7156_v60 = vsel %vm407_vm0, %v7151_v15, %v7155_v7  ;;  %v7220_v35 = vsel %vm407_vm0, %v7215_v24, %v7219_v20  ;;  %p9305_p3 = pnand %p9304_p2, %p9298_p13 }
 0x544   : > { %v7384_v49 = vpop.permute.xlu1 %7383 }
 0x545   : > { %v7764_v52 = vsel %vm812_vm4, %v7704_v9, %v7384_v49  ;;  %v19050_v9 = vshrl.u32 %v16404_v2, 16 }
 0x546   : > { %v7560_v23 = vpop.permute.xlu0 %7559 }
 0x548   : > { %v7544_v4 = vpop.permute.xlu1 %7543 }
 0x549   : > { %v7812_v56 = vsel %vm1064_vm2, %v7764_v52, %v7544_v4  ;;  %v7279_v52 = vor.u32 %v19050_v9, %v7275_v37  ;;  %v7283_v4 = vrot.slane %v7281_v25, 1 }
 0x54a   : > { %v7071_v10 = vpop.permute.xlu0 %7070  ;;  %v7860_v50 = vsel %vm4128_vm9, %v7812_v56, %v7644_v39 }
 0x54b   : > { %8846 = vmatprep.subr.msk.bf16.mxu0 %vm4178_vm10, %v7860_v50  ;;  %v7683_v49 = vsel %vm760_vm3, %v7071_v10, %v7156_v60  ;;  %v7284_v10 = vsel %vm407_vm0, %v7279_v52, %v7283_v4 }
 0x54c   : > { %v7628_v21 = vpop.permute.xlu1 %7627 }
 0x54d   : > { %v7844_v1 = vsel %vm4128_vm9, %v7796_v26, %v7628_v21 }
 0x54e   : > { %v7370_v46 = vpop.permute.xlu0 %7369  ;;  %v7896_v6 = vsel %vm4178_vm10, %v7844_v1, 0 }
 0x54f   : > { %8553 = vmatpush3.bf16.xpose.msra.mxu0 %v7896_v6  ;;  %v7750_v40 = vsel %vm812_vm4, %v7683_v49, %v7370_v46 }
 0x550   : > { %v7400_v0 = vpop.permute.xlu1 %7399 }
 0x551   : > { %v7780_v31 = vsel %vm812_vm4, %v7728_v53, %v7400_v0 }
 0x552   : > { %v7530_v18 = vpop.permute.xlu0 %7529  ;;  %v7828_v51 = vsel %vm1064_vm2, %v7780_v31, %v7560_v23  ;;  %v19051_v31 = vshrl.u32 %v16478_v32, 16 }
 0x553   : > { %v7798_v27 = vsel %vm1064_vm2, %v7750_v40, %v7530_v18 }
 0x554   : > { %v7660_v58 = vpop.permute.xlu1 %7659  ;;  %v7159_v18 = vor.u32 %v19051_v31, %v7155_v7 }
 0x555   : > { %v7876_v43 = vsel %vm4128_vm9, %v7828_v51, %v7660_v58  ;;  %v7163_v58 = vrot.slane %v7161_v19, 1  ;;  %v19052_v51 = vshrl.u32 %v16522_v42, 16 }
 0x556   : > { %v7103_v45 = vpop.permute.xlu0 %7102  ;;  %v7928_v3 = vsel %vm4178_vm10, %v7876_v43, 0 }
 0x557   : > { %8720 = vmatpush3.bf16.xpose.msra.mxu1 %v7928_v3  ;;  %v7731_v25 = vsel %vm760_vm3, %v7103_v45, %v7284_v10  ;;  %v7223_v43 = vor.u32 %v19052_v51, %v7219_v20  ;;  %v7227_v45 = vrot.slane %v7225_v36, 1  ;;  %v7164_v15 = vsel %vm407_vm0, %v7159_v18, %v7163_v58 }
 0x558   : > { %v7087_v30 = vpop.permute.xlu1 %7086  ;;  %8721 = vmatprep.subr.bf16.mxu1 %v18749_v62  ;;  %v7287_v36 = vor.u32 %v7285_v16, %v7283_v4  ;;  %v19053_v20 = vshll.u32 %v16695_v29, 16  ;;  %v19055_v10 = vshll.u32 %v16774_v8, 16 }
 0x559   : > { %v7707_v23 = vsel %vm760_vm3, %v7087_v30, %v7220_v35  ;;  %v7228_v54 = vsel %vm407_vm0, %v7223_v43, %v7227_v45  ;;  %v19059_v43 = vshll.u32 %v16859_v63, 16 }
 0x55a   : > { %v7646_v39 = vpop.permute.xlu0 %7645  ;;  %v7291_v30 = vrot.slane %v19053_v20, 1 }
 0x55c   : > { %v7386_v38 = vpop.permute.xlu1 %7385  ;;  %v7292_v49 = vsel %vm407_vm0, %v7287_v36, %v7291_v30 }
 0x55d   : > { %v7766_v34 = vsel %vm812_vm4, %v7707_v23, %v7386_v38 }
 0x55e   : > { %v7562_v13 = vpop.permute.xlu0 %7561 }
 0x560   : > { %v7546_v33 = vpop.permute.xlu1 %7545 }
 0x561   : > { %v7814_v5 = vsel %vm1064_vm2, %v7766_v34, %v7546_v33 }
 0x562   : > { %v7073_v44 = vpop.permute.xlu0 %7072  ;;  %v7862_v59 = vsel %vm4128_vm9, %v7814_v5, %v7646_v39 }
 0x563   : > { %8847 = vmatprep.subr.msk.bf16.mxu0 %vm4178_vm10, %v7862_v59  ;;  %v7686_v61 = vsel %vm760_vm3, %v7073_v44, %v7164_v15 }
 0x564   : > { %v7630_v56 = vpop.permute.xlu1 %7629 }
 0x565   : > { %v7846_v50 = vsel %vm4128_vm9, %v7798_v27, %v7630_v56  ;;  %v19054_v27 = vshrl.u32 %v16615_v47, 16 }
 0x566   : > { %v7372_v26 = vpop.permute.xlu0 %7371  ;;  %v7898_v2 = vsel %vm4178_vm10, %v7846_v50, 0  ;;  %v7171_v50 = vrot.slane %v19055_v10, 1 }
 0x567   : > { %8555 = vmatpush3.bf16.xpose.msra.mxu0 %v7898_v2  ;;  %v7752_v17 = vsel %vm812_vm4, %v7686_v61, %v7372_v26  ;;  %v7167_v56 = vor.u32 %v19054_v27, %v7163_v58  ;;  %v19056_v26 = vshrl.u32 %v16647_v28, 16  ;;  %v19058_v58 = vshrl.u32 %v16695_v29, 16 }
 0x568   : > { %v7402_v37 = vpop.permute.xlu1 %7401 }
 0x569   : > { %v7782_v21 = vsel %vm812_vm4, %v7731_v25, %v7402_v37  ;;  %v7231_v2 = vor.u32 %v19056_v26, %v7227_v45  ;;  %v19057_v25 = vshll.u32 %v16820_v55, 16  ;;  %v7295_v51 = vor.u32 %v19058_v58, %v7291_v30 }
 0x56a   : > { %v7532_v57 = vpop.permute.xlu0 %7531  ;;  %v7830_v46 = vsel %vm1064_vm2, %v7782_v21, %v7562_v13  ;;  %v7299_v45 = vrot.slane %v19059_v43, 1 }
 0x56b   : > { %v7800_v38 = vsel %vm1064_vm2, %v7752_v17, %v7532_v57  ;;  %v7235_v37 = vrot.slane %v19057_v25, 1 }
 0x56c   : > { %v7662_v1 = vpop.permute.xlu1 %7661 }
 0x56d   : > { %v7878_v6 = vsel %vm4128_vm9, %v7830_v46, %v7662_v1  ;;  %v7172_v1 = vsel %vm407_vm0, %v7167_v56, %v7171_v50  ;;  %v7236_v46 = vsel %vm407_vm0, %v7231_v2, %v7235_v37 }
 0x56e   : > { %v7105_v53 = vpop.permute.xlu0 %7104  ;;  %v7930_v0 = vsel %vm4178_vm10, %v7878_v6, 0 }
 0x56f   : > { %8722 = vmatpush3.bf16.xpose.msra.mxu1 %v7930_v0  ;;  %v7734_v16 = vsel %vm760_vm3, %v7105_v53, %v7292_v49 }
 0x570   : > { %v7089_v3 = vpop.permute.xlu1 %7088  ;;  %8723 = vmatprep.subr.bf16.mxu1 %v18749_v62 }
 0x571   : > { %v7710_v19 = vsel %vm760_vm3, %v7089_v3, %v7228_v54 }
 0x572   : > { %v7648_v41 = vpop.permute.xlu0 %7647 }
 0x574   : > { %v7388_v32 = vpop.permute.xlu1 %7387 }
 0x575   : > { %v7768_v42 = vsel %vm812_vm4, %v7710_v19, %v7388_v32 }
 0x576   : > { %v7564_v7 = vpop.permute.xlu0 %7563 }
 0x578   : > { %v7548_v24 = vpop.permute.xlu1 %7547 }
 0x579   : > { %v7816_v39 = vsel %vm1064_vm2, %v7768_v42, %v7548_v24 }
 0x57a   : > { %v7075_v60 = vpop.permute.xlu0 %7074  ;;  %v7864_v35 = vsel %vm4128_vm9, %v7816_v39, %v7648_v41 }
 0x57b   : > { %8848 = vmatprep.subr.msk.bf16.mxu0 %vm4178_vm10, %v7864_v35  ;;  %v7689_v53 = vsel %vm760_vm3, %v7075_v60, %v7172_v1  ;;  %v19060_v35 = vshrl.u32 %v16774_v8, 16 }
 0x57c   : > { %v7632_v13 = vpop.permute.xlu1 %7631 }
 0x57d   : > { %v7848_v23 = vsel %vm4128_vm9, %v7800_v38, %v7632_v13  ;;  %v7175_v38 = vor.u32 %v19060_v35, %v7171_v50  ;;  %v19061_v13 = vshrl.u32 %v16820_v55, 16 }
 0x57e   : > { %v7374_v34 = vpop.permute.xlu0 %7373  ;;  %v7900_v11 = vsel %vm4178_vm10, %v7848_v23, 0 }
 0x57f   : > { %8557 = vmatpush3.bf16.xpose.msra.mxu0 %v7900_v11  ;;  %v7754_v18 = vsel %vm812_vm4, %v7689_v53, %v7374_v34  ;;  %v7239_v49 = vor.u32 %v19061_v13, %v7235_v37  ;;  %v7180_v11 = vsel %vm407_vm0, %v7175_v38, %v16711_v14 }
 0x580   : > { %v7404_v33 = vpop.permute.xlu1 %7403 }
 0x581   : > { %v7784_v40 = vsel %vm812_vm4, %v7734_v16, %v7404_v33  ;;  %v7244_v16 = vsel %vm407_vm0, %v7239_v49, %v16778_v12 }
 0x582   : > { %v7534_v9 = vpop.permute.xlu0 %7533  ;;  %v7832_v4 = vsel %vm1064_vm2, %v7784_v40, %v7564_v7  ;;  %v7300_v7 = vsel %vm407_vm0, %v7295_v51, %v7299_v45  ;;  %v7305_v40 = vshll.u32 %v17017_v22, 16 }
 0x583   : > { %v7802_v54 = vsel %vm1064_vm2, %v7754_v18, %v7534_v9  ;;  %v19065_v18 = vld [vmem:[#allocation233_spill] sm:$0xff] }
 0x584   : > { %v7664_v52 = vpop.permute.xlu1 %7663  ;;  %v7307_v14 = vrot.slane %v7305_v40, 1 }
 0x585   : > { %v7880_v5 = vsel %vm4128_vm9, %v7832_v4, %v7664_v52 }
 0x586   : > { %v7107_v44 = vpop.permute.xlu0 %7106  ;;  %v7932_v59 = vsel %vm4178_vm10, %v7880_v5, 0  ;;  %v19062_v5 = vshrl.u32 %v16859_v63, 16 }
 0x587   : > { %8724 = vmatpush3.bf16.xpose.msra.mxu1 %v7932_v59  ;;  %v7737_v42 = vsel %vm760_vm3, %v7107_v44, %v7300_v7 }
 0x588   : > { %v7091_v21 = vpop.permute.xlu1 %7090  ;;  %8725 = vmatprep.subr.bf16.mxu1 %v18749_v62  ;;  %v7303_v44 = vor.u32 %v19062_v5, %v7299_v45  ;;  %v19066_v45 = vld [vmem:[#allocation266_spill] sm:$0xff] }
 0x589   : > { %v7713_v0 = vsel %vm760_vm3, %v7091_v21, %v7236_v46 }
 0x58a   : > { %v7650_v57 = vpop.permute.xlu0 %7649  ;;  %v7308_v56 = vsel %vm407_vm0, %v7303_v44, %v7307_v14 }
 0x58c   : > { %v7390_v47 = vpop.permute.xlu1 %7389 }
 0x58d   : > { %v7770_v28 = vsel %vm812_vm4, %v7713_v0, %v7390_v47  ;;  %v19063_v47 = vld [vmem:[#allocation260_spill] sm:$0xff] }
 0x58e   : > { %v7566_v6 = vpop.permute.xlu0 %7565 }
 0x590   : > { %v7550_v31 = vpop.permute.xlu1 %7549 }
 0x591   : > { %v7818_v3 = vsel %vm1064_vm2, %v7770_v28, %v7550_v31  ;;  %v19064_v31 = vld [vmem:[#allocation103_spill] sm:$0xff] }
 0x592   : > { %v7077_v41 = vpop.permute.xlu0 %7076  ;;  %v7866_v15 = vsel %vm4128_vm9, %v7818_v3, %v7650_v57  ;;  %v8733_v58 = vadd.f32 %v19065_v18, %v19064_v31  ;;  %v8734_v3 = vadd.f32 %v19066_v45, %v19064_v31 }
 0x593   : > { %8849 = vmatprep.subr.msk.bf16.mxu0 %vm4178_vm10, %v7866_v15  ;;  %v7692_v8 = vsel %vm760_vm3, %v7077_v41, %v7180_v11 }
 0x594   : > { %v7634_v32 = vpop.permute.xlu1 %7633 }
 0x595   : > { %v7850_v61 = vsel %vm4128_vm9, %v7802_v54, %v7634_v32 }
 0x596   : > { %v7376_v19 = vpop.permute.xlu0 %7375  ;;  %v7902_v29 = vsel %vm4178_vm10, %v7850_v61, 0 }
 0x597   : > { %8559 = vmatpush3.bf16.xpose.msra.mxu0 %v7902_v29  ;;  %v19067_v29 = vld [vmem:[#allocation76_spill] sm:$0xff] }
 0x598   : > { %v7406_v24 = vpop.permute.xlu1 %7405 }
 0x599   : > { %v7786_v17 = vsel %vm812_vm4, %v7737_v42, %v7406_v24  ;;  %v8735_v42 = vadd.f32 %v19067_v29, %v19064_v31 }
 0x59a   : > { %v7536_v36 = vpop.permute.xlu0 %7535  ;;  %v7834_v30 = vsel %vm1064_vm2, %v7786_v17, %v7566_v6 }
 0x59c   : > { %v7666_v20 = vpop.permute.xlu1 %7665 }
 0x59d   : > { %v7882_v39 = vsel %vm4128_vm9, %v7834_v30, %v7666_v20 }
 0x59e   : > { %v7934_v60 = vsel %vm4178_vm10, %v7882_v39, 0  ;;  %v7109_v34 = vpop.permute.xlu0 %7108 }
 0x59f   : > { %8726 = vmatpush3.bf16.xpose.msra.mxu1 %v7934_v60  ;;  %v7740_v63 = vsel %vm760_vm3, %v7109_v34, %v7308_v56 }
 0x5a0   : > { %v7093_v23 = vpop.permute.xlu1 %7092  ;;  %8727 = vmatprep.subr.bf16.mxu1 %v18749_v62  ;;  %v7756_v62 = vsel %vm812_vm4, %v7692_v8, %v7376_v19 }
 0x5a1   : > { %v7716_v9 = vsel %vm760_vm3, %v7093_v23, %v7244_v16  ;;  %v7804_v22 = vsel %vm1064_vm2, %v7756_v62, %v7536_v36 }
 0x5a2   : > { %v7652_v52 = vpop.permute.xlu0 %7651 }
 0x5a4   : > { %v7392_v33 = vpop.permute.xlu1 %7391 }
 0x5a5   : > { %v7772_v55 = vsel %vm812_vm4, %v7716_v9, %v7392_v33 }
 0x5a6   : > { %v7568_v25 = vpop.permute.xlu0 %7567 }
 0x5a8   : > { %v7552_v4 = vpop.permute.xlu1 %7551 }
 0x5a9   : > { %v7820_v59 = vsel %vm1064_vm2, %v7772_v55, %v7552_v4 }
 0x5aa   : > { %v7868_v12 = vsel %vm4128_vm9, %v7820_v59, %v7652_v52 }
 0x5ab   : > { %8850 = vmatprep.subr.msk.bf16.mxu0 %vm4178_vm10, %v7868_v12 }
 0x5ac   : > { %v7636_v27 = vpop.permute.xlu1 %7635 }
 0x5ad   : > { %v7852_v10 = vsel %vm4128_vm9, %v7804_v22, %v7636_v27 }
 0x5ae   : > { %v7904_v50 = vsel %vm4178_vm10, %v7852_v10, 0 }
 0x5af   : > { %8561 = vmatpush3.bf16.xpose.msra.mxu0 %v7904_v50 }
 0x5b0   : > { %v7408_v26 = vpop.permute.xlu1 %7407 }
 0x5b1   : > { %v7788_v2 = vsel %vm812_vm4, %v7740_v63, %v7408_v26 }
 0x5b2   : > { %v7836_v37 = vsel %vm1064_vm2, %v7788_v2, %v7568_v25 }
 0x5b4   : > { %v7668_v21 = vpop.permute.xlu1 %7667 }
 0x5b5   : > { %v7884_v57 = vsel %vm4128_vm9, %v7836_v37, %v7668_v21 }
 0x5b6   : > { %v7936_v1 = vsel %vm4178_vm10, %v7884_v57, 0  ;;  %8563 = vmatmul.mubr.msk.bf16.vlgmr.msra.gmra.mrb[4].mxu0 %vm4178_vm10, %v17067_v48 }
 0x5b7   : > { %8728 = vmatpush3.bf16.xpose.msra.mxu1 %v7936_v1 }
 0x5be   : > { %8730 = vmatmul.mubr.msk.bf16.vlgmr.msra.gmra.mrb[4].mxu1 %vm4178_vm10, %v17067_v48 }
 0x689   : > { %v7972_v46 = vpop.f32.mrb[4].mxu0 }
 0x68a   : > { %v8736_v6 = vadd.f32 %v7972_v46, %v19063_v47  ;;  %v7974_v53 = vpop.f32.mrb[5].mxu0 }
 0x68b   : > { %v8737_v0 = vadd.f32 %v7974_v53, %v19063_v47  ;;  %v7976_v28 = vpop.f32.mrb[6].mxu0 }
 0x68c   : > { %v8025_v51 = vrot.slane %v8736_v6, 6  ;;  %v7977_v43 = vpop.f32.mrb[7].mxu0 }
 0x68d   : > { %v8026_v48 = vrot.slane %v8737_v0, 6 }
 0x68e   : > { %v8032_v41 = vsel %vm4605_vm11, %v8733_v58, %v8025_v51 }
 0x68f   : > { %v8033_v15 = vsel %vm4605_vm11, %v8734_v3, %v8026_v48 }
 0x690   : > { %v8037_v54 = vcombine.low %v8032_v41, %v8033_v15 }
 0x691   : > { %v8013_v32 = vpop.f32.mrb[4].mxu1 }
 0x692   : > { %v8738_v7 = vadd.f32 %v8013_v32, %v19063_v47  ;;  %v8731_v61 = vpop.f32.mrb[5].mxu1  ;;  %8039 = vst [vmem:[%s217_s14] sm:$0xff] %v8037_v54 }
 0x693   : > { %v8016_v19 = vpop.f32.mrb[6].mxu1 }
 0x694   : > { %v8027_v24 = vrot.slane %v8738_v7, 6  ;;  %v8732_v17 = vpop.f32.mrb[7].mxu1 }
 0x696   : > { %v8034_v36 = vsel %vm4605_vm11, %v8735_v42, %v8027_v24 }
 0x697   : > { %8040 = vst [vmem:[%s217_s14 + $0x8] sm:$0xf] %v8034_v36 }
 0x698   : > { %9308 = shalt.err (!%p9305_p3)
}
 0x699   : > { %s9309_s8 = scalar_lea.hbm %s17251_s23, 192  ;;  %s9313_s6 = scalar_lea.hbm %s17301_s5, 384 }
 0x69a   : > { %p9310_p4 = scmp.ne.s32.totalorder %s17251_s23, %s9309_s8  ;;  %p9314_p9 = scmp.lt.u32.totalorder %s17251_s23, %s17301_s5 }
 0x69b   : > { %p9315_p10 = scmp.lt.u32.totalorder %s9313_s6, %s9309_s8  ;;  %p9317_p12 = scmp.lt.u32.totalorder %s9309_s8, %s17251_s23 }
 0x69c   : > { %p9311_p7 = pnand %p9310_p4, %p9435_p5 }
 0x69d   : > { %p9316_p11 = por %p9315_p10, %p9314_p9 }
 0x69e   : > { %p9312_p8 = pneg %p9311_p7 }
 0x69f   : > { %p9318_p13 = por %p9317_p12, %p9316_p11 }
 0x6a1   : > { %p9319_p0 = pnand %p9318_p13, %p9312_p8 }
 0x6a3   : > { %9322 = shalt.err (!%p9319_p0)
}
 0x6a4   : > { %8854 = dma.vmem_to_hbm [thread:$0]  (%p9435_p5), %s17253_s15, 192, %s17251_s23, %s8042_s22  }
 0x6a5 PF: > { %p8860_p1 = scmp.ge.s32.totalorder %s9357_s21, 2  ;;  %s8068_s10 = sand.u32 1, %s9345_s18  }
 0x6a6   : > { %s8069_s14 = scalar_lea.sflag [#allocation3], %s8068_s10 }
 0x6a7   : > { %p8857_p2 = pnand %p8860_p1, %p9439_p6 }
 0x6a9   : > { %9340 = dma.done.wait (!%p8857_p2), %s8069_s14, 192  }
 0x6aa   : > { %9342 = vsyncadd (!%p8857_p2), %s8069_s14, 4294967104  ;;  %p15_p3 = scmp.ge.s32.totalorder %s9422_s24, 4   ;;  %s19068_s18 = smov %s9349_s19 }
 0x6ab   : > { %s19069_s19 = smov %s9353_s20  ;;  %s19070_s20 = smov %s9433_s27 }
 0x6ac   : > { %s19071_s21 = smov %s9422_s24  ;;  %17 = sbr.rel (!%p15_p3) target bundleno = 3 (0x3), region = 81 }
 0x6b3   :  { %8074 = vsyncpa [#allocation3], 1 }
 0x6b4   :  { %8076 = vsyncpa [#allocation3 + $0x1], 1 }

</bundles_post_ra>
